<compile_context>
chip_gen: v6e
topology: v6e:2x2x1
jax: 0.10.0
libtpu: 0.0.40
codegen_flags: <defaults>
</compile_context>

<pallas_src>
import functools

import jax
import jax.numpy as jnp
import numpy as np
from jax.experimental import pallas as pl
from jax.experimental.pallas import tpu as pltpu


def _round_up(x, m):
    return (x + m - 1) // m * m


def _unet_up_kernel(x1_ref, x2_ref, w1_ref, b1_ref, w2_ref, b2_ref, o_ref,
                    pad1_ref, mid_ref, *, H, W, C1, C2, Cp, Cout8, LPAD):
    """Fused concat + pad + conv3x3 + ReLU + conv3x3 + ReLU (one batch elem).

    x1_ref : (1, H, W, C1)        skip connection (NHWC, f32)
    x2_ref : (1, H/2, W, C2)      low-res features, columns pre-duplicated
    w1_ref : (9, Cin, Cp)  bf16   conv1 weights, tap-major, Cout padded to Cp
    b1_ref : (1, Cp)       f32
    w2_ref : (9, Cp, Cp)   bf16   conv2 weights (input channels padded to Cp)
    b2_ref : (1, Cp)       f32
    o_ref  : (1, H*W, Cout8) f32  output, row-major over (y, x)

    scratch (persists across grid steps):
    pad1_ref: (H+2, LPAD+W+1, Cin) f32   zero-haloed conv1 input
    mid_ref : (H+2, LPAD+W+1, Cp)  bf16  zero-haloed conv1 activation
    """
    H2 = H // 2
    Cin = C1 + C2
    HW = H * W

    # Zero ONLY the halo strips the convs read (rows 0/H+1 over the read
    # columns, columns LPAD-1 / LPAD+W over the interior rows).  Tiny, done
    # every step so it is correct regardless of how the parallel grid axis is
    # split across cores; the interiors are fully overwritten below.
    def zero_halo(ref, C):
        z_row = jnp.zeros((1, W + 2, C), ref.dtype)
        z_col = jnp.zeros((H, 1, C), ref.dtype)
        ref[0:1, LPAD - 1:LPAD + W + 1, :] = z_row
        ref[H + 1:H + 2, LPAD - 1:LPAD + W + 1, :] = z_row
        ref[1:H + 1, LPAD - 1:LPAD, :] = z_col
        ref[1:H + 1, LPAD + W:LPAD + W + 1, :] = z_col

    zero_halo(pad1_ref, Cin)
    zero_halo(mid_ref, Cp)

    # ---- conv1 input: fuse torch.cat + padding=1 + (row half of) upsample ----
    pad1_ref[1:H + 1, LPAD:LPAD + W, 0:C1] = x1_ref[0]
    for ys in range(H2):                       # nearest-neighbour row duplicate
        row = x2_ref[0, ys]                    # (W, C2), columns pre-duplicated
        pad1_ref[1 + 2 * ys, LPAD:LPAD + W, C1:Cin] = row
        pad1_ref[2 + 2 * ys, LPAD:LPAD + W, C1:Cin] = row

    # ---- 3x3 conv = 9 shifted accumulating MXU matmuls (no im2col) ----------
    def conv3x3_relu(src_ref, w_ref, b_ref):
        acc = None
        for k in range(9):
            dy, dx = divmod(k, 3)
            c0 = LPAD - 1 + dx
            lhs = src_ref[dy:dy + H, c0:c0 + W, :]
            lhs = lhs.reshape(HW, src_ref.shape[-1]).astype(jnp.bfloat16)
            part = jnp.dot(lhs, w_ref[k], preferred_element_type=jnp.float32)
            acc = part if acc is None else acc + part
        # bias add + ReLU stay f32 on the VPU.
        return jnp.maximum(acc + b_ref[...], 0.0)          # (HW, Cp) f32

    act1 = conv3x3_relu(pad1_ref, w1_ref, b1_ref)
    # conv1 activation never leaves VMEM; store bf16, aligned interior.
    mid_ref[1:H + 1, LPAD:LPAD + W, :] = (
        act1.reshape(H, W, Cp).astype(mid_ref.dtype))

    act2 = conv3x3_relu(mid_ref, w2_ref, b2_ref)
    # Store only the real (rounded-to-8) output channels -> ~Cp/Cout8 less
    # HBM write traffic than the old lane-padded (H, W, Cp) output.
    o_ref[0] = act2[:, 0:Cout8].astype(o_ref.dtype)


def _pack_conv_weights(w_oihw, b, cin_pad, cp):
    """(Cout, Cin, 3, 3) -> (9, cin_pad, cp) bf16 tap-major; bias -> (1, cp) f32."""
    cout, cin = int(w_oihw.shape[0]), int(w_oihw.shape[1])
    w = jnp.transpose(w_oihw, (2, 3, 1, 0)).reshape(9, cin, cout)   # [ky*3+kx, c, o]
    w_p = jnp.zeros((9, cin_pad, cp), jnp.float32).at[:, :cin, :cout].set(w)
    b_p = jnp.zeros((1, cp), jnp.float32).at[0, :cout].set(b)
    return w_p.astype(jnp.bfloat16), b_p


def unet_up_pallas(x1_nhwc, x2_nhwc, w1, b1, w2, b2):
    """Fused unetUp body.  x1: (N,H,W,C1); x2: (N,H/2,W/2,C2).  Returns NCHW."""
    N, H, W, C1 = x1_nhwc.shape
    _, H2, W2, C2 = x2_nhwc.shape
    assert (H, W) == (2 * H2, 2 * W2)
    Cin = C1 + C2
    Cout = w1.shape[0]
    assert w1.shape == (Cout, Cin, 3, 3)
    assert w2.shape == (Cout, Cout, 3, 3)

    Cp = _round_up(max(Cout, 128), 128)   # lane-padded conv width (MXU N dim)
    Cout8 = _round_up(Cout, 8)            # sublane-padded stored channels
    LPAD = 16                             # left halo -> aligned interior stores
    Wbuf = LPAD + W + 1
    HW = H * W

    w1_p, b1_p = _pack_conv_weights(w1, b1, Cin, Cp)
    w2_p, b2_p = _pack_conv_weights(w2, b2, Cp, Cp)

    # 2x nearest upsample: columns duplicated here (half the old HBM traffic),
    # rows duplicated inside the kernel while filling the padded conv1 input.
    # TODO(synk): move the column duplication in-kernel too (needs a
    # sublane-interleaving / strided store of the low-res block).
    x2w = jnp.repeat(x2_nhwc, 2, axis=2)          # (N, H2, W, C2)

    kernel = functools.partial(_unet_up_kernel, H=H, W=W, C1=C1, C2=C2,
                               Cp=Cp, Cout8=Cout8, LPAD=LPAD)

    # Explicit scoped-VMEM budget: scratch + double-buffered blocks + slack.
    need = ((H + 2) * Wbuf * Cin * 4 + (H + 2) * Wbuf * Cp * 2
            + 2 * (H * W * C1 * 4 + H2 * W * C2 * 4
                   + 9 * Cin * Cp * 2 + 9 * Cp * Cp * 2 + 2 * Cp * 4
                   + HW * Cout8 * 4))
    vmem_limit = int(min(max(2 * need, 8 * 2**20), 48 * 2**20))

    out = pl.pallas_call(
        kernel,
        out_shape=jax.ShapeDtypeStruct((N, HW, Cout8), jnp.float32),
        grid_spec=pltpu.PrefetchScalarGridSpec(
            num_scalar_prefetch=0,
            grid=(N,),
            in_specs=[
                pl.BlockSpec((1, H, W, C1), lambda n: (n, 0, 0, 0)),
                pl.BlockSpec((1, H2, W, C2), lambda n: (n, 0, 0, 0)),
                pl.BlockSpec((9, Cin, Cp), lambda n: (0, 0, 0)),
                pl.BlockSpec((1, Cp), lambda n: (0, 0)),
                pl.BlockSpec((9, Cp, Cp), lambda n: (0, 0, 0)),
                pl.BlockSpec((1, Cp), lambda n: (0, 0)),
            ],
            out_specs=pl.BlockSpec((1, HW, Cout8), lambda n: (n, 0, 0)),
            scratch_shapes=[
                pltpu.VMEM((H + 2, Wbuf, Cin), jnp.float32),
                pltpu.VMEM((H + 2, Wbuf, Cp), jnp.bfloat16),
            ],
        ),
        compiler_params=pltpu.CompilerParams(
            dimension_semantics=("parallel",),
            vmem_limit_bytes=vmem_limit),
    )(x1_nhwc, x2w, w1_p, b1_p, w2_p, b2_p)

    out = out[..., :Cout]                          # no-op when Cout8 == Cout
    return jnp.transpose(out, (0, 2, 1)).reshape(N, Cout, H, W)   # NCHW


def init_unet_up_params(key, in_size, out_size):
    """Deterministic synthetic parameters (same shapes as the nn.Module)."""
    k1, k2, k3, k4 = jax.random.split(key, 4)
    scale1 = 1.0 / jnp.sqrt(in_size * 9.0)
    scale2 = 1.0 / jnp.sqrt(out_size * 9.0)
    return dict(
        w1=jax.random.uniform(k1, (out_size, in_size, 3, 3), jnp.float32,
                              -scale1, scale1),
        b1=jax.random.uniform(k2, (out_size,), jnp.float32, -scale1, scale1),
        w2=jax.random.uniform(k3, (out_size, out_size, 3, 3), jnp.float32,
                              -scale2, scale2),
        b2=jax.random.uniform(k4, (out_size,), jnp.float32, -scale2, scale2),
    )


@jax.jit
def unet_up_forward(params, inputs1_nchw, inputs2_nchw):
    """Forward pass matching unetUp.forward (NCHW in, NCHW out)."""
    x1 = jnp.transpose(inputs1_nchw, (0, 2, 3, 1))   # NCHW -> NHWC
    x2 = jnp.transpose(inputs2_nchw, (0, 2, 3, 1))
    return unet_up_pallas(x1, x2, params["w1"], params["b1"],
                          params["w2"], params["b2"])


def _reference_forward(params, inputs1_nchw, inputs2_nchw):
    """Pure-JAX (XLA) reference of unetUp.forward, for verification."""
    x2_up = jnp.repeat(jnp.repeat(inputs2_nchw, 2, axis=2), 2, axis=3)
    x = jnp.concatenate([inputs1_nchw, x2_up], axis=1)

    def conv_relu(x, w, b):
        y = jax.lax.conv_general_dilated(
            x, w, window_strides=(1, 1), padding="SAME",
            dimension_numbers=("NCHW", "OIHW", "NCHW"),
            precision=jax.lax.Precision.HIGHEST)
        return jax.nn.relu(y + b[None, :, None, None])

    y = conv_relu(x, params["w1"], params["b1"])
    return conv_relu(y, params["w2"], params["b2"])


if __name__ == "__main__":
    key = jax.random.PRNGKey(0)
    k_p, k_x1, k_x2 = jax.random.split(key, 3)

    N, C1, C2, H, W = 2, 4, 4, 16, 16
    in_size = C1 + C2          # concatenated channels
    out_size = 8

    params = init_unet_up_params(k_p, in_size, out_size)
    inputs1 = jax.random.normal(k_x1, (N, C1, H, W), jnp.float32)
    inputs2 = jax.random.normal(k_x2, (N, C2, H // 2, W // 2), jnp.float32)

    out = unet_up_forward(params, inputs1, inputs2)
    jax.block_until_ready(out)

    assert out.shape == (N, out_size, H, W), out.shape
    assert out.dtype == jnp.float32

    ref = _reference_forward(params, inputs1, inputs2)
    # bf16 MXU operands with f32 accumulation -> loosened tolerance.
    np.testing.assert_allclose(np.asarray(out), np.asarray(ref),
                               rtol=2e-2, atol=2e-2)

    print("KERNEL_OK")
</pallas_src>

<mosaic_0001>
module attributes {stable_mosaic.version = 11 : i64} {
  func.func @_unet_up_kernel(%arg0: i32, %arg1: memref<1x16x16x4xf32, #tpu.memory_space<vmem>>, %arg2: memref<1x8x16x4xf32, #tpu.memory_space<vmem>>, %arg3: memref<9x8x128xbf16, #tpu.memory_space<vmem>>, %arg4: memref<1x128xf32, #tpu.memory_space<vmem>>, %arg5: memref<9x128x128xbf16, #tpu.memory_space<vmem>>, %arg6: memref<1x128xf32, #tpu.memory_space<vmem>>, %arg7: memref<1x256x8xf32, #tpu.memory_space<vmem>>, %arg8: memref<18x33x8xf32, #tpu.memory_space<vmem>>, %arg9: memref<18x33x128xbf16, #tpu.memory_space<vmem>>) attributes {dimension_semantics = [#tpu.dimension_semantics<parallel>], iteration_bounds = array<i64: 2>, scalar_prefetch = 0 : i64, scratch_operands = 2 : i64, tpu.core_type = #tpu.core_type<tc>, window_params = [{transform_indices = @transform_0, window_bounds = array<i64: 1, 16, 16, 4>}, {transform_indices = @transform_1, window_bounds = array<i64: 1, 8, 16, 4>}, {pipeline_mode = #tpu.pipeline_mode<synchronous>, transform_indices = @transform_2, window_bounds = array<i64: 9, 8, 128>}, {pipeline_mode = #tpu.pipeline_mode<synchronous>, transform_indices = @transform_3, window_bounds = array<i64: 1, 128>}, {pipeline_mode = #tpu.pipeline_mode<synchronous>, transform_indices = @transform_4, window_bounds = array<i64: 9, 128, 128>}, {pipeline_mode = #tpu.pipeline_mode<synchronous>, transform_indices = @transform_5, window_bounds = array<i64: 1, 128>}, {transform_indices = @transform_6, window_bounds = array<i64: 1, 256, 8>}]} {
    %cst = arith.constant 0.000000e+00 : f32
    %0 = vector.broadcast %cst : f32 to vector<1x18x8xf32>
    %cst_0 = arith.constant 0.000000e+00 : f32
    %1 = vector.broadcast %cst_0 : f32 to vector<16x1x8xf32>
    %c0 = arith.constant 0 : index
    %c15 = arith.constant 15 : index
    %c0_1 = arith.constant 0 : index
    %2 = vector.load %arg8[%c0, %c15, %c0_1] : memref<18x33x8xf32, #tpu.memory_space<vmem>>, vector<1x18x8xf32>
    tpu.vector_store %arg8[%c0, %c15, %c0_1], %0 {strides = array<i32>} : memref<18x33x8xf32, #tpu.memory_space<vmem>>, vector<1x18x8xf32>,
    %c17 = arith.constant 17 : index
    %c15_2 = arith.constant 15 : index
    %c0_3 = arith.constant 0 : index
    %3 = vector.load %arg8[%c17, %c15_2, %c0_3] : memref<18x33x8xf32, #tpu.memory_space<vmem>>, vector<1x18x8xf32>
    tpu.vector_store %arg8[%c17, %c15_2, %c0_3], %0 {strides = array<i32>} : memref<18x33x8xf32, #tpu.memory_space<vmem>>, vector<1x18x8xf32>,
    %c1 = arith.constant 1 : index
    %c15_4 = arith.constant 15 : index
    %c0_5 = arith.constant 0 : index
    %4 = vector.load %arg8[%c1, %c15_4, %c0_5] : memref<18x33x8xf32, #tpu.memory_space<vmem>>, vector<16x1x8xf32>
    tpu.vector_store %arg8[%c1, %c15_4, %c0_5], %1 {strides = array<i32>} : memref<18x33x8xf32, #tpu.memory_space<vmem>>, vector<16x1x8xf32>,
    %c1_6 = arith.constant 1 : index
    %c32 = arith.constant 32 : index
    %c0_7 = arith.constant 0 : index
    %5 = vector.load %arg8[%c1_6, %c32, %c0_7] : memref<18x33x8xf32, #tpu.memory_space<vmem>>, vector<16x1x8xf32>
    tpu.vector_store %arg8[%c1_6, %c32, %c0_7], %1 {strides = array<i32>} : memref<18x33x8xf32, #tpu.memory_space<vmem>>, vector<16x1x8xf32>,
    %cst_8 = arith.constant 0.000000e+00 : bf16
    %6 = vector.broadcast %cst_8 : bf16 to vector<1x18x128xbf16>
    %cst_9 = arith.constant 0.000000e+00 : bf16
    %7 = vector.broadcast %cst_9 : bf16 to vector<16x1x128xbf16>
    %c0_10 = arith.constant 0 : index
    %c15_11 = arith.constant 15 : index
    %c0_12 = arith.constant 0 : index
    %8 = vector.load %arg9[%c0_10, %c15_11, %c0_12] : memref<18x33x128xbf16, #tpu.memory_space<vmem>>, vector<1x18x128xbf16>
    tpu.vector_store %arg9[%c0_10, %c15_11, %c0_12], %6 {strides = array<i32>} : memref<18x33x128xbf16, #tpu.memory_space<vmem>>, vector<1x18x128xbf16>,
    %c17_13 = arith.constant 17 : index
    %c15_14 = arith.constant 15 : index
    %c0_15 = arith.constant 0 : index
    %9 = vector.load %arg9[%c17_13, %c15_14, %c0_15] : memref<18x33x128xbf16, #tpu.memory_space<vmem>>, vector<1x18x128xbf16>
    tpu.vector_store %arg9[%c17_13, %c15_14, %c0_15], %6 {strides = array<i32>} : memref<18x33x128xbf16, #tpu.memory_space<vmem>>, vector<1x18x128xbf16>,
    %c1_16 = arith.constant 1 : index
    %c15_17 = arith.constant 15 : index
    %c0_18 = arith.constant 0 : index
    %10 = vector.load %arg9[%c1_16, %c15_17, %c0_18] : memref<18x33x128xbf16, #tpu.memory_space<vmem>>, vector<16x1x128xbf16>
    tpu.vector_store %arg9[%c1_16, %c15_17, %c0_18], %7 {strides = array<i32>} : memref<18x33x128xbf16, #tpu.memory_space<vmem>>, vector<16x1x128xbf16>,
    %c1_19 = arith.constant 1 : index
    %c32_20 = arith.constant 32 : index
    %c0_21 = arith.constant 0 : index
    %11 = vector.load %arg9[%c1_19, %c32_20, %c0_21] : memref<18x33x128xbf16, #tpu.memory_space<vmem>>, vector<16x1x128xbf16>
    tpu.vector_store %arg9[%c1_19, %c32_20, %c0_21], %7 {strides = array<i32>} : memref<18x33x128xbf16, #tpu.memory_space<vmem>>, vector<16x1x128xbf16>,
    %c0_22 = arith.constant 0 : index
    %c0_23 = arith.constant 0 : index
    %c0_24 = arith.constant 0 : index
    %c0_25 = arith.constant 0 : index
    %12 = vector.load %arg1[%c0_22, %c0_23, %c0_24, %c0_25] : memref<1x16x16x4xf32, #tpu.memory_space<vmem>>, vector<1x16x16x4xf32>
    %13 = vector.shape_cast %12 : vector<1x16x16x4xf32> to vector<16x16x4xf32>
    %c1_26 = arith.constant 1 : index
    %c16 = arith.constant 16 : index
    %c0_27 = arith.constant 0 : index
    %14 = vector.load %arg8[%c1_26, %c16, %c0_27] : memref<18x33x8xf32, #tpu.memory_space<vmem>>, vector<16x16x4xf32>
    tpu.vector_store %arg8[%c1_26, %c16, %c0_27], %13 {strides = array<i32>} : memref<18x33x8xf32, #tpu.memory_space<vmem>>, vector<16x16x4xf32>,
    %c0_28 = arith.constant 0 : index
    %c0_29 = arith.constant 0 : index
    %c0_30 = arith.constant 0 : index
    %c0_31 = arith.constant 0 : index
    %15 = vector.load %arg2[%c0_28, %c0_29, %c0_30, %c0_31] : memref<1x8x16x4xf32, #tpu.memory_space<vmem>>, vector<1x1x16x4xf32>
    %16 = vector.shape_cast %15 : vector<1x1x16x4xf32> to vector<16x4xf32>
    %c1_32 = arith.constant 1 : index
    %c16_33 = arith.constant 16 : index
    %c4 = arith.constant 4 : index
    %17 = vector.load %arg8[%c1_32, %c16_33, %c4] : memref<18x33x8xf32, #tpu.memory_space<vmem>>, vector<1x16x4xf32>
    %18 = vector.shape_cast %17 : vector<1x16x4xf32> to vector<16x4xf32>
    %19 = vector.shape_cast %16 : vector<16x4xf32> to vector<1x16x4xf32>
    tpu.vector_store %arg8[%c1_32, %c16_33, %c4], %19 {strides = array<i32>} : memref<18x33x8xf32, #tpu.memory_space<vmem>>, vector<1x16x4xf32>,
    %c2 = arith.constant 2 : index
    %c16_34 = arith.constant 16 : index
    %c4_35 = arith.constant 4 : index
    %20 = vector.load %arg8[%c2, %c16_34, %c4_35] : memref<18x33x8xf32, #tpu.memory_space<vmem>>, vector<1x16x4xf32>
    %21 = vector.shape_cast %20 : vector<1x16x4xf32> to vector<16x4xf32>
    %22 = vector.shape_cast %16 : vector<16x4xf32> to vector<1x16x4xf32>
    tpu.vector_store %arg8[%c2, %c16_34, %c4_35], %22 {strides = array<i32>} : memref<18x33x8xf32, #tpu.memory_space<vmem>>, vector<1x16x4xf32>,
    %c0_36 = arith.constant 0 : index
    %c1_37 = arith.constant 1 : index
    %c0_38 = arith.constant 0 : index
    %c0_39 = arith.constant 0 : index
    %23 = vector.load %arg2[%c0_36, %c1_37, %c0_38, %c0_39] : memref<1x8x16x4xf32, #tpu.memory_space<vmem>>, vector<1x1x16x4xf32>
    %24 = vector.shape_cast %23 : vector<1x1x16x4xf32> to vector<16x4xf32>
    %c3 = arith.constant 3 : index
    %c16_40 = arith.constant 16 : index
    %c4_41 = arith.constant 4 : index
    %25 = vector.load %arg8[%c3, %c16_40, %c4_41] : memref<18x33x8xf32, #tpu.memory_space<vmem>>, vector<1x16x4xf32>
    %26 = vector.shape_cast %25 : vector<1x16x4xf32> to vector<16x4xf32>
    %27 = vector.shape_cast %24 : vector<16x4xf32> to vector<1x16x4xf32>
    tpu.vector_store %arg8[%c3, %c16_40, %c4_41], %27 {strides = array<i32>} : memref<18x33x8xf32, #tpu.memory_space<vmem>>, vector<1x16x4xf32>,
    %c4_42 = arith.constant 4 : index
    %c16_43 = arith.constant 16 : index
    %c4_44 = arith.constant 4 : index
    %28 = vector.load %arg8[%c4_42, %c16_43, %c4_44] : memref<18x33x8xf32, #tpu.memory_space<vmem>>, vector<1x16x4xf32>
    %29 = vector.shape_cast %28 : vector<1x16x4xf32> to vector<16x4xf32>
    %30 = vector.shape_cast %24 : vector<16x4xf32> to vector<1x16x4xf32>
    tpu.vector_store %arg8[%c4_42, %c16_43, %c4_44], %30 {strides = array<i32>} : memref<18x33x8xf32, #tpu.memory_space<vmem>>, vector<1x16x4xf32>,
    %c0_45 = arith.constant 0 : index
    %c2_46 = arith.constant 2 : index
    %c0_47 = arith.constant 0 : index
    %c0_48 = arith.constant 0 : index
    %31 = vector.load %arg2[%c0_45, %c2_46, %c0_47, %c0_48] : memref<1x8x16x4xf32, #tpu.memory_space<vmem>>, vector<1x1x16x4xf32>
    %32 = vector.shape_cast %31 : vector<1x1x16x4xf32> to vector<16x4xf32>
    %c5 = arith.constant 5 : index
    %c16_49 = arith.constant 16 : index
    %c4_50 = arith.constant 4 : index
    %33 = vector.load %arg8[%c5, %c16_49, %c4_50] : memref<18x33x8xf32, #tpu.memory_space<vmem>>, vector<1x16x4xf32>
    %34 = vector.shape_cast %33 : vector<1x16x4xf32> to vector<16x4xf32>
    %35 = vector.shape_cast %32 : vector<16x4xf32> to vector<1x16x4xf32>
    tpu.vector_store %arg8[%c5, %c16_49, %c4_50], %35 {strides = array<i32>} : memref<18x33x8xf32, #tpu.memory_space<vmem>>, vector<1x16x4xf32>,
    %c6 = arith.constant 6 : index
    %c16_51 = arith.constant 16 : index
    %c4_52 = arith.constant 4 : index
    %36 = vector.load %arg8[%c6, %c16_51, %c4_52] : memref<18x33x8xf32, #tpu.memory_space<vmem>>, vector<1x16x4xf32>
    %37 = vector.shape_cast %36 : vector<1x16x4xf32> to vector<16x4xf32>
    %38 = vector.shape_cast %32 : vector<16x4xf32> to vector<1x16x4xf32>
    tpu.vector_store %arg8[%c6, %c16_51, %c4_52], %38 {strides = array<i32>} : memref<18x33x8xf32, #tpu.memory_space<vmem>>, vector<1x16x4xf32>,
    %c0_53 = arith.constant 0 : index
    %c3_54 = arith.constant 3 : index
    %c0_55 = arith.constant 0 : index
    %c0_56 = arith.constant 0 : index
    %39 = vector.load %arg2[%c0_53, %c3_54, %c0_55, %c0_56] : memref<1x8x16x4xf32, #tpu.memory_space<vmem>>, vector<1x1x16x4xf32>
    %40 = vector.shape_cast %39 : vector<1x1x16x4xf32> to vector<16x4xf32>
    %c7 = arith.constant 7 : index
    %c16_57 = arith.constant 16 : index
    %c4_58 = arith.constant 4 : index
    %41 = vector.load %arg8[%c7, %c16_57, %c4_58] : memref<18x33x8xf32, #tpu.memory_space<vmem>>, vector<1x16x4xf32>
    %42 = vector.shape_cast %41 : vector<1x16x4xf32> to vector<16x4xf32>
    %43 = vector.shape_cast %40 : vector<16x4xf32> to vector<1x16x4xf32>
    tpu.vector_store %arg8[%c7, %c16_57, %c4_58], %43 {strides = array<i32>} : memref<18x33x8xf32, #tpu.memory_space<vmem>>, vector<1x16x4xf32>,
    %c8 = arith.constant 8 : index
    %c16_59 = arith.constant 16 : index
    %c4_60 = arith.constant 4 : index
    %44 = vector.load %arg8[%c8, %c16_59, %c4_60] : memref<18x33x8xf32, #tpu.memory_space<vmem>>, vector<1x16x4xf32>
    %45 = vector.shape_cast %44 : vector<1x16x4xf32> to vector<16x4xf32>
    %46 = vector.shape_cast %40 : vector<16x4xf32> to vector<1x16x4xf32>
    tpu.vector_store %arg8[%c8, %c16_59, %c4_60], %46 {strides = array<i32>} : memref<18x33x8xf32, #tpu.memory_space<vmem>>, vector<1x16x4xf32>,
    %c0_61 = arith.constant 0 : index
    %c4_62 = arith.constant 4 : index
    %c0_63 = arith.constant 0 : index
    %c0_64 = arith.constant 0 : index
    %47 = vector.load %arg2[%c0_61, %c4_62, %c0_63, %c0_64] : memref<1x8x16x4xf32, #tpu.memory_space<vmem>>, vector<1x1x16x4xf32>
    %48 = vector.shape_cast %47 : vector<1x1x16x4xf32> to vector<16x4xf32>
    %c9 = arith.constant 9 : index
    %c16_65 = arith.constant 16 : index
    %c4_66 = arith.constant 4 : index
    %49 = vector.load %arg8[%c9, %c16_65, %c4_66] : memref<18x33x8xf32, #tpu.memory_space<vmem>>, vector<1x16x4xf32>
    %50 = vector.shape_cast %49 : vector<1x16x4xf32> to vector<16x4xf32>
    %51 = vector.shape_cast %48 : vector<16x4xf32> to vector<1x16x4xf32>
    tpu.vector_store %arg8[%c9, %c16_65, %c4_66], %51 {strides = array<i32>} : memref<18x33x8xf32, #tpu.memory_space<vmem>>, vector<1x16x4xf32>,
    %c10 = arith.constant 10 : index
    %c16_67 = arith.constant 16 : index
    %c4_68 = arith.constant 4 : index
    %52 = vector.load %arg8[%c10, %c16_67, %c4_68] : memref<18x33x8xf32, #tpu.memory_space<vmem>>, vector<1x16x4xf32>
    %53 = vector.shape_cast %52 : vector<1x16x4xf32> to vector<16x4xf32>
    %54 = vector.shape_cast %48 : vector<16x4xf32> to vector<1x16x4xf32>
    tpu.vector_store %arg8[%c10, %c16_67, %c4_68], %54 {strides = array<i32>} : memref<18x33x8xf32, #tpu.memory_space<vmem>>, vector<1x16x4xf32>,
    %c0_69 = arith.constant 0 : index
    %c5_70 = arith.constant 5 : index
    %c0_71 = arith.constant 0 : index
    %c0_72 = arith.constant 0 : index
    %55 = vector.load %arg2[%c0_69, %c5_70, %c0_71, %c0_72] : memref<1x8x16x4xf32, #tpu.memory_space<vmem>>, vector<1x1x16x4xf32>
    %56 = vector.shape_cast %55 : vector<1x1x16x4xf32> to vector<16x4xf32>
    %c11 = arith.constant 11 : index
    %c16_73 = arith.constant 16 : index
    %c4_74 = arith.constant 4 : index
    %57 = vector.load %arg8[%c11, %c16_73, %c4_74] : memref<18x33x8xf32, #tpu.memory_space<vmem>>, vector<1x16x4xf32>
    %58 = vector.shape_cast %57 : vector<1x16x4xf32> to vector<16x4xf32>
    %59 = vector.shape_cast %56 : vector<16x4xf32> to vector<1x16x4xf32>
    tpu.vector_store %arg8[%c11, %c16_73, %c4_74], %59 {strides = array<i32>} : memref<18x33x8xf32, #tpu.memory_space<vmem>>, vector<1x16x4xf32>,
    %c12 = arith.constant 12 : index
    %c16_75 = arith.constant 16 : index
    %c4_76 = arith.constant 4 : index
    %60 = vector.load %arg8[%c12, %c16_75, %c4_76] : memref<18x33x8xf32, #tpu.memory_space<vmem>>, vector<1x16x4xf32>
    %61 = vector.shape_cast %60 : vector<1x16x4xf32> to vector<16x4xf32>
    %62 = vector.shape_cast %56 : vector<16x4xf32> to vector<1x16x4xf32>
    tpu.vector_store %arg8[%c12, %c16_75, %c4_76], %62 {strides = array<i32>} : memref<18x33x8xf32, #tpu.memory_space<vmem>>, vector<1x16x4xf32>,
    %c0_77 = arith.constant 0 : index
    %c6_78 = arith.constant 6 : index
    %c0_79 = arith.constant 0 : index
    %c0_80 = arith.constant 0 : index
    %63 = vector.load %arg2[%c0_77, %c6_78, %c0_79, %c0_80] : memref<1x8x16x4xf32, #tpu.memory_space<vmem>>, vector<1x1x16x4xf32>
    %64 = vector.shape_cast %63 : vector<1x1x16x4xf32> to vector<16x4xf32>
    %c13 = arith.constant 13 : index
    %c16_81 = arith.constant 16 : index
    %c4_82 = arith.constant 4 : index
    %65 = vector.load %arg8[%c13, %c16_81, %c4_82] : memref<18x33x8xf32, #tpu.memory_space<vmem>>, vector<1x16x4xf32>
    %66 = vector.shape_cast %65 : vector<1x16x4xf32> to vector<16x4xf32>
    %67 = vector.shape_cast %64 : vector<16x4xf32> to vector<1x16x4xf32>
    tpu.vector_store %arg8[%c13, %c16_81, %c4_82], %67 {strides = array<i32>} : memref<18x33x8xf32, #tpu.memory_space<vmem>>, vector<1x16x4xf32>,
    %c14 = arith.constant 14 : index
    %c16_83 = arith.constant 16 : index
    %c4_84 = arith.constant 4 : index
    %68 = vector.load %arg8[%c14, %c16_83, %c4_84] : memref<18x33x8xf32, #tpu.memory_space<vmem>>, vector<1x16x4xf32>
    %69 = vector.shape_cast %68 : vector<1x16x4xf32> to vector<16x4xf32>
    %70 = vector.shape_cast %64 : vector<16x4xf32> to vector<1x16x4xf32>
    tpu.vector_store %arg8[%c14, %c16_83, %c4_84], %70 {strides = array<i32>} : memref<18x33x8xf32, #tpu.memory_space<vmem>>, vector<1x16x4xf32>,
    %c0_85 = arith.constant 0 : index
    %c7_86 = arith.constant 7 : index
    %c0_87 = arith.constant 0 : index
    %c0_88 = arith.constant 0 : index
    %71 = vector.load %arg2[%c0_85, %c7_86, %c0_87, %c0_88] : memref<1x8x16x4xf32, #tpu.memory_space<vmem>>, vector<1x1x16x4xf32>
    %72 = vector.shape_cast %71 : vector<1x1x16x4xf32> to vector<16x4xf32>
    %c15_89 = arith.constant 15 : index
    %c16_90 = arith.constant 16 : index
    %c4_91 = arith.constant 4 : index
    %73 = vector.load %arg8[%c15_89, %c16_90, %c4_91] : memref<18x33x8xf32, #tpu.memory_space<vmem>>, vector<1x16x4xf32>
    %74 = vector.shape_cast %73 : vector<1x16x4xf32> to vector<16x4xf32>
    %75 = vector.shape_cast %72 : vector<16x4xf32> to vector<1x16x4xf32>
    tpu.vector_store %arg8[%c15_89, %c16_90, %c4_91], %75 {strides = array<i32>} : memref<18x33x8xf32, #tpu.memory_space<vmem>>, vector<1x16x4xf32>,
    %c16_92 = arith.constant 16 : index
    %c16_93 = arith.constant 16 : index
    %c4_94 = arith.constant 4 : index
    %76 = vector.load %arg8[%c16_92, %c16_93, %c4_94] : memref<18x33x8xf32, #tpu.memory_space<vmem>>, vector<1x16x4xf32>
    %77 = vector.shape_cast %76 : vector<1x16x4xf32> to vector<16x4xf32>
    %78 = vector.shape_cast %72 : vector<16x4xf32> to vector<1x16x4xf32>
    tpu.vector_store %arg8[%c16_92, %c16_93, %c4_94], %78 {strides = array<i32>} : memref<18x33x8xf32, #tpu.memory_space<vmem>>, vector<1x16x4xf32>,
    %c0_95 = arith.constant 0 : index
    %c15_96 = arith.constant 15 : index
    %c0_97 = arith.constant 0 : index
    %79 = vector.load %arg8[%c0_95, %c15_96, %c0_97] : memref<18x33x8xf32, #tpu.memory_space<vmem>>, vector<16x16x8xf32>
    %80 = vector.shape_cast %79 : vector<16x16x8xf32> to vector<256x8xf32>
    %81 = arith.truncf %80 : vector<256x8xf32> to vector<256x8xbf16>
    %c0_98 = arith.constant 0 : index
    %c0_99 = arith.constant 0 : index
    %c0_100 = arith.constant 0 : index
    %82 = vector.load %arg3[%c0_98, %c0_99, %c0_100] : memref<9x8x128xbf16, #tpu.memory_space<vmem>>, vector<1x8x128xbf16>
    %83 = vector.shape_cast %82 : vector<1x8x128xbf16> to vector<8x128xbf16>
    %cst_101 = arith.constant dense<0.000000e+00> : vector<256x128xf32>
    %84 = tpu.matmul %81, %83, %cst_101 {dimension_numbers = #tpu.dot_dimension_numbers<[1], [0], [0], [1], [0, 0, 1, 1], [], []>} : vector<256x8xbf16>, vector<8x128xbf16>, vector<256x128xf32> -> vector<256x128xf32>
    %c0_102 = arith.constant 0 : index
    %c16_103 = arith.constant 16 : index
    %c0_104 = arith.constant 0 : index
    %85 = vector.load %arg8[%c0_102, %c16_103, %c0_104] : memref<18x33x8xf32, #tpu.memory_space<vmem>>, vector<16x16x8xf32>
    %86 = vector.shape_cast %85 : vector<16x16x8xf32> to vector<256x8xf32>
    %87 = arith.truncf %86 : vector<256x8xf32> to vector<256x8xbf16>
    %c1_105 = arith.constant 1 : index
    %c0_106 = arith.constant 0 : index
    %c0_107 = arith.constant 0 : index
    %88 = vector.load %arg3[%c1_105, %c0_106, %c0_107] : memref<9x8x128xbf16, #tpu.memory_space<vmem>>, vector<1x8x128xbf16>
    %89 = vector.shape_cast %88 : vector<1x8x128xbf16> to vector<8x128xbf16>
    %cst_108 = arith.constant dense<0.000000e+00> : vector<256x128xf32>
    %90 = tpu.matmul %87, %89, %cst_108 {dimension_numbers = #tpu.dot_dimension_numbers<[1], [0], [0], [1], [0, 0, 1, 1], [], []>} : vector<256x8xbf16>, vector<8x128xbf16>, vector<256x128xf32> -> vector<256x128xf32>
    %91 = arith.addf %84, %90 : vector<256x128xf32>
    %c0_109 = arith.constant 0 : index
    %c17_110 = arith.constant 17 : index
    %c0_111 = arith.constant 0 : index
    %92 = vector.load %arg8[%c0_109, %c17_110, %c0_111] : memref<18x33x8xf32, #tpu.memory_space<vmem>>, vector<16x16x8xf32>
    %93 = vector.shape_cast %92 : vector<16x16x8xf32> to vector<256x8xf32>
    %94 = arith.truncf %93 : vector<256x8xf32> to vector<256x8xbf16>
    %c2_112 = arith.constant 2 : index
    %c0_113 = arith.constant 0 : index
    %c0_114 = arith.constant 0 : index
    %95 = vector.load %arg3[%c2_112, %c0_113, %c0_114] : memref<9x8x128xbf16, #tpu.memory_space<vmem>>, vector<1x8x128xbf16>
    %96 = vector.shape_cast %95 : vector<1x8x128xbf16> to vector<8x128xbf16>
    %cst_115 = arith.constant dense<0.000000e+00> : vector<256x128xf32>
    %97 = tpu.matmul %94, %96, %cst_115 {dimension_numbers = #tpu.dot_dimension_numbers<[1], [0], [0], [1], [0, 0, 1, 1], [], []>} : vector<256x8xbf16>, vector<8x128xbf16>, vector<256x128xf32> -> vector<256x128xf32>
    %98 = arith.addf %91, %97 : vector<256x128xf32>
    %c1_116 = arith.constant 1 : index
    %c15_117 = arith.constant 15 : index
    %c0_118 = arith.constant 0 : index
    %99 = vector.load %arg8[%c1_116, %c15_117, %c0_118] : memref<18x33x8xf32, #tpu.memory_space<vmem>>, vector<16x16x8xf32>
    %100 = vector.shape_cast %99 : vector<16x16x8xf32> to vector<256x8xf32>
    %101 = arith.truncf %100 : vector<256x8xf32> to vector<256x8xbf16>
    %c3_119 = arith.constant 3 : index
    %c0_120 = arith.constant 0 : index
    %c0_121 = arith.constant 0 : index
    %102 = vector.load %arg3[%c3_119, %c0_120, %c0_121] : memref<9x8x128xbf16, #tpu.memory_space<vmem>>, vector<1x8x128xbf16>
    %103 = vector.shape_cast %102 : vector<1x8x128xbf16> to vector<8x128xbf16>
    %cst_122 = arith.constant dense<0.000000e+00> : vector<256x128xf32>
    %104 = tpu.matmul %101, %103, %cst_122 {dimension_numbers = #tpu.dot_dimension_numbers<[1], [0], [0], [1], [0, 0, 1, 1], [], []>} : vector<256x8xbf16>, vector<8x128xbf16>, vector<256x128xf32> -> vector<256x128xf32>
    %105 = arith.addf %98, %104 : vector<256x128xf32>
    %c1_123 = arith.constant 1 : index
    %c16_124 = arith.constant 16 : index
    %c0_125 = arith.constant 0 : index
    %106 = vector.load %arg8[%c1_123, %c16_124, %c0_125] : memref<18x33x8xf32, #tpu.memory_space<vmem>>, vector<16x16x8xf32>
    %107 = vector.shape_cast %106 : vector<16x16x8xf32> to vector<256x8xf32>
    %108 = arith.truncf %107 : vector<256x8xf32> to vector<256x8xbf16>
    %c4_126 = arith.constant 4 : index
    %c0_127 = arith.constant 0 : index
    %c0_128 = arith.constant 0 : index
    %109 = vector.load %arg3[%c4_126, %c0_127, %c0_128] : memref<9x8x128xbf16, #tpu.memory_space<vmem>>, vector<1x8x128xbf16>
    %110 = vector.shape_cast %109 : vector<1x8x128xbf16> to vector<8x128xbf16>
    %cst_129 = arith.constant dense<0.000000e+00> : vector<256x128xf32>
    %111 = tpu.matmul %108, %110, %cst_129 {dimension_numbers = #tpu.dot_dimension_numbers<[1], [0], [0], [1], [0, 0, 1, 1], [], []>} : vector<256x8xbf16>, vector<8x128xbf16>, vector<256x128xf32> -> vector<256x128xf32>
    %112 = arith.addf %105, %111 : vector<256x128xf32>
    %c1_130 = arith.constant 1 : index
    %c17_131 = arith.constant 17 : index
    %c0_132 = arith.constant 0 : index
    %113 = vector.load %arg8[%c1_130, %c17_131, %c0_132] : memref<18x33x8xf32, #tpu.memory_space<vmem>>, vector<16x16x8xf32>
    %114 = vector.shape_cast %113 : vector<16x16x8xf32> to vector<256x8xf32>
    %115 = arith.truncf %114 : vector<256x8xf32> to vector<256x8xbf16>
    %c5_133 = arith.constant 5 : index
    %c0_134 = arith.constant 0 : index
    %c0_135 = arith.constant 0 : index
    %116 = vector.load %arg3[%c5_133, %c0_134, %c0_135] : memref<9x8x128xbf16, #tpu.memory_space<vmem>>, vector<1x8x128xbf16>
    %117 = vector.shape_cast %116 : vector<1x8x128xbf16> to vector<8x128xbf16>
    %cst_136 = arith.constant dense<0.000000e+00> : vector<256x128xf32>
    %118 = tpu.matmul %115, %117, %cst_136 {dimension_numbers = #tpu.dot_dimension_numbers<[1], [0], [0], [1], [0, 0, 1, 1], [], []>} : vector<256x8xbf16>, vector<8x128xbf16>, vector<256x128xf32> -> vector<256x128xf32>
    %119 = arith.addf %112, %118 : vector<256x128xf32>
    %c2_137 = arith.constant 2 : index
    %c15_138 = arith.constant 15 : index
    %c0_139 = arith.constant 0 : index
    %120 = vector.load %arg8[%c2_137, %c15_138, %c0_139] : memref<18x33x8xf32, #tpu.memory_space<vmem>>, vector<16x16x8xf32>
    %121 = vector.shape_cast %120 : vector<16x16x8xf32> to vector<256x8xf32>
    %122 = arith.truncf %121 : vector<256x8xf32> to vector<256x8xbf16>
    %c6_140 = arith.constant 6 : index
    %c0_141 = arith.constant 0 : index
    %c0_142 = arith.constant 0 : index
    %123 = vector.load %arg3[%c6_140, %c0_141, %c0_142] : memref<9x8x128xbf16, #tpu.memory_space<vmem>>, vector<1x8x128xbf16>
    %124 = vector.shape_cast %123 : vector<1x8x128xbf16> to vector<8x128xbf16>
    %cst_143 = arith.constant dense<0.000000e+00> : vector<256x128xf32>
    %125 = tpu.matmul %122, %124, %cst_143 {dimension_numbers = #tpu.dot_dimension_numbers<[1], [0], [0], [1], [0, 0, 1, 1], [], []>} : vector<256x8xbf16>, vector<8x128xbf16>, vector<256x128xf32> -> vector<256x128xf32>
    %126 = arith.addf %119, %125 : vector<256x128xf32>
    %c2_144 = arith.constant 2 : index
    %c16_145 = arith.constant 16 : index
    %c0_146 = arith.constant 0 : index
    %127 = vector.load %arg8[%c2_144, %c16_145, %c0_146] : memref<18x33x8xf32, #tpu.memory_space<vmem>>, vector<16x16x8xf32>
    %128 = vector.shape_cast %127 : vector<16x16x8xf32> to vector<256x8xf32>
    %129 = arith.truncf %128 : vector<256x8xf32> to vector<256x8xbf16>
    %c7_147 = arith.constant 7 : index
    %c0_148 = arith.constant 0 : index
    %c0_149 = arith.constant 0 : index
    %130 = vector.load %arg3[%c7_147, %c0_148, %c0_149] : memref<9x8x128xbf16, #tpu.memory_space<vmem>>, vector<1x8x128xbf16>
    %131 = vector.shape_cast %130 : vector<1x8x128xbf16> to vector<8x128xbf16>
    %cst_150 = arith.constant dense<0.000000e+00> : vector<256x128xf32>
    %132 = tpu.matmul %129, %131, %cst_150 {dimension_numbers = #tpu.dot_dimension_numbers<[1], [0], [0], [1], [0, 0, 1, 1], [], []>} : vector<256x8xbf16>, vector<8x128xbf16>, vector<256x128xf32> -> vector<256x128xf32>
    %133 = arith.addf %126, %132 : vector<256x128xf32>
    %c2_151 = arith.constant 2 : index
    %c17_152 = arith.constant 17 : index
    %c0_153 = arith.constant 0 : index
    %134 = vector.load %arg8[%c2_151, %c17_152, %c0_153] : memref<18x33x8xf32, #tpu.memory_space<vmem>>, vector<16x16x8xf32>
    %135 = vector.shape_cast %134 : vector<16x16x8xf32> to vector<256x8xf32>
    %136 = arith.truncf %135 : vector<256x8xf32> to vector<256x8xbf16>
    %c8_154 = arith.constant 8 : index
    %c0_155 = arith.constant 0 : index
    %c0_156 = arith.constant 0 : index
    %137 = vector.load %arg3[%c8_154, %c0_155, %c0_156] : memref<9x8x128xbf16, #tpu.memory_space<vmem>>, vector<1x8x128xbf16>
    %138 = vector.shape_cast %137 : vector<1x8x128xbf16> to vector<8x128xbf16>
    %cst_157 = arith.constant dense<0.000000e+00> : vector<256x128xf32>
    %139 = tpu.matmul %136, %138, %cst_157 {dimension_numbers = #tpu.dot_dimension_numbers<[1], [0], [0], [1], [0, 0, 1, 1], [], []>} : vector<256x8xbf16>, vector<8x128xbf16>, vector<256x128xf32> -> vector<256x128xf32>
    %140 = arith.addf %133, %139 : vector<256x128xf32>
    %c0_158 = arith.constant 0 : index
    %c0_159 = arith.constant 0 : index
    %141 = vector.load %arg4[%c0_158, %c0_159] : memref<1x128xf32, #tpu.memory_space<vmem>>, vector<1x128xf32>
    %142 = vector.broadcast %141 : vector<1x128xf32> to vector<256x128xf32>
    %143 = arith.addf %140, %142 : vector<256x128xf32>
    %cst_160 = arith.constant 0.000000e+00 : f32
    %144 = vector.broadcast %cst_160 : f32 to vector<256x128xf32>
    %145 = arith.maximumf %143, %144 : vector<256x128xf32>
    %146 = vector.shape_cast %145 : vector<256x128xf32> to vector<16x16x128xf32>
    %147 = arith.truncf %146 : vector<16x16x128xf32> to vector<16x16x128xbf16>
    %c1_161 = arith.constant 1 : index
    %c16_162 = arith.constant 16 : index
    %c0_163 = arith.constant 0 : index
    %148 = vector.load %arg9[%c1_161, %c16_162, %c0_163] : memref<18x33x128xbf16, #tpu.memory_space<vmem>>, vector<16x16x128xbf16>
    tpu.vector_store %arg9[%c1_161, %c16_162, %c0_163], %147 {strides = array<i32>} : memref<18x33x128xbf16, #tpu.memory_space<vmem>>, vector<16x16x128xbf16>,
    %c0_164 = arith.constant 0 : index
    %c15_165 = arith.constant 15 : index
    %c0_166 = arith.constant 0 : index
    %149 = vector.load %arg9[%c0_164, %c15_165, %c0_166] : memref<18x33x128xbf16, #tpu.memory_space<vmem>>, vector<16x16x128xbf16>
    %150 = vector.shape_cast %149 : vector<16x16x128xbf16> to vector<256x128xbf16>
    %c0_167 = arith.constant 0 : index
    %c0_168 = arith.constant 0 : index
    %c0_169 = arith.constant 0 : index
    %151 = vector.load %arg5[%c0_167, %c0_168, %c0_169] : memref<9x128x128xbf16, #tpu.memory_space<vmem>>, vector<1x128x128xbf16>
    %152 = vector.shape_cast %151 : vector<1x128x128xbf16> to vector<128x128xbf16>
    %cst_170 = arith.constant dense<0.000000e+00> : vector<256x128xf32>
    %153 = tpu.matmul %150, %152, %cst_170 {dimension_numbers = #tpu.dot_dimension_numbers<[1], [0], [0], [1], [0, 0, 1, 1], [], []>} : vector<256x128xbf16>, vector<128x128xbf16>, vector<256x128xf32> -> vector<256x128xf32>
    %c0_171 = arith.constant 0 : index
    %c16_172 = arith.constant 16 : index
    %c0_173 = arith.constant 0 : index
    %154 = vector.load %arg9[%c0_171, %c16_172, %c0_173] : memref<18x33x128xbf16, #tpu.memory_space<vmem>>, vector<16x16x128xbf16>
    %155 = vector.shape_cast %154 : vector<16x16x128xbf16> to vector<256x128xbf16>
    %c1_174 = arith.constant 1 : index
    %c0_175 = arith.constant 0 : index
    %c0_176 = arith.constant 0 : index
    %156 = vector.load %arg5[%c1_174, %c0_175, %c0_176] : memref<9x128x128xbf16, #tpu.memory_space<vmem>>, vector<1x128x128xbf16>
    %157 = vector.shape_cast %156 : vector<1x128x128xbf16> to vector<128x128xbf16>
    %cst_177 = arith.constant dense<0.000000e+00> : vector<256x128xf32>
    %158 = tpu.matmul %155, %157, %cst_177 {dimension_numbers = #tpu.dot_dimension_numbers<[1], [0], [0], [1], [0, 0, 1, 1], [], []>} : vector<256x128xbf16>, vector<128x128xbf16>, vector<256x128xf32> -> vector<256x128xf32>
    %159 = arith.addf %153, %158 : vector<256x128xf32>
    %c0_178 = arith.constant 0 : index
    %c17_179 = arith.constant 17 : index
    %c0_180 = arith.constant 0 : index
    %160 = vector.load %arg9[%c0_178, %c17_179, %c0_180] : memref<18x33x128xbf16, #tpu.memory_space<vmem>>, vector<16x16x128xbf16>
    %161 = vector.shape_cast %160 : vector<16x16x128xbf16> to vector<256x128xbf16>
    %c2_181 = arith.constant 2 : index
    %c0_182 = arith.constant 0 : index
    %c0_183 = arith.constant 0 : index
    %162 = vector.load %arg5[%c2_181, %c0_182, %c0_183] : memref<9x128x128xbf16, #tpu.memory_space<vmem>>, vector<1x128x128xbf16>
    %163 = vector.shape_cast %162 : vector<1x128x128xbf16> to vector<128x128xbf16>
    %cst_184 = arith.constant dense<0.000000e+00> : vector<256x128xf32>
    %164 = tpu.matmul %161, %163, %cst_184 {dimension_numbers = #tpu.dot_dimension_numbers<[1], [0], [0], [1], [0, 0, 1, 1], [], []>} : vector<256x128xbf16>, vector<128x128xbf16>, vector<256x128xf32> -> vector<256x128xf32>
    %165 = arith.addf %159, %164 : vector<256x128xf32>
    %c1_185 = arith.constant 1 : index
    %c15_186 = arith.constant 15 : index
    %c0_187 = arith.constant 0 : index
    %166 = vector.load %arg9[%c1_185, %c15_186, %c0_187] : memref<18x33x128xbf16, #tpu.memory_space<vmem>>, vector<16x16x128xbf16>
    %167 = vector.shape_cast %166 : vector<16x16x128xbf16> to vector<256x128xbf16>
    %c3_188 = arith.constant 3 : index
    %c0_189 = arith.constant 0 : index
    %c0_190 = arith.constant 0 : index
    %168 = vector.load %arg5[%c3_188, %c0_189, %c0_190] : memref<9x128x128xbf16, #tpu.memory_space<vmem>>, vector<1x128x128xbf16>
    %169 = vector.shape_cast %168 : vector<1x128x128xbf16> to vector<128x128xbf16>
    %cst_191 = arith.constant dense<0.000000e+00> : vector<256x128xf32>
    %170 = tpu.matmul %167, %169, %cst_191 {dimension_numbers = #tpu.dot_dimension_numbers<[1], [0], [0], [1], [0, 0, 1, 1], [], []>} : vector<256x128xbf16>, vector<128x128xbf16>, vector<256x128xf32> -> vector<256x128xf32>
    %171 = arith.addf %165, %170 : vector<256x128xf32>
    %c1_192 = arith.constant 1 : index
    %c16_193 = arith.constant 16 : index
    %c0_194 = arith.constant 0 : index
    %172 = vector.load %arg9[%c1_192, %c16_193, %c0_194] : memref<18x33x128xbf16, #tpu.memory_space<vmem>>, vector<16x16x128xbf16>
    %173 = vector.shape_cast %172 : vector<16x16x128xbf16> to vector<256x128xbf16>
    %c4_195 = arith.constant 4 : index
    %c0_196 = arith.constant 0 : index
    %c0_197 = arith.constant 0 : index
    %174 = vector.load %arg5[%c4_195, %c0_196, %c0_197] : memref<9x128x128xbf16, #tpu.memory_space<vmem>>, vector<1x128x128xbf16>
    %175 = vector.shape_cast %174 : vector<1x128x128xbf16> to vector<128x128xbf16>
    %cst_198 = arith.constant dense<0.000000e+00> : vector<256x128xf32>
    %176 = tpu.matmul %173, %175, %cst_198 {dimension_numbers = #tpu.dot_dimension_numbers<[1], [0], [0], [1], [0, 0, 1, 1], [], []>} : vector<256x128xbf16>, vector<128x128xbf16>, vector<256x128xf32> -> vector<256x128xf32>
    %177 = arith.addf %171, %176 : vector<256x128xf32>
    %c1_199 = arith.constant 1 : index
    %c17_200 = arith.constant 17 : index
    %c0_201 = arith.constant 0 : index
    %178 = vector.load %arg9[%c1_199, %c17_200, %c0_201] : memref<18x33x128xbf16, #tpu.memory_space<vmem>>, vector<16x16x128xbf16>
    %179 = vector.shape_cast %178 : vector<16x16x128xbf16> to vector<256x128xbf16>
    %c5_202 = arith.constant 5 : index
    %c0_203 = arith.constant 0 : index
    %c0_204 = arith.constant 0 : index
    %180 = vector.load %arg5[%c5_202, %c0_203, %c0_204] : memref<9x128x128xbf16, #tpu.memory_space<vmem>>, vector<1x128x128xbf16>
    %181 = vector.shape_cast %180 : vector<1x128x128xbf16> to vector<128x128xbf16>
    %cst_205 = arith.constant dense<0.000000e+00> : vector<256x128xf32>
    %182 = tpu.matmul %179, %181, %cst_205 {dimension_numbers = #tpu.dot_dimension_numbers<[1], [0], [0], [1], [0, 0, 1, 1], [], []>} : vector<256x128xbf16>, vector<128x128xbf16>, vector<256x128xf32> -> vector<256x128xf32>
    %183 = arith.addf %177, %182 : vector<256x128xf32>
    %c2_206 = arith.constant 2 : index
    %c15_207 = arith.constant 15 : index
    %c0_208 = arith.constant 0 : index
    %184 = vector.load %arg9[%c2_206, %c15_207, %c0_208] : memref<18x33x128xbf16, #tpu.memory_space<vmem>>, vector<16x16x128xbf16>
    %185 = vector.shape_cast %184 : vector<16x16x128xbf16> to vector<256x128xbf16>
    %c6_209 = arith.constant 6 : index
    %c0_210 = arith.constant 0 : index
    %c0_211 = arith.constant 0 : index
    %186 = vector.load %arg5[%c6_209, %c0_210, %c0_211] : memref<9x128x128xbf16, #tpu.memory_space<vmem>>, vector<1x128x128xbf16>
    %187 = vector.shape_cast %186 : vector<1x128x128xbf16> to vector<128x128xbf16>
    %cst_212 = arith.constant dense<0.000000e+00> : vector<256x128xf32>
    %188 = tpu.matmul %185, %187, %cst_212 {dimension_numbers = #tpu.dot_dimension_numbers<[1], [0], [0], [1], [0, 0, 1, 1], [], []>} : vector<256x128xbf16>, vector<128x128xbf16>, vector<256x128xf32> -> vector<256x128xf32>
    %189 = arith.addf %183, %188 : vector<256x128xf32>
    %c2_213 = arith.constant 2 : index
    %c16_214 = arith.constant 16 : index
    %c0_215 = arith.constant 0 : index
    %190 = vector.load %arg9[%c2_213, %c16_214, %c0_215] : memref<18x33x128xbf16, #tpu.memory_space<vmem>>, vector<16x16x128xbf16>
    %191 = vector.shape_cast %190 : vector<16x16x128xbf16> to vector<256x128xbf16>
    %c7_216 = arith.constant 7 : index
    %c0_217 = arith.constant 0 : index
    %c0_218 = arith.constant 0 : index
    %192 = vector.load %arg5[%c7_216, %c0_217, %c0_218] : memref<9x128x128xbf16, #tpu.memory_space<vmem>>, vector<1x128x128xbf16>
    %193 = vector.shape_cast %192 : vector<1x128x128xbf16> to vector<128x128xbf16>
    %cst_219 = arith.constant dense<0.000000e+00> : vector<256x128xf32>
    %194 = tpu.matmul %191, %193, %cst_219 {dimension_numbers = #tpu.dot_dimension_numbers<[1], [0], [0], [1], [0, 0, 1, 1], [], []>} : vector<256x128xbf16>, vector<128x128xbf16>, vector<256x128xf32> -> vector<256x128xf32>
    %195 = arith.addf %189, %194 : vector<256x128xf32>
    %c2_220 = arith.constant 2 : index
    %c17_221 = arith.constant 17 : index
    %c0_222 = arith.constant 0 : index
    %196 = vector.load %arg9[%c2_220, %c17_221, %c0_222] : memref<18x33x128xbf16, #tpu.memory_space<vmem>>, vector<16x16x128xbf16>
    %197 = vector.shape_cast %196 : vector<16x16x128xbf16> to vector<256x128xbf16>
    %c8_223 = arith.constant 8 : index
    %c0_224 = arith.constant 0 : index
    %c0_225 = arith.constant 0 : index
    %198 = vector.load %arg5[%c8_223, %c0_224, %c0_225] : memref<9x128x128xbf16, #tpu.memory_space<vmem>>, vector<1x128x128xbf16>
    %199 = vector.shape_cast %198 : vector<1x128x128xbf16> to vector<128x128xbf16>
    %cst_226 = arith.constant dense<0.000000e+00> : vector<256x128xf32>
    %200 = tpu.matmul %197, %199, %cst_226 {dimension_numbers = #tpu.dot_dimension_numbers<[1], [0], [0], [1], [0, 0, 1, 1], [], []>} : vector<256x128xbf16>, vector<128x128xbf16>, vector<256x128xf32> -> vector<256x128xf32>
    %201 = arith.addf %195, %200 : vector<256x128xf32>
    %c0_227 = arith.constant 0 : index
    %c0_228 = arith.constant 0 : index
    %202 = vector.load %arg6[%c0_227, %c0_228] : memref<1x128xf32, #tpu.memory_space<vmem>>, vector<1x128xf32>
    %203 = vector.broadcast %202 : vector<1x128xf32> to vector<256x128xf32>
    %204 = arith.addf %201, %203 : vector<256x128xf32>
    %cst_229 = arith.constant 0.000000e+00 : f32
    %205 = vector.broadcast %cst_229 : f32 to vector<256x128xf32>
    %206 = arith.maximumf %204, %205 : vector<256x128xf32>
    %207 = vector.extract_strided_slice %206 {offsets = [0, 0], sizes = [256, 8], strides = [1, 1]} : vector<256x128xf32> to vector<256x8xf32>
    %c0_230 = arith.constant 0 : index
    %c0_231 = arith.constant 0 : index
    %c0_232 = arith.constant 0 : index
    %208 = vector.load %arg7[%c0_230, %c0_231, %c0_232] : memref<1x256x8xf32, #tpu.memory_space<vmem>>, vector<1x256x8xf32>
    %209 = vector.shape_cast %208 : vector<1x256x8xf32> to vector<256x8xf32>
    %210 = vector.shape_cast %207 : vector<256x8xf32> to vector<1x256x8xf32>
    tpu.vector_store %arg7[%c0_230, %c0_231, %c0_232], %210 {strides = array<i32>} : memref<1x256x8xf32, #tpu.memory_space<vmem>>, vector<1x256x8xf32>,
    return
  }
  func.func @transform_0(%arg0: i32) -> (i32, i32, i32, i32) {
    %c0_i32 = arith.constant 0 : i32
    %c0_i32_0 = arith.constant 0 : i32
    %c0_i32_1 = arith.constant 0 : i32
    %c0_i32_2 = arith.constant 0 : i32
    return %arg0, %c0_i32, %c0_i32_0, %c0_i32_1 : i32, i32, i32, i32
  }
  func.func @transform_1(%arg0: i32) -> (i32, i32, i32, i32) {
    %c0_i32 = arith.constant 0 : i32
    %c0_i32_0 = arith.constant 0 : i32
    %c0_i32_1 = arith.constant 0 : i32
    %c0_i32_2 = arith.constant 0 : i32
    return %arg0, %c0_i32, %c0_i32_0, %c0_i32_1 : i32, i32, i32, i32
  }
  func.func @transform_2(%arg0: i32) -> (i32, i32, i32) {
    %c0_i32 = arith.constant 0 : i32
    %c0_i32_0 = arith.constant 0 : i32
    %c0_i32_1 = arith.constant 0 : i32
    %c0_i32_2 = arith.constant 0 : i32
    return %c0_i32, %c0_i32_0, %c0_i32_1 : i32, i32, i32
  }
  func.func @transform_3(%arg0: i32) -> (i32, i32) {
    %c0_i32 = arith.constant 0 : i32
    %c0_i32_0 = arith.constant 0 : i32
    %c0_i32_1 = arith.constant 0 : i32
    return %c0_i32, %c0_i32_0 : i32, i32
  }
  func.func @transform_4(%arg0: i32) -> (i32, i32, i32) {
    %c0_i32 = arith.constant 0 : i32
    %c0_i32_0 = arith.constant 0 : i32
    %c0_i32_1 = arith.constant 0 : i32
    %c0_i32_2 = arith.constant 0 : i32
    return %c0_i32, %c0_i32_0, %c0_i32_1 : i32, i32, i32
  }
  func.func @transform_5(%arg0: i32) -> (i32, i32) {
    %c0_i32 = arith.constant 0 : i32
    %c0_i32_0 = arith.constant 0 : i32
    %c0_i32_1 = arith.constant 0 : i32
    return %c0_i32, %c0_i32_0 : i32, i32
  }
  func.func @transform_6(%arg0: i32) -> (i32, i32, i32) {
    %c0_i32 = arith.constant 0 : i32
    %c0_i32_0 = arith.constant 0 : i32
    %c0_i32_1 = arith.constant 0 : i32
    return %arg0, %c0_i32, %c0_i32_0 : i32, i32, i32
  }
}

</mosaic_0001>

<bundles_post_ra>
// kernel: unet_up_forward.1
= control target key start
LH: loop header
LB: loop body
LE: loop exit
PB: predicated region body
PF: predicated region fallthrough
CT: control target
= control target key end

     0   :  { %s11047_s21 = smov 0   ;;  %s14549_s0 = inlined_call_operand.vmem [shape: f32[2,16,16,4], index: 0, kind: input, shape index: {}]   ;;  %s14550_s1 = inlined_call_operand.vmem [shape: f32[2,8,16,4], index: 1, kind: input, shape index: {}]   ;;  %s14551_s2 = inlined_call_operand.vmem [shape: bf16[9,8,128], index: 2, kind: input, shape index: {}]   ;;  %s14552_s3 = inlined_call_operand.vmem [shape: f32[1,128], index: 3, kind: input, shape index: {}]   ;;  %s14553_s4 = inlined_call_operand.vmem [shape: bf16[9,128,128], index: 4, kind: input, shape index: {}]   ;;  %s14554_s5 = inlined_call_operand.vmem [shape: f32[1,128], index: 5, kind: input, shape index: {}]   ;;  %s14555_s6 = inlined_call_operand.vmem [shape: f32[2,256,8], index: 6, kind: output, shape index: {}]  }
   0x1 LB: > { %s9050_s22 = sadd.s32 4294967295, %s11007_s21   ;;  %p9054_p0 = scmp.ge.s32.totalorder %s11007_s21, 1  ;;  %s11007_s21 = sphi %s11047_s21, %s16_s21  }
   0x2   : > { %p222_p1 = scmp.lt.s32.totalorder %s11007_s21, 3 }
   0x4   : > { %p223_p2 = pnand %p9054_p0, %p222_p1 }
   0x6   : > { %226 = sbr.rel (%p223_p2) target bundleno = 1237 (0x4d5), region = 44 }
   0xb   : > { %p257_p3 = scmp.lt.s32.totalorder %s9050_s22, 1  ;;  %v9075_v0 = vld [vmem:[%s14551_s2 + $0x4] sm:$0xf]  ;;  %vm783_vm0 = vcmask 1043456   ;;  %v684_v1 = vld [vmem:[%s14551_s2] sm:$0xf] }
   0xc   : > { %vm273_vm1 = vcmask 64512   ;;  %vm276_vm2 = vcmask 58368   ;;  %10845 = vmatprep.subr.msk.bf16.mxu0 %vm783_vm0, %v9075_v0  ;;  %v785_v2 = vsel %vm783_vm0, %v9075_v0, 0  ;;  %10846 = vmatprep.subr.msk.bf16.mxu1 %vm783_vm0, %v684_v1  ;;  %v997_v3 = vsel %vm783_vm0, %v684_v1, 0  ;;  %v11074_v5 = vld [vmem:[%s14551_s2 + $0x8] sm:$0xf] }
   0xd   : > { %s14901_s22 = smov (!%p257_p3, %s9050_s22), 1  ;;  %v11009_v4 = vmov 0.0   ;;  %vm283_vm3 = vcmask 57344   ;;  %10108 = vmatpush3.bf16.msra.mxu0 %v785_v2  ;;  %10142 = vmatpush3.bf16.msra.mxu1 %v997_v3  ;;  %s11010_s10 = smov 4   ;;  %vm468_vm4 = vcmask 31744   ;;  %vm511_vm5 = vcmask 64544  }
   0xe   : > { %274 = vst.msk [vmem:[#allocation2 + $0xf] sm:$0xff] %vm273_vm1, %v11009_v4  ;;  %275 = vst.msk [vmem:[#allocation2 + $0x17] sm:$0xff] %vm273_vm1, %v11009_v4  ;;  %s9656_s29 = sshll.u32 %s14901_s22, 7  ;;  %10847 = vmatprep.subr.msk.bf16.mxu0 %vm783_vm0, %v11074_v5  ;;  %s9655_s9 = sshll.u32 %s14901_s22, 8  ;;  %v9125_v60 = vld [vmem:[%s14551_s2 + $0xc] sm:$0xf] }
   0xf   : > { %277 = vst.msk [vmem:[#allocation2 + $0x1f] sm:$0x3] %vm276_vm2, %v11009_v4  ;;  %281 = vst.msk [vmem:[#allocation2 + $0x2c7] sm:$0x3] %vm276_vm2, %v11009_v4  ;;  %s11114_s8 = scalar_lea.vmem %s14550_s1, %s9656_s29  ;;  %s11128_s13 = scalar_lea.vmem %s14549_s0, %s9655_s9  ;;  %10848 = vmatprep.subr.msk.bf16.mxu1 %vm783_vm0, %v9125_v60  ;;  %vm316_vm6 = vcmask 1043459   ;;  %vm324_vm12 = vcmask 1040384  }
  0x10   : > { %279 = vst.msk [vmem:[#allocation2 + $0x2b7] sm:$0xff] %vm273_vm1, %v11009_v4  ;;  %280 = vst.msk [vmem:[#allocation2 + $0x2bf] sm:$0xff] %vm273_vm1, %v11009_v4  ;;  %v501_v6 = vld [vmem:[%s11114_s8] sm:$0xff]  ;;  %v9061_v7 = vld [vmem:[%s11114_s8 + $0x10] sm:$0xff]  ;;  %vm317_vm7 = vsmask.f32 7950 }
  0x11   : > { %284 = vst.msk [vmem:[#allocation2 + $0x37] sm:$0x1] %vm283_vm3, %v11009_v4  ;;  %285 = vst.msk [vmem:[#allocation2 + $0x5f] sm:$0x1] %vm283_vm3, %v11009_v4  ;;  %505 = vrot.lane.b32.xlu0 %v501_v6, %s11010_s10  ;;  %522 = vrot.lane.b32.xlu1 %v9061_v7, %s11010_s10  ;;  %v502_v8 = vld [vmem:[%s11114_s8 + $0x8] sm:$0xff]  ;;  %v9062_v9 = vld [vmem:[%s11114_s8 + $0x18] sm:$0xff] }
  0x12   : > { %286 = vst.msk [vmem:[#allocation2 + $0x87] sm:$0x1] %vm283_vm3, %v11009_v4  ;;  %287 = vst.msk [vmem:[#allocation2 + $0xaf] sm:$0x1] %vm283_vm3, %v11009_v4  ;;  %v9064_v10 = vld [vmem:[%s11114_s8 + $0x28] sm:$0xff]  ;;  %v9063_v11 = vld [vmem:[%s11114_s8 + $0x20] sm:$0xff] }
  0x13   : > { %288 = vst.msk [vmem:[#allocation2 + $0xd7] sm:$0x1] %vm283_vm3, %v11009_v4  ;;  %289 = vst.msk [vmem:[#allocation2 + $0xff] sm:$0x1] %vm283_vm3, %v11009_v4  ;;  %v436_v13 = vld [vmem:[%s11128_s13] sm:$0xff]  ;;  %v438_v14 = vld [vmem:[%s11128_s13 + $0x10] sm:$0xff] }
  0x14   : > { %290 = vst.msk [vmem:[#allocation2 + $0x127] sm:$0x1] %vm283_vm3, %v11009_v4  ;;  %291 = vst.msk [vmem:[#allocation2 + $0x14f] sm:$0x1] %vm283_vm3, %v11009_v4  ;;  %v440_v15 = vld [vmem:[%s11128_s13 + $0x20] sm:$0xff]  ;;  %v442_v16 = vld [vmem:[%s11128_s13 + $0x30] sm:$0xff] }
  0x15   : > { %292 = vst.msk [vmem:[#allocation2 + $0x177] sm:$0x1] %vm283_vm3, %v11009_v4  ;;  %293 = vst.msk [vmem:[#allocation2 + $0x19f] sm:$0x1] %vm283_vm3, %v11009_v4  ;;  %507 = vrot.lane.b32.xlu0 %v502_v8, %s11010_s10  ;;  %524 = vrot.lane.b32.xlu1 %v9062_v9, %s11010_s10  ;;  %v685_v12 = vld [vmem:[#allocation2 + $0x10] sm:$0xff]  ;;  %v437_v17 = vld [vmem:[%s11128_s13 + $0x8] sm:$0xff] }
  0x16   : > { %294 = vst.msk [vmem:[#allocation2 + $0x1c7] sm:$0x1] %vm283_vm3, %v11009_v4  ;;  %295 = vst.msk [vmem:[#allocation2 + $0x1ef] sm:$0x1] %vm283_vm3, %v11009_v4  ;;  %v439_v18 = vld [vmem:[%s11128_s13 + $0x18] sm:$0xff]  ;;  %v9065_v20 = vld [vmem:[%s11114_s8 + $0x30] sm:$0xff] }
  0x17   : > { %296 = vst.msk [vmem:[#allocation2 + $0x217] sm:$0x1] %vm283_vm3, %v11009_v4  ;;  %297 = vst.msk [vmem:[#allocation2 + $0x23f] sm:$0x1] %vm283_vm3, %v11009_v4  ;;  %v9066_v19 = vld [vmem:[%s11114_s8 + $0x38] sm:$0xff]  ;;  %v441_v21 = vld [vmem:[%s11128_s13 + $0x28] sm:$0xff] }
  0x18   : > { %298 = vst.msk [vmem:[#allocation2 + $0x267] sm:$0x1] %vm283_vm3, %v11009_v4  ;;  %299 = vst.msk [vmem:[#allocation2 + $0x28f] sm:$0x1] %vm283_vm3, %v11009_v4  ;;  %v443_v22 = vld [vmem:[%s11128_s13 + $0x38] sm:$0xff]  ;;  %v636_v25 = vld [vmem:[#allocation2 + $0xf] sm:$0xff] }
  0x19   : > { %300 = vst.msk [vmem:[#allocation2 + $0x48] sm:$0x1] %vm283_vm3, %v11009_v4  ;;  %301 = vst.msk [vmem:[#allocation2 + $0x70] sm:$0x1] %vm283_vm3, %v11009_v4  ;;  %v686_v23 = vld [vmem:[#allocation2 + $0x18] sm:$0xff]  ;;  %541 = vrot.lane.b32.xlu1 %v9064_v10, %s11010_s10  ;;  %539 = vrot.lane.b32.xlu0 %v9063_v11, %s11010_s10  ;;  %v445_v27 = vld [vmem:[%s11128_s13 + $0x48] sm:$0xff] }
  0x1a   : > { %302 = vst.msk [vmem:[#allocation2 + $0x98] sm:$0x1] %vm283_vm3, %v11009_v4  ;;  %303 = vst.msk [vmem:[#allocation2 + $0xc0] sm:$0x1] %vm283_vm3, %v11009_v4  ;;  %v717_v24 = vpack.c.bf16 %v686_v23, %v685_v12  ;;  %v637_v26 = vld [vmem:[#allocation2 + $0x17] sm:$0xff]  ;;  %v444_v30 = vld [vmem:[%s11128_s13 + $0x40] sm:$0xff] }
  0x1b   : > { %304 = vst.msk [vmem:[#allocation2 + $0xe8] sm:$0x1] %vm283_vm3, %v11009_v4  ;;  %305 = vst.msk [vmem:[#allocation2 + $0x110] sm:$0x1] %vm283_vm3, %v11009_v4  ;;  %v668_v28 = vpack.c.bf16 %v637_v26, %v636_v25  ;;  %v447_v29 = vld [vmem:[%s11128_s13 + $0x58] sm:$0xff]  ;;  %v446_v31 = vld [vmem:[%s11128_s13 + $0x50] sm:$0xff] }
  0x1c   : > { %306 = vst.msk [vmem:[#allocation2 + $0x138] sm:$0x1] %vm283_vm3, %v11009_v4  ;;  %307 = vst.msk [vmem:[#allocation2 + $0x160] sm:$0x1] %vm283_vm3, %v11009_v4  ;;  %10109 = vmatprep.mubr.msk.bf16.mxu0 %vm273_vm1, %v717_v24  ;;  %v449_v32 = vld [vmem:[%s11128_s13 + $0x68] sm:$0xff]  ;;  %v451_v33 = vld [vmem:[%s11128_s13 + $0x78] sm:$0xff] }
  0x1d   : > { %308 = vst.msk [vmem:[#allocation2 + $0x188] sm:$0x1] %vm283_vm3, %v11009_v4  ;;  %309 = vst.msk [vmem:[#allocation2 + $0x1b0] sm:$0x1] %vm283_vm3, %v11009_v4  ;;  %v448_v34 = vld [vmem:[%s11128_s13 + $0x60] sm:$0xff]  ;;  %v9068_v35 = vld [vmem:[%s11114_s8 + $0x48] sm:$0xff]  ;;  %10143 = vmatprep.mubr.msk.bf16.mxu1 %vm273_vm1, %v668_v28  ;;  %558 = vrot.lane.b32.xlu1 %v9066_v19, %s11010_s10 }
  0x1e   : > { %310 = vst.msk [vmem:[#allocation2 + $0x1d8] sm:$0x1] %vm283_vm3, %v11009_v4  ;;  %311 = vst.msk [vmem:[#allocation2 + $0x200] sm:$0x1] %vm283_vm3, %v11009_v4  ;;  %v9067_v36 = vld [vmem:[%s11114_s8 + $0x40] sm:$0xff]  ;;  %v450_v37 = vld [vmem:[%s11128_s13 + $0x70] sm:$0xff]  ;;  %556 = vrot.lane.b32.xlu0 %v9065_v20, %s11010_s10 }
  0x1f   : > { %312 = vst.msk [vmem:[#allocation2 + $0x228] sm:$0x1] %vm283_vm3, %v11009_v4  ;;  %313 = vst.msk [vmem:[#allocation2 + $0x250] sm:$0x1] %vm283_vm3, %v11009_v4  ;;  %v9070_v38 = vld [vmem:[%s11114_s8 + $0x58] sm:$0xff]  ;;  %v9069_v39 = vld [vmem:[%s11114_s8 + $0x50] sm:$0xff] }
  0x20   : > { %314 = vst.msk [vmem:[#allocation2 + $0x278] sm:$0x1] %vm283_vm3, %v11009_v4  ;;  %315 = vst.msk [vmem:[#allocation2 + $0x2a0] sm:$0x1] %vm283_vm3, %v11009_v4  ;;  %v453_v40 = vld [vmem:[%s11128_s13 + $0x88] sm:$0xff]  ;;  %v455_v41 = vld [vmem:[%s11128_s13 + $0x98] sm:$0xff] }
  0x21   : > { %469 = vst.msk [vmem:[#allocation2 + $0x38] sm:$0xff] %vm468_vm4, %v436_v13  ;;  %471 = vst.msk [vmem:[#allocation2 + $0x60] sm:$0xff] %vm468_vm4, %v438_v14  ;;  %575 = vrot.lane.b32.xlu1 %v9068_v35, %s11010_s10  ;;  %v452_v42 = vld [vmem:[%s11128_s13 + $0x80] sm:$0xff]  ;;  %v9072_v43 = vld [vmem:[%s11114_s8 + $0x68] sm:$0xff]  ;;  %v1259_v14 = vsel %vm783_vm0, %v11074_v5, 0  ;;  %v1553_v19 = vsel %vm783_vm0, %v9125_v60, 0 }
  0x22   : > { %473 = vst.msk [vmem:[#allocation2 + $0x88] sm:$0xff] %vm468_vm4, %v440_v15  ;;  %475 = vst.msk [vmem:[#allocation2 + $0xb0] sm:$0xff] %vm468_vm4, %v442_v16  ;;  %573 = vrot.lane.b32.xlu0 %v9067_v36, %s11010_s10  ;;  %v9071_v44 = vld [vmem:[%s11114_s8 + $0x60] sm:$0xff]  ;;  %v454_v45 = vld [vmem:[%s11128_s13 + $0x90] sm:$0xff]  ;;  %vm3497_vm9 = vsmask.f32 4368 }
  0x23   : > { %470 = vst.msk [vmem:[#allocation2 + $0x40] sm:$0xff] %vm468_vm4, %v437_v17  ;;  %472 = vst.msk [vmem:[#allocation2 + $0x68] sm:$0xff] %vm468_vm4, %v439_v18  ;;  %v9074_v46 = vld [vmem:[%s11114_s8 + $0x78] sm:$0xff]  ;;  %v9073_v47 = vld [vmem:[%s11114_s8 + $0x70] sm:$0xff]  ;;  %vm325_vm10 = vsmask.f32 256 }
  0x24   : > { %474 = vst.msk [vmem:[#allocation2 + $0x90] sm:$0xff] %vm468_vm4, %v441_v21  ;;  %476 = vst.msk [vmem:[#allocation2 + $0xb8] sm:$0xff] %vm468_vm4, %v443_v22  ;;  %v457_v48 = vld [vmem:[%s11128_s13 + $0xa8] sm:$0xff]  ;;  %v459_v49 = vld [vmem:[%s11128_s13 + $0xb8] sm:$0xff]  ;;  %vm4510_vm14 = vsmask.f32 3328 }
  0x25   : > { %478 = vst.msk [vmem:[#allocation2 + $0xe0] sm:$0xff] %vm468_vm4, %v445_v27  ;;  %480 = vst.msk [vmem:[#allocation2 + $0x108] sm:$0xff] %vm468_vm4, %v447_v29  ;;  %592 = vrot.lane.b32.xlu1 %v9070_v38, %s11010_s10  ;;  %v456_v50 = vld [vmem:[%s11128_s13 + $0xa0] sm:$0xff]  ;;  %v458_v51 = vld [vmem:[%s11128_s13 + $0xb0] sm:$0xff]  ;;  %vm4511_vm15 = vsmask.f32 7440 }
  0x26   : > { %477 = vst.msk [vmem:[#allocation2 + $0xd8] sm:$0xff] %vm468_vm4, %v444_v30  ;;  %479 = vst.msk [vmem:[#allocation2 + $0x100] sm:$0xff] %vm468_vm4, %v446_v31  ;;  %590 = vrot.lane.b32.xlu0 %v9069_v39, %s11010_s10  ;;  %v461_v52 = vld [vmem:[%s11128_s13 + $0xc8] sm:$0xff]  ;;  %v463_v53 = vld [vmem:[%s11128_s13 + $0xd8] sm:$0xff] }
  0x27   : > { %482 = vst.msk [vmem:[#allocation2 + $0x130] sm:$0xff] %vm468_vm4, %v449_v32  ;;  %484 = vst.msk [vmem:[#allocation2 + $0x158] sm:$0xff] %vm468_vm4, %v451_v33  ;;  %v460_v54 = vld [vmem:[%s11128_s13 + $0xc0] sm:$0xff]  ;;  %v462_v55 = vld [vmem:[%s11128_s13 + $0xd0] sm:$0xff] }
  0x28   : > { %481 = vst.msk [vmem:[#allocation2 + $0x128] sm:$0xff] %vm468_vm4, %v448_v34  ;;  %483 = vst.msk [vmem:[#allocation2 + $0x150] sm:$0xff] %vm468_vm4, %v450_v37  ;;  %v465_v56 = vld [vmem:[%s11128_s13 + $0xe8] sm:$0xff]  ;;  %v467_v57 = vld [vmem:[%s11128_s13 + $0xf8] sm:$0xff] }
  0x29   : > { %486 = vst.msk [vmem:[#allocation2 + $0x180] sm:$0xff] %vm468_vm4, %v453_v40  ;;  %488 = vst.msk [vmem:[#allocation2 + $0x1a8] sm:$0xff] %vm468_vm4, %v455_v41  ;;  %609 = vrot.lane.b32.xlu1 %v9072_v43, %s11010_s10  ;;  %v464_v58 = vld [vmem:[%s11128_s13 + $0xe0] sm:$0xff]  ;;  %v466_v59 = vld [vmem:[%s11128_s13 + $0xf0] sm:$0xff] }
  0x2a   : > { %485 = vst.msk [vmem:[#allocation2 + $0x178] sm:$0xff] %vm468_vm4, %v452_v42  ;;  %487 = vst.msk [vmem:[#allocation2 + $0x1a0] sm:$0xff] %vm468_vm4, %v454_v45  ;;  %607 = vrot.lane.b32.xlu0 %v9071_v44, %s11010_s10  ;;  %v11260_v5 = vld [vmem:[%s14551_s2 + $0x10] sm:$0xf]  ;;  %v11265_v20 = vld [vmem:[%s14551_s2 + $0x14] sm:$0xf] }
  0x2b   : > { %490 = vst.msk [vmem:[#allocation2 + $0x1d0] sm:$0xff] %vm468_vm4, %v457_v48  ;;  %492 = vst.msk [vmem:[#allocation2 + $0x1f8] sm:$0xff] %vm468_vm4, %v459_v49 }
  0x2c   : > { %489 = vst.msk [vmem:[#allocation2 + $0x1c8] sm:$0xff] %vm468_vm4, %v456_v50  ;;  %491 = vst.msk [vmem:[#allocation2 + $0x1f0] sm:$0xff] %vm468_vm4, %v458_v51 }
  0x2d   : > { %626 = vrot.lane.b32.xlu1 %v9074_v46, %s11010_s10  ;;  %494 = vst.msk [vmem:[#allocation2 + $0x220] sm:$0xff] %vm468_vm4, %v461_v52  ;;  %496 = vst.msk [vmem:[#allocation2 + $0x248] sm:$0xff] %vm468_vm4, %v463_v53 }
  0x2e   : > { %624 = vrot.lane.b32.xlu0 %v9073_v47, %s11010_s10  ;;  %493 = vst.msk [vmem:[#allocation2 + $0x218] sm:$0xff] %vm468_vm4, %v460_v54  ;;  %495 = vst.msk [vmem:[#allocation2 + $0x240] sm:$0xff] %vm468_vm4, %v462_v55  ;;  %s14392_s10 = scalar_lea.vmem %s14555_s6, %s9655_s9 }
  0x2f   : > { %498 = vst.msk [vmem:[#allocation2 + $0x270] sm:$0xff] %vm468_vm4, %v465_v56  ;;  %500 = vst.msk [vmem:[#allocation2 + $0x298] sm:$0xff] %vm468_vm4, %v467_v57 }
  0x30   : > { %497 = vst.msk [vmem:[#allocation2 + $0x268] sm:$0xff] %vm468_vm4, %v464_v58  ;;  %499 = vst.msk [vmem:[#allocation2 + $0x290] sm:$0xff] %vm468_vm4, %v466_v59 }
  0x31   : > { %vm11910_vm8 = vmand %vm316_vm6, %vm317_vm7 }
  0x32   : > { %vm11976_vm11 = vmor %vm325_vm10, %vm3497_vm9 }
  0x33   : > { %vm11995_vm13 = vmand %vm324_vm12, %vm325_vm10 }
  0x83   : > { %v506_v61 = vpop.permute.xlu0 %505  ;;  %v523_v62 = vpop.permute.xlu1 %522 }
  0x84   : > { %512 = vst.msk [vmem:[#allocation2 + $0x38] sm:$0xff] %vm511_vm5, %v506_v61  ;;  %515 = vst.msk [vmem:[#allocation2 + $0x60] sm:$0xff] %vm511_vm5, %v506_v61 }
  0x85   : > { %529 = vst.msk [vmem:[#allocation2 + $0x88] sm:$0xff] %vm511_vm5, %v523_v62  ;;  %532 = vst.msk [vmem:[#allocation2 + $0xb0] sm:$0xff] %vm511_vm5, %v523_v62 }
  0x87   : > { %v508_v63 = vpop.permute.xlu0 %507  ;;  %v525_v0 = vpop.permute.xlu1 %524 }
  0x88   : > { %513 = vst.msk [vmem:[#allocation2 + $0x40] sm:$0xff] %vm511_vm5, %v508_v63  ;;  %516 = vst.msk [vmem:[#allocation2 + $0x68] sm:$0xff] %vm511_vm5, %v508_v63 }
  0x89   : > { %530 = vst.msk [vmem:[#allocation2 + $0x90] sm:$0xff] %vm511_vm5, %v525_v0  ;;  %533 = vst.msk [vmem:[#allocation2 + $0xb8] sm:$0xff] %vm511_vm5, %v525_v0 }
  0x8b   : > { %v542_v1 = vpop.permute.xlu1 %541  ;;  %v540_v2 = vpop.permute.xlu0 %539  ;;  %v687_v3 = vld [vmem:[#allocation2 + $0x38] sm:$0xff]  ;;  %v689_v6 = vld [vmem:[#allocation2 + $0x60] sm:$0xff] }
  0x8c   : > { %547 = vst.msk [vmem:[#allocation2 + $0xe0] sm:$0xff] %vm511_vm5, %v542_v1  ;;  %550 = vst.msk [vmem:[#allocation2 + $0x108] sm:$0xff] %vm511_vm5, %v542_v1  ;;  %v638_v4 = vld [vmem:[#allocation2 + $0x37] sm:$0xff]  ;;  %v640_v16 = vld [vmem:[#allocation2 + $0x5f] sm:$0xff] }
  0x8d   : > { %546 = vst.msk [vmem:[#allocation2 + $0xd8] sm:$0xff] %vm511_vm5, %v540_v2  ;;  %549 = vst.msk [vmem:[#allocation2 + $0x100] sm:$0xff] %vm511_vm5, %v540_v2  ;;  %v691_v23 = vld [vmem:[#allocation2 + $0x88] sm:$0xff]  ;;  %v693_v27 = vld [vmem:[#allocation2 + $0xb0] sm:$0xff] }
  0x8e   : > { %v642_v24 = vld [vmem:[#allocation2 + $0x87] sm:$0xff]  ;;  %v644_v29 = vld [vmem:[#allocation2 + $0xaf] sm:$0xff] }
  0x8f   : > { %v688_v7 = vld [vmem:[#allocation2 + $0x40] sm:$0xff]  ;;  %v690_v9 = vld [vmem:[#allocation2 + $0x68] sm:$0xff]  ;;  %v559_v10 = vpop.permute.xlu1 %558 }
  0x90   : > { %v639_v8 = vld [vmem:[#allocation2 + $0x3f] sm:$0xff]  ;;  %v557_v11 = vpop.permute.xlu0 %556  ;;  %v11238_v12 = vpack.c.bf16 %v688_v7, %v687_v3  ;;  %v11244_v15 = vpack.c.bf16 %v690_v9, %v689_v6  ;;  %v641_v17 = vld [vmem:[#allocation2 + $0x67] sm:$0xff]  ;;  %564 = vst.msk [vmem:[#allocation2 + $0x130] sm:$0xff] %vm511_vm5, %v559_v10  ;;  %567 = vst.msk [vmem:[#allocation2 + $0x158] sm:$0xff] %vm511_vm5, %v559_v10 }
  0x91   : > { %v11240_v13 = vpack.c.bf16 %v639_v8, %v638_v4  ;;  %563 = vst.msk [vmem:[#allocation2 + $0x128] sm:$0xff] %vm511_vm5, %v557_v11  ;;  %566 = vst.msk [vmem:[#allocation2 + $0x150] sm:$0xff] %vm511_vm5, %v557_v11  ;;  %v11250_v18 = vpack.c.bf16 %v641_v17, %v640_v16  ;;  %v692_v25 = vld [vmem:[#allocation2 + $0x90] sm:$0xff]  ;;  %v694_v28 = vld [vmem:[#allocation2 + $0xb8] sm:$0xff] }
  0x92   : > { %10110 = vmatmul.mubr.msk.bf16.vlgmr.msra.gmra.mxu0 %vm273_vm1, %v11238_v12  ;;  %v643_v26 = vld [vmem:[#allocation2 + $0x8f] sm:$0xff]  ;;  %v645_v30 = vld [vmem:[#allocation2 + $0xb7] sm:$0xff]  ;;  %v11279_v33 = vpack.c.bf16 %v692_v25, %v691_v23  ;;  %v11287_v35 = vpack.c.bf16 %v694_v28, %v693_v27 }
  0x93   : > { %10144 = vmatmul.mubr.msk.bf16.vlgmr.msra.gmra.mxu1 %vm273_vm1, %v11240_v13  ;;  %10176 = vmatpush3.bf16.msra.mxu0 %v1259_v14  ;;  %v576_v21 = vpop.permute.xlu1 %575  ;;  %v11281_v34 = vpack.c.bf16 %v643_v26, %v642_v24  ;;  %v11289_v36 = vpack.c.bf16 %v645_v30, %v644_v29  ;;  %v696_v38 = vld [vmem:[#allocation2 + $0xe0] sm:$0xff]  ;;  %v698_v44 = vld [vmem:[#allocation2 + $0x108] sm:$0xff] }
  0x94   : > { %10113 = vmatprep.mubr.msk.bf16.mxu0 %vm273_vm1, %v11244_v15  ;;  %v574_v22 = vpop.permute.xlu0 %573  ;;  %10147 = vmatprep.mubr.msk.bf16.mxu1 %vm273_vm1, %v11250_v18  ;;  %581 = vst.msk [vmem:[#allocation2 + $0x180] sm:$0xff] %vm511_vm5, %v576_v21  ;;  %584 = vst.msk [vmem:[#allocation2 + $0x1a8] sm:$0xff] %vm511_vm5, %v576_v21  ;;  %v695_v37 = vld [vmem:[#allocation2 + $0xd8] sm:$0xff]  ;;  %v697_v41 = vld [vmem:[#allocation2 + $0x100] sm:$0xff] }
  0x95   : > { %580 = vst.msk [vmem:[#allocation2 + $0x178] sm:$0xff] %vm511_vm5, %v574_v22  ;;  %583 = vst.msk [vmem:[#allocation2 + $0x1a0] sm:$0xff] %vm511_vm5, %v574_v22  ;;  %10210 = vmatpush3.bf16.msra.mxu1 %v1553_v19  ;;  %10849 = vmatprep.subr.msk.bf16.mxu0 %vm783_vm0, %v11260_v5  ;;  %v646_v39 = vld [vmem:[#allocation2 + $0xd7] sm:$0xff]  ;;  %v647_v40 = vld [vmem:[#allocation2 + $0xdf] sm:$0xff]  ;;  %v11303_v47 = vpack.c.bf16 %v696_v38, %v695_v37  ;;  %v11307_v49 = vpack.c.bf16 %v698_v44, %v697_v41 }
  0x96   : > { %10850 = vmatprep.subr.msk.bf16.mxu1 %vm783_vm0, %v11265_v20  ;;  %v648_v45 = vld [vmem:[#allocation2 + $0xff] sm:$0xff]  ;;  %v649_v46 = vld [vmem:[#allocation2 + $0x107] sm:$0xff]  ;;  %v11305_v48 = vpack.c.bf16 %v647_v40, %v646_v39 }
  0x97   : > { %v593_v31 = vpop.permute.xlu1 %592  ;;  %v11309_v50 = vpack.c.bf16 %v649_v46, %v648_v45  ;;  %v700_v54 = vld [vmem:[#allocation2 + $0x130] sm:$0xff]  ;;  %v702_v58 = vld [vmem:[#allocation2 + $0x158] sm:$0xff] }
  0x98   : > { %v591_v32 = vpop.permute.xlu0 %590  ;;  %598 = vst.msk [vmem:[#allocation2 + $0x1d0] sm:$0xff] %vm511_vm5, %v593_v31  ;;  %601 = vst.msk [vmem:[#allocation2 + $0x1f8] sm:$0xff] %vm511_vm5, %v593_v31  ;;  %v699_v53 = vld [vmem:[#allocation2 + $0x128] sm:$0xff]  ;;  %v701_v57 = vld [vmem:[#allocation2 + $0x150] sm:$0xff] }
  0x99   : > { %597 = vst.msk [vmem:[#allocation2 + $0x1c8] sm:$0xff] %vm511_vm5, %v591_v32  ;;  %600 = vst.msk [vmem:[#allocation2 + $0x1f0] sm:$0xff] %vm511_vm5, %v591_v32  ;;  %v650_v55 = vld [vmem:[#allocation2 + $0x127] sm:$0xff]  ;;  %v651_v56 = vld [vmem:[#allocation2 + $0x12f] sm:$0xff]  ;;  %v11323_v61 = vpack.c.bf16 %v700_v54, %v699_v53  ;;  %v11327_v63 = vpack.c.bf16 %v702_v58, %v701_v57 }
  0x9a   : > { %10114 = vmatmul.mubr.msk.bf16.gmra.mxu0 %vm273_vm1, %v11279_v33  ;;  %v652_v59 = vld [vmem:[#allocation2 + $0x14f] sm:$0xff]  ;;  %v653_v60 = vld [vmem:[#allocation2 + $0x157] sm:$0xff]  ;;  %v11325_v62 = vpack.c.bf16 %v651_v56, %v650_v55 }
  0x9b   : > { %10148 = vmatmul.mubr.msk.bf16.gmra.mxu1 %vm273_vm1, %v11281_v34  ;;  %10117 = vmatprep.mubr.msk.bf16.mxu0 %vm273_vm1, %v11287_v35  ;;  %v610_v42 = vpop.permute.xlu1 %609  ;;  %v11329_v0 = vpack.c.bf16 %v653_v60, %v652_v59  ;;  %v704_v2 = vld [vmem:[#allocation2 + $0x180] sm:$0xff]  ;;  %v706_v7 = vld [vmem:[#allocation2 + $0x1a8] sm:$0xff]  ;;  %v1160_v55 = vld [vmem:[#allocation2 + $0x11] sm:$0xff] }
  0x9c   : > { %10151 = vmatprep.mubr.msk.bf16.mxu1 %vm273_vm1, %v11289_v36  ;;  %v608_v43 = vpop.permute.xlu0 %607  ;;  %615 = vst.msk [vmem:[#allocation2 + $0x220] sm:$0xff] %vm511_vm5, %v610_v42  ;;  %618 = vst.msk [vmem:[#allocation2 + $0x248] sm:$0xff] %vm511_vm5, %v610_v42  ;;  %v703_v1 = vld [vmem:[#allocation2 + $0x178] sm:$0xff]  ;;  %v705_v6 = vld [vmem:[#allocation2 + $0x1a0] sm:$0xff] }
  0x9d   : > { %614 = vst.msk [vmem:[#allocation2 + $0x218] sm:$0xff] %vm511_vm5, %v608_v43  ;;  %617 = vst.msk [vmem:[#allocation2 + $0x240] sm:$0xff] %vm511_vm5, %v608_v43  ;;  %v654_v3 = vld [vmem:[#allocation2 + $0x177] sm:$0xff]  ;;  %v655_v4 = vld [vmem:[#allocation2 + $0x17f] sm:$0xff]  ;;  %v11339_v10 = vpack.c.bf16 %v704_v2, %v703_v1  ;;  %v11343_v14 = vpack.c.bf16 %v706_v7, %v705_v6  ;;  %v1847_v6 = vsel %vm783_vm0, %v11260_v5, 0 }
  0x9e   : > { %v656_v8 = vld [vmem:[#allocation2 + $0x19f] sm:$0xff]  ;;  %v657_v9 = vld [vmem:[#allocation2 + $0x1a7] sm:$0xff]  ;;  %v11341_v11 = vpack.c.bf16 %v655_v4, %v654_v3 }
  0x9f   : > { %v627_v51 = vpop.permute.xlu1 %626  ;;  %v11345_v16 = vpack.c.bf16 %v657_v9, %v656_v8  ;;  %v708_v19 = vld [vmem:[#allocation2 + $0x1d0] sm:$0xff]  ;;  %v710_v24 = vld [vmem:[#allocation2 + $0x1f8] sm:$0xff]  ;;  %v1163_v1 = vld [vmem:[#allocation2 + $0x41] sm:$0xff]  ;;  %v2141_v8 = vsel %vm783_vm0, %v11265_v20, 0 }
  0xa0   : > { %v625_v52 = vpop.permute.xlu0 %624  ;;  %632 = vst.msk [vmem:[#allocation2 + $0x270] sm:$0xff] %vm511_vm5, %v627_v51  ;;  %635 = vst.msk [vmem:[#allocation2 + $0x298] sm:$0xff] %vm511_vm5, %v627_v51  ;;  %v707_v17 = vld [vmem:[#allocation2 + $0x1c8] sm:$0xff]  ;;  %v709_v23 = vld [vmem:[#allocation2 + $0x1f0] sm:$0xff] }
  0xa1   : > { %631 = vst.msk [vmem:[#allocation2 + $0x268] sm:$0xff] %vm511_vm5, %v625_v52  ;;  %634 = vst.msk [vmem:[#allocation2 + $0x290] sm:$0xff] %vm511_vm5, %v625_v52  ;;  %v658_v21 = vld [vmem:[#allocation2 + $0x1c7] sm:$0xff]  ;;  %v659_v22 = vld [vmem:[#allocation2 + $0x1cf] sm:$0xff]  ;;  %v11355_v27 = vpack.c.bf16 %v708_v19, %v707_v17  ;;  %v11359_v29 = vpack.c.bf16 %v710_v24, %v709_v23 }
  0xa2   : > { %10118 = vmatmul.mubr.msk.bf16.gmra.mxu0 %vm273_vm1, %v11303_v47  ;;  %v660_v25 = vld [vmem:[#allocation2 + $0x1ef] sm:$0xff]  ;;  %v661_v26 = vld [vmem:[#allocation2 + $0x1f7] sm:$0xff]  ;;  %v11357_v28 = vpack.c.bf16 %v659_v22, %v658_v21  ;;  %v1164_v2 = vld [vmem:[#allocation2 + $0x61] sm:$0xff] }
  0xa3   : > { %10152 = vmatmul.mubr.msk.bf16.gmra.mxu1 %vm273_vm1, %v11305_v48  ;;  %10121 = vmatprep.mubr.msk.bf16.mxu0 %vm273_vm1, %v11307_v49  ;;  %v11361_v30 = vpack.c.bf16 %v661_v26, %v660_v25  ;;  %v712_v32 = vld [vmem:[#allocation2 + $0x220] sm:$0xff]  ;;  %v714_v40 = vld [vmem:[#allocation2 + $0x248] sm:$0xff]  ;;  %v11418_v5 = vld [vmem:[%s14551_s2 + $0x1c] sm:$0xf] }
  0xa4   : > { %10155 = vmatprep.mubr.msk.bf16.mxu1 %vm273_vm1, %v11309_v50  ;;  %v711_v31 = vld [vmem:[#allocation2 + $0x218] sm:$0xff]  ;;  %v713_v39 = vld [vmem:[#allocation2 + $0x240] sm:$0xff]  ;;  %v1165_v3 = vld [vmem:[#allocation2 + $0x69] sm:$0xff] }
  0xa5   : > { %v662_v37 = vld [vmem:[#allocation2 + $0x217] sm:$0xff]  ;;  %v663_v38 = vld [vmem:[#allocation2 + $0x21f] sm:$0xff]  ;;  %v665_v42 = vld [vmem:[#allocation2 + $0x247] sm:$0xff]  ;;  %v11371_v43 = vpack.c.bf16 %v712_v32, %v711_v31  ;;  %v11375_v45 = vpack.c.bf16 %v714_v40, %v713_v39  ;;  %v11402_v7 = vpack.c.bf16 %v1165_v3, %v1164_v2 }
  0xa6   : > { %v664_v41 = vld [vmem:[#allocation2 + $0x23f] sm:$0xff]  ;;  %v11373_v44 = vpack.c.bf16 %v663_v38, %v662_v37  ;;  %v1166_v20 = vld [vmem:[#allocation2 + $0x89] sm:$0xff]  ;;  %v1167_v9 = vld [vmem:[#allocation2 + $0x91] sm:$0xff] }
  0xa7   : > { %v11377_v46 = vpack.c.bf16 %v665_v42, %v664_v41  ;;  %v716_v52 = vld [vmem:[#allocation2 + $0x270] sm:$0xff]  ;;  %v1161_v56 = vld [vmem:[#allocation2 + $0x19] sm:$0xff]  ;;  %v11428_v21 = vpack.c.bf16 %v1167_v9, %v1166_v20  ;;  %v1171_v24 = vld [vmem:[#allocation2 + $0xe1] sm:$0xff] }
  0xa8   : > { %v715_v51 = vld [vmem:[#allocation2 + $0x268] sm:$0xff]  ;;  %v1192_v59 = vpack.c.bf16 %v1161_v56, %v1160_v55  ;;  %v1162_v60 = vld [vmem:[#allocation2 + $0x39] sm:$0xff]  ;;  %v1168_v17 = vld [vmem:[#allocation2 + $0xb1] sm:$0xff] }
  0xa9   : > { %v666_v53 = vld [vmem:[#allocation2 + $0x267] sm:$0xff]  ;;  %v667_v54 = vld [vmem:[#allocation2 + $0x26f] sm:$0xff]  ;;  %v11387_v57 = vpack.c.bf16 %v716_v52, %v715_v51  ;;  %v11398_v4 = vpack.c.bf16 %v1163_v1, %v1162_v60  ;;  %v1169_v19 = vld [vmem:[#allocation2 + $0xb9] sm:$0xff] }
  0xaa   : > { %10122 = vmatmul.mubr.msk.bf16.gmra.mxu0 %vm273_vm1, %v11323_v61  ;;  %v11389_v58 = vpack.c.bf16 %v667_v54, %v666_v53  ;;  %v11430_v22 = vpack.c.bf16 %v1169_v19, %v1168_v17  ;;  %v1170_v23 = vld [vmem:[#allocation2 + $0xd9] sm:$0xff]  ;;  %v1172_v25 = vld [vmem:[#allocation2 + $0x101] sm:$0xff]  ;;  %v1173_v26 = vld [vmem:[#allocation2 + $0x109] sm:$0xff] }
  0xab   : > { %10156 = vmatmul.mubr.msk.bf16.gmra.mxu1 %vm273_vm1, %v11325_v62  ;;  %10125 = vmatprep.mubr.msk.bf16.mxu0 %vm273_vm1, %v11327_v63  ;;  %v11440_v31 = vpack.c.bf16 %v1171_v24, %v1170_v23  ;;  %v11442_v32 = vpack.c.bf16 %v1173_v26, %v1172_v25  ;;  %v1174_v37 = vld [vmem:[#allocation2 + $0x129] sm:$0xff]  ;;  %v1175_v38 = vld [vmem:[#allocation2 + $0x131] sm:$0xff]  ;;  %v1177_v40 = vld [vmem:[#allocation2 + $0x159] sm:$0xff] }
  0xac   : > { %10159 = vmatprep.mubr.msk.bf16.mxu1 %vm273_vm1, %v11329_v0  ;;  %v1176_v39 = vld [vmem:[#allocation2 + $0x151] sm:$0xff]  ;;  %v11452_v41 = vpack.c.bf16 %v1175_v38, %v1174_v37  ;;  %v1178_v51 = vld [vmem:[#allocation2 + $0x179] sm:$0xff]  ;;  %v1179_v52 = vld [vmem:[#allocation2 + $0x181] sm:$0xff] }
  0xad   : > { %v11454_v42 = vpack.c.bf16 %v1177_v40, %v1176_v39  ;;  %v1180_v53 = vld [vmem:[#allocation2 + $0x1a1] sm:$0xff]  ;;  %v1181_v54 = vld [vmem:[#allocation2 + $0x1a9] sm:$0xff]  ;;  %v11464_v55 = vpack.c.bf16 %v1179_v52, %v1178_v51  ;;  %v1183_v60 = vld [vmem:[#allocation2 + $0x1d1] sm:$0xff]  ;;  %v2729_v51 = vsel %vm783_vm0, %v11418_v5, 0 }
  0xae   : > { %v11466_v56 = vpack.c.bf16 %v1181_v54, %v1180_v53  ;;  %v1184_v1 = vld [vmem:[#allocation2 + $0x1f1] sm:$0xff]  ;;  %v1185_v2 = vld [vmem:[#allocation2 + $0x1f9] sm:$0xff]  ;;  %v1187_v20 = vld [vmem:[#allocation2 + $0x221] sm:$0xff] }
  0xaf   : > { %v1188_v9 = vld [vmem:[#allocation2 + $0x241] sm:$0xff]  ;;  %v1189_v17 = vld [vmem:[#allocation2 + $0x249] sm:$0xff]  ;;  %v1191_v25 = vld [vmem:[#allocation2 + $0x271] sm:$0xff] }
  0xb0   : > { %v1206_v23 = vpack.c.bf16 %v1189_v17, %v1188_v9  ;;  %v1190_v24 = vld [vmem:[#allocation2 + $0x269] sm:$0xff]  ;;  %v1485_v37 = vld [vmem:[#allocation2 + $0x297] sm:$0xff]  ;;  %v9210_v52 = vld [vmem:[%s14551_s2 + $0x20] sm:$0xf] }
  0xb1   : > { %v1484_v26 = vld [vmem:[#allocation2 + $0x28f] sm:$0xff]  ;;  %v1207_v38 = vpack.c.bf16 %v1191_v25, %v1190_v24 }
  0xb2   : > { %10126 = vmatmul.mubr.msk.bf16.gmra.mxu0 %vm273_vm1, %v11339_v10  ;;  %v11494_v39 = vpack.c.bf16 %v1485_v37, %v1484_v26 }
  0xb3   : > { %10160 = vmatmul.mubr.msk.bf16.gmra.mxu1 %vm273_vm1, %v11341_v11  ;;  %10129 = vmatprep.mubr.msk.bf16.mxu0 %vm273_vm1, %v11343_v14 }
  0xb4   : > { %10163 = vmatprep.mubr.msk.bf16.mxu1 %vm273_vm1, %v11345_v16 }
  0xba   : > { %10130 = vmatmul.mubr.msk.bf16.gmra.mxu0 %vm273_vm1, %v11355_v27 }
  0xbb   : > { %10164 = vmatmul.mubr.msk.bf16.gmra.mxu1 %vm273_vm1, %v11357_v28  ;;  %10133 = vmatprep.mubr.msk.bf16.mxu0 %vm273_vm1, %v11359_v29 }
  0xbc   : > { %10167 = vmatprep.mubr.msk.bf16.mxu1 %vm273_vm1, %v11361_v30 }
  0xc2   : > { %10134 = vmatmul.mubr.msk.bf16.gmra.mxu0 %vm273_vm1, %v11371_v43 }
  0xc3   : > { %10168 = vmatmul.mubr.msk.bf16.gmra.mxu1 %vm273_vm1, %v11373_v44  ;;  %10137 = vmatprep.mubr.msk.bf16.mxu0 %vm273_vm1, %v11375_v45 }
  0xc4   : > { %10171 = vmatprep.mubr.msk.bf16.mxu1 %vm273_vm1, %v11377_v46 }
  0xca   : > { %10138 = vmatmul.mubr.msk.bf16.gmra.mxu0 %vm273_vm1, %v11387_v57 }
  0xcb   : > { %10172 = vmatmul.mubr.msk.bf16.gmra.mxu1 %vm273_vm1, %v11389_v58  ;;  %10177 = vmatprep.mubr.msk.bf16.mxu0 %vm273_vm1, %v1192_v59  ;;  %v1182_v59 = vld [vmem:[#allocation2 + $0x1c9] sm:$0xff] }
  0xcc   : > { %10211 = vmatprep.mubr.msk.bf16.mxu1 %vm273_vm1, %v11240_v13  ;;  %v11413_v13 = vld [vmem:[%s14551_s2 + $0x18] sm:$0xf]  ;;  %v11476_v3 = vpack.c.bf16 %v1183_v60, %v1182_v59  ;;  %v3023_v59 = vsel %vm783_vm0, %v9210_v52, 0 }
  0xcd   : > { %v2435_v40 = vsel %vm783_vm0, %v11413_v13, 0 }
  0xd2   : > { %10178 = vmatmul.mubr.msk.bf16.vlgmr.msra.gmra.mxu0 %vm273_vm1, %v11398_v4 }
  0xd3   : > { %10212 = vmatmul.mubr.msk.bf16.vlgmr.msra.gmra.mxu1 %vm273_vm1, %v11250_v18  ;;  %10244 = vmatpush3.bf16.msra.mxu0 %v1847_v6  ;;  %v11478_v6 = vpack.c.bf16 %v1185_v2, %v1184_v1 }
  0xd4   : > { %10181 = vmatprep.mubr.msk.bf16.mxu0 %vm273_vm1, %v11402_v7  ;;  %10215 = vmatprep.mubr.msk.bf16.mxu1 %vm273_vm1, %v11281_v34 }
  0xd5   : > { %10278 = vmatpush3.bf16.msra.mxu1 %v2141_v8  ;;  %10851 = vmatprep.subr.msk.bf16.mxu0 %vm783_vm0, %v11413_v13  ;;  %v1186_v8 = vld [vmem:[#allocation2 + $0x219] sm:$0xff]  ;;  %v2072_v13 = vld [vmem:[#allocation2 + $0x291] sm:$0xff] }
  0xd6   : > { %10852 = vmatprep.subr.msk.bf16.mxu1 %vm783_vm0, %v11418_v5  ;;  %v1205_v19 = vpack.c.bf16 %v1187_v20, %v1186_v8  ;;  %v2073_v5 = vld [vmem:[#allocation2 + $0x299] sm:$0xff] }
  0xd7   : > { %v11566_v54 = vpack.c.bf16 %v2073_v5, %v2072_v13 }
  0xda   : > { %10182 = vmatmul.mubr.msk.bf16.gmra.mxu0 %vm273_vm1, %v11428_v21 }
  0xdb   : > { %10216 = vmatmul.mubr.msk.bf16.gmra.mxu1 %vm273_vm1, %v11289_v36  ;;  %10185 = vmatprep.mubr.msk.bf16.mxu0 %vm273_vm1, %v11430_v22 }
  0xdc   : > { %10219 = vmatprep.mubr.msk.bf16.mxu1 %vm273_vm1, %v11305_v48 }
  0xe2   : > { %10186 = vmatmul.mubr.msk.bf16.gmra.mxu0 %vm273_vm1, %v11440_v31 }
  0xe3   : > { %10220 = vmatmul.mubr.msk.bf16.gmra.mxu1 %vm273_vm1, %v11309_v50  ;;  %10189 = vmatprep.mubr.msk.bf16.mxu0 %vm273_vm1, %v11442_v32 }
  0xe4   : > { %10223 = vmatprep.mubr.msk.bf16.mxu1 %vm273_vm1, %v11325_v62 }
  0xea   : > { %10190 = vmatmul.mubr.msk.bf16.gmra.mxu0 %vm273_vm1, %v11452_v41 }
  0xeb   : > { %10224 = vmatmul.mubr.msk.bf16.gmra.mxu1 %vm273_vm1, %v11329_v0  ;;  %10193 = vmatprep.mubr.msk.bf16.mxu0 %vm273_vm1, %v11454_v42 }
  0xec   : > { %10227 = vmatprep.mubr.msk.bf16.mxu1 %vm273_vm1, %v11341_v11 }
  0xf2   : > { %10194 = vmatmul.mubr.msk.bf16.gmra.mxu0 %vm273_vm1, %v11464_v55 }
  0xf3   : > { %10228 = vmatmul.mubr.msk.bf16.gmra.mxu1 %vm273_vm1, %v11345_v16  ;;  %10197 = vmatprep.mubr.msk.bf16.mxu0 %vm273_vm1, %v11466_v56 }
  0xf4   : > { %10231 = vmatprep.mubr.msk.bf16.mxu1 %vm273_vm1, %v11357_v28 }
  0xfa   : > { %10198 = vmatmul.mubr.msk.bf16.gmra.mxu0 %vm273_vm1, %v11476_v3 }
  0xfb   : > { %10232 = vmatmul.mubr.msk.bf16.gmra.mxu1 %vm273_vm1, %v11361_v30  ;;  %10201 = vmatprep.mubr.msk.bf16.mxu0 %vm273_vm1, %v11478_v6 }
  0xfc   : > { %10235 = vmatprep.mubr.msk.bf16.mxu1 %vm273_vm1, %v11373_v44 }
 0x102   : > { %10202 = vmatmul.mubr.msk.bf16.gmra.mxu0 %vm273_vm1, %v1205_v19 }
 0x103   : > { %10236 = vmatmul.mubr.msk.bf16.gmra.mxu1 %vm273_vm1, %v11377_v46  ;;  %10205 = vmatprep.mubr.msk.bf16.mxu0 %vm273_vm1, %v1206_v23 }
 0x104   : > { %10239 = vmatprep.mubr.msk.bf16.mxu1 %vm273_vm1, %v11389_v58 }
 0x10a   : > { %10206 = vmatmul.mubr.msk.bf16.gmra.mxu0 %vm273_vm1, %v1207_v38 }
 0x10b   : > { %10240 = vmatmul.mubr.msk.bf16.gmra.mxu1 %vm273_vm1, %v11494_v39  ;;  %10245 = vmatprep.mubr.msk.bf16.mxu0 %vm273_vm1, %v11238_v12  ;;  %v1778_v12 = vld [vmem:[#allocation2 + $0x290] sm:$0xff] }
 0x10c   : > { %10279 = vmatprep.mubr.msk.bf16.mxu1 %vm273_vm1, %v11398_v4  ;;  %v1779_v4 = vld [vmem:[#allocation2 + $0x298] sm:$0xff] }
 0x10d   : > { %v11564_v53 = vpack.c.bf16 %v1779_v4, %v1778_v12 }
 0x112   : > { %10246 = vmatmul.mubr.msk.bf16.vlgmr.msra.gmra.mxu0 %vm273_vm1, %v11244_v15 }
 0x113   : > { %10280 = vmatmul.mubr.msk.bf16.vlgmr.msra.gmra.mxu1 %vm273_vm1, %v11402_v7  ;;  %10312 = vmatpush3.bf16.msra.mxu0 %v2435_v40 }
 0x114   : > { %10249 = vmatprep.mubr.msk.bf16.mxu0 %vm273_vm1, %v11279_v33  ;;  %10283 = vmatprep.mubr.msk.bf16.mxu1 %vm273_vm1, %v11428_v21 }
 0x115   : > { %10346 = vmatpush3.bf16.msra.mxu1 %v2729_v51  ;;  %10853 = vmatprep.subr.msk.bf16.mxu0 %vm783_vm0, %v9210_v52  ;;  %vm12431_vm0 = vmor %vm4510_vm14, %vm4511_vm15 }
 0x11a   : > { %10250 = vmatmul.mubr.msk.bf16.gmra.mxu0 %vm273_vm1, %v11287_v35 }
 0x11b   : > { %10284 = vmatmul.mubr.msk.bf16.gmra.mxu1 %vm273_vm1, %v11430_v22  ;;  %10253 = vmatprep.mubr.msk.bf16.mxu0 %vm273_vm1, %v11303_v47 }
 0x11c   : > { %10287 = vmatprep.mubr.msk.bf16.mxu1 %vm273_vm1, %v11440_v31 }
 0x122   : > { %10254 = vmatmul.mubr.msk.bf16.gmra.mxu0 %vm273_vm1, %v11307_v49 }
 0x123   : > { %10288 = vmatmul.mubr.msk.bf16.gmra.mxu1 %vm273_vm1, %v11442_v32  ;;  %10257 = vmatprep.mubr.msk.bf16.mxu0 %vm273_vm1, %v11323_v61 }
 0x124   : > { %10291 = vmatprep.mubr.msk.bf16.mxu1 %vm273_vm1, %v11452_v41 }
 0x12a   : > { %10258 = vmatmul.mubr.msk.bf16.gmra.mxu0 %vm273_vm1, %v11327_v63 }
 0x12b   : > { %10292 = vmatmul.mubr.msk.bf16.gmra.mxu1 %vm273_vm1, %v11454_v42  ;;  %10261 = vmatprep.mubr.msk.bf16.mxu0 %vm273_vm1, %v11339_v10 }
 0x12c   : > { %10295 = vmatprep.mubr.msk.bf16.mxu1 %vm273_vm1, %v11464_v55 }
 0x132   : > { %10262 = vmatmul.mubr.msk.bf16.gmra.mxu0 %vm273_vm1, %v11343_v14 }
 0x133   : > { %10296 = vmatmul.mubr.msk.bf16.gmra.mxu1 %vm273_vm1, %v11466_v56  ;;  %10265 = vmatprep.mubr.msk.bf16.mxu0 %vm273_vm1, %v11355_v27 }
 0x134   : > { %10299 = vmatprep.mubr.msk.bf16.mxu1 %vm273_vm1, %v11476_v3 }
 0x13a   : > { %10266 = vmatmul.mubr.msk.bf16.gmra.mxu0 %vm273_vm1, %v11359_v29 }
 0x13b   : > { %10300 = vmatmul.mubr.msk.bf16.gmra.mxu1 %vm273_vm1, %v11478_v6  ;;  %10269 = vmatprep.mubr.msk.bf16.mxu0 %vm273_vm1, %v11371_v43 }
 0x13c   : > { %10303 = vmatprep.mubr.msk.bf16.mxu1 %vm273_vm1, %v1205_v19 }
 0x142   : > { %10270 = vmatmul.mubr.msk.bf16.gmra.mxu0 %vm273_vm1, %v11375_v45 }
 0x143   : > { %10304 = vmatmul.mubr.msk.bf16.gmra.mxu1 %vm273_vm1, %v1206_v23  ;;  %10273 = vmatprep.mubr.msk.bf16.mxu0 %vm273_vm1, %v11387_v57 }
 0x144   : > { %10307 = vmatprep.mubr.msk.bf16.mxu1 %vm273_vm1, %v1207_v38 }
 0x14a   : > { %10274 = vmatmul.mubr.msk.bf16.gmra.mxu0 %vm273_vm1, %v11564_v53 }
 0x14b   : > { %10308 = vmatmul.mubr.msk.bf16.gmra.mxu1 %vm273_vm1, %v11566_v54  ;;  %10313 = vmatprep.mubr.msk.bf16.mxu0 %vm273_vm1, %v11250_v18 }
 0x14c   : > { %10347 = vmatprep.mubr.msk.bf16.mxu1 %vm273_vm1, %v11244_v15 }
 0x152   : > { %v10111_v60 = vpop.f32.mrf.mxu0  ;;  %10314 = vmatmul.mubr.msk.bf16.vlgmr.msra.gmra.mxu0 %vm273_vm1, %v11281_v34 }
 0x153   : > { %v10145_v1 = vpop.f32.mrf.mxu1  ;;  %10348 = vmatmul.mubr.msk.bf16.vlgmr.msra.gmra.mxu1 %vm273_vm1, %v11279_v33  ;;  %10380 = vmatpush3.bf16.msra.mxu0 %v3023_v59 }
 0x154   : > { %v11581_v2 = vadd.f32 %v10145_v1, %v10111_v60  ;;  %10317 = vmatprep.mubr.msk.bf16.mxu0 %vm273_vm1, %v11289_v36  ;;  %10351 = vmatprep.mubr.msk.bf16.mxu1 %vm273_vm1, %v11287_v35  ;;  %v821_v15 = vpop.f32.mrf.mxu0 }
 0x155   : > { %v1033_v18 = vpop.f32.mrf.mxu1 }
 0x156   : > { %v11587_v8 = vadd.f32 %v1033_v18, %v821_v15  ;;  %v10112_v20 = vpop.f32.mrf.mxu0 }
 0x157   : > { %v10146_v9 = vpop.f32.mrf.mxu1 }
 0x158   : > { %v11589_v17 = vadd.f32 %v10146_v9, %v10112_v20  ;;  %v824_v34 = vpop.f32.mrf.mxu0 }
 0x159   : > { %v1036_v19 = vpop.f32.mrf.mxu1 }
 0x15a   : > { %v11591_v33 = vadd.f32 %v1036_v19, %v824_v34  ;;  %v10115_v23 = vpop.f32.mrf.mxu0  ;;  %10318 = vmatmul.mubr.msk.bf16.gmra.mxu0 %vm273_vm1, %v11305_v48 }
 0x15b   : > { %v10149_v24 = vpop.f32.mrf.mxu1  ;;  %10352 = vmatmul.mubr.msk.bf16.gmra.mxu1 %vm273_vm1, %v11303_v47  ;;  %10321 = vmatprep.mubr.msk.bf16.mxu0 %vm273_vm1, %v11309_v50 }
 0x15c   : > { %v11597_v35 = vadd.f32 %v10149_v24, %v10115_v23  ;;  %10355 = vmatprep.mubr.msk.bf16.mxu1 %vm273_vm1, %v11307_v49  ;;  %v837_v36 = vpop.f32.mrf.mxu0 }
 0x15d   : > { %v1049_v25 = vpop.f32.mrf.mxu1 }
 0x15e   : > { %v11603_v26 = vadd.f32 %v1049_v25, %v837_v36  ;;  %v10116_v37 = vpop.f32.mrf.mxu0 }
 0x15f   : > { %v10150_v38 = vpop.f32.mrf.mxu1 }
 0x160   : > { %v11605_v40 = vadd.f32 %v10150_v38, %v10116_v37  ;;  %v840_v48 = vpop.f32.mrf.mxu0 }
 0x161   : > { %v1052_v51 = vpop.f32.mrf.mxu1 }
 0x162   : > { %v11607_v52 = vadd.f32 %v1052_v51, %v840_v48  ;;  %v10119_v47 = vpop.f32.mrf.mxu0  ;;  %10322 = vmatmul.mubr.msk.bf16.gmra.mxu0 %vm273_vm1, %v11325_v62 }
 0x163   : > { %v10153_v12 = vpop.f32.mrf.mxu1  ;;  %10356 = vmatmul.mubr.msk.bf16.gmra.mxu1 %vm273_vm1, %v11323_v61  ;;  %10325 = vmatprep.mubr.msk.bf16.mxu0 %vm273_vm1, %v11329_v0 }
 0x164   : > { %v11613_v49 = vadd.f32 %v10153_v12, %v10119_v47  ;;  %10359 = vmatprep.mubr.msk.bf16.mxu1 %vm273_vm1, %v11327_v63  ;;  %v853_v50 = vpop.f32.mrf.mxu0 }
 0x165   : > { %v1065_v4 = vpop.f32.mrf.mxu1 }
 0x166   : > { %v11619_v13 = vadd.f32 %v1065_v4, %v853_v50  ;;  %v10120_v5 = vpop.f32.mrf.mxu0 }
 0x167   : > { %v10154_v59 = vpop.f32.mrf.mxu1 }
 0x168   : > { %v11621_v60 = vadd.f32 %v10154_v59, %v10120_v5  ;;  %v856_v62 = vpop.f32.mrf.mxu0 }
 0x169   : > { %v1068_v1 = vpop.f32.mrf.mxu1 }
 0x16a   : > { %v11623_v15 = vadd.f32 %v1068_v1, %v856_v62  ;;  %v10123_v61 = vpop.f32.mrf.mxu0  ;;  %10326 = vmatmul.mubr.msk.bf16.gmra.mxu0 %vm273_vm1, %v11341_v11 }
 0x16b   : > { %v10157_v18 = vpop.f32.mrf.mxu1  ;;  %10360 = vmatmul.mubr.msk.bf16.gmra.mxu1 %vm273_vm1, %v11339_v10  ;;  %10329 = vmatprep.mubr.msk.bf16.mxu0 %vm273_vm1, %v11345_v16 }
 0x16c   : > { %v11629_v63 = vadd.f32 %v10157_v18, %v10123_v61  ;;  %10363 = vmatprep.mubr.msk.bf16.mxu1 %vm273_vm1, %v11343_v14  ;;  %v869_v0 = vpop.f32.mrf.mxu0 }
 0x16d   : > { %v1081_v20 = vpop.f32.mrf.mxu1 }
 0x16e   : > { %v11635_v9 = vadd.f32 %v1081_v20, %v869_v0  ;;  %v10124_v34 = vpop.f32.mrf.mxu0  ;;  %v2367_v0 = vld [vmem:[#allocation2 + $0x2bf] sm:$0xff] }
 0x16f   : > { %v10158_v19 = vpop.f32.mrf.mxu1  ;;  %v2660_v20 = vld [vmem:[#allocation2 + $0x2b8] sm:$0xff] }
 0x170   : > { %v11637_v23 = vadd.f32 %v10158_v19, %v10124_v34  ;;  %v872_v11 = vpop.f32.mrf.mxu0  ;;  %v2661_v34 = vld [vmem:[#allocation2 + $0x2c0] sm:$0xff] }
 0x171   : > { %v1084_v24 = vpop.f32.mrf.mxu1 }
 0x172   : > { %v11639_v36 = vadd.f32 %v1084_v24, %v872_v11  ;;  %v10127_v10 = vpop.f32.mrf.mxu0  ;;  %10330 = vmatmul.mubr.msk.bf16.gmra.mxu0 %vm273_vm1, %v11357_v28 }
 0x173   : > { %v10161_v25 = vpop.f32.mrf.mxu1  ;;  %10364 = vmatmul.mubr.msk.bf16.gmra.mxu1 %vm273_vm1, %v11355_v27  ;;  %10333 = vmatprep.mubr.msk.bf16.mxu0 %vm273_vm1, %v11361_v30 }
 0x174   : > { %v11645_v14 = vadd.f32 %v10161_v25, %v10127_v10  ;;  %10367 = vmatprep.mubr.msk.bf16.mxu1 %vm273_vm1, %v11359_v29  ;;  %v885_v16 = vpop.f32.mrf.mxu0 }
 0x175   : > { %v1097_v37 = vpop.f32.mrf.mxu1 }
 0x176   : > { %v11651_v38 = vadd.f32 %v1097_v37, %v885_v16  ;;  %v10128_v48 = vpop.f32.mrf.mxu0 }
 0x177   : > { %v10162_v51 = vpop.f32.mrf.mxu1 }
 0x178   : > { %v11653_v47 = vadd.f32 %v10162_v51, %v10128_v48  ;;  %v11655_v28 = vpop.f32.mrf.mxu0 }
 0x179   : > { %v11657_v12 = vpop.f32.mrf.mxu1 }
 0x17a   : > { %v10131_v27 = vpop.f32.mrf.mxu0  ;;  %10334 = vmatmul.mubr.msk.bf16.gmra.mxu0 %vm273_vm1, %v11373_v44 }
 0x17b   : > { %v10165_v50 = vpop.f32.mrf.mxu1  ;;  %10368 = vmatmul.mubr.msk.bf16.gmra.mxu1 %vm273_vm1, %v11371_v43  ;;  %10337 = vmatprep.mubr.msk.bf16.mxu0 %vm273_vm1, %v11377_v46 }
 0x17c   : > { %v11663_v29 = vadd.f32 %v10165_v50, %v10131_v27  ;;  %10371 = vmatprep.mubr.msk.bf16.mxu1 %vm273_vm1, %v11375_v45  ;;  %v901_v30 = vpop.f32.mrf.mxu0  ;;  %v2366_v45 = vld [vmem:[#allocation2 + $0x2b7] sm:$0xff] }
 0x17d   : > { %v1113_v4 = vpop.f32.mrf.mxu1  ;;  %v2383_v25 = vpack.c.bf16 %v2367_v0, %v2366_v45 }
 0x17e   : > { %v11669_v5 = vadd.f32 %v1113_v4, %v901_v30  ;;  %v10132_v59 = vpop.f32.mrf.mxu0 }
 0x17f   : > { %v10166_v62 = vpop.f32.mrf.mxu1 }
 0x180   : > { %v11671_v1 = vadd.f32 %v10166_v62, %v10132_v59  ;;  %v11673_v44 = vpop.f32.mrf.mxu0 }
 0x181   : > { %v11675_v61 = vpop.f32.mrf.mxu1 }
 0x182   : > { %v10135_v43 = vpop.f32.mrf.mxu0  ;;  %10338 = vmatmul.mubr.msk.bf16.gmra.mxu0 %vm273_vm1, %v11389_v58 }
 0x183   : > { %v10169_v18 = vpop.f32.mrf.mxu1  ;;  %10372 = vmatmul.mubr.msk.bf16.gmra.mxu1 %vm273_vm1, %v11387_v57  ;;  %10341 = vmatprep.mubr.msk.bf16.mxu0 %vm273_vm1, %v11494_v39  ;;  %v2677_v57 = vpack.c.bf16 %v2661_v34, %v2660_v20 }
 0x184   : > { %v11681_v46 = vadd.f32 %v10169_v18, %v10135_v43  ;;  %10375 = vmatprep.mubr.msk.bf16.mxu1 %vm273_vm1, %v11564_v53  ;;  %v917_v19 = vpop.f32.mrf.mxu0 }
 0x185   : > { %v1129_v11 = vpop.f32.mrf.mxu1 }
 0x186   : > { %v11687_v24 = vadd.f32 %v1129_v11, %v917_v19  ;;  %v10136_v58 = vpop.f32.mrf.mxu0 }
 0x187   : > { %v10170_v10 = vpop.f32.mrf.mxu1 }
 0x188   : > { %v11689_v16 = vadd.f32 %v10170_v10, %v10136_v58  ;;  %v11691_v37 = vpop.f32.mrf.mxu0 }
 0x189   : > { %v11693_v48 = vpop.f32.mrf.mxu1 }
 0x18a   : > { %v10139_v39 = vpop.f32.mrf.mxu0  ;;  %10342 = vmatmul.mubr.msk.bf16.gmra.mxu0 %vm273_vm1, %v2383_v25 }
 0x18b   : > { %v10173_v51 = vpop.f32.mrf.mxu1  ;;  %10376 = vmatmul.mubr.msk.bf16.gmra.mxu1 %vm273_vm1, %v2677_v57  ;;  %10381 = vmatprep.mubr.msk.bf16.mxu0 %vm273_vm1, %v11402_v7 }
 0x18c   : > { %v11697_v53 = vadd.f32 %v10173_v51, %v10139_v39  ;;  %v933_v27 = vpop.f32.mrf.mxu0 }
 0x18d   : > { %v1145_v50 = vpop.f32.mrf.mxu1 }
 0x18e   : > { %v11701_v30 = vadd.f32 %v1145_v50, %v933_v27  ;;  %v10140_v4 = vpop.f32.mrf.mxu0 }
 0x18f   : > { %v10174_v59 = vpop.f32.mrf.mxu1 }
 0x190   : > { %v11703_v62 = vadd.f32 %v10174_v59, %v10140_v4  ;;  %v11705_v43 = vpop.f32.mrf.mxu0 }
 0x191   : > { %v11707_v18 = vpop.f32.mrf.mxu1 }
 0x192   : > { %v10179_v45 = vpop.f32.mrf.mxu0  ;;  %10382 = vmatmul.mubr.msk.bf16.vlgmr.msra.gmra.mxu0 %vm273_vm1, %v11428_v21 }
 0x193   : > { %v10213_v0 = vpop.f32.mrf.mxu1  ;;  %v1424_v20 = vadd.f32 %v10179_v45, %v11581_v2  ;;  %10385 = vmatprep.mubr.msk.bf16.mxu0 %vm273_vm1, %v11430_v22 }
 0x194   : > { %v1295_v7 = vpop.f32.mrf.mxu0 }
 0x195   : > { %v1589_v34 = vpop.f32.mrf.mxu1  ;;  %v11714_v19 = vadd.f32 %v10213_v0, %v1424_v20  ;;  %v1422_v11 = vadd.f32 %v1295_v7, %v11587_v8 }
 0x196   : > { %v10180_v58 = vpop.f32.mrf.mxu0 }
 0x197   : > { %v10214_v10 = vpop.f32.mrf.mxu1  ;;  %v11717_v25 = vadd.f32 %v1589_v34, %v1422_v11  ;;  %v1425_v57 = vadd.f32 %v10180_v58, %v11589_v17 }
 0x198   : > { %v1298_v39 = vpop.f32.mrf.mxu0 }
 0x199   : > { %v11720_v51 = vpop.f32.mrf.mxu1  ;;  %v11722_v21 = vadd.f32 %v10214_v10, %v1425_v57  ;;  %v11725_v2 = vadd.f32 %v1298_v39, %v11591_v33 }
 0x19a   : > { %v10183_v22 = vpop.f32.mrf.mxu0  ;;  %10386 = vmatmul.mubr.msk.bf16.gmra.mxu0 %vm273_vm1, %v11440_v31 }
 0x19b   : > { %v10217_v27 = vpop.f32.mrf.mxu1  ;;  %v1428_v8 = vadd.f32 %v10183_v22, %v11597_v35  ;;  %10389 = vmatprep.mubr.msk.bf16.mxu0 %vm273_vm1, %v11442_v32 }
 0x19c   : > { %v1311_v50 = vpop.f32.mrf.mxu0 }
 0x19d   : > { %v1605_v17 = vpop.f32.mrf.mxu1  ;;  %v11732_v4 = vadd.f32 %v10217_v27, %v1428_v8  ;;  %v1426_v59 = vadd.f32 %v1311_v50, %v11603_v26 }
 0x19e   : > { %v10184_v45 = vpop.f32.mrf.mxu0 }
 0x19f   : > { %v10218_v0 = vpop.f32.mrf.mxu1  ;;  %v11735_v33 = vadd.f32 %v1605_v17, %v1426_v59  ;;  %v1429_v20 = vadd.f32 %v10184_v45, %v11605_v40 }
 0x1a0   : > { %v1314_v7 = vpop.f32.mrf.mxu0 }
 0x1a1   : > { %v11738_v34 = vpop.f32.mrf.mxu1  ;;  %v11740_v31 = vadd.f32 %v10218_v0, %v1429_v20  ;;  %v11743_v35 = vadd.f32 %v1314_v7, %v11607_v52 }
 0x1a2   : > { %v10187_v32 = vpop.f32.mrf.mxu0  ;;  %10390 = vmatmul.mubr.msk.bf16.gmra.mxu0 %vm273_vm1, %v11452_v41 }
 0x1a3   : > { %v10221_v11 = vpop.f32.mrf.mxu1  ;;  %v1432_v26 = vadd.f32 %v10187_v32, %v11613_v49  ;;  %10393 = vmatprep.mubr.msk.bf16.mxu0 %vm273_vm1, %v11454_v42 }
 0x1a4   : > { %v1327_v58 = vpop.f32.mrf.mxu0 }
 0x1a5   : > { %v1621_v40 = vpop.f32.mrf.mxu1  ;;  %v11750_v10 = vadd.f32 %v10221_v11, %v1432_v26  ;;  %v1430_v57 = vadd.f32 %v1327_v58, %v11619_v13 }
 0x1a6   : > { %v10188_v39 = vpop.f32.mrf.mxu0 }
 0x1a7   : > { %v10222_v22 = vpop.f32.mrf.mxu1  ;;  %v11753_v52 = vadd.f32 %v1621_v40, %v1430_v57  ;;  %v1433_v27 = vadd.f32 %v10188_v39, %v11621_v60 }
 0x1a8   : > { %v1330_v8 = vpop.f32.mrf.mxu0 }
 0x1a9   : > { %v11756_v50 = vpop.f32.mrf.mxu1  ;;  %v11758_v41 = vadd.f32 %v10222_v22, %v1433_v27  ;;  %v11761_v49 = vadd.f32 %v1330_v8, %v11623_v15  ;;  %v10865_v15 = vld [vmem:[%s14553_s4 + $0x78] sm:$0xff]   ;;  %v2947_v8 = vld [vmem:[#allocation2 + $0x221] sm:$0xff] }
 0x1aa   : > { %v10191_v42 = vpop.f32.mrf.mxu0  ;;  %10394 = vmatmul.mubr.msk.bf16.gmra.mxu0 %vm273_vm1, %v11464_v55  ;;  %10413 = vmatprep.subr.bf16.mxu1 %v10865_v15  ;;  %v2946_v27 = vld [vmem:[#allocation2 + $0x219] sm:$0xff] }
 0x1ab   : > { %v10225_v17 = vpop.f32.mrf.mxu1  ;;  %v1436_v13 = vadd.f32 %v10191_v42, %v11629_v63  ;;  %10397 = vmatprep.mubr.msk.bf16.mxu0 %vm273_vm1, %v11466_v56  ;;  %10414 = vmatpush3.bf16.msra.mxu1 %v10865_v15 }
 0x1ac   : > { %v1343_v59 = vpop.f32.mrf.mxu0 }
 0x1ad   : > { %v1637_v60 = vpop.f32.mrf.mxu1  ;;  %v11768_v45 = vadd.f32 %v10225_v17, %v1436_v13  ;;  %v1434_v0 = vadd.f32 %v1343_v59, %v11635_v9  ;;  %v2949_v13 = vld [vmem:[#allocation2 + $0x249] sm:$0xff] }
 0x1ae   : > { %v10192_v20 = vpop.f32.mrf.mxu0 }
 0x1af   : > { %v10226_v7 = vpop.f32.mrf.mxu1  ;;  %v11774_v32 = vadd.f32 %v1637_v60, %v1434_v0  ;;  %v1437_v55 = vadd.f32 %v10192_v20, %v11637_v23 }
 0x1b0   : > { %v1346_v63 = vpop.f32.mrf.mxu0 }
 0x1b1   : > { %v11777_v11 = vpop.f32.mrf.mxu1  ;;  %v11779_v56 = vadd.f32 %v10226_v7, %v1437_v55  ;;  %v11782_v26 = vadd.f32 %v1346_v63, %v11639_v36  ;;  %v10866_v36 = vld [vmem:[%s14553_s4 + $0x70] sm:$0xff]  }
 0x1b2   : > { %v10195_v9 = vpop.f32.mrf.mxu0  ;;  %10398 = vmatmul.mubr.msk.bf16.gmra.mxu0 %vm273_vm1, %v11476_v3  ;;  %v2948_v3 = vld [vmem:[#allocation2 + $0x241] sm:$0xff]  ;;  %10415 = vmatprep.subr.bf16.mxu1 %v10866_v36 }
 0x1b3   : > { %v10229_v58 = vpop.f32.mrf.mxu1  ;;  %v1440_v40 = vadd.f32 %v10195_v9, %v11645_v14  ;;  %10401 = vmatprep.mubr.msk.bf16.mxu0 %vm273_vm1, %v11478_v6  ;;  %10416 = vmatpush3.bf16.msra.mxu1 %v10866_v36  ;;  %v2968_v15 = vpack.c.bf16 %v2949_v13, %v2948_v3 }
 0x1b4   : > { %v1359_v23 = vpop.f32.mrf.mxu0 }
 0x1b5   : > { %v1653_v57 = vpop.f32.mrf.mxu1  ;;  %v11789_v39 = vadd.f32 %v10229_v58, %v1440_v40  ;;  %v1438_v22 = vadd.f32 %v1359_v23, %v11651_v38  ;;  %v2967_v38 = vpack.c.bf16 %v2947_v8, %v2946_v27  ;;  %v2950_v40 = vld [vmem:[#allocation2 + $0x269] sm:$0xff]  ;;  %v2951_v23 = vld [vmem:[#allocation2 + $0x271] sm:$0xff] }
 0x1b6   : > { %v10196_v42 = vpop.f32.mrf.mxu0 }
 0x1b7   : > { %v10230_v17 = vpop.f32.mrf.mxu1  ;;  %v11795_v14 = vadd.f32 %v1653_v57, %v1438_v22  ;;  %v1441_v6 = vadd.f32 %v10196_v42, %v11653_v47  ;;  %v10867_v57 = vld [vmem:[%s14553_s4 + $0x68] sm:$0xff]  }
 0x1b8   : > { %v11798_v59 = vpop.f32.mrf.mxu0  ;;  %10417 = vmatprep.subr.bf16.mxu1 %v10867_v57 }
 0x1b9   : > { %v11800_v60 = vpop.f32.mrf.mxu1  ;;  %v11802_v0 = vadd.f32 %v10230_v17, %v1441_v6  ;;  %v2969_v17 = vpack.c.bf16 %v2951_v23, %v2950_v40  ;;  %10418 = vmatpush3.bf16.msra.mxu1 %v10867_v57 }
 0x1ba   : > { %v10199_v20 = vpop.f32.mrf.mxu0  ;;  %10402 = vmatmul.mubr.msk.bf16.gmra.mxu0 %vm273_vm1, %v2967_v38  ;;  %v2954_v38 = vld [vmem:[#allocation2 + $0x2b9] sm:$0xff] }
 0x1bb   : > { %v10233_v7 = vpop.f32.mrf.mxu1  ;;  %v1444_v55 = vadd.f32 %v10199_v20, %v11663_v29  ;;  %10405 = vmatprep.mubr.msk.bf16.mxu0 %vm273_vm1, %v2968_v15 }
 0x1bc   : > { %v1375_v63 = vpop.f32.mrf.mxu0 }
 0x1bd   : > { %v1669_v47 = vpop.f32.mrf.mxu1  ;;  %v11807_v9 = vadd.f32 %v10233_v7, %v1444_v55  ;;  %v1442_v58 = vadd.f32 %v1375_v63, %v11669_v5  ;;  %v10868_v63 = vld [vmem:[%s14553_s4 + $0x60] sm:$0xff]  }
 0x1be   : > { %v10200_v22 = vpop.f32.mrf.mxu0  ;;  %10419 = vmatprep.subr.bf16.mxu1 %v10868_v63 }
 0x1bf   : > { %v10234_v27 = vpop.f32.mrf.mxu1  ;;  %v11813_v8 = vadd.f32 %v1669_v47, %v1442_v58  ;;  %v1445_v29 = vadd.f32 %v10200_v22, %v11671_v1  ;;  %v2955_v1 = vld [vmem:[#allocation2 + $0x2c1] sm:$0xff]  ;;  %10420 = vmatpush3.bf16.msra.mxu1 %v10868_v63 }
 0x1c0   : > { %v11816_v36 = vpop.f32.mrf.mxu0  ;;  %v2971_v40 = vpack.c.bf16 %v2955_v1, %v2954_v38 }
 0x1c1   : > { %v11818_v42 = vpop.f32.mrf.mxu1  ;;  %v11820_v5 = vadd.f32 %v10234_v27, %v1445_v29 }
 0x1c2   : > { %v10203_v3 = vpop.f32.mrf.mxu0  ;;  %10406 = vmatmul.mubr.msk.bf16.gmra.mxu0 %vm273_vm1, %v2969_v17  ;;  %v10869_v17 = vld [vmem:[%s14553_s4 + $0x58] sm:$0xff]  }
 0x1c3   : > { %v10237_v13 = vpop.f32.mrf.mxu1  ;;  %v1448_v6 = vadd.f32 %v10203_v3, %v11681_v46  ;;  %10409 = vmatprep.mubr.msk.bf16.mxu0 %vm273_vm1, %v11566_v54  ;;  %10421 = vmatprep.subr.bf16.mxu1 %v10869_v17 }
 0x1c4   : > { %v1391_v15 = vpop.f32.mrf.mxu0  ;;  %10422 = vmatpush3.bf16.msra.mxu1 %v10869_v17 }
 0x1c5   : > { %v1685_v20 = vpop.f32.mrf.mxu1  ;;  %v11826_v7 = vadd.f32 %v10237_v13, %v1448_v6  ;;  %v1446_v55 = vadd.f32 %v1391_v15, %v11687_v24 }
 0x1c6   : > { %v10204_v47 = vpop.f32.mrf.mxu0 }
 0x1c7   : > { %v10238_v58 = vpop.f32.mrf.mxu1  ;;  %v11832_v23 = vadd.f32 %v1685_v20, %v1446_v55  ;;  %v1449_v46 = vadd.f32 %v10204_v47, %v11689_v16 }
 0x1c8   : > { %v11835_v54 = vpop.f32.mrf.mxu0 }
 0x1c9   : > { %v11837_v57 = vpop.f32.mrf.mxu1  ;;  %v11839_v22 = vadd.f32 %v10238_v58, %v1449_v46 }
 0x1ca   : > { %v10207_v24 = vpop.f32.mrf.mxu0  ;;  %10410 = vmatmul.mubr.msk.bf16.gmra.mxu0 %vm273_vm1, %v2971_v40 }
 0x1cb   : > { %v10241_v27 = vpop.f32.mrf.mxu1  ;;  %v1452_v29 = vadd.f32 %v10207_v24, %v11697_v53 }
 0x1cc   : > { %v1407_v3 = vpop.f32.mrf.mxu0 }
 0x1cd   : > { %v1701_v16 = vpop.f32.mrf.mxu1  ;;  %v11846_v13 = vadd.f32 %v10241_v27, %v1452_v29  ;;  %v1450_v6 = vadd.f32 %v1407_v3, %v11701_v30  ;;  %v10871_v30 = vld [vmem:[%s14553_s4 + $0x38] sm:$0xff]  }
 0x1ce   : > { %v10208_v38 = vpop.f32.mrf.mxu0  ;;  %10461 = vmatprep.subr.bf16.mxu0 %v10871_v30 }
 0x1cf   : > { %v10242_v1 = vpop.f32.mrf.mxu1  ;;  %v11849_v15 = vadd.f32 %v1701_v16, %v1450_v6  ;;  %v1453_v20 = vadd.f32 %v10208_v38, %v11703_v62  ;;  %10462 = vmatpush3.bf16.msra.mxu0 %v10871_v30  ;;  %v10872_v16 = vld [vmem:[%s14553_s4 + $0x30] sm:$0xff]  }
 0x1d0   : > { %v11852_v55 = vpop.f32.mrf.mxu0  ;;  %10463 = vmatprep.subr.bf16.mxu0 %v10872_v16 }
 0x1d1   : > { %v11854_v53 = vpop.f32.mrf.mxu1  ;;  %v11856_v63 = vadd.f32 %v10242_v1, %v1453_v20  ;;  %v10874_v20 = vld [vmem:[%s14553_s4 + $0x28] sm:$0xff]  }
 0x1d2   : > { %14566 = vst [vmem:[#allocation4_spill] sm:$0xff] %v11854_v53  ;;  %v10247_v47 = vpop.f32.mrf.mxu0 }
 0x1d3   : > { %v10281_v58 = vpop.f32.mrf.mxu1  ;;  %v2012_v40 = vadd.f32 %v10247_v47, %v11714_v19  ;;  %v10870_v19 = vld [vmem:[%s14553_s4 + $0x50] sm:$0xff]   ;;  %10464 = vmatpush3.bf16.msra.mxu0 %v10872_v16 }
 0x1d4   : > { %v1883_v46 = vpop.f32.mrf.mxu0  ;;  %10423 = vmatprep.subr.bf16.mxu1 %v10870_v19  ;;  %10465 = vmatprep.subr.bf16.mxu0 %v10874_v20 }
 0x1d5   : > { %v11862_v24 = vpop.f32.mrf.mxu1  ;;  %v11864_v27 = vadd.f32 %v10281_v58, %v2012_v40  ;;  %v11867_v62 = vadd.f32 %v1883_v46, %v11717_v25  ;;  %10424 = vmatpush3.bf16.msra.mxu1 %v10870_v19 }
 0x1d6   : > { %14567 = vst [vmem:[#allocation5_spill] sm:$0xff] %v11862_v24  ;;  %v10248_v29 = vpop.f32.mrf.mxu0 }
 0x1d7   : > { %14568 = vst [vmem:[#allocation6_spill] sm:$0xff] %v11867_v62  ;;  %v11869_v17 = vpop.f32.mrf.mxu1  ;;  %v11872_v3 = vadd.f32 %v10248_v29, %v11722_v21  ;;  %10466 = vmatpush3.bf16.msra.mxu0 %v10874_v20  ;;  %v340_v20 = vld [vmem:[#allocation3 + $0x18] sm:$0x8] }
 0x1d8   : > { %14569 = vst [vmem:[#allocation7_spill] sm:$0xff] %v11869_v17  ;;  %v11880_v6 = vpop.f32.mrf.mxu0 }
 0x1d9   : > { %14570 = vst [vmem:[#allocation8_spill] sm:$0xff] %v11872_v3  ;;  %v11882_v25 = vpop.f32.mrf.mxu1 }
 0x1da   : > { %14571 = vst [vmem:[#allocation9_spill] sm:$0xff] %v11882_v25  ;;  %v10251_v38 = vpop.f32.mrf.mxu0 }
 0x1db   : > { %v10285_v1 = vpop.f32.mrf.mxu1  ;;  %v2016_v21 = vadd.f32 %v10251_v38, %v11732_v4  ;;  %v10875_v4 = vld [vmem:[%s14553_s4 + $0x20] sm:$0xff]  }
 0x1dc   : > { %v1899_v47 = vpop.f32.mrf.mxu0  ;;  %10467 = vmatprep.subr.bf16.mxu0 %v10875_v4 }
 0x1dd   : > { %v11888_v58 = vpop.f32.mrf.mxu1  ;;  %v11890_v40 = vadd.f32 %v10285_v1, %v2016_v21  ;;  %v11893_v30 = vadd.f32 %v1899_v47, %v11735_v33  ;;  %v10873_v33 = vld [vmem:[%s14553_s4 + $0x48] sm:$0xff]   ;;  %10468 = vmatpush3.bf16.msra.mxu0 %v10875_v4  ;;  %v341_v4 = vsel %vm11910_vm8, 0, %v340_v20 }
 0x1de   : > { %14572 = vst [vmem:[#allocation10_spill] sm:$0xff] %v11888_v58  ;;  %v10252_v46 = vpop.f32.mrf.mxu0  ;;  %10425 = vmatprep.subr.bf16.mxu1 %v10873_v33  ;;  %342 = vst [vmem:[#allocation3 + $0x18] sm:$0x8] %v341_v4  ;;  %v343_v58 = vld [vmem:[#allocation3 + $0x2c] sm:$0x8] }
 0x1df   : > { %14573 = vst [vmem:[#allocation11_spill] sm:$0xff] %v11893_v30  ;;  %v11895_v29 = vpop.f32.mrf.mxu1  ;;  %v11898_v19 = vadd.f32 %v10252_v46, %v11740_v31  ;;  %v14577_v31 = vmov 0  ;;  %v10877_v46 = vld [vmem:[%s14553_s4 + $0x18] sm:$0xff]   ;;  %10426 = vmatpush3.bf16.msra.mxu1 %v10873_v33  ;;  %v319_v30 = vld [vmem:[#allocation3 + $0x4] sm:$0x8]  ;;  %v344_v25 = vsel %vm11910_vm8, 0, %v343_v58 }
 0x1e0   : > { %14574 = vst [vmem:[#allocation12_spill] sm:$0xff] %v11895_v29  ;;  %v11903_v16 = vpop.f32.mrf.mxu0  ;;  %v14578_v31 = vsel %vm11910_vm8, 4294967295, %v14577_v31  ;;  %10469 = vmatprep.subr.bf16.mxu0 %v10877_v46  ;;  %v320_v20 = vsel %vm11910_vm8, 0, %v319_v30  ;;  %345 = vst [vmem:[#allocation3 + $0x2c] sm:$0x8] %v344_v25  ;;  %v10876_v58 = vld [vmem:[%s14553_s4 + $0x40] sm:$0xff]  }
 0x1e1   : > { %14575 = vst [vmem:[#allocation13_spill] sm:$0xff] %v11898_v19  ;;  %v11905_v38 = vpop.f32.mrf.mxu1  ;;  %14579 = vst [vmem:[#allocation15_spill] sm:$0xff] %v14578_v31  ;;  %10470 = vmatpush3.bf16.msra.mxu0 %v10877_v46  ;;  %10427 = vmatprep.subr.bf16.mxu1 %v10876_v58 }
 0x1e2   : > { %14576 = vst [vmem:[#allocation14_spill] sm:$0xff] %v11905_v38  ;;  %v10255_v1 = vpop.f32.mrf.mxu0  ;;  %v11011_v38 = vmov 0   ;;  %321 = vst [vmem:[#allocation3 + $0x4] sm:$0x8] %v320_v20  ;;  %v10880_v20 = vld [vmem:[%s14553_s4 + $0x8] sm:$0xff]  }
 0x1e3   : > { %v10289_v21 = vpop.f32.mrf.mxu1  ;;  %v2020_v47 = vadd.f32 %v10255_v1, %v11750_v10  ;;  %322 = vst [vmem:[#allocation3 + $0x8] sm:$0xf] %v11011_v38  ;;  %323 = vst [vmem:[#allocation3 + $0xc] sm:$0xf] %v11011_v38  ;;  %10428 = vmatpush3.bf16.msra.mxu1 %v10876_v58 }
 0x1e4   : > { %334 = vst [vmem:[#allocation3 + $0x15c] sm:$0xf] %v11011_v38  ;;  %335 = vst [vmem:[#allocation3 + $0x160] sm:$0xf] %v11011_v38  ;;  %v1915_v29 = vpop.f32.mrf.mxu0 }
 0x1e5   : > { %v11920_v19 = vpop.f32.mrf.mxu1  ;;  %v11922_v10 = vadd.f32 %v10289_v21, %v2020_v47  ;;  %v11925_v1 = vadd.f32 %v1915_v29, %v11753_v52  ;;  %v10878_v52 = vld [vmem:[%s14553_s4 + $0x10] sm:$0xff]  }
 0x1e6   : > { %14580 = vst [vmem:[#allocation16_spill] sm:$0xff] %v11920_v19  ;;  %v10256_v38 = vpop.f32.mrf.mxu0  ;;  %10471 = vmatprep.subr.bf16.mxu0 %v10878_v52 }
 0x1e7   : > { %14581 = vst [vmem:[#allocation17_spill] sm:$0xff] %v11925_v1  ;;  %v11929_v17 = vpop.f32.mrf.mxu1  ;;  %v11934_v33 = vadd.f32 %v10256_v38, %v11758_v41  ;;  %10472 = vmatpush3.bf16.msra.mxu0 %v10878_v52 }
 0x1e8   : > { %14582 = vst [vmem:[#allocation18_spill] sm:$0xff] %v11929_v17  ;;  %v11939_v29 = vpop.f32.mrf.mxu0  ;;  %10473 = vmatprep.subr.bf16.mxu0 %v10880_v20 }
 0x1e9   : > { %14583 = vst [vmem:[#allocation19_spill] sm:$0xff] %v11934_v33  ;;  %v11941_v21 = vpop.f32.mrf.mxu1  ;;  %v3449_v62 = vld [vmem:[#allocation3 + $0x4] sm:$0x8] }
 0x1ea   : > { %14584 = vst [vmem:[#allocation20_spill] sm:$0xff] %v11941_v21  ;;  %v10259_v47 = vpop.f32.mrf.mxu0  ;;  %v3450_v41 = vld [vmem:[#allocation3 + $0x8] sm:$0xf]  ;;  %v3451_v25 = vld [vmem:[#allocation3 + $0xc] sm:$0xf] }
 0x1eb   : > { %v10293_v30 = vpop.f32.mrf.mxu1  ;;  %v2024_v46 = vadd.f32 %v10259_v47, %v11768_v45  ;;  %v3505_v4 = vshrl.u32 %v3450_v41, 16  ;;  %v3514_v38 = vshrl.u32 %v3451_v25, 16  ;;  %v9292_v33 = vcombine.low %v3450_v41, %v3451_v25  ;;  %10474 = vmatpush3.bf16.msra.mxu0 %v10880_v20 }
 0x1ec   : > { %v1931_v21 = vpop.f32.mrf.mxu0  ;;  %v3508_v3 = vshll.u32 %v3450_v41, 16  ;;  %v3517_v24 = vshll.u32 %v3451_v25, 16  ;;  %v349_v41 = vld [vmem:[#allocation3 + $0x54] sm:$0x8]  ;;  %v14588_v20 = vmov 0 }
 0x1ed   : > { %v11950_v17 = vpop.f32.mrf.mxu1  ;;  %v11952_v19 = vadd.f32 %v10293_v30, %v2024_v46  ;;  %v11955_v1 = vadd.f32 %v1931_v21, %v11774_v32  ;;  %v3507_v52 = vrot.slane %v3505_v4, 7  ;;  %v3516_v47 = vrot.slane %v3514_v38, 7  ;;  %10429 = vmatprep.mubr.bf16.mxu1 %v9292_v33  ;;  %v346_v46 = vld [vmem:[#allocation3 + $0x40] sm:$0x8]  ;;  %v10881_v33 = vld [vmem:[%s14553_s4 + $0xb8] sm:$0xff]  }
 0x1ee   : > { %14585 = vst [vmem:[#allocation21_spill] sm:$0xff] %v11950_v17  ;;  %v10260_v45 = vpop.f32.mrf.mxu0  ;;  %v3500_v30 = vshrl.u32 %v3449_v62, 16  ;;  %v347_v21 = vsel %vm11910_vm8, 0, %v346_v46  ;;  %v14589_v20 = vsel %vm11976_vm11, 4294967295, %v14588_v20  ;;  %10509 = vmatprep.subr.bf16.mxu1 %v10881_v33 }
 0x1ef   : > { %v11957_v58 = vpop.f32.mrf.mxu1  ;;  %v11960_v53 = vadd.f32 %v10260_v45, %v11779_v56  ;;  %v10884_v56 = vld [vmem:[%s14553_s4] sm:$0xff]   ;;  %v3510_v62 = vor.u32 %v3508_v3, %v3507_v52  ;;  %348 = vst [vmem:[#allocation3 + $0x40] sm:$0x8] %v347_v21  ;;  %14590 = vst [vmem:[#allocation24_spill] sm:$0xff] %v14589_v20  ;;  %v3512_v45 = vrot.slane %v3507_v52, 4  ;;  %v3519_v46 = vor.u32 %v3517_v24, %v3516_v47 }
 0x1f0   : > { %14586 = vst [vmem:[#allocation22_spill] sm:$0xff] %v11957_v58  ;;  %v11962_v17 = vpop.f32.mrf.mxu0  ;;  %v9260_v25 = vrot.slane %v3500_v30, 11  ;;  %10475 = vmatprep.subr.bf16.mxu0 %v10884_v56 }
 0x1f1   : > { %v11964_v32 = vpop.f32.mrf.mxu1  ;;  %10476 = vmatpush3.bf16.msra.mxu0 %v10884_v56  ;;  %v3520_v52 = vsel %vm11976_vm11, %v3512_v45, %v3519_v46 }
 0x1f2   : > { %14587 = vst [vmem:[#allocation23_spill] sm:$0xff] %v11964_v32  ;;  %v10263_v4 = vpop.f32.mrf.mxu0  ;;  %v350_v32 = vsel %vm11910_vm8, 0, %v349_v41  ;;  %v3511_v3 = vsel %vm11976_vm11, %v9260_v25, %v3510_v62  ;;  %v14591_v41 = vmov 0 }
 0x1f3   : > { %v10297_v38 = vpop.f32.mrf.mxu1  ;;  %v2028_v58 = vadd.f32 %v10263_v4, %v11789_v39  ;;  %351 = vst [vmem:[#allocation3 + $0x54] sm:$0x8] %v350_v32  ;;  %v9316_v39 = vcombine.low %v3511_v3, %v3520_v52  ;;  %v14592_v41 = vsel %vm11995_vm13, 4294967295, %v14591_v41  ;;  %v388_v32 = vld [vmem:[#allocation3 + $0x24] sm:$0x1] }
 0x1f4   : > { %v1947_v30 = vpop.f32.mrf.mxu0  ;;  %14593 = vst [vmem:[#allocation25_spill] sm:$0xff] %v14592_v41  ;;  %v389_v56 = vsel %vm11995_vm13, 0, %v388_v32  ;;  %v352_v4 = vld [vmem:[#allocation3 + $0x68] sm:$0x8] }
 0x1f5   : > { %v11985_v21 = vpop.f32.mrf.mxu1  ;;  %v11989_v24 = vadd.f32 %v10297_v38, %v2028_v58  ;;  %v11992_v47 = vadd.f32 %v1947_v30, %v11795_v14  ;;  %10477 = vmatprep.mubr.bf16.mxu0 %v9316_v39  ;;  %390 = vst [vmem:[#allocation3 + $0x24] sm:$0x1] %v389_v56  ;;  %v353_v46 = vsel %vm11910_vm8, 0, %v352_v4  ;;  %v355_v30 = vld [vmem:[#allocation3 + $0x7c] sm:$0x8] }
 0x1f6   : > { %v10264_v33 = vpop.f32.mrf.mxu0  ;;  %354 = vst [vmem:[#allocation3 + $0x68] sm:$0x8] %v353_v46 }
 0x1f7   : > { %v11999_v25 = vpop.f32.mrf.mxu1  ;;  %v12004_v62 = vadd.f32 %v10264_v33, %v11802_v0  ;;  %v356_v0 = vsel %vm11910_vm8, 0, %v355_v30 }
 0x1f8   : > { %v12006_v14 = vpop.f32.mrf.mxu0  ;;  %357 = vst [vmem:[#allocation3 + $0x7c] sm:$0x8] %v356_v0 }
 0x1f9   : > { %v12008_v58 = vpop.f32.mrf.mxu1 }
 0x1fa   : > { %14594 = vst [vmem:[#allocation26_spill] sm:$0xff] %v12008_v58  ;;  %v10267_v38 = vpop.f32.mrf.mxu0 }
 0x1fb   : > { %v10301_v45 = vpop.f32.mrf.mxu1  ;;  %v2032_v3 = vadd.f32 %v10267_v38, %v11807_v9 }
 0x1fc   : > { %v1963_v52 = vpop.f32.mrf.mxu0 }
 0x1fd   : > { %v12013_v32 = vpop.f32.mrf.mxu1  ;;  %v12017_v39 = vadd.f32 %v10301_v45, %v2032_v3  ;;  %v12020_v33 = vadd.f32 %v1963_v52, %v11813_v8  ;;  %v358_v45 = vld [vmem:[#allocation3 + $0x90] sm:$0x8] }
 0x1fe   : > { %14595 = vst [vmem:[#allocation27_spill] sm:$0xff] %v12013_v32  ;;  %v10268_v56 = vpop.f32.mrf.mxu0  ;;  %v359_v8 = vsel %vm11910_vm8, 0, %v358_v45 }
 0x1ff   : > { %14596 = vst [vmem:[#allocation28_spill] sm:$0xff] %v12020_v33  ;;  %v12022_v20 = vpop.f32.mrf.mxu1  ;;  %v12025_v4 = vadd.f32 %v10268_v56, %v11820_v5  ;;  %360 = vst [vmem:[#allocation3 + $0x90] sm:$0x8] %v359_v8  ;;  %v361_v5 = vld [vmem:[#allocation3 + $0xa4] sm:$0x8] }
 0x200   : > { %14597 = vst [vmem:[#allocation29_spill] sm:$0xff] %v12022_v20  ;;  %v12027_v9 = vpop.f32.mrf.mxu0 }
 0x201   : > { %14598 = vst [vmem:[#allocation30_spill] sm:$0xff] %v12025_v4  ;;  %v12029_v38 = vpop.f32.mrf.mxu1 }
 0x202   : > { %14599 = vst [vmem:[#allocation31_spill] sm:$0xff] %v12029_v38  ;;  %v10271_v46 = vpop.f32.mrf.mxu0  ;;  %v362_v38 = vsel %vm11910_vm8, 0, %v361_v5 }
 0x203   : > { %v10305_v32 = vpop.f32.mrf.mxu1  ;;  %v2036_v30 = vadd.f32 %v10271_v46, %v11826_v7  ;;  %363 = vst [vmem:[#allocation3 + $0xa4] sm:$0x8] %v362_v38 }
 0x204   : > { %v1979_v3 = vpop.f32.mrf.mxu0 }
 0x205   : > { %v2273_v58 = vpop.f32.mrf.mxu1  ;;  %v12034_v52 = vadd.f32 %v10305_v32, %v2036_v30  ;;  %v2034_v0 = vadd.f32 %v1979_v3, %v11832_v23 }
 0x206   : > { %v10272_v56 = vpop.f32.mrf.mxu0 }
 0x207   : > { %14600 = vst [vmem:[#allocation32_spill] sm:$0xff] %v12034_v52  ;;  %v10306_v20 = vpop.f32.mrf.mxu1  ;;  %v12039_v4 = vadd.f32 %v2273_v58, %v2034_v0  ;;  %v2037_v7 = vadd.f32 %v10272_v56, %v11839_v22  ;;  %v364_v22 = vld [vmem:[#allocation3 + $0xb8] sm:$0x8] }
 0x208   : > { %v12042_v46 = vpop.f32.mrf.mxu0 }
 0x209   : > { %14601 = vst [vmem:[#allocation33_spill] sm:$0xff] %v12039_v4  ;;  %v12044_v33 = vpop.f32.mrf.mxu1  ;;  %v12046_v32 = vadd.f32 %v10306_v20, %v2037_v7  ;;  %v367_v7 = vld [vmem:[#allocation3 + $0xcc] sm:$0x8] }
 0x20a   : > { %v10275_v30 = vpop.f32.mrf.mxu0 }
 0x20b   : > { %14602 = vst [vmem:[#allocation34_spill] sm:$0xff] %v12046_v32  ;;  %v10309_v23 = vpop.f32.mrf.mxu1  ;;  %v2040_v45 = vadd.f32 %v10275_v30, %v11846_v13  ;;  %v365_v13 = vsel %vm11910_vm8, 0, %v364_v22 }
 0x20c   : > { %v1995_v3 = vpop.f32.mrf.mxu0  ;;  %366 = vst [vmem:[#allocation3 + $0xb8] sm:$0x8] %v365_v13 }
 0x20d   : > { %v2289_v8 = vpop.f32.mrf.mxu1  ;;  %v12049_v52 = vadd.f32 %v10309_v23, %v2040_v45  ;;  %v2038_v58 = vadd.f32 %v1995_v3, %v11849_v15  ;;  %v368_v15 = vsel %vm11910_vm8, 0, %v367_v7  ;;  %v373_v7 = vld [vmem:[#allocation3 + $0xf4] sm:$0x8] }
 0x20e   : > { %v10276_v0 = vpop.f32.mrf.mxu0  ;;  %369 = vst [vmem:[#allocation3 + $0xcc] sm:$0x8] %v368_v15 }
 0x20f   : > { %14603 = vst [vmem:[#allocation35_spill] sm:$0xff] %v12049_v52  ;;  %v10310_v5 = vpop.f32.mrf.mxu1  ;;  %v12052_v38 = vadd.f32 %v2289_v8, %v2038_v58  ;;  %v2041_v56 = vadd.f32 %v10276_v0, %v11856_v63 }
 0x210   : > { %v12055_v4 = vpop.f32.mrf.mxu0 }
 0x211   : > { %14604 = vst [vmem:[#allocation36_spill] sm:$0xff] %v12052_v38  ;;  %v12057_v20 = vpop.f32.mrf.mxu1  ;;  %v12061_v30 = vadd.f32 %v10310_v5, %v2041_v56  ;;  %v370_v5 = vld [vmem:[#allocation3 + $0xe0] sm:$0x8] }
 0x212   : > { %v10315_v23 = vpop.f32.mrf.mxu0  ;;  %v371_v13 = vsel %vm11910_vm8, 0, %v370_v5  ;;  %v12102_v5 = vld [vmem:[%s14553_s4 + $0xf8] sm:$0xff]  }
 0x213   : > { %14605 = vst [vmem:[#allocation37_spill] sm:$0xff] %v12061_v30  ;;  %v12065_v45 = vpop.f32.mrf.mxu1  ;;  %v12068_v63 = vadd.f32 %v10315_v23, %v11864_v27  ;;  %372 = vst [vmem:[#allocation3 + $0xe0] sm:$0x8] %v371_v13  ;;  %v374_v23 = vsel %vm11910_vm8, 0, %v373_v7  ;;  %v376_v13 = vld [vmem:[#allocation3 + $0x108] sm:$0x8]  ;;  %10557 = vmatprep.subr.bf16.mxu0 %v12102_v5 }
 0x214   : > { %v12070_v3 = vpop.f32.mrf.mxu0  ;;  %375 = vst [vmem:[#allocation3 + $0xf4] sm:$0x8] %v374_v23  ;;  %14613 = vst [vmem:[#allocation45_spill] sm:$0xff] %v12102_v5 }
 0x215   : > { %v12072_v8 = vpop.f32.mrf.mxu1 }
 0x216   : > { %v12074_v58 = vpop.f32.mrf.mxu0 }
 0x217   : > { %v12076_v0 = vpop.f32.mrf.mxu1 }
 0x218   : > { %v12078_v22 = vpop.f32.mrf.mxu0 }
 0x219   : > { %v12080_v56 = vpop.f32.mrf.mxu1 }
 0x21a   : > { %14606 = vst [vmem:[#allocation38_spill] sm:$0xff] %v12080_v56  ;;  %v10319_v27 = vpop.f32.mrf.mxu0 }
 0x21b   : > { %v12084_v15 = vpop.f32.mrf.mxu1  ;;  %v12089_v30 = vadd.f32 %v10319_v27, %v11890_v40  ;;  %v377_v40 = vsel %vm11910_vm8, 0, %v376_v13  ;;  %v379_v27 = vld [vmem:[#allocation3 + $0x11c] sm:$0x8] }
 0x21c   : > { %14607 = vst [vmem:[#allocation39_spill] sm:$0xff] %v12084_v15  ;;  %v12091_v38 = vpop.f32.mrf.mxu0  ;;  %378 = vst [vmem:[#allocation3 + $0x108] sm:$0x8] %v377_v40  ;;  %v382_v40 = vld [vmem:[#allocation3 + $0x130] sm:$0x8] }
 0x21d   : > { %14608 = vst [vmem:[#allocation40_spill] sm:$0xff] %v12089_v30  ;;  %14609 = vst [vmem:[#allocation41_spill] sm:$0xff] %v12091_v38  ;;  %v12093_v52 = vpop.f32.mrf.mxu1 }
 0x21e   : > { %14610 = vst [vmem:[#allocation42_spill] sm:$0xff] %v12093_v52  ;;  %v12095_v32 = vpop.f32.mrf.mxu0 }
 0x21f   : > { %14611 = vst [vmem:[#allocation43_spill] sm:$0xff] %v12095_v32  ;;  %v12097_v56 = vpop.f32.mrf.mxu1 }
 0x220   : > { %14612 = vst [vmem:[#allocation44_spill] sm:$0xff] %v12097_v56  ;;  %v12104_v15 = vpop.f32.mrf.mxu0  ;;  %v380_v56 = vsel %vm11910_vm8, 0, %v379_v27  ;;  %v383_v27 = vsel %vm11910_vm8, 0, %v382_v40 }
 0x221   : > { %14614 = vst [vmem:[#allocation46_spill] sm:$0xff] %v12104_v15  ;;  %v12106_v7 = vpop.f32.mrf.mxu1  ;;  %381 = vst [vmem:[#allocation3 + $0x11c] sm:$0x8] %v380_v56 }
 0x222   : > { %14615 = vst [vmem:[#allocation47_spill] sm:$0xff] %v12106_v7  ;;  %v10323_v23 = vpop.f32.mrf.mxu0  ;;  %384 = vst [vmem:[#allocation3 + $0x130] sm:$0x8] %v383_v27  ;;  %v1117_v27 = vadd.f32 %v11675_v61, %v11673_v44  ;;  %v1721_v61 = vadd.f32 %v11738_v34, %v11743_v35 }
 0x223   : > { %v12111_v52 = vpop.f32.mrf.mxu1  ;;  %v12116_v30 = vadd.f32 %v10323_v23, %v11922_v10 }
 0x224   : > { %14616 = vst [vmem:[#allocation48_spill] sm:$0xff] %v12111_v52  ;;  %v12118_v15 = vpop.f32.mrf.mxu0  ;;  %v391_v52 = vld [vmem:[#allocation3 + $0x38] sm:$0x1]  ;;  %v2015_v34 = vadd.f32 %v11903_v16, %v1721_v61 }
 0x225   : > { %14617 = vst [vmem:[#allocation49_spill] sm:$0xff] %v12116_v30  ;;  %v12120_v7 = vpop.f32.mrf.mxu1  ;;  %v392_v40 = vsel %vm11995_vm13, 0, %v391_v52  ;;  %v1717_v52 = vadd.f32 %v11720_v51, %v11725_v2  ;;  %v3455_v51 = vld [vmem:[#allocation3 + $0x2c] sm:$0x8]  ;;  %v1729_v2 = vadd.f32 %v11777_v11, %v11782_v26  ;;  %v14625_v11 = vld [vmem:[#allocation6_spill] sm:$0xff]  ;;  %v14626_v26 = vld [vmem:[#allocation5_spill] sm:$0xff] }
 0x226   : > { %14618 = vst [vmem:[#allocation50_spill] sm:$0xff] %v12120_v7  ;;  %v12122_v32 = vpop.f32.mrf.mxu0  ;;  %v327_v7 = vld [vmem:[#allocation3 + $0x10] sm:$0x1]  ;;  %393 = vst [vmem:[#allocation3 + $0x38] sm:$0x1] %v392_v40  ;;  %v14624_v40 = vld [vmem:[#allocation4_spill] sm:$0xff] }
 0x227   : > { %v12124_v13 = vpop.f32.mrf.mxu1  ;;  %v328_v31 = vsel %vm11995_vm13, 0, %v327_v7  ;;  %v1443_v7 = vadd.f32 %v11816_v36, %v1117_v27  ;;  %v14632_v61 = vld [vmem:[#allocation10_spill] sm:$0xff] }
 0x228   : > { %14619 = vst [vmem:[#allocation51_spill] sm:$0xff] %v12124_v13  ;;  %v12126_v5 = vpop.f32.mrf.mxu0  ;;  %v1101_v13 = vadd.f32 %v11657_v12, %v11655_v28  ;;  %329 = vst [vmem:[#allocation3 + $0x10] sm:$0x1] %v328_v31  ;;  %v1149_v28 = vadd.f32 %v11707_v18, %v11705_v43  ;;  %v1725_v18 = vadd.f32 %v11756_v50, %v11761_v49  ;;  %v3452_v31 = vld [vmem:[#allocation3 + $0x18] sm:$0x8] }
 0x229   : > { %14620 = vst [vmem:[#allocation52_spill] sm:$0xff] %v12126_v5  ;;  %v12128_v38 = vpop.f32.mrf.mxu1 }
 0x22a   : > { %v10327_v10 = vpop.f32.mrf.mxu0  ;;  %v1439_v12 = vadd.f32 %v11798_v59, %v1101_v13  ;;  %v2011_v59 = vadd.f32 %v11880_v6, %v1717_v52  ;;  %v2019_v50 = vadd.f32 %v11939_v29, %v1725_v18  ;;  %v3458_v6 = vld [vmem:[#allocation3 + $0x40] sm:$0x8]  ;;  %v14628_v52 = vld [vmem:[#allocation8_spill] sm:$0xff]  ;;  %v14630_v29 = vld [vmem:[#allocation9_spill] sm:$0xff] }
 0x22b   : > { %v12132_v23 = vpop.f32.mrf.mxu1  ;;  %v12135_v56 = vadd.f32 %v10327_v10, %v11952_v19  ;;  %v1133_v19 = vadd.f32 %v11693_v48, %v11691_v37  ;;  %v1451_v37 = vadd.f32 %v11852_v55, %v1149_v28  ;;  %v1737_v55 = vadd.f32 %v11818_v42, %v1443_v7  ;;  %v3461_v42 = vld [vmem:[#allocation3 + $0x54] sm:$0x8] }
 0x22c   : > { %v12139_v30 = vpop.f32.mrf.mxu0  ;;  %v1733_v36 = vadd.f32 %v11800_v60, %v1439_v12  ;;  %v2304_v60 = vadd.f32 %v14626_v26, %v14625_v11  ;;  %v3522_v28 = vshrl.u32 %v3452_v31, 16  ;;  %v3544_v12 = vshrl.u32 %v3455_v51, 16  ;;  %v14635_v26 = vld [vmem:[#allocation14_spill] sm:$0xff]  ;;  %v14636_v31 = vld [vmem:[#allocation17_spill] sm:$0xff]  ;;  %v14637_v51 = vld [vmem:[#allocation16_spill] sm:$0xff] }
 0x22d   : > { %v12141_v5 = vpop.f32.mrf.mxu1  ;;  %v1447_v44 = vadd.f32 %v11835_v54, %v1133_v19  ;;  %v1745_v27 = vadd.f32 %v14624_v40, %v1451_v37  ;;  %v2023_v37 = vadd.f32 %v11962_v17, %v1729_v2  ;;  %v14634_v40 = vld [vmem:[#allocation12_spill] sm:$0xff] }
 0x22e   : > { %14621 = vst [vmem:[#allocation53_spill] sm:$0xff] %v12141_v5  ;;  %v12154_v10 = vpop.f32.mrf.mxu0  ;;  %v14641_v17 = vld [vmem:[#allocation20_spill] sm:$0xff] }
 0x22f   : > { %v12156_v5 = vpop.f32.mrf.mxu1  ;;  %v1741_v13 = vadd.f32 %v11837_v57, %v1447_v44  ;;  %v14629_v57 = vld [vmem:[#allocation7_spill] sm:$0xff]  ;;  %v2305_v44 = vadd.f32 %v14630_v29, %v2011_v59  ;;  %v12219_v2 = vadd.f32 %v14641_v17, %v2019_v50  ;;  %v12236_v50 = vrot.slane %v3544_v12, 11  ;;  %v3470_v17 = vld [vmem:[#allocation3 + $0x90] sm:$0x8] }
 0x230   : > { %v12165_v48 = vpop.f32.mrf.mxu0  ;;  %v2307_v7 = vadd.f32 %v14629_v57, %v14628_v52  ;;  %v3566_v57 = vshrl.u32 %v3458_v6, 16  ;;  %v14639_v29 = vld [vmem:[#allocation19_spill] sm:$0xff]  ;;  %v2027_v6 = vadd.f32 %v12006_v14, %v1733_v36  ;;  %v2031_v14 = vadd.f32 %v12027_v9, %v1737_v55  ;;  %v394_v9 = vld [vmem:[#allocation3 + $0x4c] sm:$0x1]  ;;  %v14651_v55 = vld [vmem:[#allocation26_spill] sm:$0xff] }
 0x231   : > { %v12167_v43 = vpop.f32.mrf.mxu1  ;;  %14646 = vst [vmem:[#allocation7_spill] sm:$0xff] %v12236_v50  ;;  %v3473_v36 = vld [vmem:[#allocation3 + $0xa4] sm:$0x8] }
 0x232   : > { %v10331_v35 = vpop.f32.mrf.mxu0  ;;  %v12252_v12 = vrot.slane %v3566_v57, 11  ;;  %v2039_v57 = vadd.f32 %v12055_v4, %v1745_v27  ;;  %v2598_v4 = vadd.f32 %v12070_v3, %v2304_v60 }
 0x233   : > { %v12176_v54 = vpop.f32.mrf.mxu1  ;;  %v12182_v49 = vadd.f32 %v10331_v35, %v11989_v24  ;;  %v14631_v24 = vld [vmem:[#allocation11_spill] sm:$0xff]  ;;  %v14633_v35 = vld [vmem:[#allocation13_spill] sm:$0xff] }
 0x234   : > { %14622 = vst [vmem:[#allocation54_spill] sm:$0xff] %v12176_v54  ;;  %v12187_v19 = vpop.f32.mrf.mxu0  ;;  %v12196_v18 = vadd.f32 %v14632_v61, %v14631_v24  ;;  %v12201_v11 = vadd.f32 %v14634_v40, %v14633_v35  ;;  %v12208_v54 = vadd.f32 %v14637_v51, %v14636_v31  ;;  %v14640_v24 = vld [vmem:[#allocation18_spill] sm:$0xff]  ;;  %v14642_v35 = vld [vmem:[#allocation21_spill] sm:$0xff]  ;;  %v3588_v40 = vshrl.u32 %v3461_v42, 16  ;;  %14649 = vst [vmem:[#allocation11_spill] sm:$0xff] %v12252_v12 }
 0x235   : > { %14623 = vst [vmem:[#allocation55_spill] sm:$0xff] %v12182_v49  ;;  %v12189_v16 = vpop.f32.mrf.mxu1  ;;  %v12216_v61 = vadd.f32 %v14640_v24, %v14639_v29  ;;  %v3467_v31 = vld [vmem:[#allocation3 + $0x7c] sm:$0x8]  ;;  %v12234_v24 = vrot.slane %v3522_v28, 11  ;;  %v12243_v42 = vadd.f32 %v11985_v21, %v11992_v47  ;;  %v2035_v21 = vadd.f32 %v12042_v46, %v1741_v13  ;;  %v3476_v12 = vld [vmem:[#allocation3 + $0xb8] sm:$0x8] }
 0x236   : > { %14627 = vst [vmem:[#allocation4_spill] sm:$0xff] %v12189_v16  ;;  %v12204_v16 = vadd.f32 %v14635_v26, %v2015_v34  ;;  %v12210_v52 = vpop.f32.mrf.mxu0  ;;  %v12223_v34 = vadd.f32 %v14642_v35, %v11955_v1  ;;  %v3464_v26 = vld [vmem:[#allocation3 + $0x68] sm:$0x8]  ;;  %v14643_v51 = vld [vmem:[#allocation22_spill] sm:$0xff]  ;;  %v14647_v1 = vld [vmem:[#allocation23_spill] sm:$0xff]  ;;  %v395_v46 = vsel %vm11995_vm13, 0, %v394_v9  ;;  %v2599_v9 = vadd.f32 %v12078_v22, %v2305_v44 }
 0x237   : > { %v12212_v59 = vpop.f32.mrf.mxu1  ;;  %v12227_v49 = vadd.f32 %v14643_v51, %v11960_v53  ;;  %14645 = vst [vmem:[#allocation8_spill] sm:$0xff] %v12234_v24  ;;  %v12239_v35 = vadd.f32 %v14647_v1, %v2023_v37  ;;  %v12247_v53 = vadd.f32 %v11999_v25, %v12004_v62  ;;  %v397_v51 = vld [vmem:[#allocation3 + $0x60] sm:$0x1]  ;;  %v3610_v50 = vshrl.u32 %v3464_v26, 16  ;;  %396 = vst [vmem:[#allocation3 + $0x4c] sm:$0x1] %v395_v46 }
 0x238   : > { %14638 = vst [vmem:[#allocation6_spill] sm:$0xff] %v12212_v59  ;;  %v12230_v59 = vpop.f32.mrf.mxu0  ;;  %v3632_v37 = vshrl.u32 %v3467_v31, 16  ;;  %v398_v1 = vsel %vm11995_vm13, 0, %v397_v51  ;;  %v12260_v25 = vrot.slane %v3588_v40, 11  ;;  %v3654_v62 = vshrl.u32 %v3470_v17, 16  ;;  %v14653_v13 = vld [vmem:[#allocation27_spill] sm:$0xff] }
 0x239   : > { %v12232_v29 = vpop.f32.mrf.mxu1  ;;  %399 = vst [vmem:[#allocation3 + $0x60] sm:$0x1] %v398_v1  ;;  %v3676_v31 = vshrl.u32 %v3473_v36, 16  ;;  %v3479_v51 = vld [vmem:[#allocation3 + $0xcc] sm:$0x8]  ;;  %v14654_v17 = vld [vmem:[#allocation30_spill] sm:$0xff]  ;;  %v12298_v46 = vadd.f32 %v12057_v20, %v2039_v57 }
 0x23a   : > { %14644 = vst [vmem:[#allocation5_spill] sm:$0xff] %v12232_v29  ;;  %v10335_v28 = vpop.f32.mrf.mxu0  ;;  %14650 = vst [vmem:[#allocation10_spill] sm:$0xff] %v12260_v25  ;;  %v12263_v29 = vadd.f32 %v14651_v55, %v2027_v6  ;;  %v14656_v6 = vld [vmem:[#allocation31_spill] sm:$0xff]  ;;  %v4462_v36 = vld [vmem:[#allocation3 + $0x8] sm:$0xf]  ;;  %v2601_v25 = vadd.f32 %v12074_v58, %v2307_v7  ;;  %v3698_v3 = vshrl.u32 %v3476_v12, 16  ;;  %v12302_v58 = vadd.f32 %v12065_v45, %v12068_v63 }
 0x23b   : > { %v12250_v24 = vpop.f32.mrf.mxu1  ;;  %v12258_v47 = vadd.f32 %v10335_v28, %v12017_v39  ;;  %v14652_v39 = vld [vmem:[#allocation28_spill] sm:$0xff]  ;;  %v14655_v28 = vld [vmem:[#allocation29_spill] sm:$0xff]  ;;  %v12279_v55 = vadd.f32 %v14656_v6, %v2031_v14  ;;  %v12293_v14 = vadd.f32 %v12044_v33, %v2035_v21  ;;  %v3720_v60 = vshrl.u32 %v3479_v51, 16  ;;  %14660 = vst [vmem:[#allocation17_spill] sm:$0xff] %v12298_v46  ;;  %v3482_v44 = vld [vmem:[#allocation3 + $0xe0] sm:$0x8] }
 0x23c   : > { %14648 = vst [vmem:[#allocation9_spill] sm:$0xff] %v12250_v24  ;;  %v12266_v26 = vpop.f32.mrf.mxu0  ;;  %v12272_v40 = vadd.f32 %v14653_v13, %v14652_v39  ;;  %v12276_v1 = vadd.f32 %v14655_v28, %v14654_v17  ;;  %v12288_v39 = vrot.slane %v3610_v50, 11  ;;  %v12290_v13 = vrot.slane %v3632_v37, 11  ;;  %v4463_v17 = vld [vmem:[#allocation3 + $0xc] sm:$0xf]  ;;  %v14662_v45 = vld [vmem:[#allocation38_spill] sm:$0xff] }
 0x23d   : > { %v12282_v27 = vpop.f32.mrf.mxu1  ;;  %v12295_v28 = vrot.slane %v3654_v62, 11  ;;  %v12306_v7 = vrot.slane %v3676_v31, 11  ;;  %v4514_v50 = vshrl.u32 %v4462_v36, 16  ;;  %v12309_v33 = vadd.f32 %v12072_v8, %v2598_v4  ;;  %v3485_v12 = vld [vmem:[#allocation3 + $0xf4] sm:$0x8]  ;;  %v14665_v6 = vld [vmem:[#allocation43_spill] sm:$0xff] }
 0x23e   : > { %v12286_v24 = vpop.f32.mrf.mxu0  ;;  %14657 = vst [vmem:[#allocation13_spill] sm:$0xff] %v12288_v39  ;;  %14658 = vst [vmem:[#allocation12_spill] sm:$0xff] %v12290_v13  ;;  %v4517_v21 = vshll.u32 %v4462_v36, 16  ;;  %v4523_v62 = vshll.u32 %v4463_v17, 16  ;;  %v4527_v20 = vshrl.u32 %v4463_v17, 16  ;;  %v12314_v57 = vadd.f32 %v12076_v0, %v2601_v25  ;;  %v14664_v31 = vld [vmem:[#allocation41_spill] sm:$0xff] }
 0x23f   : > { %14659 = vst [vmem:[#allocation14_spill] sm:$0xff] %v12295_v28  ;;  %14661 = vst [vmem:[#allocation16_spill] sm:$0xff] %v12306_v7  ;;  %v12311_v37 = vpop.f32.mrf.mxu1  ;;  %v12317_v63 = vadd.f32 %v14662_v45, %v2599_v9  ;;  %v2602_v51 = vadd.f32 %v14664_v31, %v12196_v18  ;;  %v2605_v7 = vadd.f32 %v14665_v6, %v12201_v11  ;;  %v14666_v4 = vld [vmem:[#allocation46_spill] sm:$0xff]  ;;  %v14667_v13 = vld [vmem:[#allocation32_spill] sm:$0xff]  ;;  %v12328_v17 = vrot.slane %v3698_v3, 11 }
 0x240   : > { %v12304_v22 = vpop.f32.mrf.mxu0  ;;  %v2603_v28 = vadd.f32 %v14666_v4, %v12204_v16  ;;  %v12330_v0 = vrot.slane %v3720_v60, 11  ;;  %v14670_v25 = vld [vmem:[#allocation40_spill] sm:$0xff]  ;;  %v14671_v9 = vld [vmem:[#allocation39_spill] sm:$0xff]  ;;  %v3742_v18 = vshrl.u32 %v3482_v44, 16  ;;  %v3764_v31 = vshrl.u32 %v3485_v12, 16 }
 0x241   : > { %14663 = vst [vmem:[#allocation19_spill] sm:$0xff] %v12317_v63  ;;  %14668 = vst [vmem:[#allocation18_spill] sm:$0xff] %v12328_v17  ;;  %v12334_v45 = vadd.f32 %v14671_v9, %v14670_v25  ;;  %v3488_v46 = vld [vmem:[#allocation3 + $0x108] sm:$0x8]  ;;  %v4516_v11 = vrot.slane %v4514_v50, 4  ;;  %v12336_v6 = vpop.f32.mrf.mxu1  ;;  %v14672_v63 = vld [vmem:[#allocation33_spill] sm:$0xff]  ;;  %v2606_v44 = vadd.f32 %v12118_v15, %v12208_v54  ;;  %v2609_v50 = vadd.f32 %v12122_v32, %v12216_v61 }
 0x242   : > { %v10339_v8 = vpop.f32.mrf.mxu0  ;;  %14669 = vst [vmem:[#allocation20_spill] sm:$0xff] %v12330_v0  ;;  %v12341_v3 = vrot.slane %v4523_v62, 5  ;;  %v4529_v60 = vrot.slane %v4527_v20, 4  ;;  %v14674_v25 = vld [vmem:[#allocation44_spill] sm:$0xff]  ;;  %v4464_v12 = vld [vmem:[#allocation3 + $0x10] sm:$0x1] }
 0x243   : > { %v12326_v36 = vadd.f32 %v10339_v8, %v14667_v13  ;;  %v4519_v13 = vrot.slane %v4517_v21, 5  ;;  %v14673_v8 = vld [vmem:[#allocation42_spill] sm:$0xff]  ;;  %v12347_v9 = vadd.f32 %v14674_v25, %v2605_v7  ;;  %v14676_v0 = vld [vmem:[#allocation47_spill] sm:$0xff]  ;;  %v14678_v62 = vld [vmem:[#allocation52_spill] sm:$0xff]  ;;  %v3786_v7 = vshrl.u32 %v3488_v46, 16 }
 0x244   : > { %v2567_v39 = vpop.f32.mrf.mxu0  ;;  %v12344_v4 = vadd.f32 %v14673_v8, %v2602_v51  ;;  %v12354_v21 = vadd.f32 %v14676_v0, %v2603_v28  ;;  %v2607_v20 = vadd.f32 %v14678_v62, %v12219_v2  ;;  %v14679_v51 = vld [vmem:[#allocation34_spill] sm:$0xff]  ;;  %v14680_v17 = vld [vmem:[#allocation49_spill] sm:$0xff]  ;;  %v12367_v32 = vrot.slane %v3742_v18, 11  ;;  %v12373_v2 = vpop.f32.mrf.mxu1 }
 0x245   : > { %v12339_v16 = vadd.f32 %v2567_v39, %v14672_v63  ;;  %14675 = vst [vmem:[#allocation21_spill] sm:$0xff] %v12347_v9  ;;  %v403_v63 = vld [vmem:[#allocation3 + $0x88] sm:$0x1]  ;;  %v3491_v25 = vld [vmem:[#allocation3 + $0x11c] sm:$0x8]  ;;  %v12369_v61 = vrot.slane %v3764_v31, 11  ;;  %v4520_v62 = vor.u32 %v4519_v13, %v4516_v11  ;;  %v4530_v46 = vor.u32 %v4529_v60, %v12341_v3 }
 0x246   : > { %v10340_v39 = vpop.f32.mrf.mxu0  ;;  %14677 = vst [vmem:[#allocation22_spill] sm:$0xff] %v12354_v21  ;;  %v14681_v9 = vld [vmem:[#allocation48_spill] sm:$0xff]  ;;  %14683 = vst [vmem:[#allocation26_spill] sm:$0xff] %v12367_v32  ;;  %v400_v28 = vld [vmem:[#allocation3 + $0x74] sm:$0x1]  ;;  %v404_v0 = vsel %vm11995_vm13, 0, %v403_v63  ;;  %v2610_v63 = vadd.f32 %v12139_v30, %v12223_v34  ;;  %v12387_v11 = vadd.f32 %v12128_v38, %v2607_v20  ;;  %v2613_v13 = vadd.f32 %v12154_v10, %v12227_v49 }
 0x247   : > { %v12359_v8 = vadd.f32 %v10340_v39, %v14679_v51  ;;  %v12363_v15 = vadd.f32 %v14681_v9, %v14680_v17  ;;  %14684 = vst [vmem:[#allocation28_spill] sm:$0xff] %v12369_v61  ;;  %v3494_v39 = vld [vmem:[#allocation3 + $0x130] sm:$0x8]  ;;  %v4533_v51 = vshll.u32 %v4464_v12, 16  ;;  %v5219_v21 = vld [vmem:[#allocation3 + $0x18] sm:$0x8]  ;;  %v2611_v30 = vadd.f32 %v12165_v48, %v12239_v35 }
 0x248   : > { %v12365_v54 = vpop.f32.mrf.mxu0  ;;  %v401_v17 = vsel %vm11995_vm13, 0, %v400_v28  ;;  %405 = vst [vmem:[#allocation3 + $0x88] sm:$0x1] %v404_v0  ;;  %v14685_v18 = vld [vmem:[#allocation50_spill] sm:$0xff]  ;;  %v14686_v31 = vld [vmem:[#allocation51_spill] sm:$0xff]  ;;  %v5268_v38 = vshrl.u32 %v5219_v21, 16  ;;  %v12402_v0 = vpop.f32.mrf.mxu1  ;;  %v12415_v21 = vadd.f32 %v12156_v5, %v2613_v13  ;;  %v2618_v13 = vadd.f32 %v12266_v26, %v12272_v40 }
 0x249   : > { %14682 = vst [vmem:[#allocation23_spill] sm:$0xff] %v12363_v15  ;;  %v12379_v9 = vadd.f32 %v14685_v18, %v2606_v44  ;;  %v12382_v61 = vadd.f32 %v14686_v31, %v2609_v50  ;;  %v3808_v15 = vshrl.u32 %v3491_v25, 16  ;;  %402 = vst [vmem:[#allocation3 + $0x74] sm:$0x1] %v401_v17  ;;  %v14687_v60 = vld [vmem:[#allocation35_spill] sm:$0xff]  ;;  %v12394_v44 = vrot.slane %v3786_v7, 11 }
 0x24a   : > { %v10343_v32 = vpop.f32.mrf.mxu0  ;;  %v4467_v28 = vld [vmem:[#allocation3 + $0x24] sm:$0x1]  ;;  %v12398_v50 = vadd.f32 %v12132_v23, %v12135_v56  ;;  %v3830_v25 = vshrl.u32 %v3494_v39, 16  ;;  %v5222_v20 = vld [vmem:[#allocation3 + $0x2c] sm:$0x8]  ;;  %v4531_v7 = vrot.slane %v4530_v46, 4  ;;  %v2614_v23 = vadd.f32 %v12187_v19, %v12243_v42 }
 0x24b   : > { %v12392_v12 = vadd.f32 %v10343_v32, %v14687_v60  ;;  %v14688_v10 = vld [vmem:[#allocation36_spill] sm:$0xff]  ;;  %v4521_v32 = vrot.slane %v4520_v62, 4  ;;  %v4535_v17 = vrot.slane %v4533_v51, 5  ;;  %v4470_v18 = vld [vmem:[#allocation3 + $0x38] sm:$0x1]  ;;  %v14689_v31 = vld [vmem:[#allocation53_spill] sm:$0xff]  ;;  %v2617_v39 = vadd.f32 %v12210_v52, %v12247_v53 }
 0x24c   : > { %v2583_v34 = vpop.f32.mrf.mxu0  ;;  %v12408_v60 = vadd.f32 %v14689_v31, %v2610_v63  ;;  %v12412_v48 = vrot.slane %v3808_v15, 11  ;;  %v4557_v35 = vshll.u32 %v4467_v28, 16  ;;  %v14690_v62 = vld [vmem:[#allocation37_spill] sm:$0xff]  ;;  %v5290_v51 = vshrl.u32 %v5222_v20, 16  ;;  %v5225_v53 = vld [vmem:[#allocation3 + $0x40] sm:$0x8] }
 0x24d   : > { %v12405_v49 = vadd.f32 %v2583_v34, %v14688_v10  ;;  %v12423_v63 = vadd.f32 %v12167_v43, %v2611_v30  ;;  %v2615_v19 = vadd.f32 %v12230_v59, %v12263_v29  ;;  %v14691_v5 = vmov 0  ;;  %v12439_v43 = vpop.f32.mrf.mxu1  ;;  %v14694_v30 = vld [vmem:[#allocation55_spill] sm:$0xff]  ;;  %v14695_v34 = vld [vmem:[#allocation54_spill] sm:$0xff]  ;;  %v14696_v20 = vld [vmem:[#allocation4_spill] sm:$0xff] }
 0x24e   : > { %v10344_v56 = vpop.f32.mrf.mxu0  ;;  %v14692_v5 = vsel %vm12431_vm0, 4294967295, %v14691_v5  ;;  %v12435_v15 = vrot.slane %v5268_v38, 11  ;;  %v4581_v52 = vshll.u32 %v4470_v18, 16  ;;  %v12441_v28 = vrot.slane %v3830_v25, 11  ;;  %v12460_v25 = vld [vmem:[%s14552_s3] ss:$0 sm:$0xff] }
 0x24f   : > { %v12420_v46 = vadd.f32 %v10344_v56, %v14690_v62  ;;  %14693 = vst [vmem:[#allocation27_spill] sm:$0xff] %v14692_v5  ;;  %v4526_v59 = vsel %vm12431_vm0, %v4521_v32, %v12341_v3  ;;  %v4536_v29 = vsel %vm12431_vm0, %v4531_v7, %v4535_v17  ;;  %v12450_v38 = vadd.f32 %v14695_v34, %v14694_v30  ;;  %v14697_v32 = vld [vmem:[#allocation6_spill] sm:$0xff]  ;;  %v4473_v31 = vld [vmem:[#allocation3 + $0x4c] sm:$0x1]  ;;  %v5228_v56 = vld [vmem:[#allocation3 + $0x54] sm:$0x8] }
 0x250   : > { %v12427_v42 = vpop.f32.mrf.mxu0  ;;  %v12453_v10 = vadd.f32 %v14696_v20, %v2614_v23  ;;  %v2621_v26 = vadd.f32 %v12286_v24, %v12276_v1  ;;  %v12462_v3 = vrot.slane %v4557_v35, 5  ;;  %v12465_v7 = vadd.f32 %v14697_v32, %v2617_v39  ;;  %v14698_v62 = vld [vmem:[#allocation5_spill] sm:$0xff]  ;;  %v7068_v5 = vld [vmem:[#allocation3 + $0xa4] sm:$0x8] }
 0x251   : > { %v12468_v18 = vrot.slane %v5290_v51, 11  ;;  %v5312_v23 = vshrl.u32 %v5225_v53, 16  ;;  %v12471_v24 = vadd.f32 %v14698_v62, %v2615_v19  ;;  %v2619_v1 = vadd.f32 %v12304_v22, %v12279_v55  ;;  %v409_v39 = vld [vmem:[#allocation3 + $0xb0] sm:$0x1]  ;;  %v2864_v53 = vpop.f32.mrf.mxu1  ;;  %v406_v62 = vld [vmem:[#allocation3 + $0x9c] sm:$0x1] }
 0x252   : > { %v10383_v40 = vpop.f32.mrf.mxu0  ;;  %v12475_v34 = vcombine.low %v4526_v59, %v4536_v29  ;;  %v12477_v35 = vrot.slane %v4581_v52, 5  ;;  %v14699_v20 = vld [vmem:[#allocation9_spill] sm:$0xff]  ;;  %v12484_v51 = vadd.f32 %v12282_v27, %v2618_v13  ;;  %v410_v55 = vsel %vm11995_vm13, 0, %v409_v39 }
 0x253   : > { %v3188_v17 = vadd.f32 %v10383_v40, %v12302_v58  ;;  %v12481_v58 = vadd.f32 %v14699_v20, %v12258_v47  ;;  %v4476_v40 = vld [vmem:[#allocation3 + $0x60] sm:$0x1]  ;;  %v12490_v22 = vadd.f32 %v12311_v37, %v2621_v26  ;;  %v4605_v29 = vshll.u32 %v4473_v31, 16  ;;  %v5231_v47 = vld [vmem:[#allocation3 + $0x68] sm:$0x8]  ;;  %v10377_v27 = vpop.f32.mrf.mxu1 }
 0x254   : > { %v3059_v30 = vpop.f32.mrf.mxu0  ;;  %v5334_v32 = vshrl.u32 %v5228_v56, 16  ;;  %411 = vst [vmem:[#allocation3 + $0xb0] sm:$0x1] %v410_v55  ;;  %v407_v39 = vsel %vm11995_vm13, 0, %v406_v62  ;;  %v12500_v37 = vadd.f32 %v12336_v6, %v2619_v1  ;;  %v12504_v26 = vadd.f32 %v12373_v2, %v12326_v36 }
 0x255   : > { %v3186_v19 = vadd.f32 %v3059_v30, %v12309_v33  ;;  %v3227_v52 = vadd.f32 %v12460_v25, %v3188_v17  ;;  %v12495_v30 = vrot.slane %v5312_v23, 11  ;;  %v2623_v17 = vadd.f32 %v12365_v54, %v12293_v14  ;;  %408 = vst [vmem:[#allocation3 + $0x9c] sm:$0x1] %v407_v39  ;;  %v14700_v23 = vld [vmem:[#allocation19_spill] sm:$0xff]  ;;  %v4482_v14 = vld [vmem:[#allocation3 + $0x88] sm:$0x1]  ;;  %v2877_v54 = vpop.f32.mrf.mxu1 }
 0x256   : > { %v10384_v59 = vpop.f32.mrf.mxu0  ;;  %v4629_v56 = vshll.u32 %v4476_v40, 16  ;;  %v5356_v55 = vshrl.u32 %v5231_v47, 16  ;;  %v12512_v6 = vadd.f32 %v12402_v0, %v12339_v16  ;;  %v12514_v36 = vrot.slane %v4605_v29, 5  ;;  %v4479_v39 = vld [vmem:[#allocation3 + $0x74] sm:$0x1] }
 0x257   : > { %v3225_v13 = vadd.f32 %v12460_v25, %v3186_v19  ;;  %v3189_v33 = vadd.f32 %v10384_v59, %v12314_v57  ;;  %v3259_v1 = vmax.f32 %v3227_v52, 0.0  ;;  %v12516_v2 = vrot.slane %v5334_v32, 11  ;;  %v5234_v47 = vld [vmem:[#allocation3 + $0x7c] sm:$0x8] }
 0x258   : > { %v3062_v31 = vpop.f32.mrf.mxu0  ;;  %v12522_v16 = vadd.f32 %v12439_v43, %v12359_v8  ;;  %v12524_v0 = vadd.f32 %v2864_v53, %v2623_v17  ;;  %v12527_v52 = vadd.f32 %v10377_v27, %v12392_v12  ;;  %v12529_v32 = vrot.slane %v4629_v56, 5  ;;  %v10378_v56 = vpop.f32.mrf.mxu1 }
 0x259   : > { %v3257_v20 = vmax.f32 %v3225_v13, 0.0  ;;  %v3228_v57 = vadd.f32 %v12460_v25, %v3189_v33  ;;  %v3187_v19 = vadd.f32 %v3062_v31, %v14700_v23  ;;  %v5237_v31 = vld [vmem:[#allocation3 + $0x90] sm:$0x8]  ;;  %v12532_v23 = vrot.slane %v5356_v55, 11 }
 0x25a   : > { %v10387_v59 = vpop.f32.mrf.mxu0  ;;  %14701 = vst [vmem:[#allocation30_spill] sm:$0xff] %v12529_v32  ;;  %v4653_v53 = vshll.u32 %v4479_v39, 16  ;;  %v4677_v17 = vshll.u32 %v4482_v14, 16  ;;  %v5378_v12 = vshrl.u32 %v5234_v47, 16  ;;  %v12536_v27 = vadd.f32 %v2877_v54, %v12405_v49  ;;  %v14704_v32 = vld [vmem:[#allocation17_spill] sm:$0xff]  ;;  %v14705_v54 = vld [vmem:[#allocation22_spill] sm:$0xff] }
 0x25b   : > { %v9658_v40 = vpack.c.bf16 %v3257_v20, %v3257_v20  ;;  %v3260_v62 = vmax.f32 %v3228_v57, 0.0  ;;  %v3226_v13 = vadd.f32 %v12460_v25, %v3187_v19  ;;  %v3192_v33 = vadd.f32 %v10387_v59, %v12334_v45  ;;  %14702 = vst [vmem:[#allocation29_spill] sm:$0xff] %v12532_v23  ;;  %v4488_v19 = vld [vmem:[#allocation3 + $0xb0] sm:$0x1]  ;;  %v5240_v59 = vld [vmem:[#allocation3 + $0xa4] sm:$0x8] }
 0x25c   : > { %v3075_v29 = vpop.f32.mrf.mxu0  ;;  %v4485_v55 = vld [vmem:[#allocation3 + $0x9c] sm:$0x1]  ;;  %v5400_v41 = vshrl.u32 %v5237_v31, 16  ;;  %v4725_v23 = vshll.u32 %v4488_v19, 16  ;;  %v2627_v14 = vadd.f32 %v12427_v42, %v14704_v32  ;;  %v2880_v31 = vpop.f32.mrf.mxu1  ;;  %v14706_v42 = vld [vmem:[#allocation23_spill] sm:$0xff] }
 0x25d   : > { %3417 = vst [vmem:[#allocation3 + $0x1c] sm:$0xf] %v9658_v40  ;;  %v9693_v20 = vpack.c.bf16 %v3260_v62, %v3259_v1  ;;  %v3258_v57 = vmax.f32 %v3226_v13, 0.0  ;;  %v3190_v45 = vadd.f32 %v3075_v29, %v12344_v4  ;;  %v3231_v8 = vadd.f32 %v12460_v25, %v3192_v33  ;;  %v14703_v62 = vld [vmem:[#allocation21_spill] sm:$0xff] }
 0x25e   : > { %v10388_v43 = vpop.f32.mrf.mxu0  ;;  %v4701_v29 = vshll.u32 %v4485_v55, 16  ;;  %v5422_v33 = vshrl.u32 %v5240_v59, 16 }
 0x25f   : > { %9730 = vst [vmem:[#allocation3 + $0x30] sm:$0xff] %v9693_v20   ;;  %v9659_v40 = vpack.c.bf16 %v3258_v57, %v3258_v57  ;;  %v3229_v1 = vadd.f32 %v12460_v25, %v3190_v45  ;;  %v3193_v4 = vadd.f32 %v10388_v43, %v14703_v62  ;;  %v3263_v20 = vmax.f32 %v3231_v8, 0.0 }
 0x260   : > { %v3078_v13 = vpop.f32.mrf.mxu0  ;;  %v12544_v45 = vrot.slane %v4653_v53, 5  ;;  %v12546_v43 = vrot.slane %v4677_v17, 5  ;;  %v12548_v62 = vrot.slane %v5378_v12, 11  ;;  %v12556_v8 = vrot.slane %v4725_v23, 5 }
 0x261   : > { %3418 = vst [vmem:[#allocation3 + $0x20] sm:$0xf] %v9659_v40  ;;  %v3261_v39 = vmax.f32 %v3229_v1, 0.0  ;;  %v3232_v49 = vadd.f32 %v12460_v25, %v3193_v4  ;;  %v3191_v47 = vadd.f32 %v3078_v13, %v14705_v54  ;;  %v12552_v4 = vrot.slane %v4701_v29, 5 }
 0x262   : > { %v10391_v57 = vpop.f32.mrf.mxu0  ;;  %v12554_v13 = vrot.slane %v5400_v41, 11  ;;  %14709 = vst [vmem:[#allocation41_spill] sm:$0xff] %v12556_v8  ;;  %v12558_v53 = vrot.slane %v5422_v33, 11  ;;  %v12563_v54 = vadd.f32 %v10378_v56, %v12420_v46 }
 0x263   : > { %v9662_v19 = vpack.c.bf16 %v3261_v39, %v3261_v39  ;;  %v3264_v59 = vmax.f32 %v3232_v49, 0.0  ;;  %v3230_v55 = vadd.f32 %v12460_v25, %v3191_v47  ;;  %v3196_v32 = vadd.f32 %v10391_v57, %v14706_v42  ;;  %14707 = vst [vmem:[#allocation31_spill] sm:$0xff] %v12552_v4 }
 0x264   : > { %v3091_v40 = vpop.f32.mrf.mxu0  ;;  %v3453_v1 = vld [vmem:[#allocation3 + $0x1c] sm:$0xf]  ;;  %14708 = vst [vmem:[#allocation38_spill] sm:$0xff] %v12554_v13  ;;  %14710 = vst [vmem:[#allocation43_spill] sm:$0xff] %v12558_v53  ;;  %v12565_v47 = vadd.f32 %v2880_v31, %v2627_v14 }
 0x265   : > { %3421 = vst [vmem:[#allocation3 + $0x44] sm:$0xf] %v9662_v19  ;;  %v9698_v17 = vpack.c.bf16 %v3264_v59, %v3263_v20  ;;  %v3262_v12 = vmax.f32 %v3230_v55, 0.0  ;;  %v3235_v39 = vadd.f32 %v12460_v25, %v3196_v32  ;;  %v3194_v49 = vadd.f32 %v3091_v40, %v12379_v9 }
 0x266   : > { %v10392_v29 = vpop.f32.mrf.mxu0  ;;  %v3527_v57 = vshrl.u32 %v3453_v1, 16  ;;  %v3530_v41 = vshll.u32 %v3453_v1, 16  ;;  %v3456_v42 = vld [vmem:[#allocation3 + $0x30] sm:$0xf]  ;;  %v12567_v23 = vld [vmem:[#allocation3 + $0x34] sm:$0xf] }
 0x267   : > { %9731 = vst [vmem:[#allocation3 + $0x58] sm:$0xff] %v9698_v17   ;;  %v9663_v33 = vpack.c.bf16 %v3262_v12, %v3262_v12  ;;  %v3267_v19 = vmax.f32 %v3235_v39, 0.0  ;;  %v3233_v20 = vadd.f32 %v12460_v25, %v3194_v49  ;;  %v3197_v59 = vadd.f32 %v10392_v29, %v12382_v61  ;;  %v10885_v29 = vld [vmem:[%s14553_s4 + $0xb0] sm:$0xff]  }
 0x268   : > { %v3094_v55 = vpop.f32.mrf.mxu0  ;;  %v3454_v9 = vld [vmem:[#allocation3 + $0x20] sm:$0xf]  ;;  %v3529_v32 = vrot.slane %v3527_v57, 7  ;;  %v3549_v46 = vshrl.u32 %v3456_v42, 16  ;;  %v3552_v56 = vshll.u32 %v3456_v42, 16  ;;  %v3558_v14 = vshrl.u32 %v12567_v23, 16 }
 0x269   : > { %3422 = vst [vmem:[#allocation3 + $0x48] sm:$0xf] %v9663_v33  ;;  %v3265_v31 = vmax.f32 %v3233_v20, 0.0  ;;  %v3236_v40 = vadd.f32 %v12460_v25, %v3197_v59  ;;  %v3195_v8 = vadd.f32 %v3094_v55, %v12387_v11  ;;  %v3536_v17 = vshrl.u32 %v3454_v9, 16 }
 0x26a   : > { %v10395_v12 = vpop.f32.mrf.mxu0  ;;  %v3539_v39 = vshll.u32 %v3454_v9, 16  ;;  %v9293_v53 = vcombine.low %v3453_v1, %v3454_v9  ;;  %v12574_v49 = vrot.slane %v3549_v46, 7  ;;  %v12576_v61 = vrot.slane %v3558_v14, 7 }
 0x26b   : > { %v9666_v57 = vpack.c.bf16 %v3265_v31, %v3265_v31  ;;  %v3268_v4 = vmax.f32 %v3236_v40, 0.0  ;;  %v3234_v33 = vadd.f32 %v12460_v25, %v3195_v8  ;;  %v3200_v20 = vadd.f32 %v10395_v12, %v12398_v50  ;;  %v10985_v8 = vld [vmem:[%s14553_s4 + $0xb8] sm:$0xff]  }
 0x26c   : > { %v3538_v59 = vrot.slane %v3536_v17, 7  ;;  %10430 = vmatmul.mubr.bf16.vlgmr.msra.gmra.mxu1 %v9293_v53  ;;  %v3107_v11 = vpop.f32.mrf.mxu0  ;;  %v3561_v55 = vshll.u32 %v12567_v23, 16  ;;  %v9294_v1 = vcombine.low %v3456_v42, %v12567_v23  ;;  %v3532_v9 = vor.u32 %v3530_v41, %v3529_v32  ;;  %v12585_v46 = vld [vmem:[#allocation3 + $0x44] sm:$0xf]  ;;  %v14711_v40 = vld [vmem:[#allocation8_spill] sm:$0xff] }
 0x26d   : > { %3425 = vst [vmem:[#allocation3 + $0x6c] sm:$0xf] %v9666_v57  ;;  %v9703_v14 = vpack.c.bf16 %v3268_v4, %v3267_v19  ;;  %v3266_v13 = vmax.f32 %v3234_v33, 0.0  ;;  %v3239_v31 = vadd.f32 %v12460_v25, %v3200_v20  ;;  %10510 = vmatpush3.bf16.msra.mxu1 %v10985_v8  ;;  %v3198_v50 = vadd.f32 %v3107_v11, %v12408_v60  ;;  %v10888_v19 = vld [vmem:[%s14553_s4 + $0xa8] sm:$0xff]   ;;  %v10901_v8 = vld [vmem:[%s14553_s4 + $0xf0] sm:$0xff]  }
 0x26e   : > { %10433 = vmatprep.mubr.bf16.mxu1 %v9294_v1  ;;  %v10396_v53 = vpop.f32.mrf.mxu0  ;;  %v3533_v41 = vsel %vm11976_vm11, %v14711_v40, %v3532_v9  ;;  %v3534_v42 = vrot.slane %v3529_v32, 4  ;;  %v3541_v23 = vor.u32 %v3539_v39, %v3538_v59  ;;  %10511 = vmatprep.subr.bf16.mxu1 %v10885_v29  ;;  %v3571_v4 = vshrl.u32 %v12585_v46, 16 }
 0x26f   : > { %9732 = vst [vmem:[#allocation3 + $0x80] sm:$0xff] %v9703_v14   ;;  %v9667_v12 = vpack.c.bf16 %v3266_v13, %v3266_v13  ;;  %v3271_v57 = vmax.f32 %v3239_v31, 0.0  ;;  %v3237_v60 = vadd.f32 %v12460_v25, %v3198_v50  ;;  %v3201_v33 = vadd.f32 %v10396_v53, %v12415_v21  ;;  %v12611_v21 = vld [vmem:[#allocation3 + $0x58] sm:$0xf] }
 0x270   : > { %v3110_v20 = vpop.f32.mrf.mxu0  ;;  %v3542_v11 = vsel %vm11976_vm11, %v3534_v42, %v3541_v23  ;;  %v12603_v32 = vld [vmem:[#allocation3 + $0x48] sm:$0xf]  ;;  %v12605_v39 = vrot.slane %v3571_v4, 7  ;;  %v3574_v59 = vshll.u32 %v12585_v46, 16  ;;  %v3554_v1 = vor.u32 %v3552_v56, %v12574_v49  ;;  %v14713_v42 = vld [vmem:[#allocation7_spill] sm:$0xff] }
 0x271   : > { %3426 = vst [vmem:[#allocation3 + $0x70] sm:$0xf] %v9667_v12  ;;  %v3269_v9 = vmax.f32 %v3237_v60, 0.0  ;;  %v3240_v13 = vadd.f32 %v12460_v25, %v3201_v33  ;;  %v3199_v14 = vadd.f32 %v3110_v20, %v12423_v63  ;;  %v9317_v31 = vcombine.low %v3533_v41, %v3542_v11  ;;  %10512 = vmatpush3.bf16.msra.mxu1 %v10885_v29  ;;  %v10891_v29 = vld [vmem:[%s14553_s4 + $0xa0] sm:$0xff]   ;;  %v12628_v60 = vld [vmem:[#allocation3 + $0x5c] sm:$0xf] }
 0x272   : > { %v10399_v50 = vpop.f32.mrf.mxu0  ;;  %v3580_v53 = vshrl.u32 %v12603_v32, 16  ;;  %v3583_v40 = vshll.u32 %v12603_v32, 16  ;;  %v9295_v56 = vcombine.low %v12585_v46, %v12603_v32  ;;  %v3555_v63 = vsel %vm11976_vm11, %v14713_v42, %v3554_v1  ;;  %10513 = vmatprep.subr.bf16.mxu1 %v10888_v19  ;;  %v14714_v1 = vld [vmem:[#allocation45_spill] sm:$0xff] }
 0x273   : > { %v9670_v41 = vpack.c.bf16 %v3269_v9, %v3269_v9  ;;  %v3272_v23 = vmax.f32 %v3240_v13, 0.0  ;;  %v3238_v4 = vadd.f32 %v12460_v25, %v3199_v14  ;;  %v3204_v12 = vadd.f32 %v10399_v50, %v12450_v38  ;;  %10478 = vmatmul.mubr.bf16.vlgmr.msra.gmra.mxu0 %v9317_v31 }
 0x274   : > { %v3582_v33 = vrot.slane %v3580_v53, 7  ;;  %10434 = vmatmul.mubr.bf16.gmra.mxu1 %v9295_v56  ;;  %v3556_v46 = vrot.slane %v12574_v49, 4  ;;  %v3563_v20 = vor.u32 %v3561_v55, %v12576_v61  ;;  %v3123_v11 = vpop.f32.mrf.mxu0  ;;  %v3593_v32 = vshrl.u32 %v12611_v21, 16  ;;  %10558 = vmatpush3.bf16.msra.mxu0 %v14714_v1  ;;  %v12646_v42 = vld [vmem:[#allocation3 + $0x6c] sm:$0xf] }
 0x275   : > { %3429 = vst [vmem:[#allocation3 + $0x94] sm:$0xf] %v9670_v41  ;;  %v9708_v9 = vpack.c.bf16 %v3272_v23, %v3271_v57  ;;  %v3270_v13 = vmax.f32 %v3238_v4, 0.0  ;;  %v3243_v14 = vadd.f32 %v12460_v25, %v3204_v12  ;;  %v3202_v38 = vadd.f32 %v3123_v11, %v12453_v10  ;;  %10514 = vmatpush3.bf16.msra.mxu1 %v10888_v19  ;;  %v10894_v57 = vld [vmem:[%s14553_s4 + $0x98] sm:$0xff]   ;;  %v10903_v41 = vld [vmem:[%s14553_s4 + $0xe8] sm:$0xff]  }
 0x276   : > { %10559 = vmatprep.subr.bf16.mxu0 %v10901_v8  ;;  %v3564_v31 = vsel %vm11976_vm11, %v3556_v46, %v3563_v20  ;;  %v12638_v49 = vrot.slane %v3593_v32, 7  ;;  %v3596_v61 = vshll.u32 %v12611_v21, 16  ;;  %v3602_v55 = vshrl.u32 %v12628_v60, 16  ;;  %v10400_v50 = vpop.f32.mrf.mxu0  ;;  %10515 = vmatprep.subr.bf16.mxu1 %v10891_v29 }
 0x277   : > { %9733 = vst [vmem:[#allocation3 + $0xa8] sm:$0xff] %v9708_v9   ;;  %v9671_v53 = vpack.c.bf16 %v3270_v13, %v3270_v13  ;;  %v3275_v10 = vmax.f32 %v3243_v14, 0.0  ;;  %v9318_v19 = vcombine.low %v3555_v63, %v3564_v31  ;;  %v3241_v56 = vadd.f32 %v12460_v25, %v3202_v38  ;;  %v14715_v38 = vld [vmem:[#allocation11_spill] sm:$0xff] }
 0x278   : > { %v3604_v23 = vrot.slane %v3602_v55, 7  ;;  %v3605_v4 = vshll.u32 %v12628_v60, 16  ;;  %v9296_v12 = vcombine.low %v12611_v21, %v12628_v60  ;;  %v3205_v46 = vadd.f32 %v10400_v50, %v12465_v7  ;;  %v3126_v20 = vpop.f32.mrf.mxu0  ;;  %10560 = vmatpush3.bf16.msra.mxu0 %v10901_v8  ;;  %v12658_v9 = vld [vmem:[#allocation3 + $0x70] sm:$0xf] }
 0x279   : > { %3430 = vst [vmem:[#allocation3 + $0x98] sm:$0xf] %v9671_v53  ;;  %10481 = vmatprep.mubr.bf16.mxu0 %v9318_v19  ;;  %v3273_v63 = vmax.f32 %v3241_v56, 0.0  ;;  %v3203_v11 = vadd.f32 %v3126_v20, %v12471_v24  ;;  %v3576_v32 = vor.u32 %v3574_v59, %v12605_v39  ;;  %v3578_v1 = vrot.slane %v12605_v39, 4  ;;  %10516 = vmatpush3.bf16.msra.mxu1 %v10891_v29  ;;  %v10906_v21 = vld [vmem:[%s14553_s4 + $0xe0] sm:$0xff]   ;;  %v10897_v39 = vld [vmem:[%s14553_s4 + $0x90] sm:$0xff]  }
 0x27a   : > { %10437 = vmatprep.mubr.bf16.mxu1 %v9296_v12  ;;  %v3244_v7 = vadd.f32 %v12460_v25, %v3205_v46  ;;  %v10403_v8 = vpop.f32.mrf.mxu0  ;;  %v3585_v60 = vor.u32 %v3583_v40, %v3582_v33  ;;  %v3615_v13 = vshrl.u32 %v12646_v42, 16  ;;  %v3618_v24 = vshll.u32 %v12646_v42, 16  ;;  %10517 = vmatprep.subr.bf16.mxu1 %v10894_v57  ;;  %v12683_v46 = vld [vmem:[#allocation3 + $0x80] sm:$0xf]  ;;  %v10908_v20 = vld [vmem:[%s14553_s4 + $0xd8] sm:$0xff]  }
 0x27b   : > { %v9674_v59 = vpack.c.bf16 %v3273_v63, %v3273_v63  ;;  %v3242_v29 = vadd.f32 %v12460_v25, %v3203_v11  ;;  %v3208_v14 = vadd.f32 %v10403_v8, %v12481_v58  ;;  %v3577_v31 = vsel %vm11976_vm11, %v14715_v38, %v3576_v32  ;;  %10561 = vmatprep.subr.bf16.mxu0 %v10903_v41 }
 0x27c   : > { %v3276_v40 = vmax.f32 %v3244_v7, 0.0  ;;  %v3586_v33 = vsel %vm11976_vm11, %v3578_v1, %v3585_v60  ;;  %v12676_v55 = vrot.slane %v3615_v13, 7  ;;  %v3624_v50 = vshrl.u32 %v12658_v9, 16  ;;  %v3139_v53 = vpop.f32.mrf.mxu0  ;;  %10562 = vmatpush3.bf16.msra.mxu0 %v10903_v41  ;;  %v12691_v1 = vld [vmem:[#allocation3 + $0x84] sm:$0xf] }
 0x27d   : > { %3433 = vst [vmem:[#allocation3 + $0xbc] sm:$0xf] %v9674_v59  ;;  %v3274_v19 = vmax.f32 %v3242_v29, 0.0  ;;  %v12680_v56 = vadd.f32 %v12460_v25, %v3208_v14  ;;  %v9319_v58 = vcombine.low %v3577_v31, %v3586_v33  ;;  %v3627_v12 = vshll.u32 %v12658_v9, 16  ;;  %10518 = vmatpush3.bf16.msra.mxu1 %v10894_v57  ;;  %10563 = vmatprep.subr.bf16.mxu0 %v10906_v21  ;;  %v10902_v57 = vld [vmem:[%s14553_s4 + $0x88] sm:$0xff]  }
 0x27e   : > { %v9713_v63 = vpack.c.bf16 %v3276_v40, %v3275_v10  ;;  %v3626_v11 = vrot.slane %v3624_v50, 7  ;;  %v9297_v41 = vcombine.low %v12646_v42, %v12658_v9  ;;  %v3598_v32 = vor.u32 %v3596_v61, %v12638_v49  ;;  %v10404_v7 = vpop.f32.mrf.mxu0  ;;  %10519 = vmatprep.subr.bf16.mxu1 %v10897_v39  ;;  %v14716_v9 = vld [vmem:[#allocation10_spill] sm:$0xff] }
 0x27f   : > { %v9675_v8 = vpack.c.bf16 %v3274_v19, %v3274_v19  ;;  %v3279_v60 = vmax.f32 %v12680_v56, 0.0  ;;  %10482 = vmatmul.mubr.bf16.gmra.mxu0 %v9319_v58  ;;  %v3600_v10 = vrot.slane %v12638_v49, 4  ;;  %v3607_v13 = vor.u32 %v3605_v4, %v3604_v23  ;;  %v12717_v19 = vld [vmem:[#allocation3 + $0x94] sm:$0xf] }
 0x280   : > { %9734 = vst [vmem:[#allocation3 + $0xd0] sm:$0xff] %v9713_v63   ;;  %10438 = vmatmul.mubr.bf16.gmra.mxu1 %v9297_v41  ;;  %v3599_v61 = vsel %vm11976_vm11, %v14716_v9, %v3598_v32  ;;  %v3206_v59 = vadd.f32 %v3139_v53, %v12484_v51  ;;  %v3637_v29 = vshrl.u32 %v12683_v46, 16  ;;  %v3640_v14 = vshll.u32 %v12683_v46, 16  ;;  %v3142_v38 = vpop.f32.mrf.mxu0  ;;  %10564 = vmatpush3.bf16.msra.mxu0 %v10906_v21  ;;  %v10910_v51 = vld [vmem:[%s14553_s4 + $0xd0] sm:$0xff]   ;;  %v12736_v42 = vld [vmem:[#allocation3 + $0x98] sm:$0xf] }
 0x281   : > { %3434 = vst [vmem:[#allocation3 + $0xc0] sm:$0xf] %v9675_v8  ;;  %v3608_v31 = vsel %vm11976_vm11, %v3600_v10, %v3607_v13  ;;  %v3646_v49 = vshrl.u32 %v12691_v1, 16  ;;  %v3649_v23 = vshll.u32 %v12691_v1, 16  ;;  %v9298_v4 = vcombine.low %v12683_v46, %v12691_v1  ;;  %10520 = vmatpush3.bf16.msra.mxu1 %v10897_v39  ;;  %10565 = vmatprep.subr.bf16.mxu0 %v10908_v20  ;;  %v10907_v39 = vld [vmem:[%s14553_s4 + $0x80] sm:$0xff]   ;;  %v10911_v9 = vld [vmem:[%s14553_s4 + $0xc8] sm:$0xff]  }
 0x282   : > { %v9320_v40 = vcombine.low %v3599_v61, %v3608_v31  ;;  %v3245_v21 = vadd.f32 %v12460_v25, %v3206_v59  ;;  %v12714_v33 = vrot.slane %v3637_v29, 7  ;;  %v3209_v50 = vadd.f32 %v10404_v7, %v12490_v22  ;;  %v10407_v53 = vpop.f32.mrf.mxu0  ;;  %10521 = vmatprep.subr.bf16.mxu1 %v10902_v57  ;;  %v12751_v31 = vld [vmem:[%s14553_s4 + $0x138] sm:$0xff]  }
 0x283   : > { %v3648_v56 = vrot.slane %v3646_v49, 7  ;;  %10441 = vmatprep.mubr.bf16.mxu1 %v9298_v4  ;;  %v3207_v58 = vadd.f32 %v3142_v38, %v12500_v37  ;;  %v3212_v46 = vadd.f32 %v10407_v53, %v12504_v26  ;;  %v3620_v63 = vor.u32 %v3618_v24, %v12676_v55  ;;  %v14717_v37 = vld [vmem:[#allocation13_spill] sm:$0xff] }
 0x284   : > { %10485 = vmatprep.mubr.bf16.mxu0 %v9320_v40  ;;  %v3277_v22 = vmax.f32 %v3245_v21, 0.0  ;;  %v3248_v41 = vadd.f32 %v12460_v25, %v3209_v50  ;;  %v3622_v32 = vrot.slane %v12676_v55, 4  ;;  %v3629_v1 = vor.u32 %v3627_v12, %v3626_v11  ;;  %v3155_v7 = vpop.f32.mrf.mxu0  ;;  %10566 = vmatpush3.bf16.msra.mxu0 %v10908_v20  ;;  %v12757_v50 = vld [vmem:[#allocation3 + $0xac] sm:$0xf] }
 0x285   : > { %v3246_v8 = vadd.f32 %v12460_v25, %v3207_v58  ;;  %v12731_v10 = vadd.f32 %v12460_v25, %v3212_v46  ;;  %v3621_v26 = vsel %vm11976_vm11, %v14717_v37, %v3620_v63  ;;  %v3659_v24 = vshrl.u32 %v12717_v19, 16  ;;  %10522 = vmatpush3.bf16.msra.mxu1 %v10902_v57  ;;  %10567 = vmatprep.subr.bf16.mxu0 %v10910_v51  ;;  %v12746_v57 = vld [vmem:[#allocation3 + $0xa8] sm:$0xf] }
 0x286   : > { %v9678_v13 = vpack.c.bf16 %v3277_v22, %v3277_v22  ;;  %v3280_v55 = vmax.f32 %v3248_v41, 0.0  ;;  %v3630_v12 = vsel %vm11976_vm11, %v3622_v32, %v3629_v1  ;;  %v3662_v20 = vshll.u32 %v12717_v19, 16  ;;  %v10408_v11 = vpop.f32.mrf.mxu0  ;;  %10523 = vmatprep.subr.bf16.mxu1 %v10907_v39 }
 0x287   : > { %v3278_v61 = vmax.f32 %v3246_v8, 0.0  ;;  %v3283_v59 = vmax.f32 %v12731_v10, 0.0  ;;  %v9321_v29 = vcombine.low %v3621_v26, %v3630_v12  ;;  %v3661_v38 = vrot.slane %v3659_v24, 7  ;;  %v12778_v26 = vld [vmem:[#allocation3 + $0xbc] sm:$0xf] }
 0x288   : > { %3437 = vst [vmem:[#allocation3 + $0xe4] sm:$0xf] %v9678_v13  ;;  %v9718_v49 = vpack.c.bf16 %v3280_v55, %v3279_v60  ;;  %v3668_v4 = vshrl.u32 %v12736_v42, 16  ;;  %v3671_v40 = vshll.u32 %v12736_v42, 16  ;;  %v9299_v21 = vcombine.low %v12717_v19, %v12736_v42  ;;  %v3158_v53 = vpop.f32.mrf.mxu0  ;;  %10568 = vmatpush3.bf16.msra.mxu0 %v10910_v51  ;;  %v10913_v60 = vld [vmem:[%s14553_s4 + $0xc0] sm:$0xff]  }
 0x289   : > { %v9679_v58 = vpack.c.bf16 %v3278_v61, %v3278_v61  ;;  %10486 = vmatmul.mubr.bf16.gmra.mxu0 %v9321_v29  ;;  %v3642_v46 = vor.u32 %v3640_v14, %v12714_v33  ;;  %v3644_v63 = vrot.slane %v12714_v33, 4  ;;  %v3651_v22 = vor.u32 %v3649_v23, %v3648_v56  ;;  %10524 = vmatpush3.bf16.msra.mxu1 %v10907_v39  ;;  %v14718_v14 = vld [vmem:[#allocation12_spill] sm:$0xff] }
 0x28a   : > { %9735 = vst [vmem:[#allocation3 + $0xf8] sm:$0xff] %v9718_v49   ;;  %v3670_v41 = vrot.slane %v3668_v4, 7  ;;  %10442 = vmatmul.mubr.bf16.gmra.mxu1 %v9299_v21  ;;  %v3210_v19 = vadd.f32 %v3155_v7, %v12512_v6  ;;  %v3681_v32 = vshrl.u32 %v12746_v57, 16  ;;  %v3684_v51 = vshll.u32 %v12746_v57, 16  ;;  %v10411_v1 = vpop.f32.mrf.mxu0  ;;  %10569 = vmatprep.subr.bf16.mxu0 %v10911_v9  ;;  %v12786_v61 = vld [vmem:[%s14553_s4 + $0x178] sm:$0xff]  }
 0x28b   : > { %3438 = vst [vmem:[#allocation3 + $0xe8] sm:$0xf] %v9679_v58  ;;  %v3643_v23 = vsel %vm11976_vm11, %v14718_v14, %v3642_v46  ;;  %v3652_v33 = vsel %vm11976_vm11, %v3644_v63, %v3651_v22  ;;  %v3690_v39 = vshrl.u32 %v12757_v50, 16  ;;  %v3693_v56 = vshll.u32 %v12757_v50, 16  ;;  %10605 = vmatprep.subr.bf16.mxu1 %v12751_v31 }
 0x28c   : > { %v9322_v6 = vcombine.low %v3643_v23, %v3652_v33  ;;  %v3249_v7 = vadd.f32 %v12460_v25, %v3210_v19  ;;  %v3683_v8 = vrot.slane %v3681_v32, 7  ;;  %v9300_v37 = vcombine.low %v12746_v57, %v12757_v50  ;;  %v3171_v42 = vpop.f32.mrf.mxu0  ;;  %10570 = vmatpush3.bf16.msra.mxu0 %v10911_v9  ;;  %v14719_v50 = vld [vmem:[#allocation14_spill] sm:$0xff]  ;;  %v3481_v23 = vld [vmem:[#allocation3 + $0xd4] sm:$0xf] }
 0x28d   : > { %v3692_v24 = vrot.slane %v3690_v39, 7  ;;  %v3213_v13 = vadd.f32 %v10408_v11, %v12522_v16  ;;  %v3211_v55 = vadd.f32 %v3158_v53, %v12524_v0  ;;  %v3216_v12 = vadd.f32 %v10411_v1, %v12527_v52  ;;  %10571 = vmatprep.subr.bf16.mxu0 %v10913_v60  ;;  %v3478_v52 = vld [vmem:[#allocation3 + $0xc0] sm:$0xf] }
 0x28e   : > { %10489 = vmatprep.mubr.bf16.mxu0 %v9322_v6  ;;  %v3281_v29 = vmax.f32 %v3249_v7, 0.0  ;;  %10445 = vmatprep.mubr.bf16.mxu1 %v9300_v37  ;;  %v3664_v57 = vor.u32 %v3662_v20, %v3661_v38  ;;  %v3666_v49 = vrot.slane %v3661_v38, 4  ;;  %v3673_v4 = vor.u32 %v3671_v40, %v3670_v41  ;;  %v10412_v40 = vpop.f32.mrf.mxu0  ;;  %v3480_v41 = vld [vmem:[#allocation3 + $0xd0] sm:$0xf] }
 0x28f   : > { %v3252_v9 = vadd.f32 %v12460_v25, %v3213_v13  ;;  %v3250_v16 = vadd.f32 %v12460_v25, %v3211_v55  ;;  %v12791_v0 = vadd.f32 %v12460_v25, %v3216_v12  ;;  %v3703_v11 = vshrl.u32 %v12778_v26, 16 }
 0x290   : > { %v9682_v21 = vpack.c.bf16 %v3281_v29, %v3281_v29  ;;  %v3665_v53 = vsel %vm11976_vm11, %v14719_v50, %v3664_v57  ;;  %v3674_v20 = vsel %vm11976_vm11, %v3666_v49, %v3673_v4  ;;  %v3706_v38 = vshll.u32 %v12778_v26, 16  ;;  %10572 = vmatpush3.bf16.msra.mxu0 %v10913_v60  ;;  %v3174_v12 = vpop.f32.mrf.mxu0  ;;  %v14720_v29 = vld [vmem:[#allocation16_spill] sm:$0xff] }
 0x291   : > { %v3284_v58 = vmax.f32 %v3252_v9, 0.0  ;;  %v3282_v46 = vmax.f32 %v3250_v16, 0.0  ;;  %v3287_v63 = vmax.f32 %v12791_v0, 0.0  ;;  %v9323_v22 = vcombine.low %v3665_v53, %v3674_v20  ;;  %10653 = vmatprep.subr.bf16.mxu0 %v12786_v61 }
 0x292   : > { %3441 = vst [vmem:[#allocation3 + $0x10c] sm:$0xf] %v9682_v21  ;;  %v3705_v19 = vrot.slane %v3703_v11, 7  ;;  %v3712_v32 = vshrl.u32 %v3478_v52, 16  ;;  %v3715_v1 = vshll.u32 %v3478_v52, 16  ;;  %v9301_v14 = vcombine.low %v12778_v26, %v3478_v52 }
 0x293   : > { %v9723_v33 = vpack.c.bf16 %v3284_v58, %v3283_v59  ;;  %v9683_v39 = vpack.c.bf16 %v3282_v46, %v3282_v46  ;;  %10490 = vmatmul.mubr.bf16.gmra.mxu0 %v9323_v22  ;;  %v3686_v60 = vor.u32 %v3684_v51, %v3683_v8  ;;  %v3688_v6 = vrot.slane %v3683_v8, 4  ;;  %v3484_v16 = vld [vmem:[#allocation3 + $0xe8] sm:$0xf]  ;;  %v14721_v22 = vld [vmem:[#allocation18_spill] sm:$0xff] }
 0x294   : > { %v3714_v7 = vrot.slane %v3712_v32, 7  ;;  %10446 = vmatmul.mubr.bf16.gmra.mxu1 %v9301_v14  ;;  %v3695_v37 = vor.u32 %v3693_v56, %v3692_v24  ;;  %v3214_v13 = vadd.f32 %v3171_v42, %v12536_v27  ;;  %v3725_v55 = vshrl.u32 %v3480_v41, 16  ;;  %v3483_v24 = vld [vmem:[#allocation3 + $0xe4] sm:$0xf]  ;;  %v3487_v14 = vld [vmem:[#allocation3 + $0xfc] sm:$0xf] }
 0x295   : > { %9736 = vst [vmem:[#allocation3 + $0x120] sm:$0xff] %v9723_v33   ;;  %3442 = vst [vmem:[#allocation3 + $0x110] sm:$0xf] %v9683_v39  ;;  %v3687_v26 = vsel %vm11976_vm11, %v14720_v29, %v3686_v60  ;;  %v3728_v57 = vshll.u32 %v3480_v41, 16  ;;  %v3734_v10 = vshrl.u32 %v3481_v23, 16  ;;  %v3737_v59 = vshll.u32 %v3481_v23, 16 }
 0x296   : > { %v3696_v51 = vsel %vm11976_vm11, %v3688_v6, %v3695_v37  ;;  %v3253_v8 = vadd.f32 %v12460_v25, %v3214_v13  ;;  %v3727_v49 = vrot.slane %v3725_v55, 7  ;;  %v9302_v56 = vcombine.low %v3480_v41, %v3481_v23  ;;  %v3486_v41 = vld [vmem:[#allocation3 + $0xf8] sm:$0xf]  ;;  %v14722_v13 = vld [vmem:[#allocation20_spill] sm:$0xff] }
 0x297   : > { %v9324_v27 = vcombine.low %v3687_v26, %v3696_v51  ;;  %v3736_v42 = vrot.slane %v3734_v10, 7  ;;  %v3217_v4 = vadd.f32 %v10412_v40, %v12563_v54  ;;  %v3215_v9 = vadd.f32 %v3174_v12, %v12565_v47 }
 0x298   : > { %v3285_v0 = vmax.f32 %v3253_v8, 0.0  ;;  %10449 = vmatprep.mubr.bf16.mxu1 %v9302_v56  ;;  %v3708_v52 = vor.u32 %v3706_v38, %v3705_v19  ;;  %v3710_v11 = vrot.slane %v3705_v19, 4  ;;  %v3717_v21 = vor.u32 %v3715_v1, %v3714_v7 }
 0x299   : > { %10493 = vmatprep.mubr.bf16.mxu0 %v9324_v27  ;;  %v3256_v50 = vadd.f32 %v12460_v25, %v3217_v4  ;;  %v3254_v53 = vadd.f32 %v12460_v25, %v3215_v9  ;;  %v3747_v20 = vshrl.u32 %v3483_v24, 16  ;;  %v3750_v58 = vshll.u32 %v3483_v24, 16  ;;  %v3489_v10 = vld [vmem:[#allocation3 + $0x10c] sm:$0xf] }
 0x29a   : > { %v9686_v46 = vpack.c.bf16 %v3285_v0, %v3285_v0  ;;  %v3709_v54 = vsel %vm11976_vm11, %v14721_v22, %v3708_v52  ;;  %v3718_v47 = vsel %vm11976_vm11, %v3710_v11, %v3717_v21  ;;  %v3756_v40 = vshrl.u32 %v3484_v16, 16 }
 0x29b   : > { %v3288_v38 = vmax.f32 %v3256_v50, 0.0  ;;  %v3286_v19 = vmax.f32 %v3254_v53, 0.0  ;;  %v9325_v32 = vcombine.low %v3709_v54, %v3718_v47  ;;  %v3749_v1 = vrot.slane %v3747_v20, 7 }
 0x29c   : > { %3445 = vst [vmem:[#allocation3 + $0x134] sm:$0xf] %v9686_v46  ;;  %v3758_v23 = vrot.slane %v3756_v40, 7  ;;  %v3759_v25 = vshll.u32 %v3484_v16, 16  ;;  %v9303_v33 = vcombine.low %v3483_v24, %v3484_v16  ;;  %v3730_v39 = vor.u32 %v3728_v57, %v3727_v49  ;;  %v3490_v56 = vld [vmem:[#allocation3 + $0x110] sm:$0xf] }
 0x29d   : > { %v9728_v60 = vpack.c.bf16 %v3288_v38, %v3287_v63  ;;  %v9687_v6 = vpack.c.bf16 %v3286_v19, %v3286_v19  ;;  %10494 = vmatmul.mubr.bf16.gmra.mxu0 %v9325_v32  ;;  %v3732_v7 = vrot.slane %v3727_v49, 4  ;;  %v3739_v37 = vor.u32 %v3737_v59, %v3736_v42  ;;  %v14723_v42 = vld [vmem:[#allocation26_spill] sm:$0xff]  ;;  %v3492_v52 = vld [vmem:[#allocation3 + $0x120] sm:$0xf]  ;;  %v3493_v20 = vld [vmem:[#allocation3 + $0x124] sm:$0xf] }
 0x29e   : > { %10450 = vmatmul.mubr.bf16.gmra.mxu1 %v9303_v33  ;;  %v3731_v55 = vsel %vm11976_vm11, %v14722_v13, %v3730_v39  ;;  %v3769_v12 = vshrl.u32 %v3486_v41, 16  ;;  %v3772_v29 = vshll.u32 %v3486_v41, 16  ;;  %v3778_v26 = vshrl.u32 %v3487_v14, 16 }
 0x29f   : > { %9737 = vst [vmem:[#allocation3 + $0x148] sm:$0xff] %v9728_v60   ;;  %3446 = vst [vmem:[#allocation3 + $0x138] sm:$0xf] %v9687_v6  ;;  %v3740_v51 = vsel %vm11976_vm11, %v3732_v7, %v3739_v37  ;;  %v3781_v57 = vshll.u32 %v3487_v14, 16  ;;  %v9304_v63 = vcombine.low %v3486_v41, %v3487_v14  ;;  %v3752_v8 = vor.u32 %v3750_v58, %v3749_v1  ;;  %v14724_v41 = vld [vmem:[#allocation28_spill] sm:$0xff] }
 0x2a0   : > { %v9326_v49 = vcombine.low %v3731_v55, %v3740_v51  ;;  %v3771_v59 = vrot.slane %v3769_v12, 7  ;;  %v3780_v24 = vrot.slane %v3778_v26, 7  ;;  %v3754_v27 = vrot.slane %v3749_v1, 4 }
 0x2a1   : > { %10453 = vmatprep.mubr.bf16.mxu1 %v9304_v63  ;;  %v3753_v4 = vsel %vm11976_vm11, %v14723_v42, %v3752_v8  ;;  %v3761_v9 = vor.u32 %v3759_v25, %v3758_v23  ;;  %v3791_v16 = vshrl.u32 %v3489_v10, 16  ;;  %v3794_v0 = vshll.u32 %v3489_v10, 16 }
 0x2a2   : > { %10497 = vmatprep.mubr.bf16.mxu0 %v9326_v49  ;;  %v3800_v11 = vshrl.u32 %v3490_v56, 16  ;;  %v3803_v21 = vshll.u32 %v3490_v56, 16  ;;  %v9305_v50 = vcombine.low %v3489_v10, %v3490_v56  ;;  %v3774_v53 = vor.u32 %v3772_v29, %v3771_v59 }
 0x2a3   : > { %v3762_v58 = vsel %vm11976_vm11, %v3754_v27, %v3761_v9  ;;  %v3793_v46 = vrot.slane %v3791_v16, 7  ;;  %v3776_v22 = vrot.slane %v3771_v59, 4  ;;  %v3783_v54 = vor.u32 %v3781_v57, %v3780_v24  ;;  %v3495_v32 = vld [vmem:[#allocation3 + $0x134] sm:$0xf]  ;;  %v4465_v57 = vld [vmem:[#allocation3 + $0x1c] sm:$0xf] }
 0x2a4   : > { %v9327_v47 = vcombine.low %v3753_v4, %v3762_v58  ;;  %v3802_v40 = vrot.slane %v3800_v11, 7  ;;  %v3775_v38 = vsel %vm11976_vm11, %v14724_v41, %v3774_v53  ;;  %v3813_v19 = vshrl.u32 %v3492_v52, 16  ;;  %v4466_v59 = vld [vmem:[#allocation3 + $0x20] sm:$0xf] }
 0x2a5   : > { %v3784_v1 = vsel %vm11976_vm11, %v3776_v22, %v3783_v54  ;;  %v3816_v14 = vshll.u32 %v3492_v52, 16  ;;  %v3822_v23 = vshrl.u32 %v3493_v20, 16  ;;  %v3825_v25 = vshll.u32 %v3493_v20, 16 }
 0x2a6   : > { %10498 = vmatmul.mubr.bf16.gmra.mxu0 %v9327_v47  ;;  %10454 = vmatmul.mubr.bf16.gmra.mxu1 %v9305_v50  ;;  %v9328_v33 = vcombine.low %v3775_v38, %v3784_v1  ;;  %v3815_v39 = vrot.slane %v3813_v19, 7  ;;  %v9306_v60 = vcombine.low %v3492_v52, %v3493_v20  ;;  %v3796_v6 = vor.u32 %v3794_v0, %v3793_v46  ;;  %v3496_v7 = vld [vmem:[#allocation3 + $0x138] sm:$0xf]  ;;  %v5220_v52 = vld [vmem:[#allocation3 + $0x1c] sm:$0xf] }
 0x2a7   : > { %v3824_v37 = vrot.slane %v3822_v23, 7  ;;  %v3798_v13 = vrot.slane %v3793_v46, 4  ;;  %v3805_v55 = vor.u32 %v3803_v21, %v3802_v40  ;;  %v3835_v12 = vshrl.u32 %v3495_v32, 16  ;;  %v5221_v20 = vld [vmem:[#allocation3 + $0x20] sm:$0xf] }
 0x2a8   : > { %10501 = vmatprep.mubr.bf16.mxu0 %v9328_v33  ;;  %10457 = vmatprep.mubr.bf16.mxu1 %v9306_v60  ;;  %v3797_v29 = vsel %vm11976_vm11, %v12394_v44, %v3796_v6  ;;  %v3838_v26 = vshll.u32 %v3495_v32, 16  ;;  %v3844_v10 = vshrl.u32 %v3496_v7, 16  ;;  %v3847_v51 = vshll.u32 %v3496_v7, 16  ;;  %v4468_v47 = vld [vmem:[#allocation3 + $0x30] sm:$0xf] }
 0x2a9   : > { %v3806_v63 = vsel %vm11976_vm11, %v3798_v13, %v3805_v55  ;;  %v3837_v8 = vrot.slane %v3835_v12, 7  ;;  %v9307_v56 = vcombine.low %v3495_v32, %v3496_v7  ;;  %v3818_v49 = vor.u32 %v3816_v14, %v3815_v39  ;;  %v4469_v19 = vld [vmem:[#allocation3 + $0x34] sm:$0xf]  ;;  %v5223_v13 = vld [vmem:[#allocation3 + $0x30] sm:$0xf] }
 0x2aa   : > { %v9329_v24 = vcombine.low %v3797_v29, %v3806_v63  ;;  %v3846_v27 = vrot.slane %v3844_v10, 7  ;;  %v3820_v42 = vrot.slane %v3815_v39, 4  ;;  %v3827_v4 = vor.u32 %v3825_v25, %v3824_v37 }
 0x2ab   : > { %v3819_v9 = vsel %vm11976_vm11, %v12412_v48, %v3818_v49  ;;  %v3840_v44 = vor.u32 %v3838_v26, %v3837_v8  ;;  %v3842_v16 = vrot.slane %v3837_v8, 4  ;;  %v4538_v0 = vshrl.u32 %v4465_v57, 16  ;;  %v5224_v49 = vld [vmem:[#allocation3 + $0x34] sm:$0xf] }
 0x2ac   : > { %v3828_v11 = vsel %vm11976_vm11, %v3820_v42, %v3827_v4  ;;  %v3849_v21 = vor.u32 %v3847_v51, %v3846_v27  ;;  %v4541_v50 = vshll.u32 %v4465_v57, 16  ;;  %v4547_v53 = vshll.u32 %v4466_v59, 16 }
 0x2ad   : > { %v9330_v58 = vcombine.low %v3819_v9, %v3828_v11  ;;  %v3841_v46 = vsel %vm11976_vm11, %v12441_v28, %v3840_v44  ;;  %v4540_v22 = vrot.slane %v4538_v0, 4  ;;  %v4551_v54 = vshrl.u32 %v4466_v59, 16  ;;  %v4472_v11 = vld [vmem:[#allocation3 + $0x48] sm:$0xf] }
 0x2ae   : > { %10502 = vmatmul.mubr.bf16.gmra.mxu0 %v9329_v24  ;;  %10458 = vmatmul.mubr.bf16.gmra.mxu1 %v9307_v56  ;;  %v3850_v48 = vsel %vm11976_vm11, %v3842_v16, %v3849_v21  ;;  %v4543_v40 = vrot.slane %v4541_v50, 5  ;;  %v4549_v41 = vrot.slane %v4547_v53, 5  ;;  %v5273_v38 = vshrl.u32 %v5220_v52, 16  ;;  %v4471_v24 = vld [vmem:[#allocation3 + $0x44] sm:$0xf] }
 0x2af   : > { %10505 = vmatprep.mubr.bf16.mxu0 %v9330_v58  ;;  %v9331_v32 = vcombine.low %v3841_v46, %v3850_v48  ;;  %10525 = vmatprep.mubr.bf16.mxu1 %v12475_v34  ;;  %v4553_v1 = vrot.slane %v4551_v54, 4  ;;  %v5276_v14 = vshll.u32 %v5220_v52, 16  ;;  %v5282_v23 = vshrl.u32 %v5221_v20, 16  ;;  %v5226_v54 = vld [vmem:[#allocation3 + $0x44] sm:$0xf] }
 0x2b0   : > { %v4544_v28 = vor.u32 %v4543_v40, %v4540_v22  ;;  %v5275_v25 = vrot.slane %v5273_v38, 7  ;;  %v5285_v33 = vshll.u32 %v5221_v20, 16  ;;  %v4562_v39 = vshrl.u32 %v4468_v47, 16  ;;  %v5227_v38 = vld [vmem:[#allocation3 + $0x48] sm:$0xf] }
 0x2b1   : > { %v4554_v60 = vor.u32 %v4553_v1, %v4549_v41  ;;  %v5284_v6 = vrot.slane %v5282_v23, 7  ;;  %v4565_v7 = vshll.u32 %v4468_v47, 16  ;;  %v4571_v37 = vshll.u32 %v4469_v19, 16  ;;  %v10915_v23 = vld [vmem:[%s14553_s4 + $0x128] sm:$0xff]  }
 0x2b2   : > { %v4545_v55 = vrot.slane %v4544_v28, 4  ;;  %v5278_v12 = vor.u32 %v5276_v14, %v5275_v25  ;;  %v5280_v29 = vrot.slane %v5275_v25, 4  ;;  %v4564_v26 = vrot.slane %v4562_v39, 4 }
 0x2b3   : > { %v4555_v10 = vrot.slane %v4554_v60, 4  ;;  %v5287_v51 = vor.u32 %v5285_v33, %v5284_v6  ;;  %v4567_v57 = vrot.slane %v4565_v7, 5  ;;  %v4573_v34 = vrot.slane %v4571_v37, 5  ;;  %v4474_v37 = vld [vmem:[#allocation3 + $0x58] sm:$0xf] }
 0x2b4   : > { %v4550_v63 = vsel %vm12431_vm0, %v4545_v55, %v4549_v41  ;;  %v5279_v8 = vsel %vm11976_vm11, %v12435_v15, %v5278_v12  ;;  %v4575_v56 = vshrl.u32 %v4469_v19, 16  ;;  %v5295_v59 = vshrl.u32 %v5223_v13, 16  ;;  %v10914_v15 = vld [vmem:[%s14553_s4 + $0x130] sm:$0xff]  }
 0x2b5   : > { %v4560_v27 = vsel %vm12431_vm0, %v4555_v10, %v12462_v3  ;;  %v5288_v42 = vsel %vm11976_vm11, %v5280_v29, %v5287_v51  ;;  %v4568_v4 = vor.u32 %v4567_v57, %v4564_v26  ;;  %v5298_v9 = vshll.u32 %v5223_v13, 16  ;;  %v4475_v29 = vld [vmem:[#allocation3 + $0x5c] sm:$0xf] }
 0x2b6   : > { %10506 = vmatmul.mubr.bf16.gmra.mxu0 %v9331_v32  ;;  %v9357_v44 = vcombine.low %v4550_v63, %v4560_v27  ;;  %v9412_v16 = vcombine.low %v5279_v8, %v5288_v42  ;;  %v4577_v0 = vrot.slane %v4575_v56, 4  ;;  %v5297_v52 = vrot.slane %v5295_v59, 7  ;;  %v5229_v59 = vld [vmem:[#allocation3 + $0x58] sm:$0xf] }
 0x2b7   : > { %v4569_v21 = vrot.slane %v4568_v4, 4  ;;  %v5304_v50 = vshrl.u32 %v5224_v49, 16  ;;  %v5307_v53 = vshll.u32 %v5224_v49, 16  ;;  %v4586_v20 = vshrl.u32 %v4471_v24, 16 }
 0x2b8   : > { %10526 = vmatmul.mubr.bf16.vlgmr.msra.gmra.mxu1 %v9357_v44  ;;  %10573 = vmatprep.mubr.bf16.mxu0 %v9412_v16  ;;  %v4578_v3 = vor.u32 %v4577_v0, %v4573_v34  ;;  %v5300_v58 = vor.u32 %v5298_v9, %v5297_v52  ;;  %v5302_v46 = vrot.slane %v5297_v52, 4  ;;  %v4589_v22 = vshll.u32 %v4471_v24, 16  ;;  %v5230_v52 = vld [vmem:[#allocation3 + $0x5c] sm:$0xf] }
 0x2b9   : > { %10606 = vmatpush3.bf16.msra.mxu1 %v12751_v31  ;;  %v4574_v47 = vsel %vm12431_vm0, %v4569_v21, %v4573_v34  ;;  %v5306_v48 = vrot.slane %v5304_v50, 7  ;;  %v4588_v40 = vrot.slane %v4586_v20, 4  ;;  %v4595_v41 = vshll.u32 %v4472_v11, 16  ;;  %v10920_v34 = vld [vmem:[%s14553_s4 + $0x170] sm:$0xff]  }
 0x2ba   : > { %v4579_v19 = vrot.slane %v4578_v3, 4  ;;  %v5301_v32 = vsel %vm11976_vm11, %v12468_v18, %v5300_v58  ;;  %10607 = vmatprep.subr.bf16.mxu1 %v10914_v15  ;;  %v4591_v1 = vrot.slane %v4589_v22, 5  ;;  %v4599_v14 = vshrl.u32 %v4472_v11, 16 }
 0x2bb   : > { %v5309_v31 = vor.u32 %v5307_v53, %v5306_v48  ;;  %v4597_v28 = vrot.slane %v4595_v41, 5  ;;  %v5317_v25 = vshrl.u32 %v5226_v54, 16  ;;  %v5320_v33 = vshll.u32 %v5226_v54, 16  ;;  %v4477_v53 = vld [vmem:[#allocation3 + $0x6c] sm:$0xf] }
 0x2bc   : > { %v4584_v39 = vsel %vm12431_vm0, %v4579_v19, %v12477_v35  ;;  %v4592_v60 = vor.u32 %v4591_v1, %v4588_v40  ;;  %v4601_v6 = vrot.slane %v4599_v14, 4  ;;  %v5326_v7 = vshrl.u32 %v5227_v38, 16  ;;  %v10916_v35 = vld [vmem:[%s14553_s4 + $0x120] sm:$0xff]  }
 0x2bd   : > { %v9358_v18 = vcombine.low %v4574_v47, %v4584_v39  ;;  %v5310_v13 = vsel %vm11976_vm11, %v5302_v46, %v5309_v31  ;;  %v5319_v55 = vrot.slane %v5317_v25, 7  ;;  %v5329_v12 = vshll.u32 %v5227_v38, 16  ;;  %10608 = vmatpush3.bf16.msra.mxu1 %v10914_v15  ;;  %v4478_v46 = vld [vmem:[#allocation3 + $0x70] sm:$0xf] }
 0x2be   : > { %v9413_v26 = vcombine.low %v5301_v32, %v5310_v13  ;;  %v4593_v10 = vrot.slane %v4592_v60, 4  ;;  %v4602_v51 = vor.u32 %v4601_v6, %v4597_v28  ;;  %v5328_v57 = vrot.slane %v5326_v7, 7  ;;  %10609 = vmatprep.subr.bf16.mxu1 %v10915_v23  ;;  %v5232_v32 = vld [vmem:[#allocation3 + $0x6c] sm:$0xf]  ;;  %v10918_v6 = vld [vmem:[%s14553_s4 + $0x110] sm:$0xff]   ;;  %v10923_v7 = vld [vmem:[%s14553_s4 + $0x160] sm:$0xff]  }
 0x2bf   : > { %10529 = vmatprep.mubr.bf16.mxu1 %v9358_v18  ;;  %v5322_v63 = vor.u32 %v5320_v33, %v5319_v55  ;;  %v5324_v8 = vrot.slane %v5319_v55, 4  ;;  %v4610_v56 = vshrl.u32 %v4474_v37, 16  ;;  %v4613_v49 = vshll.u32 %v4474_v37, 16 }
 0x2c0   : > { %10574 = vmatmul.mubr.bf16.vlgmr.msra.gmra.mxu0 %v9413_v26  ;;  %v4598_v24 = vsel %vm12431_vm0, %v4593_v10, %v4597_v28  ;;  %v4603_v27 = vrot.slane %v4602_v51, 4  ;;  %v5331_v42 = vor.u32 %v5329_v12, %v5328_v57  ;;  %v4619_v4 = vshll.u32 %v4475_v29, 16  ;;  %v5233_v28 = vld [vmem:[#allocation3 + $0x70] sm:$0xf]  ;;  %v14725_v12 = vld [vmem:[#allocation30_spill] sm:$0xff] }
 0x2c1   : > { %v5323_v9 = vsel %vm11976_vm11, %v12495_v30, %v5322_v63  ;;  %v4612_v44 = vrot.slane %v4610_v56, 4  ;;  %v4615_v16 = vrot.slane %v4613_v49, 5  ;;  %v4623_v0 = vshrl.u32 %v4475_v29, 16  ;;  %10610 = vmatpush3.bf16.msra.mxu1 %v10915_v23  ;;  %10654 = vmatpush3.bf16.msra.mxu0 %v12786_v61  ;;  %v10917_v61 = vld [vmem:[%s14553_s4 + $0x118] sm:$0xff]   ;;  %v4480_v57 = vld [vmem:[#allocation3 + $0x80] sm:$0xf] }
 0x2c2   : > { %v4608_v15 = vsel %vm12431_vm0, %v4603_v27, %v12514_v36  ;;  %v5332_v11 = vsel %vm11976_vm11, %v5324_v8, %v5331_v42  ;;  %v4621_v21 = vrot.slane %v4619_v4, 5  ;;  %v5339_v50 = vshrl.u32 %v5229_v59, 16  ;;  %10611 = vmatprep.subr.bf16.mxu1 %v10916_v35  ;;  %10655 = vmatprep.subr.bf16.mxu0 %v10920_v34  ;;  %v10922_v36 = vld [vmem:[%s14553_s4 + $0x168] sm:$0xff]   ;;  %v4481_v56 = vld [vmem:[#allocation3 + $0x84] sm:$0xf]  ;;  %v10925_v42 = vld [vmem:[%s14553_s4 + $0x158] sm:$0xff]  }
 0x2c3   : > { %v9359_v30 = vcombine.low %v4598_v24, %v4608_v15  ;;  %v9414_v20 = vcombine.low %v5323_v9, %v5332_v11  ;;  %v4616_v3 = vor.u32 %v4615_v16, %v4612_v44  ;;  %v4625_v58 = vrot.slane %v4623_v0, 4  ;;  %v10921_v27 = vld [vmem:[%s14553_s4 + $0x108] sm:$0xff]   ;;  %v5235_v0 = vld [vmem:[#allocation3 + $0x80] sm:$0xf] }
 0x2c4   : > { %v5341_v22 = vrot.slane %v5339_v50, 7  ;;  %v5342_v54 = vshll.u32 %v5229_v59, 16  ;;  %v5348_v47 = vshrl.u32 %v5230_v52, 16  ;;  %v5351_v48 = vshll.u32 %v5230_v52, 16 }
 0x2c5   : > { %10530 = vmatmul.mubr.bf16.gmra.mxu1 %v9359_v30  ;;  %10577 = vmatprep.mubr.bf16.mxu0 %v9414_v20  ;;  %v4617_v40 = vrot.slane %v4616_v3, 4  ;;  %v4626_v41 = vor.u32 %v4625_v58, %v4621_v21  ;;  %v4634_v38 = vshrl.u32 %v4477_v53, 16  ;;  %v4637_v19 = vshll.u32 %v4477_v53, 16  ;;  %v5236_v3 = vld [vmem:[#allocation3 + $0x84] sm:$0xf]  ;;  %v14726_v58 = vld [vmem:[#allocation29_spill] sm:$0xff] }
 0x2c6   : > { %v5344_v1 = vor.u32 %v5342_v54, %v5341_v22  ;;  %v5346_v14 = vrot.slane %v5341_v22, 4  ;;  %v5350_v23 = vrot.slane %v5348_v47, 7  ;;  %v4643_v31 = vshll.u32 %v4478_v46, 16  ;;  %10612 = vmatpush3.bf16.msra.mxu1 %v10916_v35  ;;  %10656 = vmatpush3.bf16.msra.mxu0 %v10920_v34  ;;  %v4483_v54 = vld [vmem:[#allocation3 + $0x94] sm:$0xf] }
 0x2c7   : > { %v4622_v25 = vsel %vm12431_vm0, %v4617_v40, %v4621_v21  ;;  %v4627_v33 = vrot.slane %v4626_v41, 4  ;;  %v4636_v39 = vrot.slane %v4634_v38, 4  ;;  %v4639_v60 = vrot.slane %v4637_v19, 5  ;;  %10613 = vmatprep.subr.bf16.mxu1 %v10917_v61  ;;  %10657 = vmatprep.subr.bf16.mxu0 %v10922_v36  ;;  %v10924_v38 = vld [vmem:[%s14553_s4 + $0x100] sm:$0xff]   ;;  %v10927_v19 = vld [vmem:[%s14553_s4 + $0x150] sm:$0xff]  }
 0x2c8   : > { %v5345_v37 = vsel %vm11976_vm11, %v12516_v2, %v5344_v1  ;;  %v5353_v18 = vor.u32 %v5351_v48, %v5350_v23  ;;  %v4645_v13 = vrot.slane %v4643_v31, 5  ;;  %v4647_v55 = vshrl.u32 %v4478_v46, 16  ;;  %v4484_v31 = vld [vmem:[#allocation3 + $0x98] sm:$0xf] }
 0x2c9   : > { %v4632_v29 = vsel %vm12431_vm0, %v4627_v33, %v14725_v12  ;;  %v4640_v26 = vor.u32 %v4639_v60, %v4636_v39  ;;  %v5361_v10 = vshrl.u32 %v5232_v32, 16  ;;  %v5364_v51 = vshll.u32 %v5232_v32, 16 }
 0x2ca   : > { %v9360_v35 = vcombine.low %v4622_v25, %v4632_v29  ;;  %v5354_v34 = vsel %vm11976_vm11, %v5346_v14, %v5353_v18  ;;  %v4649_v63 = vrot.slane %v4647_v55, 4  ;;  %v5370_v8 = vshrl.u32 %v5233_v28, 16  ;;  %10614 = vmatpush3.bf16.msra.mxu1 %v10917_v61  ;;  %10658 = vmatpush3.bf16.msra.mxu0 %v10922_v36  ;;  %v10928_v18 = vld [vmem:[%s14553_s4 + $0x148] sm:$0xff]  }
 0x2cb   : > { %v9415_v2 = vcombine.low %v5345_v37, %v5354_v34  ;;  %v4641_v49 = vrot.slane %v4640_v26, 4  ;;  %v5363_v59 = vrot.slane %v5361_v10, 7  ;;  %v5373_v24 = vshll.u32 %v5233_v28, 16  ;;  %10615 = vmatprep.subr.bf16.mxu1 %v10918_v6  ;;  %10659 = vmatprep.subr.bf16.mxu0 %v10923_v7  ;;  %v5238_v37 = vld [vmem:[#allocation3 + $0x94] sm:$0xf] }
 0x2cc   : > { %10533 = vmatprep.mubr.bf16.mxu1 %v9360_v35  ;;  %v4650_v4 = vor.u32 %v4649_v63, %v4645_v13  ;;  %v5372_v9 = vrot.slane %v5370_v8, 7  ;;  %v4658_v44 = vshrl.u32 %v4480_v57, 16  ;;  %v4661_v16 = vshll.u32 %v4480_v57, 16  ;;  %v5239_v10 = vld [vmem:[#allocation3 + $0x98] sm:$0xf] }
 0x2cd   : > { %10578 = vmatmul.mubr.bf16.gmra.mxu0 %v9415_v2  ;;  %v4646_v52 = vsel %vm12431_vm0, %v4641_v49, %v4645_v13  ;;  %v5366_v15 = vor.u32 %v5364_v51, %v5363_v59  ;;  %v5368_v11 = vrot.slane %v5363_v59, 4  ;;  %v4667_v21 = vshll.u32 %v4481_v56, 16  ;;  %v12946_v13 = vld [vmem:[%s14553_s4 + $0x1b8] sm:$0xff]  }
 0x2ce   : > { %v4651_v50 = vrot.slane %v4650_v4, 4  ;;  %v5375_v53 = vor.u32 %v5373_v24, %v5372_v9  ;;  %v4660_v30 = vrot.slane %v4658_v44, 4  ;;  %v4663_v20 = vrot.slane %v4661_v16, 5  ;;  %10616 = vmatpush3.bf16.msra.mxu1 %v10918_v6  ;;  %10660 = vmatpush3.bf16.msra.mxu0 %v10923_v7 }
 0x2cf   : > { %v5367_v46 = vsel %vm11976_vm11, %v14726_v58, %v5366_v15  ;;  %v4669_v61 = vrot.slane %v4667_v21, 5  ;;  %v4671_v36 = vshrl.u32 %v4481_v56, 16  ;;  %v5383_v22 = vshrl.u32 %v5235_v0, 16  ;;  %10617 = vmatprep.subr.bf16.mxu1 %v10921_v27  ;;  %10661 = vmatprep.subr.bf16.mxu0 %v10925_v42 }
 0x2d0   : > { %v4656_v47 = vsel %vm12431_vm0, %v4651_v50, %v12544_v45  ;;  %v5376_v48 = vsel %vm11976_vm11, %v5368_v11, %v5375_v53  ;;  %v4664_v40 = vor.u32 %v4663_v20, %v4660_v30  ;;  %v5386_v41 = vshll.u32 %v5235_v0, 16  ;;  %v4487_v0 = vld [vmem:[#allocation3 + $0xac] sm:$0xf]  ;;  %v5241_v20 = vld [vmem:[#allocation3 + $0xa8] sm:$0xf] }
 0x2d1   : > { %v9361_v32 = vcombine.low %v4646_v52, %v4656_v47  ;;  %v9416_v1 = vcombine.low %v5367_v46, %v5376_v48  ;;  %v4673_v14 = vrot.slane %v4671_v36, 4  ;;  %v5385_v23 = vrot.slane %v5383_v22, 7  ;;  %v12967_v36 = vld [vmem:[%s14553_s4 + $0x1f8] sm:$0xff]   ;;  %v14727_v22 = vld [vmem:[#allocation38_spill] sm:$0xff] }
 0x2d2   : > { %v4665_v28 = vrot.slane %v4664_v40, 4  ;;  %v5392_v45 = vshrl.u32 %v5236_v3, 16  ;;  %v5395_v25 = vshll.u32 %v5236_v3, 16  ;;  %v4682_v33 = vshrl.u32 %v4483_v54, 16  ;;  %10618 = vmatpush3.bf16.msra.mxu1 %v10921_v27  ;;  %10662 = vmatpush3.bf16.msra.mxu0 %v10925_v42  ;;  %v4486_v42 = vld [vmem:[#allocation3 + $0xa8] sm:$0xf] }
 0x2d3   : > { %10534 = vmatmul.mubr.bf16.gmra.mxu1 %v9361_v32  ;;  %10581 = vmatprep.mubr.bf16.mxu0 %v9416_v1  ;;  %v4674_v39 = vor.u32 %v4673_v14, %v4669_v61  ;;  %v5388_v60 = vor.u32 %v5386_v41, %v5385_v23  ;;  %v5390_v6 = vrot.slane %v5385_v23, 4  ;;  %v4685_v7 = vshll.u32 %v4483_v54, 16  ;;  %v12972_v41 = vld [vmem:[#allocation3 + $0xac] sm:$0xf]  ;;  %v412_v23 = vld [vmem:[#allocation3 + $0xc4] sm:$0x1] }
 0x2d4   : > { %v4670_v55 = vsel %vm12431_vm0, %v4665_v28, %v4669_v61  ;;  %v5394_v12 = vrot.slane %v5392_v45, 7  ;;  %v4684_v29 = vrot.slane %v4682_v33, 4  ;;  %v4691_v26 = vshll.u32 %v4484_v31, 16  ;;  %10619 = vmatprep.subr.bf16.mxu1 %v10924_v38  ;;  %10663 = vmatprep.subr.bf16.mxu0 %v10927_v19 }
 0x2d5   : > { %v4675_v51 = vrot.slane %v4674_v39, 4  ;;  %v5389_v57 = vsel %vm11976_vm11, %v12548_v62, %v5388_v60  ;;  %v4687_v35 = vrot.slane %v4685_v7, 5  ;;  %v4695_v34 = vshrl.u32 %v4484_v31, 16  ;;  %v10932_v62 = vld [vmem:[%s14553_s4 + $0x140] sm:$0xff]   ;;  %v4489_v31 = vld [vmem:[#allocation3 + $0xbc] sm:$0xf] }
 0x2d6   : > { %v5397_v63 = vor.u32 %v5395_v25, %v5394_v12  ;;  %v4693_v8 = vrot.slane %v4691_v26, 5  ;;  %v5405_v56 = vshrl.u32 %v5238_v37, 16  ;;  %v5408_v2 = vshll.u32 %v5238_v37, 16  ;;  %10620 = vmatpush3.bf16.msra.mxu1 %v10924_v38  ;;  %10664 = vmatpush3.bf16.msra.mxu0 %v10927_v19  ;;  %v14728_v38 = vld [vmem:[#allocation31_spill] sm:$0xff] }
 0x2d7   : > { %v4680_v49 = vsel %vm12431_vm0, %v4675_v51, %v12546_v43  ;;  %v4688_v59 = vor.u32 %v4687_v35, %v4684_v29  ;;  %v4697_v24 = vrot.slane %v4695_v34, 4  ;;  %v5414_v27 = vshrl.u32 %v5239_v10, 16  ;;  %10665 = vmatprep.subr.bf16.mxu0 %v10928_v18  ;;  %10701 = vmatprep.subr.bf16.mxu1 %v12946_v13  ;;  %v4490_v37 = vld [vmem:[#allocation3 + $0xc0] sm:$0xf] }
 0x2d8   : > { %v9362_v4 = vcombine.low %v4670_v55, %v4680_v49  ;;  %v5398_v9 = vsel %vm11976_vm11, %v5390_v6, %v5397_v63  ;;  %v5407_v44 = vrot.slane %v5405_v56, 7  ;;  %v5417_v16 = vshll.u32 %v5239_v10, 16  ;;  %v5243_v10 = vld [vmem:[#allocation3 + $0xb8] sm:$0x8]  ;;  %v12984_v63 = vld [vmem:[#allocation3 + $0xbc] sm:$0xf] }
 0x2d9   : > { %v9417_v52 = vcombine.low %v5389_v57, %v5398_v9  ;;  %v4689_v43 = vrot.slane %v4688_v59, 4  ;;  %v4698_v15 = vor.u32 %v4697_v24, %v4693_v8  ;;  %v5416_v11 = vrot.slane %v5414_v27, 7  ;;  %v14730_v59 = vld [vmem:[#allocation43_spill] sm:$0xff] }
 0x2da   : > { %10537 = vmatprep.mubr.bf16.mxu1 %v9362_v4  ;;  %v5410_v21 = vor.u32 %v5408_v2, %v5407_v44  ;;  %v5412_v50 = vrot.slane %v5407_v44, 4  ;;  %v4706_v53 = vshrl.u32 %v4486_v42, 16  ;;  %v4709_v30 = vshll.u32 %v4486_v42, 16  ;;  %10666 = vmatpush3.bf16.msra.mxu0 %v10928_v18  ;;  %v14731_v4 = vld [vmem:[#allocation41_spill] sm:$0xff] }
 0x2db   : > { %10582 = vmatmul.mubr.bf16.gmra.mxu0 %v9417_v52  ;;  %v4694_v3 = vsel %vm12431_vm0, %v4689_v43, %v4693_v8  ;;  %v4699_v58 = vrot.slane %v4698_v15, 4  ;;  %v5419_v46 = vor.u32 %v5417_v16, %v5416_v11  ;;  %v4715_v61 = vshll.u32 %v4487_v0, 16  ;;  %10667 = vmatprep.subr.bf16.mxu0 %v10932_v62  ;;  %v12994_v16 = vld [vmem:[#allocation3 + $0xc0] sm:$0xf] }
 0x2dc   : > { %v5411_v54 = vsel %vm11976_vm11, %v14727_v22, %v5410_v21  ;;  %v4708_v47 = vrot.slane %v4706_v53, 4  ;;  %v4711_v48 = vrot.slane %v4709_v30, 5  ;;  %v4719_v40 = vshrl.u32 %v4487_v0, 16  ;;  %v4492_v53 = vld [vmem:[#allocation3 + $0xd0] sm:$0xf] }
 0x2dd   : > { %v4704_v19 = vsel %vm12431_vm0, %v4699_v58, %v14728_v38  ;;  %v5420_v32 = vsel %vm11976_vm11, %v5412_v50, %v5419_v46  ;;  %v4717_v1 = vrot.slane %v4715_v61, 5  ;;  %v5427_v14 = vshrl.u32 %v5241_v20, 16  ;;  %v415_v50 = vld [vmem:[#allocation3 + $0xd8] sm:$0x1]  ;;  %v5246_v46 = vld [vmem:[#allocation3 + $0xcc] sm:$0x8] }
 0x2de   : > { %v9363_v28 = vcombine.low %v4694_v3, %v4704_v19  ;;  %v9418_v45 = vcombine.low %v5411_v54, %v5420_v32  ;;  %v4712_v25 = vor.u32 %v4711_v48, %v4708_v47  ;;  %v4721_v33 = vrot.slane %v4719_v40, 4  ;;  %10668 = vmatpush3.bf16.msra.mxu0 %v10932_v62  ;;  %v4493_v48 = vld [vmem:[#allocation3 + $0xd4] sm:$0xf] }
 0x2df   : > { %v5429_v39 = vrot.slane %v5427_v14, 7  ;;  %v5430_v60 = vshll.u32 %v5241_v20, 16  ;;  %v5436_v6 = vshrl.u32 %v12972_v41, 16  ;;  %v5439_v7 = vshll.u32 %v12972_v41, 16  ;;  %10749 = vmatprep.subr.bf16.mxu0 %v12967_v36 }
 0x2e0   : > { %10538 = vmatmul.mubr.bf16.gmra.mxu1 %v9363_v28  ;;  %10585 = vmatprep.mubr.bf16.mxu0 %v9418_v45  ;;  %v4713_v18 = vrot.slane %v4712_v25, 4  ;;  %v4722_v55 = vor.u32 %v4721_v33, %v4717_v1  ;;  %v413_v29 = vsel %vm11995_vm13, 0, %v412_v23  ;;  %v4730_v26 = vshrl.u32 %v4489_v31, 16  ;;  %v13006_v45 = vld [vmem:[#allocation3 + $0xd0] sm:$0xf] }
 0x2e1   : > { %v5432_v51 = vor.u32 %v5430_v60, %v5429_v39  ;;  %v5434_v57 = vrot.slane %v5429_v39, 4  ;;  %v5438_v35 = vrot.slane %v5436_v6, 7  ;;  %414 = vst [vmem:[#allocation3 + $0xc4] sm:$0x1] %v413_v29  ;;  %v4733_v34 = vshll.u32 %v4489_v31, 16 }
 0x2e2   : > { %v4718_v8 = vsel %vm12431_vm0, %v4713_v18, %v4717_v1  ;;  %v4723_v56 = vrot.slane %v4722_v55, 4  ;;  %v4732_v2 = vrot.slane %v4730_v26, 4  ;;  %v4739_v49 = vshll.u32 %v4490_v37, 16  ;;  %v418_v55 = vld [vmem:[#allocation3 + $0xec] sm:$0x1] }
 0x2e3   : > { %v5433_v24 = vsel %vm11976_vm11, %v14730_v59, %v5432_v51  ;;  %v5441_v27 = vor.u32 %v5439_v7, %v5438_v35  ;;  %v4735_v42 = vrot.slane %v4733_v34, 5  ;;  %v4743_v62 = vshrl.u32 %v4490_v37, 16 }
 0x2e4   : > { %v4728_v9 = vsel %vm12431_vm0, %v4723_v56, %v14731_v4  ;;  %v4741_v44 = vrot.slane %v4739_v49, 5  ;;  %v5444_v0 = vshrl.u32 %v5243_v10, 16  ;;  %v5449_v52 = vshrl.u32 %v12984_v63, 16  ;;  %v13010_v10 = vld [vmem:[#allocation3 + $0xd4] sm:$0xf] }
 0x2e5   : > { %v9364_v43 = vcombine.low %v4718_v8, %v4728_v9  ;;  %v5442_v15 = vsel %vm11976_vm11, %v5434_v57, %v5441_v27  ;;  %v4736_v11 = vor.u32 %v4735_v42, %v4732_v2  ;;  %v4745_v21 = vrot.slane %v4743_v62, 4  ;;  %v4495_v2 = vld [vmem:[#allocation3 + $0xe4] sm:$0xf] }
 0x2e6   : > { %v9419_v30 = vcombine.low %v5433_v24, %v5442_v15  ;;  %v9388_v20 = vrot.slane %v5444_v0, 11  ;;  %v5451_v3 = vrot.slane %v5449_v52, 7  ;;  %v5452_v58 = vshll.u32 %v12984_v63, 16  ;;  %v5249_v0 = vld [vmem:[#allocation3 + $0xe0] sm:$0x8] }
 0x2e7   : > { %10541 = vmatprep.mubr.bf16.mxu1 %v9364_v43  ;;  %v4737_v61 = vrot.slane %v4736_v11, 4  ;;  %v4746_v22 = vor.u32 %v4745_v21, %v4741_v44  ;;  %v5458_v54 = vshrl.u32 %v12994_v16, 16  ;;  %v5461_v47 = vshll.u32 %v12994_v16, 16 }
 0x2e8   : > { %10586 = vmatmul.mubr.bf16.gmra.mxu0 %v9419_v30  ;;  %v4491_v40 = vld [vmem:[#allocation3 + $0xc4] sm:$0x1]  ;;  %v5454_v38 = vor.u32 %v5452_v58, %v5451_v3  ;;  %v5456_v19 = vrot.slane %v5451_v3, 4  ;;  %v416_v32 = vsel %vm11995_vm13, 0, %v415_v50  ;;  %v4754_v1 = vshrl.u32 %v4492_v53, 16 }
 0x2e9   : > { %v4742_v14 = vsel %vm12431_vm0, %v4737_v61, %v4741_v44  ;;  %v4747_v23 = vrot.slane %v4746_v22, 4  ;;  %v4749_v31 = vshll.u32 %v4491_v40, 16  ;;  %v5460_v28 = vrot.slane %v5458_v54, 7  ;;  %417 = vst [vmem:[#allocation3 + $0xd8] sm:$0x1] %v416_v32 }
 0x2ea   : > { %v5455_v25 = vsel %vm11976_vm11, %v9388_v20, %v5454_v38  ;;  %v4756_v33 = vrot.slane %v4754_v1, 4  ;;  %v4757_v39 = vshll.u32 %v4492_v53, 16  ;;  %v4763_v60 = vshll.u32 %v4493_v48, 16  ;;  %v4496_v44 = vld [vmem:[#allocation3 + $0xe8] sm:$0xf] }
 0x2eb   : > { %v4751_v6 = vrot.slane %v4749_v31, 5  ;;  %v5463_v7 = vor.u32 %v5461_v47, %v5460_v28  ;;  %v4767_v37 = vshrl.u32 %v4493_v48, 16  ;;  %v5466_v18 = vshrl.u32 %v5246_v46, 16  ;;  %v13022_v3 = vld [vmem:[#allocation3 + $0xe4] sm:$0xf] }
 0x2ec   : > { %v4759_v29 = vrot.slane %v4757_v39, 5  ;;  %v4765_v26 = vrot.slane %v4763_v60, 5  ;;  %v5471_v51 = vshrl.u32 %v13006_v45, 16  ;;  %v5474_v57 = vshll.u32 %v13006_v45, 16 }
 0x2ed   : > { %v4752_v35 = vsel %vm12431_vm0, %v4747_v23, %v4751_v6  ;;  %v5464_v34 = vsel %vm11976_vm11, %v5456_v19, %v5463_v7  ;;  %v4769_v8 = vrot.slane %v4767_v37, 4  ;;  %v9389_v56 = vrot.slane %v5466_v18, 11  ;;  %v13028_v19 = vld [vmem:[#allocation3 + $0xe8] sm:$0xf]  ;;  %v4498_v37 = vld [vmem:[#allocation3 + $0xf8] sm:$0xf] }
 0x2ee   : > { %v9365_v49 = vcombine.low %v4742_v14, %v4752_v35  ;;  %v9420_v59 = vcombine.low %v5455_v25, %v5464_v34  ;;  %v4760_v24 = vor.u32 %v4759_v29, %v4756_v33  ;;  %v5473_v27 = vrot.slane %v5471_v51, 7  ;;  %v421_v33 = vld [vmem:[#allocation3 + $0x100] sm:$0x1]  ;;  %v4499_v18 = vld [vmem:[#allocation3 + $0xfc] sm:$0xf] }
 0x2ef   : > { %v4770_v42 = vor.u32 %v4769_v8, %v4765_v26  ;;  %v5480_v62 = vshrl.u32 %v13010_v10, 16  ;;  %v5483_v4 = vshll.u32 %v13010_v10, 16  ;;  %v419_v9 = vsel %vm11995_vm13, 0, %v418_v55 }
 0x2f0   : > { %10542 = vmatmul.mubr.bf16.gmra.mxu1 %v9365_v49  ;;  %10589 = vmatprep.mubr.bf16.mxu0 %v9420_v59  ;;  %v4494_v52 = vld [vmem:[#allocation3 + $0xd8] sm:$0x1]  ;;  %v4761_v43 = vrot.slane %v4760_v24, 4  ;;  %v5476_v15 = vor.u32 %v5474_v57, %v5473_v27  ;;  %v5478_v11 = vrot.slane %v5473_v27, 4  ;;  %420 = vst [vmem:[#allocation3 + $0xec] sm:$0x1] %v419_v9 }
 0x2f1   : > { %v4778_v21 = vshrl.u32 %v4495_v2, 16  ;;  %v4771_v50 = vrot.slane %v4770_v42, 4  ;;  %v4773_v53 = vshll.u32 %v4494_v52, 16  ;;  %v5482_v30 = vrot.slane %v5480_v62, 7  ;;  %v13042_v42 = vld [vmem:[#allocation3 + $0xf8] sm:$0xf] }
 0x2f2   : > { %v4781_v20 = vshll.u32 %v4495_v2, 16  ;;  %v4766_v58 = vsel %vm12431_vm0, %v4761_v43, %v4765_v26  ;;  %v5477_v46 = vsel %vm11976_vm11, %v9389_v56, %v5476_v15  ;;  %v4787_v22 = vshll.u32 %v4496_v44, 16  ;;  %v5252_v2 = vld [vmem:[#allocation3 + $0xf4] sm:$0x8] }
 0x2f3   : > { %v4780_v61 = vrot.slane %v4778_v21, 4  ;;  %v4775_v54 = vrot.slane %v4773_v53, 5  ;;  %v5485_v47 = vor.u32 %v5483_v4, %v5482_v30  ;;  %v4791_v40 = vshrl.u32 %v4496_v44, 16  ;;  %v13048_v30 = vld [vmem:[#allocation3 + $0xfc] sm:$0xf] }
 0x2f4   : > { %v4783_v48 = vrot.slane %v4781_v20, 5  ;;  %v4789_v38 = vrot.slane %v4787_v22, 5  ;;  %v5488_v32 = vshrl.u32 %v5249_v0, 16  ;;  %v5493_v1 = vshrl.u32 %v13022_v3, 16 }
 0x2f5   : > { %v5496_v14 = vshll.u32 %v13022_v3, 16  ;;  %v4776_v23 = vsel %vm12431_vm0, %v4771_v50, %v4775_v54  ;;  %v5486_v31 = vsel %vm11976_vm11, %v5478_v11, %v5485_v47  ;;  %v4793_v25 = vrot.slane %v4791_v40, 4  ;;  %v424_v11 = vld [vmem:[#allocation3 + $0x114] sm:$0x1]  ;;  %v4501_v54 = vld [vmem:[#allocation3 + $0x10c] sm:$0xf] }
 0x2f6   : > { %v4784_v28 = vor.u32 %v4783_v48, %v4780_v61  ;;  %v9366_v39 = vcombine.low %v4766_v58, %v4776_v23  ;;  %v9421_v60 = vcombine.low %v5477_v46, %v5486_v31  ;;  %v9390_v6 = vrot.slane %v5488_v32, 11  ;;  %v4502_v31 = vld [vmem:[#allocation3 + $0x110] sm:$0xf] }
 0x2f7   : > { %v5495_v7 = vrot.slane %v5493_v1, 7  ;;  %v4497_v55 = vld [vmem:[#allocation3 + $0xec] sm:$0x1]  ;;  %v4794_v26 = vor.u32 %v4793_v25, %v4789_v38  ;;  %v5502_v51 = vshrl.u32 %v13028_v19, 16  ;;  %v5505_v57 = vshll.u32 %v13028_v19, 16 }
 0x2f8   : > { %v4785_v29 = vrot.slane %v4784_v28, 4  ;;  %10545 = vmatprep.mubr.bf16.mxu1 %v9366_v39  ;;  %10590 = vmatmul.mubr.bf16.gmra.mxu0 %v9421_v60  ;;  %v4797_v35 = vshll.u32 %v4497_v55, 16  ;;  %v422_v56 = vsel %vm11995_vm13, 0, %v421_v33  ;;  %v4802_v27 = vshrl.u32 %v4498_v37, 16  ;;  %v5255_v28 = vld [vmem:[#allocation3 + $0x108] sm:$0x8] }
 0x2f9   : > { %v5498_v34 = vor.u32 %v5496_v14, %v5495_v7  ;;  %v5500_v8 = vrot.slane %v5495_v7, 4  ;;  %v4795_v59 = vrot.slane %v4794_v26, 4  ;;  %v5504_v24 = vrot.slane %v5502_v51, 7  ;;  %423 = vst [vmem:[#allocation3 + $0x100] sm:$0x1] %v422_v56 }
 0x2fa   : > { %v4790_v49 = vsel %vm12431_vm0, %v4785_v29, %v4789_v38  ;;  %v4799_v62 = vrot.slane %v4797_v35, 5  ;;  %v4805_v9 = vshll.u32 %v4498_v37, 16  ;;  %v4811_v44 = vshll.u32 %v4499_v18, 16  ;;  %v13058_v29 = vld [vmem:[#allocation3 + $0x10c] sm:$0xf] }
 0x2fb   : > { %v5499_v4 = vsel %vm11976_vm11, %v9390_v6, %v5498_v34  ;;  %v5507_v0 = vor.u32 %v5505_v57, %v5504_v24  ;;  %v4804_v52 = vrot.slane %v4802_v27, 4  ;;  %v4815_v43 = vshrl.u32 %v4499_v18, 16 }
 0x2fc   : > { %v5510_v15 = vshrl.u32 %v5252_v2, 16  ;;  %v4800_v21 = vsel %vm12431_vm0, %v4795_v59, %v4799_v62  ;;  %v4807_v50 = vrot.slane %v4805_v9, 5  ;;  %v4813_v53 = vrot.slane %v4811_v44, 5  ;;  %v13064_v59 = vld [vmem:[#allocation3 + $0x110] sm:$0xf] }
 0x2fd   : > { %v5515_v20 = vshrl.u32 %v13042_v42, 16  ;;  %v9367_v58 = vcombine.low %v4790_v49, %v4800_v21  ;;  %v5508_v46 = vsel %vm11976_vm11, %v5500_v8, %v5507_v0  ;;  %v4817_v61 = vrot.slane %v4815_v43, 4 }
 0x2fe   : > { %v9391_v22 = vrot.slane %v5510_v15, 11  ;;  %v9422_v47 = vcombine.low %v5499_v4, %v5508_v46  ;;  %v4808_v48 = vor.u32 %v4807_v50, %v4804_v52  ;;  %v5518_v38 = vshll.u32 %v13042_v42, 16  ;;  %v427_v52 = vld [vmem:[#allocation3 + $0x128] sm:$0x1]  ;;  %v4504_v50 = vld [vmem:[#allocation3 + $0x120] sm:$0xf] }
 0x2ff   : > { %v5517_v40 = vrot.slane %v5515_v20, 7  ;;  %10546 = vmatmul.mubr.bf16.gmra.mxu1 %v9367_v58  ;;  %v4818_v32 = vor.u32 %v4817_v61, %v4813_v53  ;;  %v5524_v1 = vshrl.u32 %v13048_v30, 16  ;;  %v5527_v14 = vshll.u32 %v13048_v30, 16 }
 0x300   : > { %v425_v23 = vsel %vm11995_vm13, 0, %v424_v11  ;;  %10593 = vmatprep.mubr.bf16.mxu0 %v9422_v47  ;;  %v4500_v25 = vld [vmem:[#allocation3 + $0x100] sm:$0x1]  ;;  %v4809_v33 = vrot.slane %v4808_v48, 4  ;;  %v4826_v6 = vshrl.u32 %v4501_v54, 16  ;;  %v4829_v55 = vshll.u32 %v4501_v54, 16 }
 0x301   : > { %v5520_v39 = vor.u32 %v5518_v38, %v5517_v40  ;;  %v5522_v60 = vrot.slane %v5517_v40, 4  ;;  %426 = vst [vmem:[#allocation3 + $0x114] sm:$0x1] %v425_v23  ;;  %v4819_v7 = vrot.slane %v4818_v32, 4  ;;  %v4821_v37 = vshll.u32 %v4500_v25, 16 }
 0x302   : > { %v5526_v18 = vrot.slane %v5524_v1, 7  ;;  %v4814_v26 = vsel %vm12431_vm0, %v4809_v33, %v4813_v53  ;;  %v4828_v57 = vrot.slane %v4826_v6, 4  ;;  %v4835_v35 = vshll.u32 %v4502_v31, 16  ;;  %v4505_v53 = vld [vmem:[#allocation3 + $0x124] sm:$0xf] }
 0x303   : > { %v5521_v51 = vsel %vm11976_vm11, %v9391_v22, %v5520_v39  ;;  %v4823_v34 = vrot.slane %v4821_v37, 5  ;;  %v4831_v56 = vrot.slane %v4829_v55, 5  ;;  %v4839_v2 = vshrl.u32 %v4502_v31, 16  ;;  %v5258_v38 = vld [vmem:[#allocation3 + $0x11c] sm:$0x8] }
 0x304   : > { %v5529_v8 = vor.u32 %v5527_v14, %v5526_v18  ;;  %v4837_v49 = vrot.slane %v4835_v35, 5  ;;  %v5532_v24 = vshrl.u32 %v5255_v28, 16  ;;  %v5537_v27 = vshrl.u32 %v13058_v29, 16  ;;  %v13078_v31 = vld [vmem:[#allocation3 + $0x120] sm:$0xf] }
 0x305   : > { %v5540_v62 = vshll.u32 %v13058_v29, 16  ;;  %v4824_v4 = vsel %vm12431_vm0, %v4819_v7, %v4823_v34  ;;  %v4832_v44 = vor.u32 %v4831_v56, %v4828_v57  ;;  %v4841_v0 = vrot.slane %v4839_v2, 4  ;;  %v430_v18 = vld [vmem:[#allocation3 + $0x13c] sm:$0x1]  ;;  %v13084_v57 = vld [vmem:[#allocation3 + $0x124] sm:$0xf] }
 0x306   : > { %v5530_v9 = vsel %vm11976_vm11, %v5522_v60, %v5529_v8  ;;  %v9368_v43 = vcombine.low %v4814_v26, %v4824_v4  ;;  %v9392_v11 = vrot.slane %v5532_v24, 11  ;;  %v5539_v21 = vrot.slane %v5537_v27, 7 }
 0x307   : > { %v9423_v15 = vcombine.low %v5521_v51, %v5530_v9  ;;  %v4833_v58 = vrot.slane %v4832_v44, 4  ;;  %v4842_v46 = vor.u32 %v4841_v0, %v4837_v49  ;;  %v5546_v61 = vshrl.u32 %v13064_v59, 16 }
 0x308   : > { %v4503_v20 = vld [vmem:[#allocation3 + $0x114] sm:$0x1]  ;;  %v5549_v22 = vshll.u32 %v13064_v59, 16  ;;  %10549 = vmatprep.mubr.bf16.mxu1 %v9368_v43  ;;  %v5542_v47 = vor.u32 %v5540_v62, %v5539_v21  ;;  %v5544_v48 = vrot.slane %v5539_v21, 4  ;;  %v428_v40 = vsel %vm11995_vm13, 0, %v427_v52 }
 0x309   : > { %10594 = vmatmul.mubr.bf16.gmra.mxu0 %v9423_v15  ;;  %v4845_v54 = vshll.u32 %v4503_v20, 16  ;;  %v4838_v32 = vsel %vm12431_vm0, %v4833_v58, %v4837_v49  ;;  %v4843_v1 = vrot.slane %v4842_v46, 4  ;;  %v5548_v14 = vrot.slane %v5546_v61, 7  ;;  %429 = vst [vmem:[#allocation3 + $0x128] sm:$0x1] %v428_v40 }
 0x30a   : > { %v4850_v23 = vshrl.u32 %v4504_v50, 16  ;;  %v5543_v25 = vsel %vm11976_vm11, %v9392_v11, %v5542_v47  ;;  %v4853_v33 = vshll.u32 %v4504_v50, 16  ;;  %v4859_v39 = vshll.u32 %v4505_v53, 16  ;;  %v4507_v49 = vld [vmem:[#allocation3 + $0x134] sm:$0xf] }
 0x30b   : > { %v4847_v28 = vrot.slane %v4845_v54, 5  ;;  %v5551_v60 = vor.u32 %v5549_v22, %v5548_v14  ;;  %v4863_v7 = vshrl.u32 %v4505_v53, 16  ;;  %v5554_v37 = vshrl.u32 %v5258_v38, 16  ;;  %v4508_v43 = vld [vmem:[#allocation3 + $0x138] sm:$0xf] }
 0x30c   : > { %v4852_v6 = vrot.slane %v4850_v23, 4  ;;  %v4855_v26 = vrot.slane %v4853_v33, 5  ;;  %v4861_v51 = vrot.slane %v4859_v39, 5  ;;  %v5559_v35 = vshrl.u32 %v13078_v31, 16  ;;  %v5261_v15 = vld [vmem:[#allocation3 + $0x130] sm:$0x8] }
 0x30d   : > { %v4848_v55 = vsel %vm12431_vm0, %v4843_v1, %v4847_v28  ;;  %v5552_v8 = vsel %vm11976_vm11, %v5544_v48, %v5551_v60  ;;  %v4865_v56 = vrot.slane %v4863_v7, 4  ;;  %v9393_v2 = vrot.slane %v5554_v37, 11  ;;  %v13094_v54 = vld [vmem:[#allocation3 + $0x134] sm:$0xf] }
 0x30e   : > { %v9369_v34 = vcombine.low %v4838_v32, %v4848_v55  ;;  %v9424_v24 = vcombine.low %v5543_v25, %v5552_v8  ;;  %v4856_v27 = vor.u32 %v4855_v26, %v4852_v6  ;;  %v5561_v62 = vrot.slane %v5559_v35, 7  ;;  %v13100_v25 = vld [vmem:[#allocation3 + $0x138] sm:$0xf]  ;;  %v13108_v8 = vld [vmem:[#allocation3 + $0x148] sm:$0xf] }
 0x30f   : > { %v5562_v4 = vshll.u32 %v13078_v31, 16  ;;  %v4866_v9 = vor.u32 %v4865_v56, %v4861_v51  ;;  %v5568_v44 = vshrl.u32 %v13084_v57, 16  ;;  %v5571_v0 = vshll.u32 %v13084_v57, 16 }
 0x310   : > { %10550 = vmatmul.mubr.bf16.gmra.mxu1 %v9369_v34  ;;  %v431_v52 = vsel %vm11995_vm13, 0, %v430_v18  ;;  %10597 = vmatprep.mubr.bf16.mxu0 %v9424_v24  ;;  %v4506_v11 = vld [vmem:[#allocation3 + $0x128] sm:$0x1]  ;;  %v4857_v21 = vrot.slane %v4856_v27, 4  ;;  %v5566_v53 = vrot.slane %v5561_v62, 4  ;;  %v4874_v20 = vshrl.u32 %v4507_v49, 16 }
 0x311   : > { %v5564_v50 = vor.u32 %v5562_v4, %v5561_v62  ;;  %432 = vst [vmem:[#allocation3 + $0x13c] sm:$0x1] %v431_v52  ;;  %v4867_v58 = vrot.slane %v4866_v9, 4  ;;  %v4869_v46 = vshll.u32 %v4506_v11, 16  ;;  %v5570_v61 = vrot.slane %v5568_v44, 7 }
 0x312   : > { %v4877_v22 = vshll.u32 %v4507_v49, 16  ;;  %v4862_v47 = vsel %vm12431_vm0, %v4857_v21, %v4861_v51  ;;  %v4876_v40 = vrot.slane %v4874_v20, 4  ;;  %v4883_v38 = vshll.u32 %v4508_v43, 16  ;;  %v385_v34 = vld [vmem:[#allocation3 + $0x144] sm:$0x8] }
 0x313   : > { %v5565_v48 = vsel %vm11976_vm11, %v9393_v2, %v5564_v50  ;;  %v4871_v32 = vrot.slane %v4869_v46, 5  ;;  %v5573_v1 = vor.u32 %v5571_v0, %v5570_v61  ;;  %v4887_v23 = vshrl.u32 %v4508_v43, 16  ;;  %v10986_v44 = vld [vmem:[#allocation3 + $0x1c] sm:$0xf]  ;;  %v10987_v0 = vld [vmem:[#allocation3 + $0x20] sm:$0xf] }
 0x314   : > { %v4879_v14 = vrot.slane %v4877_v22, 5  ;;  %v4885_v28 = vrot.slane %v4883_v38, 5  ;;  %v5576_v33 = vshrl.u32 %v5261_v15, 16  ;;  %v5581_v39 = vshrl.u32 %v13094_v54, 16  ;;  %v13112_v43 = vld [vmem:[#allocation3 + $0x14c] sm:$0xf] }
 0x315   : > { %v5584_v60 = vshll.u32 %v13094_v54, 16  ;;  %v4872_v6 = vsel %vm12431_vm0, %v4867_v58, %v4871_v32  ;;  %v5574_v7 = vsel %vm11976_vm11, %v5566_v53, %v5573_v1  ;;  %v4889_v18 = vrot.slane %v4887_v23, 4  ;;  %v6295_v20 = vld [vmem:[#allocation3 + $0x1c] sm:$0xf]  ;;  %v13124_v32 = vld [vmem:[#allocation3 + $0x30] sm:$0xf] }
 0x316   : > { %v4880_v37 = vor.u32 %v4879_v14, %v4876_v40  ;;  %v9370_v55 = vcombine.low %v4862_v47, %v4872_v6  ;;  %v9425_v26 = vcombine.low %v5565_v48, %v5574_v7  ;;  %v9394_v51 = vrot.slane %v5576_v33, 11  ;;  %v6296_v47 = vld [vmem:[#allocation3 + $0x20] sm:$0xf]  ;;  %v13126_v1 = vld [vmem:[#allocation3 + $0x34] sm:$0xf] }
 0x317   : > { %v5583_v35 = vrot.slane %v5581_v39, 7  ;;  %v4890_v49 = vor.u32 %v4889_v18, %v4885_v28  ;;  %v5590_v24 = vshrl.u32 %v13100_v25, 16  ;;  %v5593_v27 = vshll.u32 %v13100_v25, 16 }
 0x318   : > { %v4509_v56 = vld [vmem:[#allocation3 + $0x13c] sm:$0x1]  ;;  %v4881_v2 = vrot.slane %v4880_v37, 4  ;;  %10553 = vmatprep.mubr.bf16.mxu1 %v9370_v55  ;;  %10598 = vmatmul.mubr.bf16.gmra.mxu0 %v9425_v26  ;;  %v9452_v52 = vcombine.low %v10986_v44, %v10987_v0  ;;  %v386_v53 = vsel %vm11910_vm8, 0, %v385_v34  ;;  %v5603_v61 = vshrl.u32 %v13108_v8, 16 }
 0x319   : > { %v4893_v62 = vshll.u32 %v4509_v56, 16  ;;  %v5586_v4 = vor.u32 %v5584_v60, %v5583_v35  ;;  %v5588_v9 = vrot.slane %v5583_v35, 4  ;;  %v4891_v11 = vrot.slane %v4890_v49, 4  ;;  %387 = vst [vmem:[#allocation3 + $0x144] sm:$0x8] %v386_v53 }
 0x31a   : > { %v4886_v15 = vsel %vm12431_vm0, %v4881_v2, %v4885_v28  ;;  %v5592_v21 = vrot.slane %v5590_v24, 7  ;;  %v5606_v22 = vshll.u32 %v13108_v8, 16  ;;  %v5612_v40 = vshrl.u32 %v13112_v43, 16  ;;  %v6297_v37 = vld [vmem:[#allocation3 + $0x24] sm:$0x1] }
 0x31b   : > { %v4895_v58 = vrot.slane %v4893_v62, 5  ;;  %v5587_v46 = vsel %vm11976_vm11, %v9394_v51, %v5586_v4  ;;  %v5615_v38 = vshll.u32 %v13112_v43, 16  ;;  %v9453_v14 = vcombine.low %v13124_v32, %v13126_v1  ;;  %v6298_v55 = vld [vmem:[#allocation3 + $0x30] sm:$0xf]  ;;  %v6299_v56 = vld [vmem:[#allocation3 + $0x34] sm:$0xf] }
 0x31c   : > { %v5595_v48 = vor.u32 %v5593_v27, %v5592_v21  ;;  %v5605_v28 = vrot.slane %v5603_v61, 7  ;;  %v6344_v33 = vshrl.u32 %v6295_v20, 16  ;;  %v6347_v39 = vshll.u32 %v6295_v20, 16  ;;  %v10990_v4 = vld [vmem:[#allocation3 + $0x44] sm:$0xf] }
 0x31d   : > { %v4896_v23 = vsel %vm12431_vm0, %v4891_v11, %v4895_v58  ;;  %v5614_v7 = vrot.slane %v5612_v40, 7  ;;  %v6353_v18 = vshll.u32 %v6296_v47, 16  ;;  %v6357_v27 = vshrl.u32 %v6296_v47, 16  ;;  %v10991_v44 = vld [vmem:[#allocation3 + $0x48] sm:$0xf] }
 0x31e   : > { %v9371_v60 = vcombine.low %v4886_v15, %v4896_v23  ;;  %v5596_v6 = vsel %vm11976_vm11, %v5588_v9, %v5595_v48  ;;  %v5608_v51 = vor.u32 %v5606_v22, %v5605_v28  ;;  %v5610_v35 = vrot.slane %v5605_v28, 4  ;;  %v6300_v58 = vld [vmem:[#allocation3 + $0x38] sm:$0x1]  ;;  %v6301_v40 = vld [vmem:[#allocation3 + $0x44] sm:$0xf] }
 0x31f   : > { %v9426_v26 = vcombine.low %v5587_v46, %v5596_v6  ;;  %v6346_v34 = vrot.slane %v6344_v33, 4  ;;  %v5617_v2 = vor.u32 %v5615_v38, %v5614_v7  ;;  %v6349_v49 = vrot.slane %v6347_v39, 5  ;;  %v13136_v39 = vld [vmem:[#allocation3 + $0x58] sm:$0xf] }
 0x320   : > { %10554 = vmatmul.mubr.bf16.gmra.mxu1 %v9371_v60  ;;  %v6355_v24 = vrot.slane %v6353_v18, 5  ;;  %v6363_v62 = vshll.u32 %v6297_v37, 16  ;;  %v9454_v9 = vcombine.low %v10990_v4, %v10991_v44  ;;  %v6368_v0 = vshrl.u32 %v6298_v55, 16  ;;  %v5264_v11 = vld [vmem:[#allocation3 + $0x144] sm:$0x8] }
 0x321   : > { %10601 = vmatprep.mubr.bf16.mxu0 %v9426_v26  ;;  %10621 = vmatprep.mubr.bf16.mxu1 %v9452_v52  ;;  %v6371_v15 = vshll.u32 %v6298_v55, 16  ;;  %v5618_v21 = vsel %vm11976_vm11, %v5610_v35, %v5617_v2  ;;  %v6350_v53 = vor.u32 %v6349_v49, %v6346_v34  ;;  %v6359_v20 = vrot.slane %v6357_v27, 4  ;;  %v13138_v60 = vld [vmem:[#allocation3 + $0x5c] sm:$0xf]  ;;  %v10933_v55 = vld [vmem:[%s14553_s4 + $0x1b0] sm:$0xff]  }
 0x322   : > { %v6377_v46 = vshll.u32 %v6299_v56, 16  ;;  %v5598_v61 = vshrl.u32 %v5264_v11, 16  ;;  %v6365_v22 = vrot.slane %v6363_v62, 5  ;;  %v6370_v48 = vrot.slane %v6368_v0, 4  ;;  %v6302_v26 = vld [vmem:[#allocation3 + $0x48] sm:$0xf] }
 0x323   : > { %v6373_v47 = vrot.slane %v6371_v15, 5  ;;  %v6351_v52 = vrot.slane %v6350_v53, 4  ;;  %v6360_v38 = vor.u32 %v6359_v20, %v6355_v24  ;;  %v6381_v1 = vshrl.u32 %v6299_v56, 16  ;;  %v6303_v49 = vld [vmem:[#allocation3 + $0x4c] sm:$0x1] }
 0x324   : > { %v6379_v32 = vrot.slane %v6377_v46, 5  ;;  %v9395_v23 = vrot.slane %v5598_v61, 11  ;;  %v6387_v33 = vshll.u32 %v6300_v58, 16  ;;  %v9455_v6 = vcombine.low %v13136_v39, %v13138_v60  ;;  %v6304_v0 = vld [vmem:[#allocation3 + $0x58] sm:$0xf] }
 0x325   : > { %v6374_v28 = vor.u32 %v6373_v47, %v6370_v48  ;;  %v6356_v7 = vsel %vm12431_vm0, %v6351_v52, %v6355_v24  ;;  %v6361_v37 = vrot.slane %v6360_v38, 4  ;;  %v6383_v18 = vrot.slane %v6381_v1, 4  ;;  %v6305_v20 = vld [vmem:[#allocation3 + $0x5c] sm:$0xf]  ;;  %v10994_v46 = vld [vmem:[#allocation3 + $0x6c] sm:$0xf] }
 0x326   : > { %v6392_v35 = vshrl.u32 %v6301_v40, 16  ;;  %v5609_v34 = vsel %vm11976_vm11, %v9395_v23, %v5608_v51  ;;  %v6389_v2 = vrot.slane %v6387_v33, 5  ;;  %v6395_v27 = vshll.u32 %v6301_v40, 16  ;;  %v10995_v61 = vld [vmem:[#allocation3 + $0x70] sm:$0xf]  ;;  %v10936_v48 = vld [vmem:[%s14553_s4 + $0x1a8] sm:$0xff]  }
 0x327   : > { %v6375_v56 = vrot.slane %v6374_v28, 4  ;;  %v9427_v62 = vcombine.low %v5609_v34, %v5618_v21  ;;  %v6366_v24 = vsel %vm12431_vm0, %v6361_v37, %v6365_v22  ;;  %v6384_v4 = vor.u32 %v6383_v18, %v6379_v32  ;;  %v6306_v47 = vld [vmem:[#allocation3 + $0x60] sm:$0x1]  ;;  %v6307_v28 = vld [vmem:[#allocation3 + $0x6c] sm:$0xf] }
 0x328   : > { %10622 = vmatmul.mubr.bf16.vlgmr.msra.gmra.mxu1 %v9453_v14  ;;  %v6394_v44 = vrot.slane %v6392_v35, 4  ;;  %v9492_v15 = vcombine.low %v6356_v7, %v6366_v24  ;;  %v6397_v51 = vrot.slane %v6395_v27, 5  ;;  %v6401_v53 = vshll.u32 %v6302_v26, 16  ;;  %v6308_v27 = vld [vmem:[#allocation3 + $0x70] sm:$0xf] }
 0x329   : > { %10702 = vmatpush3.bf16.msra.mxu1 %v12946_v13  ;;  %10625 = vmatprep.mubr.bf16.mxu1 %v9454_v9  ;;  %v6380_v11 = vsel %vm12431_vm0, %v6375_v56, %v6379_v32  ;;  %v6385_v58 = vrot.slane %v6384_v4, 4  ;;  %v6405_v14 = vshrl.u32 %v6302_v26, 16  ;;  %v6411_v21 = vshll.u32 %v6303_v49, 16  ;;  %v13170_v4 = vld [vmem:[#allocation3 + $0x84] sm:$0xf] }
 0x32a   : > { %10602 = vmatmul.mubr.bf16.gmra.mxu0 %v9427_v62  ;;  %10703 = vmatprep.subr.bf16.mxu1 %v10933_v55  ;;  %v9456_v22 = vcombine.low %v10994_v46, %v10995_v61  ;;  %v6398_v13 = vor.u32 %v6397_v51, %v6394_v44  ;;  %v6403_v9 = vrot.slane %v6401_v53, 5  ;;  %v6416_v40 = vshrl.u32 %v6304_v0, 16 }
 0x32b   : > { %10669 = vmatprep.mubr.bf16.mxu0 %v9492_v15  ;;  %v6419_v52 = vshll.u32 %v6304_v0, 16  ;;  %v6390_v38 = vsel %vm12431_vm0, %v6385_v58, %v6389_v2  ;;  %v6407_v32 = vrot.slane %v6405_v14, 4  ;;  %v6413_v1 = vrot.slane %v6411_v21, 5  ;;  %v10939_v2 = vld [vmem:[%s14553_s4 + $0x1a0] sm:$0xff]   ;;  %v10949_v14 = vld [vmem:[%s14553_s4 + $0x1f0] sm:$0xff]  }
 0x32c   : > { %v6425_v23 = vshll.u32 %v6305_v20, 16  ;;  %v9493_v33 = vcombine.low %v6380_v11, %v6390_v38  ;;  %v6399_v7 = vrot.slane %v6398_v13, 4  ;;  %v6418_v37 = vrot.slane %v6416_v40, 4  ;;  %v13159_v26 = vpop.f32.mrf.mxu1  ;;  %v6309_v0 = vld [vmem:[#allocation3 + $0x74] sm:$0x1] }
 0x32d   : > { %10704 = vmatpush3.bf16.msra.mxu1 %v10933_v55  ;;  %v6421_v18 = vrot.slane %v6419_v52, 5  ;;  %v6408_v35 = vor.u32 %v6407_v32, %v6403_v9  ;;  %v6429_v56 = vshrl.u32 %v6305_v20, 16  ;;  %v6435_v49 = vshll.u32 %v6306_v47, 16  ;;  %v13168_v55 = vld [vmem:[#allocation3 + $0x80] sm:$0xf] }
 0x32e   : > { %v13161_v34 = vrot.slane %v6425_v23, 5  ;;  %10705 = vmatprep.subr.bf16.mxu1 %v10936_v48  ;;  %v6404_v62 = vsel %vm12431_vm0, %v6399_v7, %v6403_v9  ;;  %v9457_v44 = vcombine.low %v13168_v55, %v13170_v4  ;;  %v6440_v15 = vshrl.u32 %v6307_v28, 16  ;;  %v13174_v11 = vpop.f32.mrf.mxu1  ;;  %v6310_v9 = vld [vmem:[#allocation3 + $0x80] sm:$0xf]  ;;  %v6311_v52 = vld [vmem:[#allocation3 + $0x84] sm:$0xf] }
 0x32f   : > { %v6422_v24 = vor.u32 %v6421_v18, %v6418_v37  ;;  %v6409_v51 = vrot.slane %v6408_v35, 4  ;;  %v6431_v53 = vrot.slane %v6429_v56, 4  ;;  %v6437_v20 = vrot.slane %v6435_v49, 5  ;;  %v10998_v18 = vld [vmem:[#allocation3 + $0x94] sm:$0xf]  ;;  %v10951_v49 = vld [vmem:[%s14553_s4 + $0x1e8] sm:$0xff]  }
 0x330   : > { %10626 = vmatmul.mubr.bf16.gmra.mxu1 %v9455_v6  ;;  %v6443_v58 = vshll.u32 %v6307_v28, 16  ;;  %v6442_v46 = vrot.slane %v6440_v15, 4  ;;  %v6449_v61 = vshll.u32 %v6308_v27, 16  ;;  %v6453_v13 = vshrl.u32 %v6308_v27, 16  ;;  %v13182_v47 = vpop.f32.mrf.mxu1  ;;  %v6312_v28 = vld [vmem:[#allocation3 + $0x88] sm:$0x1] }
 0x331   : > { %10629 = vmatprep.mubr.bf16.mxu1 %v9456_v22  ;;  %v6423_v21 = vrot.slane %v6422_v24, 4  ;;  %10706 = vmatpush3.bf16.msra.mxu1 %v10936_v48  ;;  %v6414_v39 = vsel %vm12431_vm0, %v6409_v51, %v6413_v1  ;;  %v6432_v60 = vor.u32 %v6431_v53, %v13161_v34  ;;  %v6459_v40 = vshll.u32 %v6309_v0, 16  ;;  %v10942_v22 = vld [vmem:[%s14553_s4 + $0x198] sm:$0xff]   ;;  %v10999_v35 = vld [vmem:[#allocation3 + $0x98] sm:$0xf] }
 0x332   : > { %10670 = vmatmul.mubr.bf16.vlgmr.msra.gmra.mxu0 %v9493_v33  ;;  %v6445_v6 = vrot.slane %v6443_v58, 5  ;;  %10707 = vmatprep.subr.bf16.mxu1 %v10939_v2  ;;  %v9494_v38 = vcombine.low %v6404_v62, %v6414_v39  ;;  %v6451_v32 = vrot.slane %v6449_v61, 5  ;;  %v6455_v23 = vrot.slane %v6453_v13, 4  ;;  %v13194_v1 = vpop.f32.mrf.mxu1  ;;  %v11000_v4 = vld [vmem:[#allocation3 + $0xa8] sm:$0xf] }
 0x333   : > { %v6428_v48 = vsel %vm12431_vm0, %v6423_v21, %v13161_v34  ;;  %10750 = vmatpush3.bf16.msra.mxu0 %v12967_v36  ;;  %v6433_v33 = vrot.slane %v6432_v60, 4  ;;  %v6461_v37 = vrot.slane %v6459_v40, 5  ;;  %v9458_v56 = vcombine.low %v10998_v18, %v10999_v35  ;;  %v13199_v27 = vpop.f32.mrf.mxu0  ;;  %v6313_v21 = vld [vmem:[#allocation3 + $0x94] sm:$0xf]  ;;  %v6314_v60 = vld [vmem:[#allocation3 + $0x98] sm:$0xf] }
 0x334   : > { %v6446_v7 = vor.u32 %v6445_v6, %v6442_v46  ;;  %10751 = vmatprep.subr.bf16.mxu0 %v10949_v14  ;;  %10673 = vmatprep.mubr.bf16.mxu0 %v9494_v38  ;;  %v6456_v34 = vor.u32 %v6455_v23, %v6451_v32  ;;  %v6464_v62 = vshrl.u32 %v6310_v9, 16  ;;  %v6467_v24 = vshll.u32 %v6310_v9, 16  ;;  %v13201_v0 = vpop.f32.mrf.mxu1  ;;  %v10945_v46 = vld [vmem:[%s14553_s4 + $0x190] sm:$0xff]   ;;  %v6315_v23 = vld [vmem:[#allocation3 + $0x9c] sm:$0x1] }
 0x335   : > { %v6473_v36 = vshll.u32 %v6311_v52, 16  ;;  %10708 = vmatpush3.bf16.msra.mxu1 %v10939_v2  ;;  %v6438_v15 = vsel %vm12431_vm0, %v6433_v33, %v6437_v20  ;;  %v6477_v53 = vshrl.u32 %v6311_v52, 16  ;;  %v6483_v58 = vshll.u32 %v6312_v28, 16  ;;  %v13208_v61 = vpop.f32.mrf.mxu0 }
 0x336   : > { %v6447_v51 = vrot.slane %v6446_v7, 4  ;;  %10709 = vmatprep.subr.bf16.mxu1 %v10942_v22  ;;  %v9495_v13 = vcombine.low %v6428_v48, %v6438_v15  ;;  %v6457_v9 = vrot.slane %v6456_v34, 4  ;;  %v6466_v39 = vrot.slane %v6464_v62, 4  ;;  %v13210_v6 = vpop.f32.mrf.mxu1  ;;  %v10954_v48 = vld [vmem:[%s14553_s4 + $0x1e0] sm:$0xff]   ;;  %v6316_v62 = vld [vmem:[#allocation3 + $0xa8] sm:$0xf] }
 0x337   : > { %v6469_v2 = vrot.slane %v6467_v24, 5  ;;  %10752 = vmatpush3.bf16.msra.mxu0 %v10949_v14  ;;  %v6475_v40 = vrot.slane %v6473_v36, 5  ;;  %v6479_v52 = vrot.slane %v6477_v53, 4  ;;  %v6485_v38 = vrot.slane %v6483_v58, 5  ;;  %v13220_v28 = vpop.f32.mrf.mxu0 }
 0x338   : > { %10630 = vmatmul.mubr.bf16.gmra.mxu1 %v9457_v44  ;;  %v6452_v20 = vsel %vm12431_vm0, %v6447_v51, %v6451_v32  ;;  %10753 = vmatprep.subr.bf16.mxu0 %v10951_v49  ;;  %v6462_v14 = vsel %vm12431_vm0, %v6457_v9, %v6461_v37  ;;  %v9459_v44 = vcombine.low %v11000_v4, %v12972_v41  ;;  %v6488_v32 = vshrl.u32 %v6313_v21, 16  ;;  %v13225_v33 = vpop.f32.mrf.mxu1  ;;  %v10950_v37 = vld [vmem:[%s14553_s4 + $0x188] sm:$0xff]   ;;  %v6317_v41 = vld [vmem:[#allocation3 + $0xac] sm:$0xf] }
 0x339   : > { %10633 = vmatprep.mubr.bf16.mxu1 %v9458_v56  ;;  %v6470_v55 = vor.u32 %v6469_v2, %v6466_v39  ;;  %10710 = vmatpush3.bf16.msra.mxu1 %v10942_v22  ;;  %v9496_v7 = vcombine.low %v6452_v20, %v6462_v14  ;;  %v6480_v18 = vor.u32 %v6479_v52, %v6475_v40  ;;  %v6491_v35 = vshll.u32 %v6313_v21, 16  ;;  %v10956_v21 = vld [vmem:[%s14553_s4 + $0x1d8] sm:$0xff]   ;;  %v6319_v14 = vld [vmem:[#allocation3 + $0xbc] sm:$0xf] }
 0x33a   : > { %10674 = vmatmul.mubr.bf16.gmra.mxu0 %v9495_v13  ;;  %v6497_v34 = vshll.u32 %v6314_v60, 16  ;;  %10711 = vmatprep.subr.bf16.mxu1 %v10945_v46  ;;  %v6490_v24 = vrot.slane %v6488_v32, 4  ;;  %v6501_v36 = vshrl.u32 %v6314_v60, 16  ;;  %v6507_v15 = vshll.u32 %v6315_v23, 16  ;;  %v13235_v13 = vpop.f32.mrf.mxu0  ;;  %v13239_v20 = vpop.f32.mrf.mxu1 }
 0x33b   : > { %v6471_v56 = vrot.slane %v6470_v55, 4  ;;  %10754 = vmatpush3.bf16.msra.mxu0 %v10951_v49  ;;  %10677 = vmatprep.mubr.bf16.mxu0 %v9496_v7  ;;  %v6481_v22 = vrot.slane %v6480_v18, 4  ;;  %v6493_v51 = vrot.slane %v6491_v35, 5  ;;  %v9460_v58 = vcombine.low %v12984_v63, %v12994_v16  ;;  %v6318_v49 = vld [vmem:[#allocation3 + $0xb0] sm:$0x1] }
 0x33c   : > { %v6499_v53 = vrot.slane %v6497_v34, 5  ;;  %10755 = vmatprep.subr.bf16.mxu0 %v10954_v48  ;;  %v6503_v39 = vrot.slane %v6501_v36, 4  ;;  %v6509_v2 = vrot.slane %v6507_v15, 5  ;;  %v6512_v60 = vshrl.u32 %v6316_v62, 16  ;;  %v10955_v55 = vld [vmem:[%s14553_s4 + $0x180] sm:$0xff]  }
 0x33d   : > { %v6476_v9 = vsel %vm12431_vm0, %v6471_v56, %v6475_v40  ;;  %10712 = vmatpush3.bf16.msra.mxu1 %v10945_v46  ;;  %v6486_v63 = vsel %vm12431_vm0, %v6481_v22, %v6485_v38  ;;  %v6494_v16 = vor.u32 %v6493_v51, %v6490_v24  ;;  %v6515_v52 = vshll.u32 %v6316_v62, 16  ;;  %v6320_v18 = vld [vmem:[#allocation3 + $0xc0] sm:$0xf] }
 0x33e   : > { %v6521_v23 = vshll.u32 %v6317_v41, 16  ;;  %10713 = vmatprep.subr.bf16.mxu1 %v10950_v37  ;;  %v9497_v40 = vcombine.low %v6476_v9, %v6486_v63  ;;  %v6504_v4 = vor.u32 %v6503_v39, %v6499_v53  ;;  %v6514_v32 = vrot.slane %v6512_v60, 4  ;;  %v10958_v62 = vld [vmem:[%s14553_s4 + $0x1d0] sm:$0xff]   ;;  %v6322_v63 = vld [vmem:[#allocation3 + $0xd0] sm:$0xf] }
 0x33f   : > { %v6525_v7 = vshrl.u32 %v6317_v41, 16  ;;  %10756 = vmatpush3.bf16.msra.mxu0 %v10954_v48  ;;  %v6495_v46 = vrot.slane %v6494_v16, 4  ;;  %v6517_v35 = vrot.slane %v6515_v52, 5  ;;  %v6531_v38 = vshll.u32 %v6318_v49, 16  ;;  %v13249_v56 = vpop.f32.mrf.mxu0  ;;  %v6321_v9 = vld [vmem:[#allocation3 + $0xc4] sm:$0x1] }
 0x340   : > { %10634 = vmatmul.mubr.bf16.gmra.mxu1 %v9459_v44  ;;  %v6523_v34 = vrot.slane %v6521_v23, 5  ;;  %10757 = vmatprep.subr.bf16.mxu0 %v10956_v21  ;;  %v6505_v24 = vrot.slane %v6504_v4, 4  ;;  %v9461_v15 = vcombine.low %v13006_v45, %v13010_v10  ;;  %v6536_v41 = vshrl.u32 %v6319_v14, 16  ;;  %v13253_v48 = vpop.f32.mrf.mxu1  ;;  %v10959_v4 = vld [vmem:[%s14553_s4 + $0x1c8] sm:$0xff]  }
 0x341   : > { %10637 = vmatprep.mubr.bf16.mxu1 %v9460_v58  ;;  %v6527_v36 = vrot.slane %v6525_v7, 4  ;;  %10714 = vmatpush3.bf16.msra.mxu1 %v10950_v37  ;;  %v6500_v44 = vsel %vm12431_vm0, %v6495_v46, %v6499_v53  ;;  %v6518_v22 = vor.u32 %v6517_v35, %v6514_v32  ;;  %v6533_v51 = vrot.slane %v6531_v38, 5  ;;  %v13260_v58 = vld [vmem:[%s14553_s4 + $0x238] sm:$0xff]   ;;  %v13262_v49 = vpop.f32.mrf.mxu0 }
 0x342   : > { %10678 = vmatmul.mubr.bf16.gmra.mxu0 %v9497_v40  ;;  %v6539_v39 = vshll.u32 %v6319_v14, 16  ;;  %10715 = vmatprep.subr.bf16.mxu1 %v10955_v55  ;;  %v6510_v45 = vsel %vm12431_vm0, %v6505_v24, %v6509_v2  ;;  %v6538_v37 = vrot.slane %v6536_v41, 4  ;;  %v6545_v60 = vshll.u32 %v6320_v18, 16  ;;  %v13266_v53 = vpop.f32.mrf.mxu1  ;;  %v6323_v40 = vld [vmem:[#allocation3 + $0xd4] sm:$0xf] }
 0x343   : > { %v6528_v10 = vor.u32 %v6527_v36, %v6523_v34  ;;  %10758 = vmatpush3.bf16.msra.mxu0 %v10956_v21  ;;  %14733 = vst [vmem:[#allocation46_spill] sm:$0xff] %v13266_v53  ;;  %v9498_v16 = vcombine.low %v6500_v44, %v6510_v45  ;;  %v6519_v52 = vrot.slane %v6518_v22, 4  ;;  %v6549_v14 = vshrl.u32 %v6320_v18, 16  ;;  %v13271_v32 = vpop.f32.mrf.mxu0  ;;  %v6324_v36 = vld [vmem:[#allocation3 + $0xd8] sm:$0x1] }
 0x344   : > { %v6541_v23 = vrot.slane %v6539_v39, 5  ;;  %10759 = vmatprep.subr.bf16.mxu0 %v10958_v62  ;;  %v6547_v7 = vrot.slane %v6545_v60, 5  ;;  %v6555_v46 = vshll.u32 %v6321_v9, 16  ;;  %v9462_v21 = vcombine.low %v13022_v3, %v13028_v19  ;;  %v13275_v35 = vpop.f32.mrf.mxu1  ;;  %v10962_v60 = vld [vmem:[%s14553_s4 + $0x1c0] sm:$0xff]  }
 0x345   : > { %v6529_v2 = vrot.slane %v6528_v10, 4  ;;  %10716 = vmatpush3.bf16.msra.mxu1 %v10955_v55  ;;  %14734 = vst [vmem:[#allocation32_spill] sm:$0xff] %v13275_v35  ;;  %10681 = vmatprep.mubr.bf16.mxu0 %v9498_v16  ;;  %v6524_v18 = vsel %vm12431_vm0, %v6519_v52, %v6523_v34  ;;  %v6551_v24 = vrot.slane %v6549_v14, 4  ;;  %v6560_v41 = vshrl.u32 %v6322_v63, 16  ;;  %v13280_v44 = vpop.f32.mrf.mxu0  ;;  %v6325_v55 = vld [vmem:[#allocation3 + $0xe4] sm:$0xf] }
 0x346   : > { %v6542_v38 = vor.u32 %v6541_v23, %v6538_v37  ;;  %10797 = vmatprep.subr.bf16.mxu1 %v13260_v58  ;;  %v6557_v9 = vrot.slane %v6555_v46, 5  ;;  %v6563_v3 = vshll.u32 %v6322_v63, 16  ;;  %v6569_v19 = vshll.u32 %v6323_v40, 16  ;;  %v13284_v39 = vpop.f32.mrf.mxu1  ;;  %v6326_v23 = vld [vmem:[#allocation3 + $0xe8] sm:$0xf] }
 0x347   : > { %v6534_v22 = vsel %vm12431_vm0, %v6529_v2, %v6533_v51  ;;  %10760 = vmatpush3.bf16.msra.mxu0 %v10958_v62  ;;  %14735 = vst [vmem:[#allocation40_spill] sm:$0xff] %v13284_v39  ;;  %v6552_v10 = vor.u32 %v6551_v24, %v6547_v7  ;;  %v6562_v37 = vrot.slane %v6560_v41, 4  ;;  %v6573_v52 = vshrl.u32 %v6323_v40, 16 }
 0x348   : > { %v9499_v45 = vcombine.low %v6524_v18, %v6534_v22  ;;  %10638 = vmatmul.mubr.bf16.gmra.mxu1 %v9461_v15  ;;  %v6543_v34 = vrot.slane %v6542_v38, 4  ;;  %10761 = vmatprep.subr.bf16.mxu0 %v10959_v4  ;;  %v6565_v16 = vrot.slane %v6563_v3, 5  ;;  %v6571_v51 = vrot.slane %v6569_v19, 5  ;;  %v6328_v19 = vld [vmem:[#allocation3 + $0xf8] sm:$0xf] }
 0x349   : > { %10641 = vmatprep.mubr.bf16.mxu1 %v9462_v21  ;;  %v6579_v63 = vshll.u32 %v6324_v36, 16  ;;  %v6553_v14 = vrot.slane %v6552_v10, 4  ;;  %v9463_v15 = vcombine.low %v13042_v42, %v13048_v30  ;;  %v6584_v2 = vshrl.u32 %v6325_v55, 16  ;;  %v13293_v46 = vpop.f32.mrf.mxu0  ;;  %v6327_v21 = vld [vmem:[#allocation3 + $0xec] sm:$0x1] }
 0x34a   : > { %10682 = vmatmul.mubr.bf16.gmra.mxu0 %v9499_v45  ;;  %v6548_v62 = vsel %vm12431_vm0, %v6543_v34, %v6547_v7  ;;  %v6566_v18 = vor.u32 %v6565_v16, %v6562_v37  ;;  %v6575_v38 = vrot.slane %v6573_v52, 4  ;;  %v6587_v41 = vshll.u32 %v6325_v55, 16  ;;  %v13295_v40 = vpop.f32.mrf.mxu1  ;;  %v6329_v37 = vld [vmem:[#allocation3 + $0xfc] sm:$0xf] }
 0x34b   : > { %v6581_v24 = vrot.slane %v6579_v63, 5  ;;  %10762 = vmatpush3.bf16.msra.mxu0 %v10959_v4  ;;  %v6558_v36 = vsel %vm12431_vm0, %v6553_v14, %v6557_v9  ;;  %v6586_v22 = vrot.slane %v6584_v2, 4  ;;  %v6593_v7 = vshll.u32 %v6326_v23, 16  ;;  %v13299_v42 = vpop.f32.mrf.mxu0 }
 0x34c   : > { %v6597_v3 = vshrl.u32 %v6326_v23, 16  ;;  %10763 = vmatprep.subr.bf16.mxu0 %v10962_v60  ;;  %14736 = vst [vmem:[#allocation39_spill] sm:$0xff] %v13299_v42  ;;  %v9500_v30 = vcombine.low %v6548_v62, %v6558_v36  ;;  %v6567_v45 = vrot.slane %v6566_v18, 4  ;;  %v6576_v34 = vor.u32 %v6575_v38, %v6571_v51  ;;  %v13301_v16 = vpop.f32.mrf.mxu1  ;;  %v6330_v36 = vld [vmem:[#allocation3 + $0x100] sm:$0x1] }
 0x34d   : > { %v6589_v10 = vrot.slane %v6587_v41, 5  ;;  %v6595_v4 = vrot.slane %v6593_v7, 5  ;;  %v6603_v52 = vshll.u32 %v6327_v21, 16  ;;  %v9464_v9 = vcombine.low %v13058_v29, %v13064_v59  ;;  %v13305_v63 = vpop.f32.mrf.mxu0 }
 0x34e   : > { %v6599_v55 = vrot.slane %v6597_v3, 4  ;;  %14737 = vst [vmem:[#allocation33_spill] sm:$0xff] %v13305_v63  ;;  %10685 = vmatprep.mubr.bf16.mxu0 %v9500_v30  ;;  %v6572_v23 = vsel %vm12431_vm0, %v6567_v45, %v6571_v51  ;;  %v6577_v14 = vrot.slane %v6576_v34, 4  ;;  %v6608_v2 = vshrl.u32 %v6328_v19, 16  ;;  %v13309_v18 = vpop.f32.mrf.mxu1 }
 0x34f   : > { %v6590_v62 = vor.u32 %v6589_v10, %v6586_v22  ;;  %10764 = vmatpush3.bf16.msra.mxu0 %v10962_v60  ;;  %14738 = vst [vmem:[#allocation42_spill] sm:$0xff] %v13309_v18  ;;  %v6605_v41 = vrot.slane %v6603_v52, 5  ;;  %v6611_v21 = vshll.u32 %v6328_v19, 16  ;;  %v6617_v7 = vshll.u32 %v6329_v37, 16  ;;  %v13311_v3 = vpop.f32.mrf.mxu0  ;;  %v6331_v22 = vld [vmem:[#allocation3 + $0x10c] sm:$0xf] }
 0x350   : > { %10642 = vmatmul.mubr.bf16.gmra.mxu1 %v9463_v15  ;;  %v6600_v38 = vor.u32 %v6599_v55, %v6595_v4  ;;  %14739 = vst [vmem:[#allocation44_spill] sm:$0xff] %v13311_v3  ;;  %v6582_v29 = vsel %vm12431_vm0, %v6577_v14, %v6581_v24  ;;  %v6610_v51 = vrot.slane %v6608_v2, 4  ;;  %v6621_v30 = vshrl.u32 %v6329_v37, 16  ;;  %v13315_v45 = vpop.f32.mrf.mxu1  ;;  %v6332_v55 = vld [vmem:[#allocation3 + $0x110] sm:$0xf] }
 0x351   : > { %v6591_v59 = vrot.slane %v6590_v62, 4  ;;  %10645 = vmatprep.mubr.bf16.mxu1 %v9464_v9  ;;  %14740 = vst [vmem:[#allocation47_spill] sm:$0xff] %v13315_v45  ;;  %v9501_v60 = vcombine.low %v6572_v23, %v6582_v29  ;;  %v6613_v15 = vrot.slane %v6611_v21, 5  ;;  %v6619_v10 = vrot.slane %v6617_v7, 5  ;;  %v6333_v14 = vld [vmem:[#allocation3 + $0x114] sm:$0x1] }
 0x352   : > { %v6601_v34 = vrot.slane %v6600_v38, 4  ;;  %v6623_v52 = vrot.slane %v6621_v30, 4  ;;  %v6627_v18 = vshll.u32 %v6330_v36, 16  ;;  %v9465_v24 = vcombine.low %v13078_v31, %v13084_v57  ;;  %v6338_v3 = vld [vmem:[#allocation3 + $0x138] sm:$0xf] }
 0x353   : > { %v6596_v19 = vsel %vm12431_vm0, %v6591_v59, %v6595_v4  ;;  %10686 = vmatmul.mubr.bf16.gmra.mxu0 %v9501_v60  ;;  %v6614_v9 = vor.u32 %v6613_v15, %v6610_v51  ;;  %v6632_v62 = vshrl.u32 %v6331_v22, 16  ;;  %v6635_v23 = vshll.u32 %v6331_v22, 16  ;;  %v13323_v2 = vpop.f32.mrf.mxu0  ;;  %v6334_v4 = vld [vmem:[#allocation3 + $0x120] sm:$0xf]  ;;  %v6335_v60 = vld [vmem:[#allocation3 + $0x124] sm:$0xf] }
 0x354   : > { %v6606_v37 = vsel %vm12431_vm0, %v6601_v34, %v6605_v41  ;;  %v6624_v21 = vor.u32 %v6623_v52, %v6619_v10  ;;  %v6629_v7 = vrot.slane %v6627_v18, 5  ;;  %v6641_v29 = vshll.u32 %v6332_v55, 16  ;;  %v13325_v59 = vpop.f32.mrf.mxu1 }
 0x355   : > { %v9502_v38 = vcombine.low %v6596_v19, %v6606_v37  ;;  %v6615_v36 = vrot.slane %v6614_v9, 4  ;;  %v6634_v30 = vrot.slane %v6632_v62, 4  ;;  %v6637_v31 = vrot.slane %v6635_v23, 5  ;;  %v13327_v45 = vpop.f32.mrf.mxu0  ;;  %v6336_v37 = vld [vmem:[#allocation3 + $0x128] sm:$0x1] }
 0x356   : > { %v6645_v57 = vshrl.u32 %v6332_v55, 16  ;;  %v6625_v41 = vrot.slane %v6624_v21, 4  ;;  %v6643_v51 = vrot.slane %v6641_v29, 5  ;;  %v6651_v22 = vshll.u32 %v6333_v14, 16  ;;  %v13331_v15 = vpop.f32.mrf.mxu1 }
 0x357   : > { %10689 = vmatprep.mubr.bf16.mxu0 %v9502_v38  ;;  %v9466_v34 = vcombine.low %v13094_v54, %v13100_v25  ;;  %v6620_v18 = vsel %vm12431_vm0, %v6615_v36, %v6619_v10  ;;  %v6638_v19 = vor.u32 %v6637_v31, %v6634_v30  ;;  %v6656_v55 = vshrl.u32 %v6334_v4, 16  ;;  %v13335_v9 = vpop.f32.mrf.mxu0  ;;  %v6337_v54 = vld [vmem:[#allocation3 + $0x134] sm:$0xf] }
 0x358   : > { %10646 = vmatmul.mubr.bf16.gmra.mxu1 %v9465_v24  ;;  %v6647_v52 = vrot.slane %v6645_v57, 4  ;;  %14741 = vst [vmem:[#allocation52_spill] sm:$0xff] %v13335_v9  ;;  %v6630_v62 = vsel %vm12431_vm0, %v6625_v41, %v6629_v7  ;;  %v6653_v23 = vrot.slane %v6651_v22, 5  ;;  %v6659_v14 = vshll.u32 %v6334_v4, 16  ;;  %v13339_v25 = vpop.f32.mrf.mxu1 }
 0x359   : > { %10649 = vmatprep.mubr.bf16.mxu1 %v9466_v34  ;;  %v6665_v38 = vshll.u32 %v6335_v60, 16  ;;  %v9503_v21 = vcombine.low %v6620_v18, %v6630_v62  ;;  %v6639_v29 = vrot.slane %v6638_v19, 4  ;;  %v6658_v24 = vrot.slane %v6656_v55, 4  ;;  %v13341_v36 = vpop.f32.mrf.mxu0  ;;  %v7050_v34 = vld [vmem:[#allocation3 + $0x2c] sm:$0x8] }
 0x35a   : > { %v6648_v10 = vor.u32 %v6647_v52, %v6643_v51  ;;  %14742 = vst [vmem:[#allocation34_spill] sm:$0xff] %v13341_v36  ;;  %v6661_v30 = vrot.slane %v6659_v14, 5  ;;  %v6669_v57 = vshrl.u32 %v6335_v60, 16  ;;  %v6675_v9 = vshll.u32 %v6336_v37, 16  ;;  %v13343_v39 = vpop.f32.mrf.mxu1  ;;  %v6339_v55 = vld [vmem:[#allocation3 + $0x13c] sm:$0x1] }
 0x35b   : > { %v6667_v31 = vrot.slane %v6665_v38, 5  ;;  %14743 = vst [vmem:[#allocation49_spill] sm:$0xff] %v13343_v39  ;;  %10690 = vmatmul.mubr.bf16.gmra.mxu0 %v9503_v21  ;;  %v6644_v7 = vsel %vm12431_vm0, %v6639_v29, %v6643_v51  ;;  %v9467_v41 = vcombine.low %v13108_v8, %v13112_v43  ;;  %v6680_v22 = vshrl.u32 %v6337_v54, 16  ;;  %v13351_v21 = vld [vmem:[#allocation3 + $0x30] sm:$0xf] }
 0x35c   : > { %v6649_v4 = vrot.slane %v6648_v10, 4  ;;  %v6662_v18 = vor.u32 %v6661_v30, %v6658_v24  ;;  %v6671_v19 = vrot.slane %v6669_v57, 4  ;;  %v6677_v52 = vrot.slane %v6675_v9, 5  ;;  %v13357_v30 = vld [vmem:[#allocation3 + $0x34] sm:$0xf] }
 0x35d   : > { %v6683_v62 = vshll.u32 %v6337_v54, 16  ;;  %v6682_v37 = vrot.slane %v6680_v22, 4  ;;  %v6689_v14 = vshll.u32 %v6338_v3, 16  ;;  %v6693_v38 = vshrl.u32 %v6338_v3, 16  ;;  %v13353_v51 = vpop.f32.mrf.mxu0 }
 0x35e   : > { %v6654_v60 = vsel %vm12431_vm0, %v6649_v4, %v6653_v23  ;;  %v6663_v10 = vrot.slane %v6662_v18, 4  ;;  %v6672_v8 = vor.u32 %v6671_v19, %v6667_v31  ;;  %v13355_v36 = vpop.f32.mrf.mxu1  ;;  %v6699_v54 = vshll.u32 %v6339_v55, 16  ;;  %v433_v18 = vld [vmem:[#allocation3 + $0x150] sm:$0x1] }
 0x35f   : > { %v9504_v29 = vcombine.low %v6644_v7, %v6654_v60  ;;  %v6685_v43 = vrot.slane %v6683_v62, 5  ;;  %v6691_v9 = vrot.slane %v6689_v14, 5  ;;  %v6695_v24 = vrot.slane %v6693_v38, 4  ;;  %v13359_v57 = vpop.f32.mrf.mxu0  ;;  %v6340_v14 = vld [vmem:[#allocation3 + $0x148] sm:$0xf] }
 0x360   : > { %10650 = vmatmul.mubr.bf16.gmra.mxu1 %v9467_v41  ;;  %v7099_v23 = vshrl.u32 %v7050_v34, 16  ;;  %v6668_v3 = vsel %vm12431_vm0, %v6663_v10, %v6667_v31  ;;  %v6673_v4 = vrot.slane %v6672_v8, 4  ;;  %v7104_v22 = vshrl.u32 %v13351_v21, 16  ;;  %v13364_v19 = vpop.f32.mrf.mxu1  ;;  %v6341_v10 = vld [vmem:[#allocation3 + $0x14c] sm:$0xf] }
 0x361   : > { %10693 = vmatprep.mubr.bf16.mxu0 %v9504_v29  ;;  %v6686_v7 = vor.u32 %v6685_v43, %v6682_v37  ;;  %14744 = vst [vmem:[#allocation48_spill] sm:$0xff] %v13364_v19  ;;  %v6696_v41 = vor.u32 %v6695_v24, %v6691_v9  ;;  %v6701_v62 = vrot.slane %v6699_v54, 5  ;;  %v7107_v55 = vshll.u32 %v13351_v21, 16  ;;  %v13367_v34 = vpop.f32.mrf.mxu0 }
 0x362   : > { %v9516_v60 = vrot.slane %v7099_v23, 11  ;;  %v6678_v38 = vsel %vm12431_vm0, %v6673_v4, %v6677_v52  ;;  %v7106_v31 = vrot.slane %v7104_v22, 7  ;;  %v7113_v37 = vshrl.u32 %v13357_v30, 16  ;;  %v13372_v8 = vpop.f32.mrf.mxu1  ;;  %v7053_v22 = vld [vmem:[#allocation3 + $0x40] sm:$0x8] }
 0x363   : > { %v6687_v29 = vrot.slane %v6686_v7, 4  ;;  %14745 = vst [vmem:[#allocation50_spill] sm:$0xff] %v13372_v8  ;;  %v9505_v43 = vcombine.low %v6668_v3, %v6678_v38  ;;  %v6697_v39 = vrot.slane %v6696_v41, 4  ;;  %v7116_v24 = vshll.u32 %v13357_v30, 16  ;;  %v13377_v23 = vpop.f32.mrf.mxu0 }
 0x364   : > { %v434_v54 = vsel %vm11995_vm13, 0, %v433_v18  ;;  %14746 = vst [vmem:[#allocation51_spill] sm:$0xff] %v13377_v23  ;;  %v7109_v52 = vor.u32 %v7107_v55, %v7106_v31  ;;  %v7111_v4 = vrot.slane %v7106_v31, 4  ;;  %v7115_v7 = vrot.slane %v7113_v37, 7  ;;  %v13381_v63 = vpop.f32.mrf.mxu1  ;;  %v13385_v18 = vld [vmem:[#allocation3 + $0x44] sm:$0xf] }
 0x365   : > { %v6692_v50 = vsel %vm12431_vm0, %v6687_v29, %v6691_v9  ;;  %435 = vst [vmem:[#allocation3 + $0x150] sm:$0x1] %v434_v54  ;;  %14747 = vst [vmem:[#allocation35_spill] sm:$0xff] %v13381_v63  ;;  %10694 = vmatmul.mubr.bf16.gmra.mxu0 %v9505_v43  ;;  %v6702_v3 = vsel %vm12431_vm0, %v6697_v39, %v6701_v62  ;;  %v6704_v41 = vshrl.u32 %v6340_v14, 16  ;;  %v6707_v38 = vshll.u32 %v6340_v14, 16 }
 0x366   : > { %v6713_v12 = vshll.u32 %v6341_v10, 16  ;;  %v9506_v23 = vcombine.low %v6692_v50, %v6702_v3  ;;  %v7110_v9 = vsel %vm11976_vm11, %v9516_v60, %v7109_v52  ;;  %v7118_v55 = vor.u32 %v7116_v24, %v7115_v7  ;;  %v13389_v31 = vld [vmem:[#allocation3 + $0x48] sm:$0xf]  ;;  %v13391_v37 = vpop.f32.mrf.mxu0  ;;  %v13393_v54 = vpop.f32.mrf.mxu1  ;;  %v7056_v60 = vld [vmem:[#allocation3 + $0x54] sm:$0x8] }
 0x367   : > { %v6717_v29 = vshrl.u32 %v6341_v10, 16  ;;  %14748 = vst [vmem:[#allocation36_spill] sm:$0xff] %v13393_v54  ;;  %v6706_v43 = vrot.slane %v6704_v41, 4  ;;  %v6709_v63 = vrot.slane %v6707_v38, 5  ;;  %v7121_v62 = vshrl.u32 %v7053_v22, 16 }
 0x368   : > { %v6715_v39 = vrot.slane %v6713_v12, 5  ;;  %10697 = vmatprep.mubr.bf16.mxu0 %v9506_v23  ;;  %v7119_v14 = vsel %vm11976_vm11, %v7111_v4, %v7118_v55  ;;  %v7126_v3 = vshrl.u32 %v13385_v18, 16  ;;  %v13398_v24 = vld [vmem:[#allocation3 + $0x58] sm:$0xf]  ;;  %v13400_v10 = vpop.f32.mrf.mxu0  ;;  %v13402_v52 = vpop.f32.mrf.mxu1  ;;  %v7129_v41 = vshll.u32 %v13385_v18, 16 }
 0x369   : > { %v6719_v50 = vrot.slane %v6717_v29, 4  ;;  %14749 = vst [vmem:[#allocation53_spill] sm:$0xff] %v13400_v10  ;;  %14750 = vst [vmem:[#allocation37_spill] sm:$0xff] %v13402_v52  ;;  %v9548_v7 = vcombine.low %v7110_v9, %v7119_v14  ;;  %v6710_v35 = vor.u32 %v6709_v63, %v6706_v43  ;;  %v7135_v12 = vshrl.u32 %v13389_v31, 16  ;;  %v13407_v55 = vld [vmem:[#allocation3 + $0x5c] sm:$0xf] }
 0x36a   : > { %v9517_v22 = vrot.slane %v7121_v62, 11  ;;  %v7128_v38 = vrot.slane %v7126_v3, 7  ;;  %v7138_v4 = vshll.u32 %v13389_v31, 16  ;;  %v13409_v29 = vpop.f32.mrf.mxu0  ;;  %v13411_v54 = vpop.f32.mrf.mxu1  ;;  %v7143_v63 = vshrl.u32 %v7056_v60, 16 }
 0x36b   : > { %v6720_v23 = vor.u32 %v6719_v50, %v6715_v39  ;;  %14751 = vst [vmem:[#allocation55_spill] sm:$0xff] %v13409_v29  ;;  %14752 = vst [vmem:[#allocation54_spill] sm:$0xff] %v13411_v54  ;;  %10717 = vmatprep.mubr.bf16.mxu1 %v9548_v7  ;;  %v6711_v52 = vrot.slane %v6710_v35, 4  ;;  %v7137_v9 = vrot.slane %v7135_v12, 7  ;;  %v7148_v43 = vshrl.u32 %v13398_v24, 16 }
 0x36c   : > { %v6342_v8 = vld [vmem:[#allocation3 + $0x150] sm:$0x1]  ;;  %v7131_v50 = vor.u32 %v7129_v41, %v7128_v38  ;;  %v13414_v62 = vpop.f32.mrf.mxu0  ;;  %v13416_v3 = vpop.f32.mrf.mxu1  ;;  %v7133_v29 = vrot.slane %v7128_v38, 4  ;;  %v7059_v7 = vld [vmem:[#allocation3 + $0x68] sm:$0x8]  ;;  %v9518_v35 = vrot.slane %v7143_v63, 11 }
 0x36d   : > { %v6721_v14 = vrot.slane %v6720_v23, 4  ;;  %v6723_v10 = vshll.u32 %v6342_v8, 16  ;;  %14753 = vst [vmem:[#allocation4_spill] sm:$0xff] %v13414_v62  ;;  %14754 = vst [vmem:[#allocation6_spill] sm:$0xff] %v13416_v3  ;;  %v6716_v19 = vsel %vm12431_vm0, %v6711_v52, %v6715_v39  ;;  %v7140_v42 = vor.u32 %v7138_v4, %v7137_v9  ;;  %v13422_v23 = vld [vmem:[#allocation3 + $0x6c] sm:$0xf] }
 0x36e   : > { %v7150_v54 = vrot.slane %v7148_v43, 7  ;;  %v7151_v60 = vshll.u32 %v13398_v24, 16  ;;  %v7157_v12 = vshrl.u32 %v13407_v55, 16  ;;  %v13424_v8 = vpop.f32.mrf.mxu0  ;;  %v13426_v41 = vpop.f32.mrf.mxu1  ;;  %v7132_v3 = vsel %vm11976_vm11, %v9517_v22, %v7131_v50  ;;  %v13433_v38 = vld [vmem:[#allocation3 + $0x70] sm:$0xf]  ;;  %v10964_v62 = vld [vmem:[%s14553_s4 + $0x230] sm:$0xff]  }
 0x36f   : > { %v6725_v53 = vrot.slane %v6723_v10, 5  ;;  %14755 = vst [vmem:[#allocation5_spill] sm:$0xff] %v13424_v8  ;;  %14756 = vst [vmem:[#allocation9_spill] sm:$0xff] %v13426_v41  ;;  %v7141_v39 = vsel %vm11976_vm11, %v7133_v29, %v7140_v42  ;;  %v7160_v10 = vshll.u32 %v13407_v55, 16  ;;  %v7165_v29 = vshrl.u32 %v7059_v7, 16 }
 0x370   : > { %v7155_v52 = vrot.slane %v7150_v54, 4  ;;  %v9549_v9 = vcombine.low %v7132_v3, %v7141_v39  ;;  %v7153_v63 = vor.u32 %v7151_v60, %v7150_v54  ;;  %v7159_v43 = vrot.slane %v7157_v12, 7  ;;  %v13440_v41 = vpop.f32.mrf.mxu0  ;;  %v13442_v22 = vpop.f32.mrf.mxu1  ;;  %v7062_v8 = vld [vmem:[#allocation3 + $0x7c] sm:$0x8]  ;;  %v13450_v60 = vld [vmem:[#allocation3 + $0x80] sm:$0xf] }
 0x371   : > { %v6726_v4 = vsel %vm12431_vm0, %v6721_v14, %v6725_v53  ;;  %14757 = vst [vmem:[#allocation19_spill] sm:$0xff] %v13442_v22  ;;  %v7170_v50 = vshrl.u32 %v13422_v23, 16  ;;  %v9588_v53 = vcombine.low %v13351_v21, %v13357_v30  ;;  %v7179_v3 = vshrl.u32 %v13433_v38, 16  ;;  %v13458_v21 = vld [vmem:[#allocation3 + $0x84] sm:$0xf] }
 0x372   : > { %v9507_v42 = vcombine.low %v6716_v19, %v6726_v4  ;;  %10718 = vmatmul.mubr.bf16.vlgmr.msra.gmra.mxu1 %v9549_v9  ;;  %v7154_v54 = vsel %vm11976_vm11, %v9518_v35, %v7153_v63  ;;  %v7162_v14 = vor.u32 %v7160_v10, %v7159_v43  ;;  %v13452_v12 = vpop.f32.mrf.mxu0  ;;  %v13454_v39 = vpop.f32.mrf.mxu1  ;;  %v9519_v19 = vrot.slane %v7165_v29, 11  ;;  %v10967_v63 = vld [vmem:[%s14553_s4 + $0x228] sm:$0xff]  }
 0x373   : > { %14758 = vst [vmem:[#allocation21_spill] sm:$0xff] %v13454_v39  ;;  %10798 = vmatpush3.bf16.msra.mxu1 %v13260_v58  ;;  %v7172_v7 = vrot.slane %v7170_v50, 7  ;;  %v7173_v4 = vshll.u32 %v13422_v23, 16  ;;  %v7181_v35 = vrot.slane %v7179_v3, 7  ;;  %v7182_v10 = vshll.u32 %v13433_v38, 16 }
 0x374   : > { %10698 = vmatmul.mubr.bf16.gmra.mxu0 %v9507_v42  ;;  %v7163_v30 = vsel %vm11976_vm11, %v7155_v52, %v7162_v14  ;;  %10799 = vmatprep.subr.bf16.mxu1 %v10964_v62  ;;  %v7187_v9 = vshrl.u32 %v7062_v8, 16  ;;  %v13466_v58 = vpop.f32.mrf.mxu0  ;;  %v13468_v43 = vpop.f32.mrf.mxu1  ;;  %v7192_v50 = vshrl.u32 %v13450_v60, 16  ;;  %v7201_v52 = vshrl.u32 %v13458_v21, 16  ;;  %v7065_v14 = vld [vmem:[#allocation3 + $0x90] sm:$0x8] }
 0x375   : > { %10765 = vmatprep.mubr.bf16.mxu0 %v9588_v53  ;;  %14759 = vst [vmem:[#allocation17_spill] sm:$0xff] %v13466_v58  ;;  %14760 = vst [vmem:[#allocation22_spill] sm:$0xff] %v13468_v43  ;;  %v9550_v42 = vcombine.low %v7154_v54, %v7163_v30  ;;  %v7175_v29 = vor.u32 %v7173_v4, %v7172_v7  ;;  %v7177_v53 = vrot.slane %v7172_v7, 4  ;;  %v7195_v54 = vshll.u32 %v13450_v60, 16  ;;  %v13479_v4 = vld [vmem:[#allocation3 + $0x94] sm:$0xf] }
 0x376   : > { %v7184_v39 = vor.u32 %v7182_v10, %v7181_v35  ;;  %v13472_v3 = vpop.f32.mrf.mxu0  ;;  %v13476_v8 = vadd.f32 %v13199_v27, %v13159_v26  ;;  %v9520_v58 = vrot.slane %v7187_v9, 11  ;;  %v7194_v22 = vrot.slane %v7192_v50, 7 }
 0x377   : > { %10721 = vmatprep.mubr.bf16.mxu1 %v9550_v42  ;;  %10800 = vmatpush3.bf16.msra.mxu1 %v10964_v62  ;;  %v7176_v7 = vsel %vm11976_vm11, %v9519_v19, %v7175_v29  ;;  %v7203_v35 = vrot.slane %v7201_v52, 7  ;;  %v7204_v10 = vshll.u32 %v13458_v21, 16  ;;  %v13486_v42 = vld [vmem:[#allocation3 + $0x98] sm:$0xf]  ;;  %v9589_v62 = vcombine.low %v13385_v18, %v13389_v31 }
 0x378   : > { %v7185_v30 = vsel %vm11976_vm11, %v7177_v53, %v7184_v39  ;;  %10801 = vmatprep.subr.bf16.mxu1 %v10967_v63  ;;  %v13488_v26 = vpop.f32.mrf.mxu1  ;;  %v13490_v27 = vpop.f32.mrf.mxu0  ;;  %v7197_v50 = vor.u32 %v7195_v54, %v7194_v22  ;;  %v7199_v43 = vrot.slane %v7194_v22, 4  ;;  %v10970_v39 = vld [vmem:[%s14553_s4 + $0x220] sm:$0xff]   ;;  %v9590_v19 = vcombine.low %v13398_v24, %v13407_v55 }
 0x379   : > { %14761 = vst [vmem:[#allocation23_spill] sm:$0xff] %v13488_v26  ;;  %14762 = vst [vmem:[#allocation8_spill] sm:$0xff] %v13490_v27  ;;  %v9551_v9 = vcombine.low %v7176_v7, %v7185_v30  ;;  %v7206_v29 = vor.u32 %v7204_v10, %v7203_v35  ;;  %v7209_v53 = vshrl.u32 %v7065_v14, 16  ;;  %v7214_v52 = vshrl.u32 %v13479_v4, 16  ;;  %v13500_v26 = vld [vmem:[#allocation3 + $0xa8] sm:$0xf] }
 0x37a   : > { %v13502_v27 = vpop.f32.mrf.mxu1  ;;  %v13504_v18 = vpop.f32.mrf.mxu0  ;;  %v13508_v31 = vadd.f32 %v13208_v61, %v13174_v11  ;;  %v7198_v24 = vsel %vm11976_vm11, %v9520_v58, %v7197_v50  ;;  %v7217_v55 = vshll.u32 %v13479_v4, 16  ;;  %v7223_v22 = vshrl.u32 %v13486_v42, 16  ;;  %v13514_v14 = vld [vmem:[#allocation3 + $0xac] sm:$0xf] }
 0x37b   : > { %14763 = vst [vmem:[#allocation24_spill] sm:$0xff] %v13504_v18  ;;  %10722 = vmatmul.mubr.bf16.gmra.mxu1 %v9551_v9  ;;  %v7207_v54 = vsel %vm11976_vm11, %v7199_v43, %v7206_v29  ;;  %v9521_v7 = vrot.slane %v7209_v53, 11  ;;  %v7216_v30 = vrot.slane %v7214_v52, 7  ;;  %v7226_v35 = vshll.u32 %v13486_v42, 16  ;;  %v10973_v9 = vld [vmem:[%s14553_s4 + $0x218] sm:$0xff]  }
 0x37c   : > { %10766 = vmatmul.mubr.bf16.vlgmr.msra.gmra.mxu0 %v9589_v62  ;;  %10802 = vmatpush3.bf16.msra.mxu1 %v10967_v63  ;;  %v13519_v11 = vpop.f32.mrf.mxu0  ;;  %v9552_v61 = vcombine.low %v7198_v24, %v7207_v54  ;;  %v7225_v10 = vrot.slane %v7223_v22, 7  ;;  %v7231_v58 = vshrl.u32 %v7068_v5, 16  ;;  %v7236_v62 = vshrl.u32 %v13500_v26, 16  ;;  %v13525_v50 = vpop.f32.mrf.mxu1  ;;  %v7071_v22 = vld [vmem:[#allocation3 + $0xb8] sm:$0x8] }
 0x37d   : > { %10769 = vmatprep.mubr.bf16.mxu0 %v9590_v19  ;;  %14764 = vst [vmem:[#allocation7_spill] sm:$0xff] %v13519_v11  ;;  %10803 = vmatprep.subr.bf16.mxu1 %v10970_v39  ;;  %v13529_v43 = vadd.f32 %v13220_v28, %v13182_v47  ;;  %v7219_v19 = vor.u32 %v7217_v55, %v7216_v30  ;;  %v7221_v63 = vrot.slane %v7216_v30, 4  ;;  %v7245_v29 = vshrl.u32 %v13514_v14, 16  ;;  %v13538_v28 = vld [vmem:[#allocation3 + $0xbc] sm:$0xf] }
 0x37e   : > { %10725 = vmatprep.mubr.bf16.mxu1 %v9552_v61  ;;  %v7228_v53 = vor.u32 %v7226_v35, %v7225_v10  ;;  %v9522_v5 = vrot.slane %v7231_v58, 11  ;;  %v7238_v52 = vrot.slane %v7236_v62, 7  ;;  %v7239_v24 = vshll.u32 %v13500_v26, 16  ;;  %v13540_v55 = vld [vmem:[#allocation3 + $0xc0] sm:$0xf] }
 0x37f   : > { %v9591_v54 = vcombine.low %v13422_v23, %v13433_v38  ;;  %v7220_v11 = vsel %vm11976_vm11, %v9521_v7, %v7219_v19  ;;  %v7247_v18 = vrot.slane %v7245_v29, 7  ;;  %v7248_v47 = vshll.u32 %v13514_v14, 16  ;;  %v13550_v38 = vpop.f32.mrf.mxu1  ;;  %v7074_v19 = vld [vmem:[#allocation3 + $0xcc] sm:$0x8] }
 0x380   : > { %10804 = vmatpush3.bf16.msra.mxu1 %v10970_v39  ;;  %v13542_v30 = vpop.f32.mrf.mxu0  ;;  %v7229_v35 = vsel %vm11976_vm11, %v7221_v63, %v7228_v53  ;;  %v7241_v61 = vor.u32 %v7239_v24, %v7238_v52  ;;  %v7243_v10 = vrot.slane %v7238_v52, 4  ;;  %v13548_v23 = vadd.f32 %v13293_v46, %v13253_v48  ;;  %14765 = vst [vmem:[#allocation45_spill] sm:$0xff] %v13550_v38  ;;  %v10976_v63 = vld [vmem:[%s14553_s4 + $0x210] sm:$0xff]  }
 0x381   : > { %10805 = vmatprep.subr.bf16.mxu1 %v10973_v9  ;;  %v9553_v7 = vcombine.low %v7220_v11, %v7229_v35  ;;  %v9592_v58 = vcombine.low %v13450_v60, %v13458_v21  ;;  %v7250_v62 = vor.u32 %v7248_v47, %v7247_v18  ;;  %v7253_v39 = vshrl.u32 %v7071_v22, 16  ;;  %v13567_v21 = vld [vmem:[#allocation3 + $0xd0] sm:$0xf]  ;;  %v13569_v18 = vld [vmem:[#allocation3 + $0xd4] sm:$0xf] }
 0x382   : > { %v13557_v29 = vpop.f32.mrf.mxu0  ;;  %v13561_v48 = vadd.f32 %v13235_v13, %v13194_v1  ;;  %v7242_v46 = vsel %vm11976_vm11, %v9522_v5, %v7241_v61  ;;  %v7258_v11 = vshrl.u32 %v13538_v28, 16  ;;  %v7267_v60 = vshrl.u32 %v13540_v55, 16 }
 0x383   : > { %v13573_v53 = vadd.f32 %v13249_v56, %v13201_v0  ;;  %10726 = vmatmul.mubr.bf16.gmra.mxu1 %v9553_v7  ;;  %v7251_v1 = vsel %vm11976_vm11, %v7243_v10, %v7250_v62  ;;  %v9523_v13 = vrot.slane %v7253_v39, 11  ;;  %v7261_v5 = vshll.u32 %v13538_v28, 16  ;;  %v10979_v7 = vld [vmem:[%s14553_s4 + $0x208] sm:$0xff]  }
 0x384   : > { %14766 = vst [vmem:[#allocation11_spill] sm:$0xff] %v13561_v48  ;;  %10770 = vmatmul.mubr.bf16.gmra.mxu0 %v9591_v54  ;;  %v9554_v52 = vcombine.low %v7242_v46, %v7251_v1  ;;  %v7260_v24 = vrot.slane %v7258_v11, 7  ;;  %v7269_v22 = vrot.slane %v7267_v60, 7  ;;  %v7270_v54 = vshll.u32 %v13540_v55, 16  ;;  %10806 = vmatpush3.bf16.msra.mxu1 %v10973_v9  ;;  %v13581_v35 = vpop.f32.mrf.mxu0  ;;  %v13591_v46 = vld [vmem:[#allocation3 + $0xe4] sm:$0xf] }
 0x385   : > { %10773 = vmatprep.mubr.bf16.mxu0 %v9592_v58  ;;  %v13579_v47 = vpop.f32.mrf.mxu1  ;;  %v9593_v0 = vcombine.low %v13479_v4, %v13486_v42  ;;  %v7275_v56 = vshrl.u32 %v7074_v19, 16  ;;  %v7280_v61 = vshrl.u32 %v13567_v21, 16  ;;  %v7289_v10 = vshrl.u32 %v13569_v18, 16  ;;  %10807 = vmatprep.subr.bf16.mxu1 %v10976_v63  ;;  %v7077_v1 = vld [vmem:[#allocation3 + $0xe0] sm:$0x8] }
 0x386   : > { %10729 = vmatprep.mubr.bf16.mxu1 %v9554_v52  ;;  %v7263_v58 = vor.u32 %v7261_v5, %v7260_v24  ;;  %v7265_v9 = vrot.slane %v7260_v24, 4  ;;  %v7272_v62 = vor.u32 %v7270_v54, %v7269_v22  ;;  %v7283_v39 = vshll.u32 %v13567_v21, 16  ;;  %v13606_v22 = vld [vmem:[#allocation3 + $0xe8] sm:$0xf]  ;;  %v13608_v54 = vpop.f32.mrf.mxu0 }
 0x387   : > { %v13593_v11 = vpop.f32.mrf.mxu1  ;;  %v9524_v4 = vrot.slane %v7275_v56, 11  ;;  %v7282_v42 = vrot.slane %v7280_v61, 7  ;;  %v7291_v19 = vrot.slane %v7289_v10, 7  ;;  %v7292_v60 = vshll.u32 %v13569_v18, 16  ;;  %14767 = vst [vmem:[#allocation10_spill] sm:$0xff] %v13608_v54 }
 0x388   : > { %v7264_v38 = vsel %vm11976_vm11, %v9523_v13, %v7263_v58  ;;  %v7273_v5 = vsel %vm11976_vm11, %v7265_v9, %v7272_v62  ;;  %v9594_v52 = vcombine.low %v13500_v26, %v13514_v14  ;;  %v13604_v24 = vadd.f32 %v13323_v2, %v13295_v40  ;;  %10808 = vmatpush3.bf16.msra.mxu1 %v10976_v63  ;;  %v10982_v13 = vld [vmem:[%s14553_s4 + $0x200] sm:$0xff]   ;;  %v13622_v63 = vld [vmem:[#allocation3 + $0xf8] sm:$0xf]  ;;  %v8129_v54 = vld [vmem:[#allocation3 + $0x44] sm:$0xf] }
 0x389   : > { %v9555_v56 = vcombine.low %v7264_v38, %v7273_v5  ;;  %v7285_v61 = vor.u32 %v7283_v39, %v7282_v42  ;;  %v7287_v10 = vrot.slane %v7282_v42, 4  ;;  %v7294_v48 = vor.u32 %v7292_v60, %v7291_v19  ;;  %10809 = vmatprep.subr.bf16.mxu1 %v10979_v7  ;;  %v7080_v38 = vld [vmem:[#allocation3 + $0xf4] sm:$0x8]  ;;  %v13624_v58 = vpop.f32.mrf.mxu1 }
 0x38a   : > { %v13615_v26 = vadd.f32 %v13262_v49, %v13210_v6  ;;  %v13619_v40 = vadd.f32 %v13271_v32, %v13225_v33  ;;  %v7297_v2 = vshrl.u32 %v7077_v1, 16  ;;  %v7302_v14 = vshrl.u32 %v13591_v46, 16  ;;  %v13632_v32 = vld [vmem:[#allocation3 + $0xfc] sm:$0xf] }
 0x38b   : > { %10730 = vmatmul.mubr.bf16.gmra.mxu1 %v9555_v56  ;;  %v7286_v9 = vsel %vm11976_vm11, %v9524_v4, %v7285_v61  ;;  %v7295_v6 = vsel %vm11976_vm11, %v7287_v10, %v7294_v48  ;;  %v7305_v33 = vshll.u32 %v13591_v46, 16  ;;  %v7311_v49 = vshrl.u32 %v13606_v22, 16 }
 0x38c   : > { %10774 = vmatmul.mubr.bf16.gmra.mxu0 %v9593_v0  ;;  %v9556_v0 = vcombine.low %v7286_v9, %v7295_v6  ;;  %v9525_v62 = vrot.slane %v7297_v2, 11  ;;  %v7304_v39 = vrot.slane %v7302_v14, 7  ;;  %v7314_v42 = vshll.u32 %v13606_v22, 16  ;;  %10810 = vmatpush3.bf16.msra.mxu1 %v10979_v7  ;;  %v13645_v7 = vpop.f32.mrf.mxu1 }
 0x38d   : > { %10777 = vmatprep.mubr.bf16.mxu0 %v9594_v52  ;;  %v13635_v19 = vpop.f32.mrf.mxu0  ;;  %v7313_v60 = vrot.slane %v7311_v49, 7  ;;  %v13639_v4 = vadd.f32 %v13327_v45, %v13301_v16  ;;  %v7319_v48 = vshrl.u32 %v7080_v38, 16  ;;  %v7324_v1 = vshrl.u32 %v13622_v63, 16  ;;  %10811 = vmatprep.subr.bf16.mxu1 %v10982_v13  ;;  %14768 = vst [vmem:[#allocation13_spill] sm:$0xff] %v13645_v7  ;;  %v7083_v38 = vld [vmem:[#allocation3 + $0x108] sm:$0x8] }
 0x38e   : > { %10733 = vmatprep.mubr.bf16.mxu1 %v9556_v0  ;;  %v9595_v5 = vcombine.low %v13538_v28, %v13540_v55  ;;  %v7307_v52 = vor.u32 %v7305_v33, %v7304_v39  ;;  %v7309_v56 = vrot.slane %v7304_v39, 4  ;;  %v7333_v61 = vshrl.u32 %v13632_v32, 16  ;;  %v13655_v33 = vld [vmem:[#allocation3 + $0x10c] sm:$0xf]  ;;  %v13657_v49 = vld [vmem:[#allocation3 + $0x110] sm:$0xf] }
 0x38f   : > { %v13647_v10 = vpop.f32.mrf.mxu0  ;;  %v7316_v2 = vor.u32 %v7314_v42, %v7313_v60  ;;  %v9526_v14 = vrot.slane %v7319_v48, 11  ;;  %v7326_v16 = vrot.slane %v7324_v1, 7  ;;  %v7327_v45 = vshll.u32 %v13622_v63, 16  ;;  %v7086_v1 = vld [vmem:[#allocation3 + $0x11c] sm:$0x8]  ;;  %v14785_v7 = vld [vmem:[#allocation5_spill] sm:$0xff] }
 0x390   : > { %v7308_v9 = vsel %vm11976_vm11, %v9525_v62, %v7307_v52  ;;  %v9596_v28 = vcombine.low %v13567_v21, %v13569_v18  ;;  %v7335_v55 = vrot.slane %v7333_v61, 7  ;;  %v7336_v6 = vshll.u32 %v13632_v32, 16  ;;  %10812 = vmatpush3.bf16.msra.mxu1 %v10982_v13 }
 0x391   : > { %v7317_v0 = vsel %vm11976_vm11, %v7309_v56, %v7316_v2  ;;  %v7329_v39 = vor.u32 %v7327_v45, %v7326_v16  ;;  %v7331_v42 = vrot.slane %v7326_v16, 4  ;;  %v13663_v60 = vadd.f32 %v13353_v51, %v13325_v59  ;;  %v13671_v13 = vpop.f32.mrf.mxu0 }
 0x392   : > { %v13667_v21 = vadd.f32 %v13280_v44, %v13239_v20  ;;  %v9557_v18 = vcombine.low %v7308_v9, %v7317_v0  ;;  %v7338_v62 = vor.u32 %v7336_v6, %v7335_v55  ;;  %v7341_v48 = vshrl.u32 %v7083_v38, 16  ;;  %v13679_v44 = vld [vmem:[#allocation3 + $0x120] sm:$0xf] }
 0x393   : > { %14769 = vst [vmem:[#allocation12_spill] sm:$0xff] %v13663_v60  ;;  %v13669_v52 = vpop.f32.mrf.mxu1  ;;  %v7330_v56 = vsel %vm11976_vm11, %v9526_v14, %v7329_v39  ;;  %v9597_v59 = vcombine.low %v13591_v46, %v13606_v22  ;;  %v7346_v51 = vshrl.u32 %v13655_v33, 16  ;;  %v7355_v20 = vshrl.u32 %v13657_v49, 16  ;;  %v13696_v39 = vpop.f32.mrf.mxu0 }
 0x394   : > { %14770 = vst [vmem:[#allocation14_spill] sm:$0xff] %v13667_v21  ;;  %10778 = vmatmul.mubr.bf16.gmra.mxu0 %v9595_v5  ;;  %v13681_v5 = vld [vmem:[#allocation3 + $0x124] sm:$0xf]  ;;  %10734 = vmatmul.mubr.bf16.gmra.mxu1 %v9557_v18  ;;  %v7339_v61 = vsel %vm11976_vm11, %v7331_v42, %v7338_v62  ;;  %v9527_v2 = vrot.slane %v7341_v48, 11  ;;  %v7349_v16 = vshll.u32 %v13655_v33, 16  ;;  %v7358_v14 = vshll.u32 %v13657_v49, 16 }
 0x395   : > { %10781 = vmatprep.mubr.bf16.mxu0 %v9596_v28  ;;  %v13687_v45 = vpop.f32.mrf.mxu1  ;;  %v9558_v46 = vcombine.low %v7330_v56, %v7339_v61  ;;  %v7348_v22 = vrot.slane %v7346_v51, 7  ;;  %v7357_v38 = vrot.slane %v7355_v20, 7  ;;  %v13691_v9 = vadd.f32 %v13359_v57, %v13331_v15  ;;  %14772 = vst [vmem:[#allocation18_spill] sm:$0xff] %v13696_v39  ;;  %v13699_v56 = vld [vmem:[#allocation3 + $0x134] sm:$0xf] }
 0x396   : > { %v7363_v28 = vshrl.u32 %v7086_v1, 16  ;;  %v7368_v55 = vshrl.u32 %v13679_v44, 16  ;;  %v7371_v6 = vshll.u32 %v13679_v44, 16  ;;  %v7377_v0 = vshrl.u32 %v13681_v5, 16  ;;  %v7089_v61 = vld [vmem:[#allocation3 + $0x130] sm:$0x8] }
 0x397   : > { %14771 = vst [vmem:[#allocation16_spill] sm:$0xff] %v13691_v9  ;;  %10737 = vmatprep.mubr.bf16.mxu1 %v9558_v46  ;;  %v7351_v42 = vor.u32 %v7349_v16, %v7348_v22  ;;  %v7353_v18 = vrot.slane %v7348_v22, 4  ;;  %v7360_v62 = vor.u32 %v7358_v14, %v7357_v38  ;;  %v7380_v48 = vshll.u32 %v13681_v5, 16  ;;  %v13701_v51 = vpop.f32.mrf.mxu1  ;;  %v13717_v38 = vld [vmem:[#allocation3 + $0x138] sm:$0xf] }
 0x398   : > { %v9528_v15 = vrot.slane %v7363_v28, 11  ;;  %v7370_v57 = vrot.slane %v7368_v55, 7  ;;  %v7379_v1 = vrot.slane %v7377_v0, 7  ;;  %v13705_v20 = vadd.f32 %v13367_v34, %v13339_v25 }
 0x399   : > { %v7352_v46 = vsel %vm11976_vm11, %v9527_v2, %v7351_v42  ;;  %v7361_v16 = vsel %vm11976_vm11, %v7353_v18, %v7360_v62  ;;  %v9598_v14 = vcombine.low %v13622_v63, %v13632_v32  ;;  %v13715_v22 = vadd.f32 %v13391_v37, %v13355_v36  ;;  %v14775_v2 = vld [vmem:[#allocation46_spill] sm:$0xff]  ;;  %v14776_v42 = vld [vmem:[#allocation39_spill] sm:$0xff]  ;;  %v13728_v18 = vld [vmem:[#allocation3 + $0x148] sm:$0xf] }
 0x39a   : > { %14773 = vst [vmem:[#allocation20_spill] sm:$0xff] %v13705_v20  ;;  %v9559_v28 = vcombine.low %v7352_v46, %v7361_v16  ;;  %v7373_v25 = vor.u32 %v7371_v6, %v7370_v57  ;;  %v7375_v34 = vrot.slane %v7370_v57, 4  ;;  %v7382_v55 = vor.u32 %v7380_v48, %v7379_v1  ;;  %v7092_v37 = vld [vmem:[#allocation3 + $0x144] sm:$0x8]  ;;  %v14784_v20 = vld [vmem:[#allocation36_spill] sm:$0xff] }
 0x39b   : > { %14774 = vst [vmem:[#allocation26_spill] sm:$0xff] %v13715_v22  ;;  %v13719_v0 = vpop.f32.mrf.mxu0  ;;  %v13723_v39 = vadd.f32 %v14776_v42, %v14775_v2  ;;  %v9599_v63 = vcombine.low %v13655_v33, %v13657_v49  ;;  %v7385_v32 = vshrl.u32 %v7089_v61, 16  ;;  %v7390_v36 = vshrl.u32 %v13699_v56, 16  ;;  %v13738_v33 = vld [vmem:[#allocation3 + $0x14c] sm:$0xf]  ;;  %v14779_v2 = vld [vmem:[#allocation53_spill] sm:$0xff] }
 0x39c   : > { %10782 = vmatmul.mubr.bf16.gmra.mxu0 %v9597_v59  ;;  %v13730_v59 = vpop.f32.mrf.mxu1  ;;  %10738 = vmatmul.mubr.bf16.gmra.mxu1 %v9559_v28  ;;  %v7374_v6 = vsel %vm11976_vm11, %v9528_v15, %v7373_v25  ;;  %v7383_v62 = vsel %vm11976_vm11, %v7375_v34, %v7382_v55  ;;  %v7393_v48 = vshll.u32 %v13699_v56, 16  ;;  %v7399_v57 = vshrl.u32 %v13717_v38, 16  ;;  %v14778_v28 = vld [vmem:[#allocation48_spill] sm:$0xff] }
 0x39d   : > { %10785 = vmatprep.mubr.bf16.mxu0 %v9598_v14  ;;  %14777 = vst [vmem:[#allocation28_spill] sm:$0xff] %v13730_v59  ;;  %v13740_v49 = vpop.f32.mrf.mxu0  ;;  %v9560_v1 = vcombine.low %v7374_v6, %v7383_v62  ;;  %v9529_v61 = vrot.slane %v7385_v32, 11  ;;  %v7392_v46 = vrot.slane %v7390_v36, 7  ;;  %v7402_v16 = vshll.u32 %v13717_v38, 16 }
 0x39e   : > { %v7401_v14 = vrot.slane %v7399_v57, 7  ;;  %v13745_v15 = vadd.f32 %v14779_v2, %v14778_v28  ;;  %v7407_v25 = vshrl.u32 %v7092_v37, 16  ;;  %v7412_v34 = vshrl.u32 %v13728_v18, 16  ;;  %v331_v28 = vld [vmem:[#allocation3 + $0x158] sm:$0x8] }
 0x39f   : > { %10741 = vmatprep.mubr.bf16.mxu1 %v9560_v1  ;;  %v7395_v55 = vor.u32 %v7393_v48, %v7392_v46  ;;  %v7397_v42 = vrot.slane %v7392_v46, 4  ;;  %v9600_v59 = vcombine.low %v13679_v44, %v13681_v5  ;;  %v7421_v6 = vshrl.u32 %v13738_v33, 16  ;;  %v13754_v2 = vpop.f32.mrf.mxu0  ;;  %v14781_v46 = vld [vmem:[#allocation50_spill] sm:$0xff]  ;;  %v14782_v44 = vld [vmem:[#allocation55_spill] sm:$0xff] }
 0x3a0   : > { %14780 = vst [vmem:[#allocation30_spill] sm:$0xff] %v13745_v15  ;;  %v13751_v32 = vpop.f32.mrf.mxu1  ;;  %v7404_v36 = vor.u32 %v7402_v16, %v7401_v14  ;;  %v9530_v62 = vrot.slane %v7407_v25, 11  ;;  %v7414_v57 = vrot.slane %v7412_v34, 7  ;;  %v7415_v22 = vshll.u32 %v13728_v18, 16  ;;  %v13763_v15 = vld [vmem:[#allocation3 + $0x15c] sm:$0xf] }
 0x3a1   : > { %v7396_v37 = vsel %vm11976_vm11, %v9529_v61, %v7395_v55  ;;  %v7423_v48 = vrot.slane %v7421_v6, 7  ;;  %v7424_v1 = vshll.u32 %v13738_v33, 16  ;;  %v13761_v5 = vadd.f32 %v14782_v44, %v14781_v46  ;;  %v13765_v16 = vld [vmem:[#allocation3 + $0x160] sm:$0xf]  ;;  %v14787_v55 = vld [vmem:[#allocation32_spill] sm:$0xff]  ;;  %v14788_v6 = vld [vmem:[#allocation33_spill] sm:$0xff] }
 0x3a2   : > { %v7405_v14 = vsel %vm11976_vm11, %v7397_v42, %v7404_v36  ;;  %v7417_v25 = vor.u32 %v7415_v22, %v7414_v57  ;;  %v7419_v34 = vrot.slane %v7414_v57, 4  ;;  %v13771_v61 = vadd.f32 %v14785_v7, %v14784_v20  ;;  %v13779_v60 = vpop.f32.mrf.mxu1  ;;  %v8127_v36 = vld [vmem:[#allocation3 + $0x34] sm:$0xf]  ;;  %v13787_v57 = vpop.f32.mrf.mxu0 }
 0x3a3   : > { %14783 = vst [vmem:[#allocation29_spill] sm:$0xff] %v13761_v5  ;;  %v13775_v21 = vadd.f32 %v14788_v6, %v14787_v55  ;;  %v9561_v46 = vcombine.low %v7396_v37, %v7405_v14  ;;  %v7426_v44 = vor.u32 %v7424_v1, %v7423_v48  ;;  %v332_v9 = vsel %vm11910_vm8, 0, %v331_v28  ;;  %14790 = vst [vmem:[#allocation31_spill] sm:$0xff] %v13787_v57  ;;  %v14791_v48 = vld [vmem:[#allocation37_spill] sm:$0xff] }
 0x3a4   : > { %10786 = vmatmul.mubr.bf16.gmra.mxu0 %v9599_v63  ;;  %14786 = vst [vmem:[#allocation38_spill] sm:$0xff] %v13771_v61  ;;  %v8126_v63 = vld [vmem:[#allocation3 + $0x30] sm:$0xf]  ;;  %v7418_v22 = vsel %vm11976_vm11, %v9530_v62, %v7417_v25  ;;  %v9601_v7 = vcombine.low %v13699_v56, %v13717_v38  ;;  %333 = vst [vmem:[#allocation3 + $0x158] sm:$0x8] %v332_v9  ;;  %v7434_v20 = vshrl.u32 %v13763_v15, 16 }
 0x3a5   : > { %10789 = vmatprep.mubr.bf16.mxu0 %v9600_v59  ;;  %v7443_v42 = vshrl.u32 %v13765_v16, 16  ;;  %v8128_v59 = vld [vmem:[#allocation3 + $0x38] sm:$0x1]  ;;  %10742 = vmatmul.mubr.bf16.gmra.mxu1 %v9561_v46  ;;  %v7427_v28 = vsel %vm11976_vm11, %v7419_v34, %v7426_v44  ;;  %v7437_v37 = vshll.u32 %v13763_v15, 16  ;;  %v7446_v62 = vshll.u32 %v13765_v16, 16  ;;  %v13797_v46 = vpop.f32.mrf.mxu1 }
 0x3a6   : > { %v13795_v56 = vadd.f32 %v13440_v41, %v14791_v48  ;;  %v9562_v9 = vcombine.low %v7418_v22, %v7427_v28  ;;  %v7436_v38 = vrot.slane %v7434_v20, 7  ;;  %v8175_v5 = vshrl.u32 %v8126_v63, 16  ;;  %v14793_v48 = vld [vmem:[#allocation54_spill] sm:$0xff] }
 0x3a7   : > { %v7445_v1 = vrot.slane %v7443_v42, 7  ;;  %v8178_v14 = vshll.u32 %v8126_v63, 16  ;;  %v8184_v25 = vshll.u32 %v8127_v36, 16  ;;  %v8188_v55 = vshrl.u32 %v8127_v36, 16  ;;  %v8130_v63 = vld [vmem:[#allocation3 + $0x48] sm:$0xf] }
 0x3a8   : > { %14792 = vst [vmem:[#allocation43_spill] sm:$0xff] %v13795_v56  ;;  %v8194_v6 = vshll.u32 %v8128_v59, 16  ;;  %10745 = vmatprep.mubr.bf16.mxu1 %v9562_v9  ;;  %v7441_v34 = vrot.slane %v7436_v38, 4  ;;  %v9602_v57 = vcombine.low %v13728_v18, %v13738_v33  ;;  %v8177_v61 = vrot.slane %v8175_v5, 4  ;;  %v13801_v41 = vpop.f32.mrf.mxu0  ;;  %v14795_v9 = vld [vmem:[#allocation9_spill] sm:$0xff]  ;;  %v14797_v5 = vld [vmem:[#allocation23_spill] sm:$0xff] }
 0x3a9   : > { %v7448_v44 = vor.u32 %v7446_v62, %v7445_v1  ;;  %v7439_v22 = vor.u32 %v7437_v37, %v7436_v38  ;;  %v8180_v20 = vrot.slane %v8178_v14, 5  ;;  %v8186_v42 = vrot.slane %v8184_v25, 5  ;;  %v8131_v33 = vld [vmem:[#allocation3 + $0x4c] sm:$0x1]  ;;  %v13817_v25 = vpop.f32.mrf.mxu1 }
 0x3aa   : > { %v8190_v28 = vrot.slane %v8188_v55, 4  ;;  %v8196_v59 = vrot.slane %v8194_v6, 5  ;;  %v13807_v62 = vadd.f32 %v13452_v12, %v14793_v48  ;;  %v13811_v18 = vadd.f32 %v13472_v3, %v14795_v9  ;;  %14798 = vst [vmem:[#allocation39_spill] sm:$0xff] %v13817_v25  ;;  %v8133_v25 = vld [vmem:[#allocation3 + $0x5c] sm:$0xf] }
 0x3ab   : > { %v7449_v36 = vsel %vm11976_vm11, %v7441_v34, %v7448_v44  ;;  %v7095_v1 = vld [vmem:[#allocation3 + $0x158] sm:$0x8]  ;;  %v8181_v37 = vor.u32 %v8180_v20, %v8177_v61  ;;  %v5189_v14 = vadd.f32 %v14797_v5, %v13476_v8  ;;  %v8199_v12 = vshrl.u32 %v8129_v54, 16  ;;  %v13819_v44 = vpop.f32.mrf.mxu0 }
 0x3ac   : > { %10790 = vmatmul.mubr.bf16.gmra.mxu0 %v9601_v7  ;;  %14794 = vst [vmem:[#allocation41_spill] sm:$0xff] %v13807_v62  ;;  %14796 = vst [vmem:[#allocation46_spill] sm:$0xff] %v13811_v18  ;;  %v8191_v38 = vor.u32 %v8190_v28, %v8186_v42  ;;  %v9603_v7 = vcombine.low %v13763_v15, %v13765_v16  ;;  %v7429_v55 = vshrl.u32 %v7095_v1, 16  ;;  %v8202_v6 = vshll.u32 %v8129_v54, 16  ;;  %v8132_v15 = vld [vmem:[#allocation3 + $0x58] sm:$0xf] }
 0x3ad   : > { %10793 = vmatprep.mubr.bf16.mxu0 %v9602_v57  ;;  %v8208_v34 = vshll.u32 %v8130_v63, 16  ;;  %14799 = vst [vmem:[#allocation48_spill] sm:$0xff] %v13819_v44  ;;  %v8182_v3 = vrot.slane %v8181_v37, 4  ;;  %v8212_v9 = vshrl.u32 %v8130_v63, 16  ;;  %v8218_v57 = vshll.u32 %v8131_v33, 16 }
 0x3ae   : > { %v8192_v48 = vrot.slane %v8191_v38, 4  ;;  %v9531_v61 = vrot.slane %v7429_v55, 11  ;;  %v8201_v20 = vrot.slane %v8199_v12, 4  ;;  %v8204_v28 = vrot.slane %v8202_v6, 5  ;;  %v8134_v62 = vld [vmem:[#allocation3 + $0x60] sm:$0x1]  ;;  %v13833_v6 = vpop.f32.mrf.mxu0 }
 0x3af   : > { %v8210_v18 = vrot.slane %v8208_v34, 5  ;;  %v8187_v8 = vsel %vm12431_vm0, %v8182_v3, %v8186_v42  ;;  %v8214_v5 = vrot.slane %v8212_v9, 4  ;;  %v8220_v54 = vrot.slane %v8218_v57, 5  ;;  %v14802_v38 = vld [vmem:[#allocation19_spill] sm:$0xff]  ;;  %v14803_v55 = vld [vmem:[#allocation8_spill] sm:$0xff] }
 0x3b0   : > { %v8197_v1 = vsel %vm12431_vm0, %v8192_v48, %v8196_v59  ;;  %v13825_v56 = vpop.f32.mrf.mxu1  ;;  %v7440_v63 = vsel %vm11976_vm11, %v9531_v61, %v7439_v22  ;;  %v8205_v37 = vor.u32 %v8204_v28, %v8201_v20  ;;  %v13831_v12 = vadd.f32 %v14803_v55, %v14802_v38  ;;  %v14804_v28 = vld [vmem:[#allocation40_spill] sm:$0xff]  ;;  %v8136_v55 = vld [vmem:[#allocation3 + $0x70] sm:$0xf] }
 0x3b1   : > { %14801 = vst [vmem:[#allocation53_spill] sm:$0xff] %v13825_v56  ;;  %v9628_v33 = vcombine.low %v8187_v8, %v8197_v1  ;;  %v9563_v42 = vcombine.low %v7440_v63, %v7449_v36  ;;  %v8215_v34 = vor.u32 %v8214_v5, %v8210_v18  ;;  %v8223_v59 = vshrl.u32 %v8132_v15, 16  ;;  %v14805_v8 = vld [vmem:[#allocation44_spill] sm:$0xff]  ;;  %v14806_v1 = vld [vmem:[#allocation42_spill] sm:$0xff]  ;;  %v13847_v63 = vpop.f32.mrf.mxu0 }
 0x3b2   : > { %v8226_v3 = vshll.u32 %v8132_v15, 16  ;;  %v8206_v48 = vrot.slane %v8205_v37, 4  ;;  %v8232_v9 = vshll.u32 %v8133_v25, 16  ;;  %v8236_v57 = vshrl.u32 %v8133_v25, 16  ;;  %v13835_v56 = vpop.f32.mrf.mxu1  ;;  %v14807_v15 = vld [vmem:[#allocation52_spill] sm:$0xff]  ;;  %14808 = vst [vmem:[#allocation50_spill] sm:$0xff] %v13847_v63 }
 0x3b3   : > { %v8242_v44 = vshll.u32 %v8134_v62, 16  ;;  %10746 = vmatmul.mubr.bf16.gmra.mxu1 %v9563_v42  ;;  %v8216_v17 = vrot.slane %v8215_v34, 4  ;;  %v8225_v22 = vrot.slane %v8223_v59, 4  ;;  %v5187_v20 = vadd.f32 %v13502_v27, %v13508_v31  ;;  %v8135_v5 = vld [vmem:[#allocation3 + $0x6c] sm:$0xf]  ;;  %v14809_v42 = vld [vmem:[#allocation49_spill] sm:$0xff] }
 0x3b4   : > { %10794 = vmatmul.mubr.bf16.gmra.mxu0 %v9603_v7  ;;  %v8228_v61 = vrot.slane %v8226_v3, 5  ;;  %v13841_v36 = vadd.f32 %v14805_v8, %v14804_v28  ;;  %v13845_v7 = vadd.f32 %v14807_v15, %v14806_v1  ;;  %10813 = vmatprep.mubr.bf16.mxu1 %v9628_v33  ;;  %v8234_v25 = vrot.slane %v8232_v9, 5  ;;  %v14810_v34 = vld [vmem:[#allocation51_spill] sm:$0xff]  ;;  %v13859_v28 = vpop.f32.mrf.mxu1 }
 0x3b5   : > { %v8238_v62 = vrot.slane %v8236_v57, 4  ;;  %v8211_v37 = vsel %vm12431_vm0, %v8206_v48, %v8210_v18  ;;  %v8221_v27 = vsel %vm12431_vm0, %v8216_v17, %v8220_v54  ;;  %v5190_v38 = vadd.f32 %v13525_v50, %v13529_v43  ;;  %v8137_v57 = vld [vmem:[#allocation3 + $0x74] sm:$0x1] }
 0x3b6   : > { %v8229_v31 = vor.u32 %v8228_v61, %v8225_v22  ;;  %v13857_v59 = vadd.f32 %v14810_v34, %v14809_v42  ;;  %v9629_v33 = vcombine.low %v8211_v37, %v8221_v27  ;;  %v8244_v9 = vrot.slane %v8242_v44, 5  ;;  %v8138_v61 = vld [vmem:[#allocation3 + $0x80] sm:$0xf]  ;;  %v8140_v27 = vld [vmem:[#allocation3 + $0x88] sm:$0x1] }
 0x3b7   : > { %v8239_v3 = vor.u32 %v8238_v62, %v8234_v25  ;;  %v13862_v18 = vadd.f32 %v13542_v30, %v5189_v14  ;;  %v5193_v54 = vadd.f32 %v13579_v47, %v13573_v53  ;;  %v8247_v48 = vshrl.u32 %v8135_v5, 16  ;;  %v8139_v30 = vld [vmem:[#allocation3 + $0x84] sm:$0xf] }
 0x3b8   : > { %v8230_v8 = vrot.slane %v8229_v31, 4  ;;  %v8250_v43 = vshll.u32 %v8135_v5, 16  ;;  %v8256_v17 = vshll.u32 %v8136_v55, 16  ;;  %v8260_v22 = vshrl.u32 %v8136_v55, 16  ;;  %v13866_v1 = vpop.f32.mrf.mxu0  ;;  %v13875_v31 = vpop.f32.mrf.mxu1 }
 0x3b9   : > { %v8240_v50 = vrot.slane %v8239_v3, 4  ;;  %v8249_v15 = vrot.slane %v8247_v48, 4  ;;  %v8266_v62 = vshll.u32 %v8137_v57, 16  ;;  %v13871_v37 = vadd.f32 %v13557_v29, %v5187_v20 }
 0x3ba   : > { %v8235_v44 = vsel %vm12431_vm0, %v8230_v8, %v8234_v25  ;;  %v8252_v47 = vrot.slane %v8250_v43, 5  ;;  %v8258_v14 = vrot.slane %v8256_v17, 5  ;;  %v8262_v5 = vrot.slane %v8260_v22, 4  ;;  %v13877_v20 = vpop.f32.mrf.mxu0 }
 0x3bb   : > { %v8245_v53 = vsel %vm12431_vm0, %v8240_v50, %v8244_v9  ;;  %10814 = vmatmul.mubr.bf16.vlgmr.msra.gmra.mxu1 %v9629_v33  ;;  %v8268_v42 = vrot.slane %v8266_v62, 5  ;;  %v8271_v34 = vshrl.u32 %v8138_v61, 16  ;;  %v8274_v25 = vshll.u32 %v8138_v61, 16  ;;  %v14811_v61 = vld [vmem:[#allocation35_spill] sm:$0xff] }
 0x3bc   : > { %v9630_v55 = vcombine.low %v8235_v44, %v8245_v53  ;;  %v8253_v3 = vor.u32 %v8252_v47, %v8249_v15  ;;  %v8263_v57 = vor.u32 %v8262_v5, %v8258_v14  ;;  %v8280_v8 = vshll.u32 %v8139_v30, 16  ;;  %v14812_v15 = vld [vmem:[#allocation4_spill] sm:$0xff] }
 0x3bd   : > { %v8284_v29 = vshrl.u32 %v8139_v30, 16  ;;  %v8273_v48 = vrot.slane %v8271_v34, 4  ;;  %v8276_v9 = vrot.slane %v8274_v25, 5  ;;  %v8290_v50 = vshll.u32 %v8140_v27, 16  ;;  %v8141_v27 = vld [vmem:[#allocation3 + $0x94] sm:$0xf] }
 0x3be   : > { %10817 = vmatprep.mubr.bf16.mxu1 %v9630_v55  ;;  %v5191_v43 = vadd.f32 %v13593_v11, %v13615_v26  ;;  %v8254_v17 = vrot.slane %v8253_v3, 4  ;;  %v8264_v22 = vrot.slane %v8263_v57, 4  ;;  %v8282_v33 = vrot.slane %v8280_v8, 5  ;;  %v8142_v25 = vld [vmem:[#allocation3 + $0x98] sm:$0xf]  ;;  %v13896_v57 = vpop.f32.mrf.mxu0 }
 0x3bf   : > { %v8286_v44 = vrot.slane %v8284_v29, 4  ;;  %v13881_v62 = vpop.f32.mrf.mxu1  ;;  %v13885_v53 = vadd.f32 %v14812_v15, %v14811_v61  ;;  %v8277_v30 = vor.u32 %v8276_v9, %v8273_v48  ;;  %v13888_v47 = vadd.f32 %v13581_v35, %v5190_v38  ;;  %v8143_v3 = vld [vmem:[#allocation3 + $0x9c] sm:$0x1]  ;;  %v14814_v29 = vld [vmem:[#allocation17_spill] sm:$0xff] }
 0x3c0   : > { %v5194_v5 = vadd.f32 %v13624_v58, %v13619_v40  ;;  %v8259_v11 = vsel %vm12431_vm0, %v8254_v17, %v8258_v14  ;;  %v8269_v26 = vsel %vm12431_vm0, %v8264_v22, %v8268_v42  ;;  %v8292_v34 = vrot.slane %v8290_v50, 5  ;;  %v14813_v8 = vld [vmem:[#allocation6_spill] sm:$0xff]  ;;  %v8144_v50 = vld [vmem:[#allocation3 + $0xa8] sm:$0xf] }
 0x3c1   : > { %v8287_v55 = vor.u32 %v8286_v44, %v8282_v33  ;;  %v13900_v35 = vadd.f32 %v14814_v29, %v14813_v8  ;;  %v9631_v38 = vcombine.low %v8259_v11, %v8269_v26  ;;  %v8278_v48 = vrot.slane %v8277_v30, 4  ;;  %v13907_v17 = vpop.f32.mrf.mxu1  ;;  %v8145_v30 = vld [vmem:[#allocation3 + $0xac] sm:$0xf] }
 0x3c2   : > { %v13903_v40 = vadd.f32 %v13635_v19, %v5193_v54  ;;  %v5197_v14 = vadd.f32 %v13669_v52, %v13548_v23  ;;  %v8295_v42 = vshrl.u32 %v8141_v27, 16  ;;  %v8298_v9 = vshll.u32 %v8141_v27, 16  ;;  %v8146_v52 = vld [vmem:[#allocation3 + $0xb0] sm:$0x1]  ;;  %v13916_v27 = vpop.f32.mrf.mxu0 }
 0x3c3   : > { %v8288_v58 = vrot.slane %v8287_v55, 4  ;;  %10818 = vmatmul.mubr.bf16.gmra.mxu1 %v9631_v38  ;;  %v8283_v22 = vsel %vm12431_vm0, %v8278_v48, %v8282_v33  ;;  %v8304_v44 = vshll.u32 %v8142_v25, 16  ;;  %v8308_v61 = vshrl.u32 %v8142_v25, 16  ;;  %v13918_v48 = vpop.f32.mrf.mxu1 }
 0x3c4   : > { %v8314_v15 = vshll.u32 %v8143_v3, 16  ;;  %v8297_v54 = vrot.slane %v8295_v42, 4  ;;  %v8300_v11 = vrot.slane %v8298_v9, 5  ;;  %v13914_v23 = vadd.f32 %v13647_v10, %v5191_v43 }
 0x3c5   : > { %v8293_v19 = vsel %vm12431_vm0, %v8288_v58, %v8292_v34  ;;  %v8306_v55 = vrot.slane %v8304_v44, 5  ;;  %v8310_v8 = vrot.slane %v8308_v61, 4  ;;  %v8319_v38 = vshrl.u32 %v8144_v50, 16  ;;  %v14816_v61 = vld [vmem:[#allocation21_spill] sm:$0xff] }
 0x3c6   : > { %14815 = vst [vmem:[#allocation55_spill] sm:$0xff] %v13914_v23  ;;  %v9632_v26 = vcombine.low %v8283_v22, %v8293_v19  ;;  %v8316_v29 = vrot.slane %v8314_v15, 5  ;;  %v8301_v33 = vor.u32 %v8300_v11, %v8297_v54  ;;  %v8322_v25 = vshll.u32 %v8144_v50, 16  ;;  %v14817_v15 = vld [vmem:[#allocation24_spill] sm:$0xff] }
 0x3c7   : > { %v8328_v3 = vshll.u32 %v8145_v30, 16  ;;  %v8311_v34 = vor.u32 %v8310_v8, %v8306_v55  ;;  %v8332_v58 = vshrl.u32 %v8145_v30, 16  ;;  %v8338_v42 = vshll.u32 %v8146_v52, 16  ;;  %v8147_v30 = vld [vmem:[#allocation3 + $0xbc] sm:$0xf] }
 0x3c8   : > { %10821 = vmatprep.mubr.bf16.mxu1 %v9632_v26  ;;  %v5195_v10 = vadd.f32 %v13687_v45, %v13723_v39  ;;  %v8302_v43 = vrot.slane %v8301_v33, 4  ;;  %v8321_v9 = vrot.slane %v8319_v38, 4  ;;  %v8324_v63 = vrot.slane %v8322_v25, 5  ;;  %v14819_v52 = vld [vmem:[#allocation22_spill] sm:$0xff]  ;;  %v14820_v26 = vld [vmem:[#allocation7_spill] sm:$0xff]  ;;  %v13937_v25 = vpop.f32.mrf.mxu1 }
 0x3c9   : > { %v8330_v22 = vrot.slane %v8328_v3, 5  ;;  %v13922_v44 = vpop.f32.mrf.mxu0  ;;  %v13926_v19 = vadd.f32 %v14817_v15, %v14816_v61  ;;  %v8312_v50 = vrot.slane %v8311_v34, 4  ;;  %v8334_v54 = vrot.slane %v8332_v58, 4  ;;  %v8148_v38 = vld [vmem:[#allocation3 + $0xc0] sm:$0xf] }
 0x3ca   : > { %v13929_v11 = vadd.f32 %v13671_v13, %v5194_v5  ;;  %v13933_v8 = vadd.f32 %v14820_v26, %v14819_v52  ;;  %v8325_v45 = vor.u32 %v8324_v63, %v8321_v9  ;;  %v8340_v39 = vrot.slane %v8338_v42, 5  ;;  %v8149_v58 = vld [vmem:[#allocation3 + $0xc4] sm:$0x1] }
 0x3cb   : > { %v5198_v33 = vadd.f32 %v13701_v51, %v13775_v21  ;;  %v8307_v3 = vsel %vm12431_vm0, %v8302_v43, %v8306_v55  ;;  %v8317_v13 = vsel %vm12431_vm0, %v8312_v50, %v8316_v29  ;;  %v8335_v5 = vor.u32 %v8334_v54, %v8330_v22  ;;  %v13948_v51 = vpop.f32.mrf.mxu0  ;;  %v8150_v43 = vld [vmem:[#allocation3 + $0xd0] sm:$0xf]  ;;  %v8151_v54 = vld [vmem:[#allocation3 + $0xd4] sm:$0xf] }
 0x3cc   : > { %14818 = vst [vmem:[#allocation36_spill] sm:$0xff] %v13929_v11  ;;  %v13944_v34 = vadd.f32 %v13719_v0, %v5197_v14  ;;  %v9633_v61 = vcombine.low %v8307_v3, %v8317_v13  ;;  %v8326_v63 = vrot.slane %v8325_v45, 4  ;;  %v5201_v42 = vadd.f32 %v13751_v32, %v13604_v24 }
 0x3cd   : > { %v8343_v21 = vshrl.u32 %v8147_v30, 16  ;;  %v8336_v9 = vrot.slane %v8335_v5, 4  ;;  %v8346_v15 = vshll.u32 %v8147_v30, 16  ;;  %v8352_v52 = vshll.u32 %v8148_v38, 16 }
 0x3ce   : > { %14821 = vst [vmem:[#allocation5_spill] sm:$0xff] %v13944_v34  ;;  %v8356_v55 = vshrl.u32 %v8148_v38, 16  ;;  %10822 = vmatmul.mubr.bf16.gmra.mxu1 %v9633_v61  ;;  %v8331_v29 = vsel %vm12431_vm0, %v8326_v63, %v8330_v22  ;;  %v8362_v14 = vshll.u32 %v8149_v58, 16  ;;  %v13953_v50 = vadd.f32 %v13740_v49, %v5195_v10  ;;  %v8152_v38 = vld [vmem:[#allocation3 + $0xd8] sm:$0x1]  ;;  %v13959_v22 = vpop.f32.mrf.mxu0 }
 0x3cf   : > { %v8345_v0 = vrot.slane %v8343_v21, 4  ;;  %v8341_v24 = vsel %vm12431_vm0, %v8336_v9, %v8340_v39  ;;  %v8348_v32 = vrot.slane %v8346_v15, 5  ;;  %v8354_v30 = vrot.slane %v8352_v52, 5 }
 0x3d0   : > { %14822 = vst [vmem:[#allocation32_spill] sm:$0xff] %v13953_v50  ;;  %v13955_v26 = vpop.f32.mrf.mxu1  ;;  %v8358_v45 = vrot.slane %v8356_v55, 4  ;;  %v9634_v3 = vcombine.low %v8331_v29, %v8341_v24  ;;  %v8364_v13 = vrot.slane %v8362_v14, 5  ;;  %v8367_v5 = vshrl.u32 %v8150_v43, 16  ;;  %v14824_v14 = vld [vmem:[#allocation45_spill] sm:$0xff] }
 0x3d1   : > { %v8370_v61 = vshll.u32 %v8150_v43, 16  ;;  %v8349_v58 = vor.u32 %v8348_v32, %v8345_v0  ;;  %v8376_v49 = vshll.u32 %v8151_v54, 16  ;;  %v8380_v10 = vshrl.u32 %v8151_v54, 16  ;;  %v14823_v43 = vld [vmem:[#allocation11_spill] sm:$0xff] }
 0x3d2   : > { %v8359_v63 = vor.u32 %v8358_v45, %v8354_v30  ;;  %10825 = vmatprep.mubr.bf16.mxu1 %v9634_v3  ;;  %v8369_v21 = vrot.slane %v8367_v5, 4  ;;  %v8386_v34 = vshll.u32 %v8152_v38, 16  ;;  %v5199_v39 = vadd.f32 %v13779_v60, %v13639_v4  ;;  %v13963_v9 = vpop.f32.mrf.mxu1  ;;  %v8153_v45 = vld [vmem:[#allocation3 + $0xe4] sm:$0xf]  ;;  %v13972_v38 = vpop.f32.mrf.mxu0 }
 0x3d3   : > { %v8372_v50 = vrot.slane %v8370_v61, 5  ;;  %v8350_v15 = vrot.slane %v8349_v58, 4  ;;  %v8378_v55 = vrot.slane %v8376_v49, 5  ;;  %v8382_v29 = vrot.slane %v8380_v10, 4  ;;  %v8154_v61 = vld [vmem:[#allocation3 + $0xe8] sm:$0xf] }
 0x3d4   : > { %v8360_v52 = vrot.slane %v8359_v63, 4  ;;  %v5188_v24 = vadd.f32 %v14824_v14, %v14823_v43  ;;  %v13968_v32 = vadd.f32 %v13754_v2, %v5198_v33  ;;  %v5202_v54 = vadd.f32 %v13797_v46, %v13845_v7  ;;  %v8155_v58 = vld [vmem:[#allocation3 + $0xec] sm:$0x1]  ;;  %v13984_v7 = vpop.f32.mrf.mxu1 }
 0x3d5   : > { %v8373_v0 = vor.u32 %v8372_v50, %v8369_v21  ;;  %v8355_v4 = vsel %vm12431_vm0, %v8350_v15, %v8354_v30  ;;  %v8383_v3 = vor.u32 %v8382_v29, %v8378_v55  ;;  %v8388_v5 = vrot.slane %v8386_v34, 5  ;;  %v14826_v50 = vld [vmem:[#allocation10_spill] sm:$0xff]  ;;  %v14828_v10 = vld [vmem:[#allocation12_spill] sm:$0xff]  ;;  %v14829_v30 = vld [vmem:[#allocation53_spill] sm:$0xff] }
 0x3d6   : > { %14825 = vst [vmem:[#allocation33_spill] sm:$0xff] %v13968_v32  ;;  %v8365_v60 = vsel %vm12431_vm0, %v8360_v52, %v8364_v13  ;;  %v13979_v63 = vadd.f32 %v14826_v50, %v5188_v24  ;;  %v13982_v46 = vadd.f32 %v13801_v41, %v5201_v42  ;;  %v5205_v21 = vadd.f32 %v14829_v30, %v14828_v10  ;;  %v8156_v52 = vld [vmem:[#allocation3 + $0xf8] sm:$0xf]  ;;  %v8157_v24 = vld [vmem:[#allocation3 + $0xfc] sm:$0xf] }
 0x3d7   : > { %v9635_v2 = vcombine.low %v8355_v4, %v8365_v60  ;;  %v8374_v33 = vrot.slane %v8373_v0, 4  ;;  %v8384_v49 = vrot.slane %v8383_v3, 4  ;;  %v8391_v15 = vshrl.u32 %v8153_v45, 16  ;;  %v14830_v60 = vld [vmem:[#allocation48_spill] sm:$0xff] }
 0x3d8   : > { %14827 = vst [vmem:[#allocation15_spill] sm:$0xff] %v13982_v46  ;;  %v8394_v13 = vshll.u32 %v8153_v45, 16  ;;  %v8400_v29 = vshll.u32 %v8154_v61, 16  ;;  %v8404_v43 = vshrl.u32 %v8154_v61, 16  ;;  %v8410_v14 = vshll.u32 %v8155_v58, 16  ;;  %v13990_v0 = vpop.f32.mrf.mxu0 }
 0x3d9   : > { %10826 = vmatmul.mubr.bf16.gmra.mxu1 %v9635_v2  ;;  %v8379_v34 = vsel %vm12431_vm0, %v8374_v33, %v8378_v55  ;;  %v8389_v41 = vsel %vm12431_vm0, %v8384_v49, %v8388_v5  ;;  %v8393_v42 = vrot.slane %v8391_v15, 4  ;;  %v13995_v3 = vadd.f32 %v14830_v60, %v5199_v39  ;;  %v8158_v45 = vld [vmem:[#allocation3 + $0x100] sm:$0x1]  ;;  %v13997_v55 = vpop.f32.mrf.mxu1  ;;  %v14832_v49 = vld [vmem:[#allocation16_spill] sm:$0xff] }
 0x3da   : > { %v8396_v4 = vrot.slane %v8394_v13, 5  ;;  %v9636_v50 = vcombine.low %v8379_v34, %v8389_v41  ;;  %v8402_v2 = vrot.slane %v8400_v29, 5  ;;  %v8406_v10 = vrot.slane %v8404_v43, 4  ;;  %v14001_v39 = vpop.f32.mrf.mxu0  ;;  %v14834_v41 = vld [vmem:[#allocation13_spill] sm:$0xff] }
 0x3db   : > { %14831 = vst [vmem:[#allocation37_spill] sm:$0xff] %v13995_v3  ;;  %v8412_v30 = vrot.slane %v8410_v14, 5  ;;  %v8415_v58 = vshrl.u32 %v8156_v52, 16  ;;  %v8418_v33 = vshll.u32 %v8156_v52, 16  ;;  %v8424_v46 = vshll.u32 %v8157_v24, 16  ;;  %v14833_v14 = vld [vmem:[#allocation14_spill] sm:$0xff] }
 0x3dc   : > { %v8397_v61 = vor.u32 %v8396_v4, %v8393_v42  ;;  %10829 = vmatprep.mubr.bf16.mxu1 %v9636_v50  ;;  %v8407_v32 = vor.u32 %v8406_v10, %v8402_v2  ;;  %v8428_v11 = vshrl.u32 %v8157_v24, 16  ;;  %v8434_v5 = vshll.u32 %v8158_v45, 16  ;;  %v8159_v24 = vld [vmem:[#allocation3 + $0x10c] sm:$0xf] }
 0x3dd   : > { %v5203_v15 = vadd.f32 %v13835_v56, %v14832_v49  ;;  %v8417_v34 = vrot.slane %v8415_v58, 4  ;;  %v8420_v29 = vrot.slane %v8418_v33, 5  ;;  %v8426_v43 = vrot.slane %v8424_v46, 5  ;;  %v8160_v58 = vld [vmem:[#allocation3 + $0x110] sm:$0xf] }
 0x3de   : > { %v8398_v13 = vrot.slane %v8397_v61, 4  ;;  %v14005_v60 = vadd.f32 %v14834_v41, %v14833_v14  ;;  %v8408_v42 = vrot.slane %v8407_v32, 4  ;;  %v8430_v52 = vrot.slane %v8428_v11, 4  ;;  %v14836_v61 = vld [vmem:[#allocation20_spill] sm:$0xff] }
 0x3df   : > { %v14008_v4 = vadd.f32 %v13833_v6, %v5202_v54  ;;  %v8421_v50 = vor.u32 %v8420_v29, %v8417_v34  ;;  %v8436_v10 = vrot.slane %v8434_v5, 5  ;;  %v5206_v46 = vadd.f32 %v13859_v28, %v14836_v61  ;;  %v8161_v54 = vld [vmem:[#allocation3 + $0x114] sm:$0x1]  ;;  %v14838_v34 = vld [vmem:[#allocation26_spill] sm:$0xff] }
 0x3e0   : > { %v14010_v45 = vpop.f32.mrf.mxu1  ;;  %v8403_v56 = vsel %vm12431_vm0, %v8398_v13, %v8402_v2  ;;  %v8413_v33 = vsel %vm12431_vm0, %v8408_v42, %v8412_v30  ;;  %v8431_v32 = vor.u32 %v8430_v52, %v8426_v43  ;;  %v5204_v6 = vadd.f32 %v13875_v31, %v13857_v59  ;;  %v14025_v2 = vpop.f32.mrf.mxu0  ;;  %v8162_v52 = vld [vmem:[#allocation3 + $0x120] sm:$0xf] }
 0x3e1   : > { %14835 = vst [vmem:[#allocation54_spill] sm:$0xff] %v14008_v4  ;;  %v14021_v11 = vadd.f32 %v13866_v1, %v5205_v21  ;;  %v9637_v5 = vcombine.low %v8403_v56, %v8413_v33  ;;  %v8422_v13 = vrot.slane %v8421_v50, 4  ;;  %v5209_v28 = vadd.f32 %v13881_v62, %v14838_v34  ;;  %v8163_v50 = vld [vmem:[#allocation3 + $0x124] sm:$0xf] }
 0x3e2   : > { %v14023_v49 = vpop.f32.mrf.mxu1  ;;  %v8439_v29 = vshrl.u32 %v8159_v24, 16  ;;  %v8432_v14 = vrot.slane %v8431_v32, 4  ;;  %v8442_v30 = vshll.u32 %v8159_v24, 16  ;;  %v8448_v41 = vshll.u32 %v8160_v58, 16  ;;  %v14038_v32 = vpop.f32.mrf.mxu0 }
 0x3e3   : > { %14837 = vst [vmem:[#allocation9_spill] sm:$0xff] %v14021_v11  ;;  %v8452_v42 = vshrl.u32 %v8160_v58, 16  ;;  %10830 = vmatmul.mubr.bf16.gmra.mxu1 %v9637_v5  ;;  %v8427_v1 = vsel %vm12431_vm0, %v8422_v13, %v8426_v43  ;;  %v8458_v21 = vshll.u32 %v8161_v54, 16  ;;  %v14034_v56 = vadd.f32 %v13877_v20, %v5203_v15  ;;  %v8164_v58 = vld [vmem:[#allocation3 + $0x128] sm:$0x1] }
 0x3e4   : > { %v14029_v59 = vpop.f32.mrf.mxu1  ;;  %v8441_v31 = vrot.slane %v8439_v29, 4  ;;  %v8437_v62 = vsel %vm12431_vm0, %v8432_v14, %v8436_v10  ;;  %v8444_v61 = vrot.slane %v8442_v30, 5  ;;  %v8450_v24 = vrot.slane %v8448_v41, 5  ;;  %v14840_v41 = vld [vmem:[#allocation30_spill] sm:$0xff] }
 0x3e5   : > { %14839 = vst [vmem:[#allocation23_spill] sm:$0xff] %v14034_v56  ;;  %v8454_v33 = vrot.slane %v8452_v42, 4  ;;  %v9638_v5 = vcombine.low %v8427_v1, %v8437_v62  ;;  %v8460_v11 = vrot.slane %v8458_v21, 5  ;;  %v8463_v43 = vshrl.u32 %v8162_v52, 16 }
 0x3e6   : > { %v14040_v34 = vpop.f32.mrf.mxu1  ;;  %v8466_v13 = vshll.u32 %v8162_v52, 16  ;;  %v8445_v54 = vor.u32 %v8444_v61, %v8441_v31  ;;  %v8472_v20 = vshll.u32 %v8163_v50, 16  ;;  %v8476_v15 = vshrl.u32 %v8163_v50, 16  ;;  %v14841_v61 = vld [vmem:[#allocation29_spill] sm:$0xff] }
 0x3e7   : > { %v8455_v29 = vor.u32 %v8454_v33, %v8450_v24  ;;  %10833 = vmatprep.mubr.bf16.mxu1 %v9638_v5  ;;  %v8465_v10 = vrot.slane %v8463_v43, 4  ;;  %v8482_v30 = vshll.u32 %v8164_v58, 16  ;;  %v5207_v42 = vadd.f32 %v13907_v17, %v14840_v41  ;;  %v8165_v58 = vld [vmem:[#allocation3 + $0x134] sm:$0xf] }
 0x3e8   : > { %v14042_v56 = vpop.f32.mrf.mxu1  ;;  %v8468_v14 = vrot.slane %v8466_v13, 5  ;;  %v8446_v4 = vrot.slane %v8445_v54, 4  ;;  %v8474_v23 = vrot.slane %v8472_v20, 5  ;;  %v8478_v1 = vrot.slane %v8476_v15, 4  ;;  %v8166_v54 = vld [vmem:[#allocation3 + $0x138] sm:$0xf] }
 0x3e9   : > { %v8456_v3 = vrot.slane %v8455_v29, 4  ;;  %v8484_v62 = vrot.slane %v8482_v30, 5  ;;  %v14051_v50 = vadd.f32 %v13896_v57, %v5206_v46  ;;  %v5210_v33 = vadd.f32 %v13918_v48, %v14841_v61  ;;  %v8167_v29 = vld [vmem:[#allocation3 + $0x13c] sm:$0x1] }
 0x3ea   : > { %v14046_v21 = vpop.f32.mrf.mxu0  ;;  %v14048_v52 = vpop.f32.mrf.mxu1  ;;  %v8469_v31 = vor.u32 %v8468_v14, %v8465_v10  ;;  %v8451_v17 = vsel %vm12431_vm0, %v8446_v4, %v8450_v24  ;;  %v8479_v43 = vor.u32 %v8478_v1, %v8474_v23  ;;  %v14060_v13 = vadd.f32 %v13916_v27, %v5204_v6  ;;  %v8168_v10 = vld [vmem:[#allocation3 + $0x148] sm:$0xf] }
 0x3eb   : > { %v8461_v5 = vsel %vm12431_vm0, %v8456_v3, %v8460_v11  ;;  %v5208_v48 = vadd.f32 %v13937_v25, %v13885_v53  ;;  %v14069_v4 = vadd.f32 %v13922_v44, %v5209_v28  ;;  %v14844_v3 = vld [vmem:[#allocation38_spill] sm:$0xff]  ;;  %v8487_v27 = vshrl.u32 %v8165_v58, 16  ;;  %v8169_v44 = vld [vmem:[#allocation3 + $0x14c] sm:$0xf] }
 0x3ec   : > { %14842 = vst [vmem:[#allocation27_spill] sm:$0xff] %v14060_v13  ;;  %v14062_v20 = vpop.f32.mrf.mxu0  ;;  %v14064_v57 = vpop.f32.mrf.mxu1  ;;  %v9639_v46 = vcombine.low %v8451_v17, %v8461_v5  ;;  %v8470_v15 = vrot.slane %v8469_v31, 4  ;;  %v8480_v24 = vrot.slane %v8479_v43, 4  ;;  %v5213_v11 = vadd.f32 %v13955_v26, %v14844_v3 }
 0x3ed   : > { %14843 = vst [vmem:[#allocation19_spill] sm:$0xff] %v14069_v4  ;;  %v8490_v6 = vshll.u32 %v8165_v58, 16  ;;  %v8496_v1 = vshll.u32 %v8166_v54, 16  ;;  %v8500_v53 = vshrl.u32 %v8166_v54, 16  ;;  %v8506_v25 = vshll.u32 %v8167_v29, 16 }
 0x3ee   : > { %v14073_v14 = vpop.f32.mrf.mxu0  ;;  %v14075_v30 = vpop.f32.mrf.mxu1  ;;  %10834 = vmatmul.mubr.bf16.gmra.mxu1 %v9639_v46  ;;  %v8475_v41 = vsel %vm12431_vm0, %v8470_v15, %v8474_v23  ;;  %v8485_v28 = vsel %vm12431_vm0, %v8480_v24, %v8484_v62  ;;  %v8489_v31 = vrot.slane %v8487_v27, 4  ;;  %v14082_v61 = vadd.f32 %v13948_v51, %v5207_v42  ;;  %v8170_v58 = vld [vmem:[#allocation3 + $0x150] sm:$0x1]  ;;  %v14847_v27 = vld [vmem:[#allocation43_spill] sm:$0xff] }
 0x3ef   : > { %v8492_v26 = vrot.slane %v8490_v6, 5  ;;  %v9640_v43 = vcombine.low %v8475_v41, %v8485_v28  ;;  %v8498_v46 = vrot.slane %v8496_v1, 5  ;;  %v8502_v23 = vrot.slane %v8500_v53, 4 }
 0x3f0   : > { %14845 = vst [vmem:[#allocation8_spill] sm:$0xff] %v14082_v61  ;;  %v14084_v17 = vpop.f32.mrf.mxu0  ;;  %v14086_v5 = vpop.f32.mrf.mxu1  ;;  %v8508_v15 = vrot.slane %v8506_v25, 5  ;;  %v8511_v29 = vshrl.u32 %v8168_v10, 16  ;;  %v8514_v3 = vshll.u32 %v8168_v10, 16  ;;  %v8520_v4 = vshll.u32 %v8169_v44, 16 }
 0x3f1   : > { %v8493_v54 = vor.u32 %v8492_v26, %v8489_v31  ;;  %10837 = vmatprep.mubr.bf16.mxu1 %v9640_v43  ;;  %v8503_v51 = vor.u32 %v8502_v23, %v8498_v46  ;;  %v8524_v42 = vshrl.u32 %v8169_v44, 16  ;;  %v8530_v24 = vshll.u32 %v8170_v58, 16  ;;  %v336_v43 = vld [vmem:[#allocation3 + $0x164] sm:$0x1] }
 0x3f2   : > { %v14088_v13 = vpop.f32.mrf.mxu0  ;;  %v14090_v62 = vpop.f32.mrf.mxu1  ;;  %v5211_v6 = vadd.f32 %v13963_v9, %v14847_v27  ;;  %v8513_v41 = vrot.slane %v8511_v29, 4  ;;  %v8516_v1 = vrot.slane %v8514_v3, 5  ;;  %v8522_v53 = vrot.slane %v8520_v4, 5  ;;  %v14848_v9 = vld [vmem:[#allocation41_spill] sm:$0xff]  ;;  %v8172_v29 = vld [vmem:[#allocation3 + $0x160] sm:$0xf] }
 0x3f3   : > { %14846 = vst [vmem:[#allocation40_spill] sm:$0xff] %v14088_v13  ;;  %v8494_v61 = vrot.slane %v8493_v54, 4  ;;  %v8504_v10 = vrot.slane %v8503_v51, 4  ;;  %v8526_v31 = vrot.slane %v8524_v42, 4  ;;  %v8532_v26 = vrot.slane %v8530_v24, 5  ;;  %v14849_v24 = vld [vmem:[#allocation46_spill] sm:$0xff] }
 0x3f4   : > { %v14094_v25 = vpop.f32.mrf.mxu0  ;;  %v14096_v28 = vpop.f32.mrf.mxu1  ;;  %v14099_v13 = vadd.f32 %v13959_v22, %v5210_v33  ;;  %v8517_v58 = vor.u32 %v8516_v1, %v8513_v41  ;;  %v5214_v23 = vadd.f32 %v13984_v7, %v14848_v9  ;;  %v14106_v4 = vadd.f32 %v13972_v38, %v5208_v48  ;;  %v8171_v54 = vld [vmem:[#allocation3 + $0x15c] sm:$0xf] }
 0x3f5   : > { %v8499_v44 = vsel %vm12431_vm0, %v8494_v61, %v8498_v46  ;;  %v8509_v22 = vsel %vm12431_vm0, %v8504_v10, %v8508_v15  ;;  %v8527_v33 = vor.u32 %v8526_v31, %v8522_v53  ;;  %v5212_v42 = vadd.f32 %v13997_v55, %v13900_v35  ;;  %v14854_v48 = vld [vmem:[#allocation34_spill] sm:$0xff] }
 0x3f6   : > { %v14108_v3 = vpop.f32.mrf.mxu0  ;;  %v6155_v51 = vpop.f32.mrf.mxu1  ;;  %v14115_v61 = vadd.f32 %v13990_v0, %v5213_v11  ;;  %v9641_v46 = vcombine.low %v8499_v44, %v8509_v22  ;;  %v8518_v7 = vrot.slane %v8517_v58, 4  ;;  %v5217_v38 = vadd.f32 %v14010_v45, %v14849_v24 }
 0x3f7   : > { %v337_v27 = vsel %vm11995_vm13, 0, %v336_v43  ;;  %v8528_v9 = vrot.slane %v8527_v33, 4  ;;  %v8535_v15 = vshrl.u32 %v8171_v54, 16  ;;  %v8538_v10 = vshll.u32 %v8171_v54, 16 }
 0x3f8   : > { %v14121_v41 = vpop.f32.mrf.mxu0  ;;  %v10631_v1 = vpop.f32.mrf.mxu1  ;;  %338 = vst [vmem:[#allocation3 + $0x164] sm:$0x1] %v337_v27  ;;  %v8544_v31 = vshll.u32 %v8172_v29, 16  ;;  %10838 = vmatmul.mubr.bf16.gmra.mxu1 %v9641_v46  ;;  %v8523_v35 = vsel %vm12431_vm0, %v8518_v7, %v8522_v53  ;;  %v8548_v0 = vshrl.u32 %v8172_v29, 16  ;;  %v14126_v55 = vadd.f32 %v14001_v39, %v5211_v6 }
 0x3f9   : > { %v5215_v45 = vadd.f32 %v14023_v49, %v13831_v12  ;;  %v8533_v44 = vsel %vm12431_vm0, %v8528_v9, %v8532_v26  ;;  %v8537_v58 = vrot.slane %v8535_v15, 4  ;;  %v8540_v54 = vrot.slane %v8538_v10, 5  ;;  %v14855_v15 = vld [vmem:[#allocation55_spill] sm:$0xff] }
 0x3fa   : > { %v14130_v11 = vpop.f32.mrf.mxu0  ;;  %v6168_v43 = vpop.f32.mrf.mxu1  ;;  %v8546_v22 = vrot.slane %v8544_v31, 5  ;;  %v9642_v33 = vcombine.low %v8523_v35, %v8533_v44  ;;  %v8550_v46 = vrot.slane %v8548_v0, 4  ;;  %v14135_v53 = vadd.f32 %v14025_v2, %v5214_v23  ;;  %v14856_v10 = vld [vmem:[#allocation31_spill] sm:$0xff] }
 0x3fb   : > { %v5218_v39 = vadd.f32 %v14029_v59, %v13926_v19  ;;  %v8541_v49 = vor.u32 %v8540_v54, %v8537_v58  ;;  %v14142_v29 = vadd.f32 %v14038_v32, %v5212_v42  ;;  %v5216_v26 = vadd.f32 %v14040_v34, %v13933_v8  ;;  %v14858_v0 = vld [vmem:[#allocation39_spill] sm:$0xff]  ;;  %v14859_v54 = vld [vmem:[#allocation5_spill] sm:$0xff] }
 0x3fc   : > { %v14139_v6 = vpop.f32.mrf.mxu0  ;;  %v10632_v12 = vpop.f32.mrf.mxu1  ;;  %v14147_v7 = vadd.f32 %v14046_v21, %v5217_v38  ;;  %10841 = vmatprep.mubr.bf16.mxu1 %v9642_v33  ;;  %v8551_v24 = vor.u32 %v8550_v46, %v8546_v22  ;;  %v14151_v2 = vadd.f32 %v14042_v56, %v13862_v18  ;;  %v14154_v19 = vadd.f32 %v14062_v20, %v5215_v45  ;;  %v14851_v56 = vld [vmem:[#allocation18_spill] sm:$0xff]  ;;  %v14860_v33 = vld [vmem:[#allocation32_spill] sm:$0xff] }
 0x3fd   : > { %v14158_v59 = vadd.f32 %v14048_v52, %v13871_v37  ;;  %v8542_v8 = vrot.slane %v8541_v49, 4  ;;  %v14163_v34 = vadd.f32 %v14073_v14, %v5218_v39  ;;  %v14167_v21 = vadd.f32 %v14064_v57, %v13888_v47  ;;  %v14852_v37 = vld [vmem:[#allocation28_spill] sm:$0xff]  ;;  %v14861_v39 = vld [vmem:[#allocation33_spill] sm:$0xff] }
 0x3fe   : > { %v14160_v32 = vpop.f32.mrf.mxu0  ;;  %v6171_v23 = vpop.f32.mrf.mxu1  ;;  %v14170_v18 = vadd.f32 %v14084_v17, %v5216_v26  ;;  %v5914_v20 = vadd.f32 %v14851_v56, %v14005_v60  ;;  %v5196_v52 = vadd.f32 %v14852_v37, %v13841_v36  ;;  %v14178_v38 = vadd.f32 %v14075_v30, %v13979_v63  ;;  %v14853_v17 = vld [vmem:[#allocation47_spill] sm:$0xff]  ;;  %v14857_v63 = vld [vmem:[#allocation36_spill] sm:$0xff]  ;;  %v14862_v26 = vld [vmem:[#allocation50_spill] sm:$0xff] }
 0x3ff   : > { %v8173_v42 = vld [vmem:[#allocation3 + $0x164] sm:$0x1]  ;;  %v14182_v14 = vadd.f32 %v14086_v5, %v13903_v40  ;;  %v4387_v27 = vadd.f32 %v14854_v48, %v14853_v17  ;;  %v8552_v9 = vrot.slane %v8551_v24, 4  ;;  %v14190_v36 = vadd.f32 %v14090_v62, %v14855_v15  ;;  %v14865_v37 = vld [vmem:[#allocation37_spill] sm:$0xff] }
 0x400   : > { %v14184_v47 = vpop.f32.mrf.mxu0  ;;  %v10635_v57 = vpop.f32.mrf.mxu1  ;;  %v8554_v60 = vshll.u32 %v8173_v42, 16  ;;  %v5918_v31 = vadd.f32 %v14856_v10, %v5196_v52  ;;  %v14195_v30 = vadd.f32 %v14096_v28, %v14857_v63  ;;  %v14197_v40 = vadd.f32 %v6155_v51, %v5914_v20  ;;  %v14866_v42 = vld [vmem:[#allocation54_spill] sm:$0xff]  ;;  %v14868_v15 = vld [vmem:[#allocation9_spill] sm:$0xff] }
 0x401   : > { %v5200_v45 = vadd.f32 %v14858_v0, %v4387_v27  ;;  %v8547_v44 = vsel %vm12431_vm0, %v8542_v8, %v8546_v22  ;;  %v14205_v62 = vadd.f32 %v10631_v1, %v14859_v54  ;;  %v14208_v46 = vadd.f32 %v6168_v43, %v14860_v33  ;;  %v14864_v22 = vld [vmem:[#allocation15_spill] sm:$0xff] }
 0x402   : > { %v14199_v5 = vpop.f32.mrf.mxu0  ;;  %v6184_v35 = vpop.f32.mrf.mxu1  ;;  %v8556_v58 = vrot.slane %v8554_v60, 5  ;;  %v14211_v28 = vadd.f32 %v10632_v12, %v14861_v39  ;;  %v14218_v20 = vadd.f32 %v6171_v23, %v5918_v31  ;;  %v6277_v8 = vadd.f32 %v10635_v57, %v14864_v22  ;;  %v14869_v57 = vld [vmem:[#allocation23_spill] sm:$0xff] }
 0x403   : > { %v5922_v24 = vadd.f32 %v14862_v26, %v5200_v45  ;;  %v6275_v52 = vadd.f32 %v6184_v35, %v14865_v37  ;;  %v14870_v33 = vld [vmem:[#allocation27_spill] sm:$0xff] }
 0x404   : > { %v14213_v51 = vpop.f32.mrf.mxu0  ;;  %v10636_v49 = vpop.f32.mrf.mxu1  ;;  %v8557_v56 = vsel %vm12431_vm0, %v8552_v9, %v8556_v58  ;;  %14863 = vst [vmem:[#allocation44_spill] sm:$0xff] %v14218_v20 }
 0x405   : > { %v9643_v1 = vcombine.low %v8547_v44, %v8557_v56  ;;  %v6278_v12 = vadd.f32 %v10636_v49, %v14866_v42  ;;  %v14871_v56 = vld [vmem:[#allocation19_spill] sm:$0xff] }
 0x406   : > { %v14222_v43 = vpop.f32.mrf.mxu0  ;;  %v6187_v17 = vpop.f32.mrf.mxu1 }
 0x407   : > { %v6276_v48 = vadd.f32 %v6187_v17, %v5922_v24  ;;  %10842 = vmatmul.mubr.bf16.gmra.mxu1 %v9643_v1  ;;  %v14872_v1 = vld [vmem:[#allocation8_spill] sm:$0xff] }
 0x408   : > { %v14225_v27 = vpop.f32.mrf.mxu0  ;;  %v10639_v60 = vpop.f32.mrf.mxu1 }
 0x409   : > { %14867 = vst [vmem:[#allocation42_spill] sm:$0xff] %v14225_v27  ;;  %v6281_v16 = vadd.f32 %v10639_v60, %v14868_v15 }
 0x40a   : > { %v10683_v9 = vpop.f32.mrf.mxu0  ;;  %v6200_v23 = vpop.f32.mrf.mxu1 }
 0x40b   : > { %v14228_v10 = vadd.f32 %v10683_v9, %v6277_v8  ;;  %v6279_v31 = vadd.f32 %v6200_v23, %v14869_v57 }
 0x40c   : > { %v6938_v63 = vpop.f32.mrf.mxu0  ;;  %v10640_v35 = vpop.f32.mrf.mxu1 }
 0x40d   : > { %v14231_v0 = vadd.f32 %v6938_v63, %v6275_v52  ;;  %v6282_v45 = vadd.f32 %v10640_v35, %v14051_v50 }
 0x40e   : > { %v10684_v44 = vpop.f32.mrf.mxu0  ;;  %v6203_v58 = vpop.f32.mrf.mxu1 }
 0x40f   : > { %v14234_v54 = vadd.f32 %v10684_v44, %v6278_v12  ;;  %v6280_v39 = vadd.f32 %v6203_v58, %v14870_v33 }
 0x410   : > { %v6941_v49 = vpop.f32.mrf.mxu0  ;;  %v10643_v26 = vpop.f32.mrf.mxu1 }
 0x411   : > { %v14237_v24 = vadd.f32 %v6941_v49, %v6276_v48  ;;  %v6285_v22 = vadd.f32 %v10643_v26, %v14871_v56 }
 0x412   : > { %v6216_v8 = vpop.f32.mrf.mxu1 }
 0x413   : > { %v6283_v37 = vadd.f32 %v6216_v8, %v14872_v1  ;;  %v10687_v42 = vpop.f32.mrf.mxu0 }
 0x414   : > { %v10644_v52 = vpop.f32.mrf.mxu1  ;;  %v14241_v17 = vadd.f32 %v10687_v42, %v6281_v16 }
 0x415   : > { %v6286_v50 = vadd.f32 %v10644_v52, %v14099_v13  ;;  %v6954_v60 = vpop.f32.mrf.mxu0 }
 0x416   : > { %v6219_v12 = vpop.f32.mrf.mxu1  ;;  %v14244_v15 = vadd.f32 %v6954_v60, %v6279_v31 }
 0x417   : > { %v6284_v9 = vadd.f32 %v6219_v12, %v14106_v4  ;;  %v10688_v23 = vpop.f32.mrf.mxu0 }
 0x418   : > { %v10647_v48 = vpop.f32.mrf.mxu1  ;;  %v14247_v57 = vadd.f32 %v10688_v23, %v6282_v45 }
 0x419   : > { %v6289_v63 = vadd.f32 %v10647_v48, %v14115_v61  ;;  %v6957_v35 = vpop.f32.mrf.mxu0 }
 0x41a   : > { %v6232_v44 = vpop.f32.mrf.mxu1  ;;  %v14250_v58 = vadd.f32 %v6957_v35, %v6280_v39 }
 0x41b   : > { %v6287_v16 = vadd.f32 %v6232_v44, %v14126_v55  ;;  %v10691_v33 = vpop.f32.mrf.mxu0 }
 0x41c   : > { %v10648_v13 = vpop.f32.mrf.mxu1  ;;  %v14253_v49 = vadd.f32 %v10691_v33, %v6285_v22 }
 0x41d   : > { %v6290_v31 = vadd.f32 %v10648_v13, %v14135_v53  ;;  %v6970_v26 = vpop.f32.mrf.mxu0 }
 0x41e   : > { %v6235_v4 = vpop.f32.mrf.mxu1  ;;  %v14256_v56 = vadd.f32 %v6970_v26, %v6283_v37 }
 0x41f   : > { %v6288_v45 = vadd.f32 %v6235_v4, %v14142_v29  ;;  %v10692_v8 = vpop.f32.mrf.mxu0 }
 0x420   : > { %v10651_v61 = vpop.f32.mrf.mxu1  ;;  %v14259_v1 = vadd.f32 %v10692_v8, %v6286_v50 }
 0x421   : > { %v6293_v39 = vadd.f32 %v10651_v61, %v14147_v7  ;;  %v6973_v42 = vpop.f32.mrf.mxu0 }
 0x422   : > { %v6248_v55 = vpop.f32.mrf.mxu1  ;;  %v14262_v52 = vadd.f32 %v6973_v42, %v6284_v9 }
 0x423   : > { %v6291_v22 = vadd.f32 %v6248_v55, %v14154_v19 }
 0x424   : > { %v10652_v60 = vpop.f32.mrf.mxu1 }
 0x425   : > { %v6294_v53 = vadd.f32 %v10652_v60, %v14163_v34  ;;  %v10695_v12 = vpop.f32.mrf.mxu0 }
 0x426   : > { %v6251_v37 = vpop.f32.mrf.mxu1  ;;  %v7043_v23 = vadd.f32 %v10695_v12, %v6289_v63 }
 0x427   : > { %v6292_v29 = vadd.f32 %v6251_v37, %v14170_v18  ;;  %v6986_v48 = vpop.f32.mrf.mxu0 }
 0x428   : > { %v7041_v35 = vadd.f32 %v6986_v48, %v6287_v16 }
 0x429   : > { %v10696_v50 = vpop.f32.mrf.mxu0 }
 0x42a   : > { %v7044_v44 = vadd.f32 %v10696_v50, %v6290_v31 }
 0x42b   : > { %v6989_v33 = vpop.f32.mrf.mxu0 }
 0x42c   : > { %v7042_v7 = vadd.f32 %v6989_v33, %v6288_v45 }
 0x432   : > { %v14267_v13 = vpop.f32.mrf.mxu1 }
 0x434   : > { %v10699_v9 = vpop.f32.mrf.mxu0  ;;  %v14269_v4 = vpop.f32.mrf.mxu1 }
 0x435   : > { %v7047_v26 = vadd.f32 %v10699_v9, %v6293_v39 }
 0x436   : > { %v7002_v19 = vpop.f32.mrf.mxu0  ;;  %v14271_v34 = vpop.f32.mrf.mxu1 }
 0x437   : > { %v7045_v8 = vadd.f32 %v7002_v19, %v6291_v22 }
 0x438   : > { %v10700_v61 = vpop.f32.mrf.mxu0  ;;  %v14275_v18 = vpop.f32.mrf.mxu1 }
 0x439   : > { %v14273_v63 = vadd.f32 %v10700_v61, %v6294_v53 }
 0x43a   : > { %v7005_v16 = vpop.f32.mrf.mxu0 }
 0x43b   : > { %v14277_v42 = vadd.f32 %v7005_v16, %v6292_v29  ;;  %v14279_v31 = vpop.f32.mrf.mxu1 }
 0x43c   : > { %v10767_v48 = vpop.f32.mrf.mxu0 }
 0x43d   : > { %v14281_v45 = vpop.f32.mrf.mxu1 }
 0x43e   : > { %v7967_v19 = vpop.f32.mrf.mxu0 }
 0x43f   : > { %v14283_v55 = vpop.f32.mrf.mxu1 }
 0x441   : > { %v14285_v39 = vpop.f32.mrf.mxu1 }
 0x443   : > { %v14287_v60 = vpop.f32.mrf.mxu1 }
 0x445   : > { %v14289_v22 = vpop.f32.mrf.mxu1 }
 0x447   : > { %v14291_v12 = vpop.f32.mrf.mxu1 }
 0x448   : > { %14873 = vst [vmem:[#allocation52_spill] sm:$0xff] %v14291_v12  ;;  %v10768_v12 = vpop.f32.mrf.mxu0 }
 0x449   : > { %v14293_v53 = vpop.f32.mrf.mxu1 }
 0x44a   : > { %14874 = vst [vmem:[#allocation49_spill] sm:$0xff] %v14293_v53 }
 0x44b   : > { %v10731_v37 = vpop.f32.mrf.mxu1 }
 0x44c   : > { %v14296_v29 = vadd.f32 %v10731_v37, %v14228_v10 }
 0x44d   : > { %v7661_v50 = vpop.f32.mrf.mxu1 }
 0x44e   : > { %v14299_v33 = vadd.f32 %v7661_v50, %v14231_v0  ;;  %v7970_v0 = vpop.f32.mrf.mxu0 }
 0x44f   : > { %v10732_v9 = vpop.f32.mrf.mxu1 }
 0x450   : > { %14875 = vst [vmem:[#allocation51_spill] sm:$0xff] %v14299_v33  ;;  %v14302_v61 = vadd.f32 %v10732_v9, %v14234_v54 }
 0x451   : > { %v7664_v16 = vpop.f32.mrf.mxu1 }
 0x452   : > { %v14305_v27 = vadd.f32 %v7664_v16, %v14237_v24  ;;  %v14319_v24 = vpop.f32.mrf.mxu0 }
 0x454   : > { %14876 = vst [vmem:[#allocation35_spill] sm:$0xff] %v14305_v27  ;;  %v10735_v53 = vpop.f32.mrf.mxu1 }
 0x455   : > { %v14308_v20 = vadd.f32 %v10735_v53, %v14241_v17 }
 0x456   : > { %v7677_v10 = vpop.f32.mrf.mxu1 }
 0x457   : > { %v14311_v37 = vadd.f32 %v7677_v10, %v14244_v15  ;;  %v14327_v15 = vpop.f32.mrf.mxu0 }
 0x458   : > { %v10736_v50 = vpop.f32.mrf.mxu1 }
 0x459   : > { %v14314_v33 = vadd.f32 %v10736_v50, %v14247_v57 }
 0x45a   : > { %v7680_v54 = vpop.f32.mrf.mxu1 }
 0x45b   : > { %14877 = vst [vmem:[#allocation4_spill] sm:$0xff] %v14314_v33  ;;  %v14317_v9 = vadd.f32 %v7680_v54, %v14250_v58  ;;  %v14335_v54 = vpop.f32.mrf.mxu0 }
 0x45c   : > { %v10739_v16 = vpop.f32.mrf.mxu1 }
 0x45d   : > { %14878 = vst [vmem:[#allocation6_spill] sm:$0xff] %v14317_v9  ;;  %v14322_v27 = vadd.f32 %v10739_v16, %v14253_v49  ;;  %v14339_v16 = vpop.f32.mrf.mxu0 }
 0x45e   : > { %v7693_v17 = vpop.f32.mrf.mxu1 }
 0x45f   : > { %14879 = vst [vmem:[#allocation17_spill] sm:$0xff] %v14322_v27  ;;  %v14325_v53 = vadd.f32 %v7693_v17, %v14256_v56 }
 0x460   : > { %v10740_v10 = vpop.f32.mrf.mxu1 }
 0x461   : > { %14880 = vst [vmem:[#allocation21_spill] sm:$0xff] %v14325_v53  ;;  %v14330_v57 = vadd.f32 %v10740_v10, %v14259_v1  ;;  %v14345_v1 = vpop.f32.mrf.mxu0 }
 0x462   : > { %v7696_v50 = vpop.f32.mrf.mxu1 }
 0x463   : > { %v14333_v58 = vadd.f32 %v7696_v50, %v14262_v52  ;;  %v14349_v52 = vpop.f32.mrf.mxu0 }
 0x465   : > { %14881 = vst [vmem:[#allocation24_spill] sm:$0xff] %v14333_v58  ;;  %v10743_v9 = vpop.f32.mrf.mxu1  ;;  %v14351_v58 = vpop.f32.mrf.mxu0 }
 0x466   : > { %v14337_v33 = vadd.f32 %v10743_v9, %v7043_v23 }
 0x467   : > { %v7709_v49 = vpop.f32.mrf.mxu1 }
 0x468   : > { %14882 = vst [vmem:[#allocation22_spill] sm:$0xff] %v14337_v33  ;;  %v14341_v56 = vadd.f32 %v7709_v49, %v7041_v35  ;;  %v14885_v33 = vld [vmem:[#allocation40_spill] sm:$0xff] }
 0x469   : > { %v10744_v17 = vpop.f32.mrf.mxu1  ;;  %v7019_v35 = vadd.f32 %v14885_v33, %v14151_v2 }
 0x46a   : > { %v14343_v53 = vadd.f32 %v10744_v17, %v7044_v44  ;;  %v7017_v17 = vadd.f32 %v14094_v25, %v14158_v59  ;;  %v14376_v25 = vld [vmem:[%s14554_s5] ss:$0 sm:$0xff]  ;;  %v7018_v59 = vadd.f32 %v14121_v41, %v14178_v38  ;;  %v7021_v41 = vadd.f32 %v14139_v6, %v14190_v36 }
 0x46b   : > { %v7712_v27 = vpop.f32.mrf.mxu1 }
 0x46c   : > { %14883 = vst [vmem:[#allocation7_spill] sm:$0xff] %v14343_v53  ;;  %v14347_v10 = vadd.f32 %v7712_v27, %v7042_v7  ;;  %v7742_v27 = vadd.f32 %v14267_v13, %v7019_v35  ;;  %v14362_v7 = vpop.f32.mrf.mxu0 }
 0x46e   : > { %14884 = vst [vmem:[#allocation11_spill] sm:$0xff] %v14347_v10  ;;  %v8096_v2 = vadd.f32 %v10767_v48, %v7742_v27  ;;  %v7741_v48 = vadd.f32 %v14275_v18, %v7018_v59 }
 0x473   : > { %v10747_v50 = vpop.f32.mrf.mxu1 }
 0x474   : > { %v14353_v23 = vadd.f32 %v10747_v50, %v7047_v26  ;;  %v7020_v26 = vadd.f32 %v14108_v3, %v14167_v21  ;;  %v7740_v50 = vadd.f32 %v14269_v4, %v7017_v17  ;;  %v14381_v3 = vpop.f32.mrf.mxu0  ;;  %v7023_v4 = vadd.f32 %v14130_v11, %v14182_v14 }
 0x475   : > { %v7725_v9 = vpop.f32.mrf.mxu1  ;;  %v8095_v14 = vadd.f32 %v7970_v0, %v7741_v48  ;;  %v7744_v17 = vadd.f32 %v14281_v45, %v7021_v41  ;;  %v7022_v0 = vadd.f32 %v14184_v47, %v14197_v40 }
 0x476   : > { %v14357_v49 = vadd.f32 %v7725_v9, %v7045_v8  ;;  %v7743_v13 = vadd.f32 %v14271_v34, %v7020_v26  ;;  %v7746_v38 = vadd.f32 %v14279_v31, %v7023_v4  ;;  %v14397_v34 = vpop.f32.mrf.mxu0 }
 0x477   : > { %v10748_v44 = vpop.f32.mrf.mxu1  ;;  %v7745_v59 = vadd.f32 %v14285_v39, %v7022_v0 }
 0x478   : > { %v14365_v10 = vadd.f32 %v10748_v44, %v14273_v63  ;;  %v8094_v63 = vadd.f32 %v7967_v19, %v7740_v50  ;;  %v7024_v44 = vadd.f32 %v14160_v32, %v14195_v30  ;;  %v8100_v26 = vadd.f32 %v14319_v24, %v7746_v38  ;;  %v14411_v30 = vpop.f32.mrf.mxu0 }
 0x479   : > { %v7728_v53 = vpop.f32.mrf.mxu1  ;;  %v8098_v32 = vadd.f32 %v14327_v15, %v7744_v17  ;;  %v14888_v17 = vld [vmem:[#allocation52_spill] sm:$0xff] }
 0x47a   : > { %v14371_v8 = vadd.f32 %v7728_v53, %v14277_v42  ;;  %v8097_v53 = vadd.f32 %v10768_v12, %v7743_v13  ;;  %v7747_v50 = vadd.f32 %v14283_v55, %v7024_v44  ;;  %v8018_v4 = vpop.f32.mrf.mxu0 }
 0x47b   : > { %v10815_v33 = vpop.f32.mrf.mxu1 }
 0x47c   : > { %v8850_v21 = vadd.f32 %v10815_v33, %v8096_v2  ;;  %v8101_v47 = vadd.f32 %v14335_v54, %v7747_v50  ;;  %v7027_v54 = vadd.f32 %v14199_v5, %v14205_v62  ;;  %v7028_v5 = vadd.f32 %v14222_v43, %v14211_v28  ;;  %v14889_v43 = vld [vmem:[#allocation49_spill] sm:$0xff] }
 0x47d   : > { %v8721_v42 = vpop.f32.mrf.mxu1 }
 0x47e   : > { %v8889_v9 = vadd.f32 %v14376_v25, %v8850_v21  ;;  %v8848_v35 = vadd.f32 %v8721_v42, %v8094_v63  ;;  %v8099_v21 = vadd.f32 %v14339_v16, %v7745_v59  ;;  %v7025_v16 = vadd.f32 %v14213_v51, %v14208_v46  ;;  %v14886_v51 = vld [vmem:[#allocation44_spill] sm:$0xff] }
 0x47f   : > { %v10816_v11 = vpop.f32.mrf.mxu1  ;;  %v7750_v38 = vadd.f32 %v14287_v60, %v7027_v54  ;;  %v14887_v60 = vld [vmem:[#allocation42_spill] sm:$0xff]  ;;  %v8109_v54 = vadd.f32 %v14411_v30, %v14302_v61 }
 0x480   : > { %v8921_v18 = vmax.f32 %v8889_v9, 0.0  ;;  %v8887_v12 = vadd.f32 %v14376_v25, %v8848_v35  ;;  %v8851_v19 = vadd.f32 %v10816_v11, %v8097_v53  ;;  %v10783_v11 = vpop.f32.mrf.mxu0  ;;  %v7748_v62 = vadd.f32 %v14289_v22, %v7025_v16 }
 0x481   : > { %v8724_v27 = vpop.f32.mrf.mxu1  ;;  %v7026_v44 = vadd.f32 %v14887_v60, %v14886_v51 }
 0x482   : > { %8953 = vst.msk [vmem:[%s14392_s10 + $0x10] sm:$0xff] %vm273_vm1, %v8921_v18  ;;  %v8919_v6 = vmax.f32 %v8887_v12, 0.0  ;;  %v8890_v36 = vadd.f32 %v14376_v25, %v8851_v19  ;;  %v8849_v31 = vadd.f32 %v8724_v27, %v8095_v14  ;;  %v8104_v12 = vadd.f32 %v14345_v1, %v7750_v38 }
 0x483   : > { %v10819_v2 = vpop.f32.mrf.mxu1  ;;  %v7751_v27 = vadd.f32 %v14888_v17, %v7028_v5  ;;  %v7749_v22 = vadd.f32 %v14889_v43, %v7026_v44 }
 0x484   : > { %8951 = vst.msk [vmem:[%s14392_s10] sm:$0xff] %vm273_vm1, %v8919_v6  ;;  %v8922_v45 = vmax.f32 %v8890_v36, 0.0  ;;  %v8888_v24 = vadd.f32 %v14376_v25, %v8849_v31  ;;  %v8854_v33 = vadd.f32 %v10819_v2, %v8100_v26  ;;  %v8102_v26 = vadd.f32 %v14349_v52, %v7748_v62  ;;  %v8031_v36 = vpop.f32.mrf.mxu0 }
 0x485   : > { %v8737_v13 = vpop.f32.mrf.mxu1  ;;  %v8105_v1 = vadd.f32 %v14351_v58, %v7751_v27  ;;  %v8103_v2 = vadd.f32 %v14362_v7, %v7749_v22  ;;  %v8110_v51 = vadd.f32 %v8031_v36, %v14311_v37  ;;  %v14892_v27 = vld [vmem:[#allocation4_spill] sm:$0xff] }
 0x486   : > { %8954 = vst.msk [vmem:[%s14392_s10 + $0x18] sm:$0xff] %vm273_vm1, %v8922_v45  ;;  %v8920_v40 = vmax.f32 %v8888_v24, 0.0  ;;  %v8893_v55 = vadd.f32 %v14376_v25, %v8854_v33  ;;  %v8852_v15 = vadd.f32 %v8737_v13, %v8098_v32  ;;  %v10784_v24 = vpop.f32.mrf.mxu0 }
 0x487   : > { %v10820_v63 = vpop.f32.mrf.mxu1 }
 0x488   : > { %8952 = vst.msk [vmem:[%s14392_s10 + $0x8] sm:$0xff] %vm273_vm1, %v8920_v40  ;;  %v8925_v42 = vmax.f32 %v8893_v55, 0.0  ;;  %v8891_v39 = vadd.f32 %v14376_v25, %v8852_v15  ;;  %v8855_v48 = vadd.f32 %v10820_v63, %v8101_v47  ;;  %v8108_v47 = vadd.f32 %v14381_v3, %v14296_v29  ;;  %v8034_v55 = vpop.f32.mrf.mxu0  ;;  %v14890_v63 = vld [vmem:[#allocation51_spill] sm:$0xff] }
 0x489   : > { %v8740_v53 = vpop.f32.mrf.mxu1 }
 0x48a   : > { %8957 = vst.msk [vmem:[%s14392_s10 + $0x30] sm:$0xff] %vm273_vm1, %v8925_v42  ;;  %v8923_v9 = vmax.f32 %v8891_v39, 0.0  ;;  %v8894_v35 = vadd.f32 %v14376_v25, %v8855_v48  ;;  %v8853_v41 = vadd.f32 %v8740_v53, %v8099_v21  ;;  %v8106_v21 = vadd.f32 %v14397_v34, %v14890_v63  ;;  %v10787_v53 = vpop.f32.mrf.mxu0 }
 0x48c   : > { %8955 = vst.msk [vmem:[%s14392_s10 + $0x20] sm:$0xff] %vm273_vm1, %v8923_v9  ;;  %v8926_v14 = vmax.f32 %v8894_v35, 0.0  ;;  %v8892_v18 = vadd.f32 %v14376_v25, %v8853_v41  ;;  %v14891_v35 = vld [vmem:[#allocation35_spill] sm:$0xff]  ;;  %v8047_v5 = vpop.f32.mrf.mxu0 }
 0x48d   : > { %v8107_v34 = vadd.f32 %v8018_v4, %v14891_v35  ;;  %v8112_v4 = vadd.f32 %v10783_v11, %v14308_v20  ;;  %v14893_v20 = vld [vmem:[#allocation6_spill] sm:$0xff] }
 0x48e   : > { %8958 = vst.msk [vmem:[%s14392_s10 + $0x38] sm:$0xff] %vm273_vm1, %v8926_v14  ;;  %v8924_v19 = vmax.f32 %v8892_v18, 0.0  ;;  %v10823_v46 = vpop.f32.mrf.mxu1  ;;  %v10788_v60 = vpop.f32.mrf.mxu0  ;;  %v8111_v11 = vadd.f32 %v8034_v55, %v14893_v20 }
 0x48f   : > { %v8858_v6 = vadd.f32 %v10823_v46, %v8104_v12  ;;  %v8117_v55 = vadd.f32 %v10788_v60, %v14330_v57 }
 0x490   : > { %8956 = vst.msk [vmem:[%s14392_s10 + $0x28] sm:$0xff] %vm273_vm1, %v8924_v19  ;;  %v8753_v28 = vpop.f32.mrf.mxu1  ;;  %v8050_v22 = vpop.f32.mrf.mxu0 }
 0x491   : > { %v8897_v31 = vadd.f32 %v14376_v25, %v8858_v6  ;;  %v8856_v0 = vadd.f32 %v8753_v28, %v8102_v26  ;;  %v8113_v26 = vadd.f32 %v10784_v24, %v14892_v27 }
 0x492   : > { %v10824_v50 = vpop.f32.mrf.mxu1 }
 0x493   : > { %v8929_v32 = vmax.f32 %v8897_v31, 0.0  ;;  %v8895_v52 = vadd.f32 %v14376_v25, %v8856_v0  ;;  %v8859_v45 = vadd.f32 %v10824_v50, %v8105_v1 }
 0x494   : > { %v8756_v33 = vpop.f32.mrf.mxu1 }
 0x495   : > { %8961 = vst.msk [vmem:[%s14392_s10 + $0x50] sm:$0xff] %vm273_vm1, %v8929_v32  ;;  %v8927_v59 = vmax.f32 %v8895_v52, 0.0  ;;  %v8898_v13 = vadd.f32 %v14376_v25, %v8859_v45  ;;  %v8857_v58 = vadd.f32 %v8756_v33, %v8103_v2  ;;  %v14894_v32 = vld [vmem:[#allocation17_spill] sm:$0xff]  ;;  %v10791_v45 = vpop.f32.mrf.mxu0 }
 0x496   : > { %v8116_v52 = vadd.f32 %v10787_v53, %v14894_v32 }
 0x497   : > { %8959 = vst.msk [vmem:[%s14392_s10 + $0x40] sm:$0xff] %vm273_vm1, %v8927_v59  ;;  %v8930_v7 = vmax.f32 %v8898_v13, 0.0  ;;  %v8896_v40 = vadd.f32 %v14376_v25, %v8857_v58  ;;  %v14895_v13 = vld [vmem:[#allocation21_spill] sm:$0xff] }
 0x498   : > { %v8114_v58 = vadd.f32 %v8047_v5, %v14895_v13 }
 0x499   : > { %v10827_v15 = vpop.f32.mrf.mxu1  ;;  %8962 = vst.msk [vmem:[%s14392_s10 + $0x58] sm:$0xff] %vm273_vm1, %v8930_v7  ;;  %v8928_v42 = vmax.f32 %v8896_v40, 0.0 }
 0x49a   : > { %v8862_v39 = vadd.f32 %v10827_v15, %v8108_v47  ;;  %v8063_v15 = vpop.f32.mrf.mxu0 }
 0x49b   : > { %v8769_v48 = vpop.f32.mrf.mxu1  ;;  %8960 = vst.msk [vmem:[%s14392_s10 + $0x48] sm:$0xff] %vm273_vm1, %v8928_v42  ;;  %v8118_v5 = vadd.f32 %v8063_v15, %v14341_v56 }
 0x49c   : > { %v8901_v29 = vadd.f32 %v14376_v25, %v8862_v39  ;;  %v8860_v3 = vadd.f32 %v8769_v48, %v8106_v21  ;;  %v14896_v39 = vld [vmem:[#allocation24_spill] sm:$0xff] }
 0x49d   : > { %v10828_v9 = vpop.f32.mrf.mxu1  ;;  %v8115_v48 = vadd.f32 %v8050_v22, %v14896_v39 }
 0x49e   : > { %v8933_v41 = vmax.f32 %v8901_v29, 0.0  ;;  %v8899_v16 = vadd.f32 %v14376_v25, %v8860_v3  ;;  %v8863_v38 = vadd.f32 %v10828_v9, %v8109_v54  ;;  %v10792_v9 = vpop.f32.mrf.mxu0 }
 0x49f   : > { %v8772_v14 = vpop.f32.mrf.mxu1 }
 0x4a0   : > { %8965 = vst.msk [vmem:[%s14392_s10 + $0x70] sm:$0xff] %vm273_vm1, %v8933_v41  ;;  %v8931_v61 = vmax.f32 %v8899_v16, 0.0  ;;  %v8902_v30 = vadd.f32 %v14376_v25, %v8863_v38  ;;  %v8861_v18 = vadd.f32 %v8772_v14, %v8107_v34  ;;  %v14897_v38 = vld [vmem:[#allocation22_spill] sm:$0xff] }
 0x4a1   : > { %v8120_v14 = vadd.f32 %v10791_v45, %v14897_v38 }
 0x4a2   : > { %8963 = vst.msk [vmem:[%s14392_s10 + $0x60] sm:$0xff] %vm273_vm1, %v8931_v61  ;;  %v8934_v62 = vmax.f32 %v8902_v30, 0.0  ;;  %v8900_v12 = vadd.f32 %v14376_v25, %v8861_v18  ;;  %v8066_v61 = vpop.f32.mrf.mxu0 }
 0x4a3   : > { %v10831_v46 = vpop.f32.mrf.mxu1 }
 0x4a4   : > { %8966 = vst.msk [vmem:[%s14392_s10 + $0x78] sm:$0xff] %vm273_vm1, %v8934_v62  ;;  %v8932_v19 = vmax.f32 %v8900_v12, 0.0  ;;  %v8866_v44 = vadd.f32 %v10831_v46, %v8112_v4  ;;  %v14898_v4 = vld [vmem:[#allocation7_spill] sm:$0xff]  ;;  %v10795_v60 = vpop.f32.mrf.mxu0 }
 0x4a5   : > { %v8785_v17 = vpop.f32.mrf.mxu1 }
 0x4a6   : > { %8964 = vst.msk [vmem:[%s14392_s10 + $0x68] sm:$0xff] %vm273_vm1, %v8932_v19  ;;  %v8905_v6 = vadd.f32 %v14376_v25, %v8866_v44  ;;  %v8864_v28 = vadd.f32 %v8785_v17, %v8110_v51  ;;  %v8121_v19 = vadd.f32 %v10792_v9, %v14898_v4  ;;  %v14899_v17 = vld [vmem:[#allocation11_spill] sm:$0xff]  ;;  %v8079_v22 = vpop.f32.mrf.mxu0 }
 0x4a7   : > { %v10832_v43 = vpop.f32.mrf.mxu1  ;;  %v8119_v27 = vadd.f32 %v8066_v61, %v14899_v17 }
 0x4a8   : > { %v8937_v1 = vmax.f32 %v8905_v6, 0.0  ;;  %v8903_v31 = vadd.f32 %v14376_v25, %v8864_v28  ;;  %v8867_v37 = vadd.f32 %v10832_v43, %v8113_v26 }
 0x4a9   : > { %v8788_v36 = vpop.f32.mrf.mxu1 }
 0x4aa   : > { %8969 = vst.msk [vmem:[%s14392_s10 + $0x90] sm:$0xff] %vm273_vm1, %v8937_v1  ;;  %v8935_v0 = vmax.f32 %v8903_v31, 0.0  ;;  %v8906_v50 = vadd.f32 %v14376_v25, %v8867_v37  ;;  %v8865_v2 = vadd.f32 %v8788_v36, %v8111_v11  ;;  %v10796_v36 = vpop.f32.mrf.mxu0 }
 0x4ac   : > { %8967 = vst.msk [vmem:[%s14392_s10 + $0x80] sm:$0xff] %vm273_vm1, %v8935_v0  ;;  %v8938_v24 = vmax.f32 %v8906_v50, 0.0  ;;  %v8904_v33 = vadd.f32 %v14376_v25, %v8865_v2  ;;  %v8124_v0 = vadd.f32 %v10795_v60, %v14353_v23  ;;  %v8122_v2 = vadd.f32 %v8079_v22, %v14357_v49 }
 0x4ae   : > { %v10835_v59 = vpop.f32.mrf.mxu1  ;;  %8970 = vst.msk [vmem:[%s14392_s10 + $0x98] sm:$0xff] %vm273_vm1, %v8938_v24  ;;  %v8936_v47 = vmax.f32 %v8904_v33, 0.0  ;;  %v8125_v24 = vadd.f32 %v10796_v36, %v14365_v10 }
 0x4af   : > { %v8870_v7 = vadd.f32 %v10835_v59, %v8116_v52  ;;  %v8082_v52 = vpop.f32.mrf.mxu0 }
 0x4b0   : > { %v8801_v40 = vpop.f32.mrf.mxu1  ;;  %8968 = vst.msk [vmem:[%s14392_s10 + $0x88] sm:$0xff] %vm273_vm1, %v8936_v47  ;;  %v8123_v23 = vadd.f32 %v8082_v52, %v14371_v8 }
 0x4b1   : > { %v8909_v63 = vadd.f32 %v14376_v25, %v8870_v7  ;;  %v8868_v21 = vadd.f32 %v8801_v40, %v8114_v58 }
 0x4b2   : > { %v10836_v42 = vpop.f32.mrf.mxu1 }
 0x4b3   : > { %v8941_v54 = vmax.f32 %v8909_v63, 0.0  ;;  %v8907_v29 = vadd.f32 %v14376_v25, %v8868_v21  ;;  %v8871_v3 = vadd.f32 %v10836_v42, %v8117_v55 }
 0x4b4   : > { %v8804_v53 = vpop.f32.mrf.mxu1 }
 0x4b5   : > { %8973 = vst.msk [vmem:[%s14392_s10 + $0xb0] sm:$0xff] %vm273_vm1, %v8941_v54  ;;  %v8939_v57 = vmax.f32 %v8907_v29, 0.0  ;;  %v8910_v35 = vadd.f32 %v14376_v25, %v8871_v3  ;;  %v8869_v34 = vadd.f32 %v8804_v53, %v8115_v48 }
 0x4b7   : > { %8971 = vst.msk [vmem:[%s14392_s10 + $0xa0] sm:$0xff] %vm273_vm1, %v8939_v57  ;;  %v8942_v41 = vmax.f32 %v8910_v35, 0.0  ;;  %v8908_v16 = vadd.f32 %v14376_v25, %v8869_v34 }
 0x4b8   : > { %v10839_v18 = vpop.f32.mrf.mxu1 }
 0x4b9   : > { %8974 = vst.msk [vmem:[%s14392_s10 + $0xb8] sm:$0xff] %vm273_vm1, %v8942_v41  ;;  %v8940_v30 = vmax.f32 %v8908_v16, 0.0  ;;  %v8874_v62 = vadd.f32 %v10839_v18, %v8120_v14 }
 0x4ba   : > { %v8817_v12 = vpop.f32.mrf.mxu1 }
 0x4bb   : > { %8972 = vst.msk [vmem:[%s14392_s10 + $0xa8] sm:$0xff] %vm273_vm1, %v8940_v30  ;;  %v8913_v46 = vadd.f32 %v14376_v25, %v8874_v62  ;;  %v8872_v51 = vadd.f32 %v8817_v12, %v8118_v5 }
 0x4bc   : > { %v10840_v44 = vpop.f32.mrf.mxu1 }
 0x4bd   : > { %v8945_v26 = vmax.f32 %v8913_v46, 0.0  ;;  %v8911_v6 = vadd.f32 %v14376_v25, %v8872_v51  ;;  %v8875_v56 = vadd.f32 %v10840_v44, %v8121_v19 }
 0x4be   : > { %v8820_v28 = vpop.f32.mrf.mxu1 }
 0x4bf   : > { %8977 = vst.msk [vmem:[%s14392_s10 + $0xd0] sm:$0xff] %vm273_vm1, %v8945_v26  ;;  %v8943_v43 = vmax.f32 %v8911_v6, 0.0  ;;  %v8914_v20 = vadd.f32 %v14376_v25, %v8875_v56  ;;  %v8873_v11 = vadd.f32 %v8820_v28, %v8119_v27 }
 0x4c1   : > { %8975 = vst.msk [vmem:[%s14392_s10 + $0xc0] sm:$0xff] %vm273_vm1, %v8943_v43  ;;  %v8946_v1 = vmax.f32 %v8914_v20, 0.0  ;;  %v8912_v31 = vadd.f32 %v14376_v25, %v8873_v11 }
 0x4c3   : > { %8978 = vst.msk [vmem:[%s14392_s10 + $0xd8] sm:$0xff] %vm273_vm1, %v8946_v1  ;;  %v8944_v37 = vmax.f32 %v8912_v31, 0.0 }
 0x4c5   : > { %8976 = vst.msk [vmem:[%s14392_s10 + $0xc8] sm:$0xff] %vm273_vm1, %v8944_v37 }
 0x4c7   : > { %v10843_v50 = vpop.f32.mrf.mxu1 }
 0x4c8   : > { %v8878_v32 = vadd.f32 %v10843_v50, %v8124_v0 }
 0x4c9   : > { %v8833_v45 = vpop.f32.mrf.mxu1 }
 0x4ca   : > { %v8917_v33 = vadd.f32 %v14376_v25, %v8878_v32  ;;  %v8876_v59 = vadd.f32 %v8833_v45, %v8122_v2 }
 0x4cb   : > { %v10844_v13 = vpop.f32.mrf.mxu1 }
 0x4cc   : > { %v8949_v58 = vmax.f32 %v8917_v33, 0.0  ;;  %v8915_v47 = vadd.f32 %v14376_v25, %v8876_v59  ;;  %v8879_v7 = vadd.f32 %v10844_v13, %v8125_v24 }
 0x4cd   : > { %v8836_v40 = vpop.f32.mrf.mxu1 }
 0x4ce   : > { %8981 = vst.msk [vmem:[%s14392_s10 + $0xf0] sm:$0xff] %vm273_vm1, %v8949_v58  ;;  %v8947_v49 = vmax.f32 %v8915_v47, 0.0  ;;  %v8918_v55 = vadd.f32 %v14376_v25, %v8879_v7  ;;  %v8877_v15 = vadd.f32 %v8836_v40, %v8123_v23 }
 0x4d0   : > { %8979 = vst.msk [vmem:[%s14392_s10 + $0xe0] sm:$0xff] %vm273_vm1, %v8947_v49  ;;  %v8950_v10 = vmax.f32 %v8918_v55, 0.0  ;;  %v8916_v63 = vadd.f32 %v14376_v25, %v8877_v15 }
 0x4d2   : > { %8982 = vst.msk [vmem:[%s14392_s10 + $0xf8] sm:$0xff] %vm273_vm1, %v8950_v10  ;;  %v8948_v21 = vmax.f32 %v8916_v63, 0.0 }
 0x4d4   : > { %8980 = vst.msk [vmem:[%s14392_s10 + $0xe8] sm:$0xff] %vm273_vm1, %v8948_v21 }
 0x4d5 PF: > { %s16_s21 = sadd.s32 1, %s11007_s21  }
 0x4d6   : > { %p13_p4 = scmp.ge.s32.totalorder %s16_s21, 4  }
 0x4d8   :  { %15 = sbr.rel (!%p13_p4) target bundleno = 1 (0x1), region = 120 }

</bundles_post_ra>
